<compile_context>
chip_gen: v7x
topology: tpu7x:2x2x1
jax: 0.10.0
libtpu: 0.0.40
codegen_flags: <defaults>
</compile_context>

<pallas_src>
import functools

import jax
import jax.numpy as jnp
from jax.experimental import pallas as pl
from jax.experimental.pallas import tpu as pltpu

NEG_SLOPE = 0.01   # torch nn.LeakyReLU default negative_slope
BN_EPS = 1e-5      # torch nn.BatchNorm2d default eps


# ------------------------------ Pallas kernel ------------------------------- #

def _leaky(y):
    # 0 < slope < 1  =>  LeakyReLU(y) == max(y, slope*y)
    return jnp.maximum(y, NEG_SLOPE * y)


def _stage_padded(pad_ref, interior, H, W, C):
    """Write `interior` (H, W, C) into pad_ref (H+2, W+2, C) with a zero halo.

    Only the four 1-pixel border strips are zeroed; the interior is fully
    overwritten every grid step, so no full-buffer memset is needed.
    """
    zrow = jnp.zeros((1, W + 2, C), pad_ref.dtype)
    pad_ref[0:1, :, :] = zrow                      # top halo row
    pad_ref[H + 1:H + 2, :, :] = zrow              # bottom halo row
    zcol = jnp.zeros((H, 1, C), pad_ref.dtype)
    pad_ref[1:H + 1, 0:1, :] = zcol                # left halo column
    pad_ref[1:H + 1, W + 1:W + 2, :] = zcol        # right halo column
    pad_ref[1:H + 1, 1:W + 1, :] = interior        # payload


def _res_block_kernel(x_ref, w1_ref, b1_ref, w2_ref, b2_ref, out_ref,
                      xpad_scr, hpad_scr, *,
                      H, W, Cin, Cmid, Cout, has_proj, mxu_dtype):
    """Fully fused Res_block forward for one batch element.

    x_ref   : (1, H, W, Cin)   input (NHWC)
    w1_ref  : (9*Cin, Cmid)    conv1 weights with BN1 scale folded in
    b1_ref  : (1, Cmid)        conv1 bias + BN1 folded
    w2_ref  : (9*Cmid[+Cin], Cout)  conv2 (+ 1x1 shortcut) weights, BN scale folded
    b2_ref  : (1, Cout)        conv2 + BN2 (+ shortcut BN) bias folded
    out_ref : (1, Cout, H*W)   lane-dense NCHW-flat output
    """
    prec = (jax.lax.Precision.HIGHEST if jnp.dtype(mxu_dtype) == jnp.dtype(jnp.float32)
            else jax.lax.Precision.DEFAULT)

    x = x_ref[0]                                              # (H, W, Cin) f32

    # ---- zero-padded input staged in VMEM (padding=1 halo handled in-kernel) ----
    _stage_padded(xpad_scr, x, H, W, Cin)

    # ---- conv1 as a single im2col GEMM: K = 9*Cin ----
    cols1 = [xpad_scr[ky:ky + H, kx:kx + W, :]
             for ky in range(3) for kx in range(3)]
    patches1 = jnp.concatenate(cols1, axis=-1)                # (H, W, 9*Cin)
    lhs1 = patches1.reshape(H * W, 9 * Cin)                   # leading-dim merge: free

    h = jnp.dot(lhs1.astype(mxu_dtype), w1_ref[...],
                precision=prec, preferred_element_type=jnp.float32)   # (H*W, Cmid)
    h = _leaky(h + b1_ref[...])                               # folded bias+BN1, LeakyReLU

    # ---- conv1 activation never leaves VMEM: stage it zero-padded for conv2 ----
    _stage_padded(hpad_scr, h.reshape(H, W, Cmid), H, W, Cmid)

    # ---- conv2 (+ projected shortcut fused along K) as a single im2col GEMM ----
    cols2 = [hpad_scr[ky:ky + H, kx:kx + W, :]
             for ky in range(3) for kx in range(3)]
    if has_proj:
        cols2.append(x)                                       # 1x1 shortcut -> extra K=Cin
    k2 = 9 * Cmid + (Cin if has_proj else 0)
    patches2 = jnp.concatenate(cols2, axis=-1)                # (H, W, k2)
    lhs2 = patches2.reshape(H * W, k2)

    y = jnp.dot(lhs2.astype(mxu_dtype), w2_ref[...],
                precision=prec, preferred_element_type=jnp.float32)   # (H*W, Cout)
    y = y + b2_ref[...]                                       # conv2+BN2 (+shortcut BN) bias
    if not has_proj:
        y = y + x.reshape(H * W, Cout)                        # identity shortcut (Cin == Cout)
    y = _leaky(y)

    # lane-dense store: (Cout, H*W) has a 128-multiple lane dim and is NCHW-flat.
    out_ref[0] = jnp.transpose(y).astype(out_ref.dtype)


# --------------------------------- Wrapper ---------------------------------- #

def _bn_fold(gamma, beta, mean, var, conv_bias):
    scale = gamma / jnp.sqrt(var + BN_EPS)
    bias = beta + scale * (conv_bias - mean)
    return scale.astype(jnp.float32), bias.astype(jnp.float32)


def res_block_forward(x_nchw, params, *, mxu_dtype=jnp.float32):
    """Res_block forward. Accepts/returns NCHW f32 to match the PyTorch module."""
    N, Cin, H, W = x_nchw.shape
    w1 = params["w1"]                     # (3, 3, Cin, Cmid)  HWIO
    w2 = params["w2"]                     # (3, 3, Cmid, Cout) HWIO
    Cmid = w1.shape[-1]
    Cout = w2.shape[-1]
    has_proj = params.get("w_sc") is not None
    if not has_proj:
        assert Cin == Cout, "identity shortcut requires Cin == Cout"

    # Fold BN (eval-mode) scale into the weights, bias into a single per-channel add.
    scale1, bias1 = _bn_fold(params["bn1_gamma"], params["bn1_beta"],
                             params["bn1_mean"], params["bn1_var"], params["b1"])
    scale2, bias2 = _bn_fold(params["bn2_gamma"], params["bn2_beta"],
                             params["bn2_mean"], params["bn2_var"], params["b2"])

    w1_slab = (w1 * scale1).reshape(9 * Cin, Cmid)            # row order: (ky, kx, cin)
    w2_slab = (w2 * scale2).reshape(9 * Cmid, Cout)
    if has_proj:
        scale_sc, bias_sc = _bn_fold(params["bnsc_gamma"], params["bnsc_beta"],
                                     params["bnsc_mean"], params["bnsc_var"],
                                     params["b_sc"])
        w2_slab = jnp.concatenate([w2_slab, params["w_sc"] * scale_sc], axis=0)
        bias2 = bias2 + bias_sc

    K1 = 9 * Cin
    K2 = 9 * Cmid + (Cin if has_proj else 0)

    x_nhwc = jnp.transpose(x_nchw, (0, 2, 3, 1))              # NCHW -> NHWC (compute layout)

    kernel = functools.partial(
        _res_block_kernel, H=H, W=W, Cin=Cin, Cmid=Cmid, Cout=Cout,
        has_proj=has_proj, mxu_dtype=mxu_dtype)

    itemsize = jnp.dtype(mxu_dtype).itemsize
    cost = pl.CostEstimate(
        flops=2 * N * H * W * (K1 * Cmid + K2 * Cout),
        transcendentals=0,
        bytes_accessed=(N * H * W * Cin * 4 + N * H * W * Cout * 4
                        + (K1 * Cmid + K2 * Cout) * itemsize
                        + (Cmid + Cout) * 4))

    out_flat = pl.pallas_call(
        kernel,
        out_shape=jax.ShapeDtypeStruct((N, Cout, H * W), jnp.float32),
        grid=(N,),
        in_specs=[
            pl.BlockSpec((1, H, W, Cin), lambda n: (n, 0, 0, 0)),
            pl.BlockSpec((K1, Cmid), lambda n: (0, 0)),
            pl.BlockSpec((1, Cmid), lambda n: (0, 0)),
            pl.BlockSpec((K2, Cout), lambda n: (0, 0)),
            pl.BlockSpec((1, Cout), lambda n: (0, 0)),
        ],
        out_specs=pl.BlockSpec((1, Cout, H * W), lambda n: (n, 0, 0)),
        scratch_shapes=[
            pltpu.VMEM((H + 2, W + 2, Cin), jnp.float32),     # padded input
            pltpu.VMEM((H + 2, W + 2, Cmid), jnp.float32),    # padded conv1 activation
        ],
        compiler_params=pltpu.CompilerParams(
            dimension_semantics=("parallel",),                # megacore across batch
            vmem_limit_bytes=32 * 1024 * 1024,
        ),
        cost_estimate=cost,
    )(x_nhwc,
      w1_slab.astype(mxu_dtype), bias1.reshape(1, Cmid),
      w2_slab.astype(mxu_dtype), bias2.reshape(1, Cout))

    # (N, Cout, H*W) -> (N, Cout, H, W): trailing-dim split, free in XLA (no transpose).
    return out_flat.reshape(N, Cout, H, W)


# ------------------------ deterministic parameters -------------------------- #

def init_params(key, in_channels, out_channels):
    ks = jax.random.split(key, 10)
    p = {
        # conv weights stored HWIO (kh, kw, Cin, Cout)
        "w1": 0.1 * jax.random.normal(ks[0], (3, 3, in_channels, out_channels), jnp.float32),
        "b1": 0.05 * jax.random.normal(ks[1], (out_channels,), jnp.float32),
        "bn1_gamma": 1.0 + 0.1 * jax.random.normal(ks[2], (out_channels,), jnp.float32),
        "bn1_beta": 0.1 * jax.random.normal(ks[3], (out_channels,), jnp.float32),
        "bn1_mean": jnp.zeros((out_channels,), jnp.float32),
        "bn1_var": jnp.ones((out_channels,), jnp.float32),

        "w2": 0.1 * jax.random.normal(ks[4], (3, 3, out_channels, out_channels), jnp.float32),
        "b2": 0.05 * jax.random.normal(ks[5], (out_channels,), jnp.float32),
        "bn2_gamma": 1.0 + 0.1 * jax.random.normal(ks[6], (out_channels,), jnp.float32),
        "bn2_beta": 0.1 * jax.random.normal(ks[7], (out_channels,), jnp.float32),
        "bn2_mean": jnp.zeros((out_channels,), jnp.float32),
        "bn2_var": jnp.ones((out_channels,), jnp.float32),
    }
    if in_channels != out_channels:  # stride fixed to 1 in this script
        p["w_sc"] = 0.1 * jax.random.normal(ks[8], (in_channels, out_channels), jnp.float32)
        p["b_sc"] = 0.05 * jax.random.normal(ks[9], (out_channels,), jnp.float32)
        p["bnsc_gamma"] = jnp.ones((out_channels,), jnp.float32)
        p["bnsc_beta"] = jnp.zeros((out_channels,), jnp.float32)
        p["bnsc_mean"] = jnp.zeros((out_channels,), jnp.float32)
        p["bnsc_var"] = jnp.ones((out_channels,), jnp.float32)
    else:
        p["w_sc"] = None
    return p


# -------------------------------- reference ---------------------------------- #

def _ref_forward(x, params):
    """Plain-JAX reference (NCHW) mirroring the PyTorch forward (eval-mode BN)."""
    def conv(xx, w_hwio, b):
        y = jax.lax.conv_general_dilated(
            xx, w_hwio, (1, 1), "SAME",
            dimension_numbers=("NCHW", "HWIO", "NCHW"),
            precision=jax.lax.Precision.HIGHEST)
        return y + b[None, :, None, None]

    def bn(xx, g, be, m, v):
        return ((xx - m[None, :, None, None]) / jnp.sqrt(v[None, :, None, None] + BN_EPS)
                * g[None, :, None, None] + be[None, :, None, None])

    def lrelu(xx):
        return jnp.where(xx >= 0, xx, NEG_SLOPE * xx)

    if params.get("w_sc") is not None:
        res = bn(conv(x, params["w_sc"][None, None], params["b_sc"]),
                 params["bnsc_gamma"], params["bnsc_beta"],
                 params["bnsc_mean"], params["bnsc_var"])
    else:
        res = x
    out = lrelu(bn(conv(x, params["w1"], params["b1"]),
                   params["bn1_gamma"], params["bn1_beta"],
                   params["bn1_mean"], params["bn1_var"]))
    out = bn(conv(out, params["w2"], params["b2"]),
             params["bn2_gamma"], params["bn2_beta"],
             params["bn2_mean"], params["bn2_var"])
    return lrelu(out + res)


# ----------------------------------- main ------------------------------------ #

if __name__ == "__main__":
    key = jax.random.PRNGKey(0)
    k_x, k_p1, k_p2 = jax.random.split(key, 3)

    N, C_IN, C_OUT, H, W = 2, 4, 8, 16, 16

    # Case 1: projection (1x1 conv) shortcut, f32 MXU operands.
    x = jax.random.normal(k_x, (N, C_IN, H, W), jnp.float32)   # NCHW like PyTorch
    params = init_params(k_p1, C_IN, C_OUT)
    out = jax.block_until_ready(res_block_forward(x, params))
    assert out.shape == (N, C_OUT, H, W)
    ref = jax.block_until_ready(_ref_forward(x, params))
    err = float(jnp.max(jnp.abs(out - ref)))
    assert jnp.allclose(out, ref, rtol=1e-3, atol=1e-3), err

    # Case 2: identity shortcut (Cin == Cout) -> no shortcut matmul in the kernel.
    x2 = jax.random.normal(k_x, (N, C_OUT, H, W), jnp.float32)
    params_id = init_params(k_p2, C_OUT, C_OUT)
    out_id = jax.block_until_ready(res_block_forward(x2, params_id))
    ref_id = jax.block_until_ready(_ref_forward(x2, params_id))
    err_id = float(jnp.max(jnp.abs(out_id - ref_id)))
    assert jnp.allclose(out_id, ref_id, rtol=1e-3, atol=1e-3), err_id

    # Case 3: bf16 MXU operands (v6e/v7x path), f32 accumulate + f32 epilogue.
    out_bf16 = jax.block_until_ready(
        res_block_forward(x, params, mxu_dtype=jnp.bfloat16))
    err_bf16 = float(jnp.max(jnp.abs(out_bf16 - ref)))
    assert jnp.allclose(out_bf16, ref, rtol=5e-2, atol=5e-2), err_bf16

    print("KERNEL_OK")
</pallas_src>

<mosaic_0001>
module attributes {stable_mosaic.version = 11 : i64} {
  func.func @_res_block_kernel(%arg0: i32, %arg1: memref<1x16x16x4xf32, #tpu.memory_space<vmem>>, %arg2: memref<36x8xf32, #tpu.memory_space<vmem>>, %arg3: memref<1x8xf32, #tpu.memory_space<vmem>>, %arg4: memref<76x8xf32, #tpu.memory_space<vmem>>, %arg5: memref<1x8xf32, #tpu.memory_space<vmem>>, %arg6: memref<1x8x256xf32, #tpu.memory_space<vmem>>, %arg7: memref<18x18x4xf32, #tpu.memory_space<vmem>>, %arg8: memref<18x18x8xf32, #tpu.memory_space<vmem>>) attributes {dimension_semantics = [#tpu.dimension_semantics<parallel>], iteration_bounds = array<i64: 2>, scalar_prefetch = 0 : i64, scratch_operands = 2 : i64, tpu.core_type = #tpu.core_type<tc>, window_params = [{transform_indices = @transform_0, window_bounds = array<i64: 1, 16, 16, 4>}, {pipeline_mode = #tpu.pipeline_mode<synchronous>, transform_indices = @transform_1, window_bounds = array<i64: 36, 8>}, {pipeline_mode = #tpu.pipeline_mode<synchronous>, transform_indices = @transform_2, window_bounds = array<i64: 1, 8>}, {pipeline_mode = #tpu.pipeline_mode<synchronous>, transform_indices = @transform_3, window_bounds = array<i64: 76, 8>}, {pipeline_mode = #tpu.pipeline_mode<synchronous>, transform_indices = @transform_4, window_bounds = array<i64: 1, 8>}, {transform_indices = @transform_5, window_bounds = array<i64: 1, 8, 256>}]} {
    %c0 = arith.constant 0 : index
    %c0_0 = arith.constant 0 : index
    %c0_1 = arith.constant 0 : index
    %c0_2 = arith.constant 0 : index
    %0 = vector.load %arg1[%c0, %c0_0, %c0_1, %c0_2] : memref<1x16x16x4xf32, #tpu.memory_space<vmem>>, vector<1x16x16x4xf32>
    %1 = vector.shape_cast %0 : vector<1x16x16x4xf32> to vector<16x16x4xf32>
    %cst = arith.constant 0.000000e+00 : f32
    %2 = vector.broadcast %cst : f32 to vector<1x18x4xf32>
    %c0_3 = arith.constant 0 : index
    %c0_4 = arith.constant 0 : index
    %c0_5 = arith.constant 0 : index
    %3 = vector.load %arg7[%c0_3, %c0_4, %c0_5] : memref<18x18x4xf32, #tpu.memory_space<vmem>>, vector<1x18x4xf32>
    tpu.vector_store %arg7[%c0_3, %c0_4, %c0_5], %2 {strides = array<i32>} : memref<18x18x4xf32, #tpu.memory_space<vmem>>, vector<1x18x4xf32>,
    %c17 = arith.constant 17 : index
    %c0_6 = arith.constant 0 : index
    %c0_7 = arith.constant 0 : index
    %4 = vector.load %arg7[%c17, %c0_6, %c0_7] : memref<18x18x4xf32, #tpu.memory_space<vmem>>, vector<1x18x4xf32>
    tpu.vector_store %arg7[%c17, %c0_6, %c0_7], %2 {strides = array<i32>} : memref<18x18x4xf32, #tpu.memory_space<vmem>>, vector<1x18x4xf32>,
    %cst_8 = arith.constant 0.000000e+00 : f32
    %5 = vector.broadcast %cst_8 : f32 to vector<16x1x4xf32>
    %c1 = arith.constant 1 : index
    %c0_9 = arith.constant 0 : index
    %c0_10 = arith.constant 0 : index
    %6 = vector.load %arg7[%c1, %c0_9, %c0_10] : memref<18x18x4xf32, #tpu.memory_space<vmem>>, vector<16x1x4xf32>
    tpu.vector_store %arg7[%c1, %c0_9, %c0_10], %5 {strides = array<i32>} : memref<18x18x4xf32, #tpu.memory_space<vmem>>, vector<16x1x4xf32>,
    %c1_11 = arith.constant 1 : index
    %c17_12 = arith.constant 17 : index
    %c0_13 = arith.constant 0 : index
    %7 = vector.load %arg7[%c1_11, %c17_12, %c0_13] : memref<18x18x4xf32, #tpu.memory_space<vmem>>, vector<16x1x4xf32>
    tpu.vector_store %arg7[%c1_11, %c17_12, %c0_13], %5 {strides = array<i32>} : memref<18x18x4xf32, #tpu.memory_space<vmem>>, vector<16x1x4xf32>,
    %c1_14 = arith.constant 1 : index
    %c1_15 = arith.constant 1 : index
    %c0_16 = arith.constant 0 : index
    %8 = vector.load %arg7[%c1_14, %c1_15, %c0_16] : memref<18x18x4xf32, #tpu.memory_space<vmem>>, vector<16x16x4xf32>
    tpu.vector_store %arg7[%c1_14, %c1_15, %c0_16], %1 {strides = array<i32>} : memref<18x18x4xf32, #tpu.memory_space<vmem>>, vector<16x16x4xf32>,
    %c0_17 = arith.constant 0 : index
    %c0_18 = arith.constant 0 : index
    %c0_19 = arith.constant 0 : index
    %9 = vector.load %arg7[%c0_17, %c0_18, %c0_19] : memref<18x18x4xf32, #tpu.memory_space<vmem>>, vector<16x16x4xf32>
    %c0_20 = arith.constant 0 : index
    %c1_21 = arith.constant 1 : index
    %c0_22 = arith.constant 0 : index
    %10 = vector.load %arg7[%c0_20, %c1_21, %c0_22] : memref<18x18x4xf32, #tpu.memory_space<vmem>>, vector<16x16x4xf32>
    %c0_23 = arith.constant 0 : index
    %c2 = arith.constant 2 : index
    %c0_24 = arith.constant 0 : index
    %11 = vector.load %arg7[%c0_23, %c2, %c0_24] : memref<18x18x4xf32, #tpu.memory_space<vmem>>, vector<16x16x4xf32>
    %c1_25 = arith.constant 1 : index
    %c0_26 = arith.constant 0 : index
    %c0_27 = arith.constant 0 : index
    %12 = vector.load %arg7[%c1_25, %c0_26, %c0_27] : memref<18x18x4xf32, #tpu.memory_space<vmem>>, vector<16x16x4xf32>
    %c1_28 = arith.constant 1 : index
    %c1_29 = arith.constant 1 : index
    %c0_30 = arith.constant 0 : index
    %13 = vector.load %arg7[%c1_28, %c1_29, %c0_30] : memref<18x18x4xf32, #tpu.memory_space<vmem>>, vector<16x16x4xf32>
    %c1_31 = arith.constant 1 : index
    %c2_32 = arith.constant 2 : index
    %c0_33 = arith.constant 0 : index
    %14 = vector.load %arg7[%c1_31, %c2_32, %c0_33] : memref<18x18x4xf32, #tpu.memory_space<vmem>>, vector<16x16x4xf32>
    %c2_34 = arith.constant 2 : index
    %c0_35 = arith.constant 0 : index
    %c0_36 = arith.constant 0 : index
    %15 = vector.load %arg7[%c2_34, %c0_35, %c0_36] : memref<18x18x4xf32, #tpu.memory_space<vmem>>, vector<16x16x4xf32>
    %c2_37 = arith.constant 2 : index
    %c1_38 = arith.constant 1 : index
    %c0_39 = arith.constant 0 : index
    %16 = vector.load %arg7[%c2_37, %c1_38, %c0_39] : memref<18x18x4xf32, #tpu.memory_space<vmem>>, vector<16x16x4xf32>
    %c2_40 = arith.constant 2 : index
    %c2_41 = arith.constant 2 : index
    %c0_42 = arith.constant 0 : index
    %17 = vector.load %arg7[%c2_40, %c2_41, %c0_42] : memref<18x18x4xf32, #tpu.memory_space<vmem>>, vector<16x16x4xf32>
    %18 = tpu.concatenate %9, %10, %11, %12, %13, %14, %15, %16, %17 in 2 : vector<16x16x4xf32>, vector<16x16x4xf32>, vector<16x16x4xf32>, vector<16x16x4xf32>, vector<16x16x4xf32>, vector<16x16x4xf32>, vector<16x16x4xf32>, vector<16x16x4xf32>, vector<16x16x4xf32> -> vector<16x16x36xf32>
    %19 = vector.shape_cast %18 : vector<16x16x36xf32> to vector<256x36xf32>
    %c0_43 = arith.constant 0 : index
    %c0_44 = arith.constant 0 : index
    %20 = vector.load %arg2[%c0_43, %c0_44] : memref<36x8xf32, #tpu.memory_space<vmem>>, vector<36x8xf32>
    %cst_45 = arith.constant dense<0.000000e+00> : vector<256x8xf32>
    %21 = tpu.matmul %19, %20, %cst_45 {dimension_numbers = #tpu.dot_dimension_numbers<[1], [0], [0], [1], [0, 0, 1, 1], [], []>, precision = #tpu.contract_precision<fp32>} : vector<256x36xf32>, vector<36x8xf32>, vector<256x8xf32> -> vector<256x8xf32>
    %c0_46 = arith.constant 0 : index
    %c0_47 = arith.constant 0 : index
    %22 = vector.load %arg3[%c0_46, %c0_47] : memref<1x8xf32, #tpu.memory_space<vmem>>, vector<1x8xf32>
    %23 = vector.broadcast %22 : vector<1x8xf32> to vector<256x8xf32>
    %24 = arith.addf %21, %23 : vector<256x8xf32>
    %cst_48 = arith.constant 0.00999999977 : f32
    %25 = vector.broadcast %cst_48 : f32 to vector<256x8xf32>
    %26 = arith.mulf %25, %24 : vector<256x8xf32>
    %27 = arith.maximumf %24, %26 : vector<256x8xf32>
    %28 = vector.shape_cast %27 : vector<256x8xf32> to vector<16x16x8xf32>
    %cst_49 = arith.constant 0.000000e+00 : f32
    %29 = vector.broadcast %cst_49 : f32 to vector<1x18x8xf32>
    %c0_50 = arith.constant 0 : index
    %c0_51 = arith.constant 0 : index
    %c0_52 = arith.constant 0 : index
    %30 = vector.load %arg8[%c0_50, %c0_51, %c0_52] : memref<18x18x8xf32, #tpu.memory_space<vmem>>, vector<1x18x8xf32>
    tpu.vector_store %arg8[%c0_50, %c0_51, %c0_52], %29 {strides = array<i32>} : memref<18x18x8xf32, #tpu.memory_space<vmem>>, vector<1x18x8xf32>,
    %c17_53 = arith.constant 17 : index
    %c0_54 = arith.constant 0 : index
    %c0_55 = arith.constant 0 : index
    %31 = vector.load %arg8[%c17_53, %c0_54, %c0_55] : memref<18x18x8xf32, #tpu.memory_space<vmem>>, vector<1x18x8xf32>
    tpu.vector_store %arg8[%c17_53, %c0_54, %c0_55], %29 {strides = array<i32>} : memref<18x18x8xf32, #tpu.memory_space<vmem>>, vector<1x18x8xf32>,
    %cst_56 = arith.constant 0.000000e+00 : f32
    %32 = vector.broadcast %cst_56 : f32 to vector<16x1x8xf32>
    %c1_57 = arith.constant 1 : index
    %c0_58 = arith.constant 0 : index
    %c0_59 = arith.constant 0 : index
    %33 = vector.load %arg8[%c1_57, %c0_58, %c0_59] : memref<18x18x8xf32, #tpu.memory_space<vmem>>, vector<16x1x8xf32>
    tpu.vector_store %arg8[%c1_57, %c0_58, %c0_59], %32 {strides = array<i32>} : memref<18x18x8xf32, #tpu.memory_space<vmem>>, vector<16x1x8xf32>,
    %c1_60 = arith.constant 1 : index
    %c17_61 = arith.constant 17 : index
    %c0_62 = arith.constant 0 : index
    %34 = vector.load %arg8[%c1_60, %c17_61, %c0_62] : memref<18x18x8xf32, #tpu.memory_space<vmem>>, vector<16x1x8xf32>
    tpu.vector_store %arg8[%c1_60, %c17_61, %c0_62], %32 {strides = array<i32>} : memref<18x18x8xf32, #tpu.memory_space<vmem>>, vector<16x1x8xf32>,
    %c1_63 = arith.constant 1 : index
    %c1_64 = arith.constant 1 : index
    %c0_65 = arith.constant 0 : index
    %35 = vector.load %arg8[%c1_63, %c1_64, %c0_65] : memref<18x18x8xf32, #tpu.memory_space<vmem>>, vector<16x16x8xf32>
    tpu.vector_store %arg8[%c1_63, %c1_64, %c0_65], %28 {strides = array<i32>} : memref<18x18x8xf32, #tpu.memory_space<vmem>>, vector<16x16x8xf32>,
    %c0_66 = arith.constant 0 : index
    %c0_67 = arith.constant 0 : index
    %c0_68 = arith.constant 0 : index
    %36 = vector.load %arg8[%c0_66, %c0_67, %c0_68] : memref<18x18x8xf32, #tpu.memory_space<vmem>>, vector<16x16x8xf32>
    %c0_69 = arith.constant 0 : index
    %c1_70 = arith.constant 1 : index
    %c0_71 = arith.constant 0 : index
    %37 = vector.load %arg8[%c0_69, %c1_70, %c0_71] : memref<18x18x8xf32, #tpu.memory_space<vmem>>, vector<16x16x8xf32>
    %c0_72 = arith.constant 0 : index
    %c2_73 = arith.constant 2 : index
    %c0_74 = arith.constant 0 : index
    %38 = vector.load %arg8[%c0_72, %c2_73, %c0_74] : memref<18x18x8xf32, #tpu.memory_space<vmem>>, vector<16x16x8xf32>
    %c1_75 = arith.constant 1 : index
    %c0_76 = arith.constant 0 : index
    %c0_77 = arith.constant 0 : index
    %39 = vector.load %arg8[%c1_75, %c0_76, %c0_77] : memref<18x18x8xf32, #tpu.memory_space<vmem>>, vector<16x16x8xf32>
    %c1_78 = arith.constant 1 : index
    %c1_79 = arith.constant 1 : index
    %c0_80 = arith.constant 0 : index
    %40 = vector.load %arg8[%c1_78, %c1_79, %c0_80] : memref<18x18x8xf32, #tpu.memory_space<vmem>>, vector<16x16x8xf32>
    %c1_81 = arith.constant 1 : index
    %c2_82 = arith.constant 2 : index
    %c0_83 = arith.constant 0 : index
    %41 = vector.load %arg8[%c1_81, %c2_82, %c0_83] : memref<18x18x8xf32, #tpu.memory_space<vmem>>, vector<16x16x8xf32>
    %c2_84 = arith.constant 2 : index
    %c0_85 = arith.constant 0 : index
    %c0_86 = arith.constant 0 : index
    %42 = vector.load %arg8[%c2_84, %c0_85, %c0_86] : memref<18x18x8xf32, #tpu.memory_space<vmem>>, vector<16x16x8xf32>
    %c2_87 = arith.constant 2 : index
    %c1_88 = arith.constant 1 : index
    %c0_89 = arith.constant 0 : index
    %43 = vector.load %arg8[%c2_87, %c1_88, %c0_89] : memref<18x18x8xf32, #tpu.memory_space<vmem>>, vector<16x16x8xf32>
    %c2_90 = arith.constant 2 : index
    %c2_91 = arith.constant 2 : index
    %c0_92 = arith.constant 0 : index
    %44 = vector.load %arg8[%c2_90, %c2_91, %c0_92] : memref<18x18x8xf32, #tpu.memory_space<vmem>>, vector<16x16x8xf32>
    %45 = tpu.concatenate %36, %37, %38, %39, %40, %41, %42, %43, %44, %1 in 2 : vector<16x16x8xf32>, vector<16x16x8xf32>, vector<16x16x8xf32>, vector<16x16x8xf32>, vector<16x16x8xf32>, vector<16x16x8xf32>, vector<16x16x8xf32>, vector<16x16x8xf32>, vector<16x16x8xf32>, vector<16x16x4xf32> -> vector<16x16x76xf32>
    %46 = vector.shape_cast %45 : vector<16x16x76xf32> to vector<256x76xf32>
    %c0_93 = arith.constant 0 : index
    %c0_94 = arith.constant 0 : index
    %47 = vector.load %arg4[%c0_93, %c0_94] : memref<76x8xf32, #tpu.memory_space<vmem>>, vector<76x8xf32>
    %cst_95 = arith.constant dense<0.000000e+00> : vector<256x8xf32>
    %48 = tpu.matmul %46, %47, %cst_95 {dimension_numbers = #tpu.dot_dimension_numbers<[1], [0], [0], [1], [0, 0, 1, 1], [], []>, precision = #tpu.contract_precision<fp32>} : vector<256x76xf32>, vector<76x8xf32>, vector<256x8xf32> -> vector<256x8xf32>
    %c0_96 = arith.constant 0 : index
    %c0_97 = arith.constant 0 : index
    %49 = vector.load %arg5[%c0_96, %c0_97] : memref<1x8xf32, #tpu.memory_space<vmem>>, vector<1x8xf32>
    %50 = vector.broadcast %49 : vector<1x8xf32> to vector<256x8xf32>
    %51 = arith.addf %48, %50 : vector<256x8xf32>
    %cst_98 = arith.constant 0.00999999977 : f32
    %52 = vector.broadcast %cst_98 : f32 to vector<256x8xf32>
    %53 = arith.mulf %52, %51 : vector<256x8xf32>
    %54 = arith.maximumf %51, %53 : vector<256x8xf32>
    %55 = tpu.transpose %54, [1, 0] : vector<256x8xf32> -> vector<8x256xf32>
    %c0_99 = arith.constant 0 : index
    %c0_100 = arith.constant 0 : index
    %c0_101 = arith.constant 0 : index
    %56 = vector.load %arg6[%c0_99, %c0_100, %c0_101] : memref<1x8x256xf32, #tpu.memory_space<vmem>>, vector<1x8x256xf32>
    %57 = vector.shape_cast %56 : vector<1x8x256xf32> to vector<8x256xf32>
    %58 = vector.shape_cast %55 : vector<8x256xf32> to vector<1x8x256xf32>
    tpu.vector_store %arg6[%c0_99, %c0_100, %c0_101], %58 {strides = array<i32>} : memref<1x8x256xf32, #tpu.memory_space<vmem>>, vector<1x8x256xf32>,
    return
  }
  func.func @transform_0(%arg0: i32) -> (i32, i32, i32, i32) {
    %c0_i32 = arith.constant 0 : i32
    %c0_i32_0 = arith.constant 0 : i32
    %c0_i32_1 = arith.constant 0 : i32
    %c0_i32_2 = arith.constant 0 : i32
    return %arg0, %c0_i32, %c0_i32_0, %c0_i32_1 : i32, i32, i32, i32
  }
  func.func @transform_1(%arg0: i32) -> (i32, i32) {
    %c0_i32 = arith.constant 0 : i32
    %c0_i32_0 = arith.constant 0 : i32
    %c0_i32_1 = arith.constant 0 : i32
    return %c0_i32, %c0_i32_0 : i32, i32
  }
  func.func @transform_2(%arg0: i32) -> (i32, i32) {
    %c0_i32 = arith.constant 0 : i32
    %c0_i32_0 = arith.constant 0 : i32
    %c0_i32_1 = arith.constant 0 : i32
    return %c0_i32, %c0_i32_0 : i32, i32
  }
  func.func @transform_3(%arg0: i32) -> (i32, i32) {
    %c0_i32 = arith.constant 0 : i32
    %c0_i32_0 = arith.constant 0 : i32
    %c0_i32_1 = arith.constant 0 : i32
    return %c0_i32, %c0_i32_0 : i32, i32
  }
  func.func @transform_4(%arg0: i32) -> (i32, i32) {
    %c0_i32 = arith.constant 0 : i32
    %c0_i32_0 = arith.constant 0 : i32
    %c0_i32_1 = arith.constant 0 : i32
    return %c0_i32, %c0_i32_0 : i32, i32
  }
  func.func @transform_5(%arg0: i32) -> (i32, i32, i32) {
    %c0_i32 = arith.constant 0 : i32
    %c0_i32_0 = arith.constant 0 : i32
    %c0_i32_1 = arith.constant 0 : i32
    return %arg0, %c0_i32, %c0_i32_0 : i32, i32, i32
  }
}

</mosaic_0001>

<bundles_post_ra>
// kernel: tpu_custom_call.1
= control target key start
LH: loop header
LB: loop body
LE: loop exit
PB: predicated region body
PF: predicated region fallthrough
CT: control target
= control target key end

     0   :  { %10 = vsyncpa [#allocation5], 0  ;;  %s14043_s0 = inlined_call_operand.vmem [shape: f32[2,16,16,4], index: 0, kind: input, shape index: {}]   ;;  %s14044_s1 = inlined_call_operand.vmem [shape: f32[36,8], index: 1, kind: input, shape index: {}]   ;;  %s14045_s2 = inlined_call_operand.vmem [shape: f32[1,8], index: 2, kind: input, shape index: {}]   ;;  %s14046_s3 = inlined_call_operand.vmem [shape: f32[76,8], index: 3, kind: input, shape index: {}]   ;;  %s14047_s4 = inlined_call_operand.vmem [shape: f32[1,8], index: 4, kind: input, shape index: {}]   ;;  %s14048_s5 = inlined_call_operand.hbm [shape: f32[2,8,256], index: 5, kind: output, shape index: {}]  }
   0x1   :  { %12 = vsyncpa [#allocation5 + $0x1], 0  ;;  %s9922_s18 = smov 0   ;;  %s9924_s19 = smov 0  }
   0x2   :  { %s9926_s20 = smov 0   ;;  %s9928_s21 = smov 0  }
   0x3 LB: > { %s9943_s22 = sadd.s32 4294967295, %s9875_s21   ;;  %s7939_s23 = sadd.s32 4294967294, %s9875_s21   ;;  %s9875_s21 = sphi %s9928_s21, %s14762_s21   ;;  %s9871_s20 = sphi %s9926_s20, %s14761_s20   ;;  %s9867_s19 = sphi %s9924_s19, %s14760_s19   ;;  %s9863_s18 = sphi %s9922_s18, %s14759_s18  }
   0x4   : > { %s9947_s24 = sadd.s32 1, %s9875_s21   ;;  %s135_s25 = sadd.s32 1, %s9871_s20 }
   0x5   : > { %s132_s26 = ssub.s32 %s9875_s21, %s9947_s24  ;;  %p145_p0 = scmp.ne.s32.totalorder %s9871_s20, %s9867_s19 }
   0x6   : > { %p133_p1 = scmp.eq.s32.totalorder %s132_s26, 0  ;;  %p146_p2 = scmp.eq.s32.totalorder %s9943_s22, 1 }
   0x7   : > { %p151_p3 = scmp.ne.s32.totalorder %s9867_s19, %s9863_s18  ;;  %p152_p4 = scmp.eq.s32.totalorder %s7939_s23, 1 }
   0x8   : > { %s9958_s27 = scalar_select %p133_p1, %s9871_s20, %s135_s25  }
   0x9   : > { %p9960_p5 = por %p146_p2, %p145_p0  ;;  %p9964_p6 = por %p152_p4, %p151_p3 }
   0xa   : > { %p7942_p7 = scmp.ge.s32.totalorder %s9875_s21, 1  ;;  %p190_p8 = scmp.lt.s32.totalorder %s9875_s21, 3 }
   0xc   : > { %p191_p9 = pnand %p7942_p7, %p190_p8 }
   0xe   : > { %194 = sbr.rel (%p191_p9) target bundleno = 2489 (0x9b9), region = 40 }
  0x15   : > { %vm255_vm0 = vcmask 31744   ;;  %vm258_vm1 = vcmask 25600   ;;  %vm265_vm2 = vcmask 24576   ;;  %v14049_v0 = vmov 0.0   ;;  %p218_p10 = scmp.lt.s32.totalorder %s9943_s22, 1  ;;  %s9878_s10 = smov 8  }
  0x16   : > { %256 = vst.msk [vmem:[#allocation2] sm:$0xff] %vm255_vm0, %v14049_v0  ;;  %257 = vst.msk [vmem:[#allocation2 + $0x8] sm:$0xff] %vm255_vm0, %v14049_v0  ;;  %vm1675_vm3 = vcmask 64512   ;;  %s9879_s11 = smov 4   ;;  %s9880_s12 = smov 12   ;;  %v10155_v26 = vld [vmem:[%s14044_s1] sm:$0xff] }
  0x17   : > { %261 = vst.msk [vmem:[#allocation2 + $0x198] sm:$0xff] %vm255_vm0, %v14049_v0  ;;  %262 = vst.msk [vmem:[#allocation2 + $0x1a0] sm:$0xff] %vm255_vm0, %v14049_v0  ;;  %s219_s30 = scalar_select %p218_p10, %s9943_s22, 1  ;;  %v10160_v27 = vld [vmem:[%s14044_s1 + $0x8] sm:$0xff]  ;;  %v14054_v28 = vand.u32 4294901760, %v10155_v26  ;;  %v10176_v31 = vld [vmem:[%s14044_s1 + $0x10] sm:$0xff] }
  0x18   : > { %259 = vst.msk [vmem:[#allocation2 + $0x10] sm:$0x3] %vm258_vm1, %v14049_v0  ;;  %263 = vst.msk [vmem:[#allocation2 + $0x1a8] sm:$0x3] %vm258_vm1, %v14049_v0  ;;  %s9881_s13 = smov 16   ;;  %s9882_s14 = smov 20  }
  0x19   : > { %266 = vst.msk [vmem:[#allocation2 + $0x18] sm:$0x1] %vm265_vm2, %v14049_v0  ;;  %267 = vst.msk [vmem:[#allocation2 + $0x30] sm:$0x1] %vm265_vm2, %v14049_v0  ;;  %s7953_s6 = sshll.u32 %s219_s30, 8  ;;  %s9883_s15 = smov 24  }
  0x1a   : > { %268 = vst.msk [vmem:[#allocation2 + $0x48] sm:$0x1] %vm265_vm2, %v14049_v0  ;;  %269 = vst.msk [vmem:[#allocation2 + $0x60] sm:$0x1] %vm265_vm2, %v14049_v0  ;;  %s10059_s9 = scalar_lea.vmem %s14043_s0, %s7953_s6  ;;  %s9884_s16 = smov 28   ;;  %v14053_v29 = vand.u32 4294901760, %v10160_v27 }
  0x1b   : > { %270 = vst.msk [vmem:[#allocation2 + $0x78] sm:$0x1] %vm265_vm2, %v14049_v0  ;;  %271 = vst.msk [vmem:[#allocation2 + $0x90] sm:$0x1] %vm265_vm2, %v14049_v0  ;;  %v10062_v1 = vld [vmem:[%s10059_s9] sm:$0xff]  ;;  %v10065_v2 = vld [vmem:[%s10059_s9 + $0x8] sm:$0xff] }
  0x1c   : > { %272 = vst.msk [vmem:[#allocation2 + $0xa8] sm:$0x1] %vm265_vm2, %v14049_v0  ;;  %273 = vst.msk [vmem:[#allocation2 + $0xc0] sm:$0x1] %vm265_vm2, %v14049_v0  ;;  %v10068_v3 = vld [vmem:[%s10059_s9 + $0x10] sm:$0xff]  ;;  %v10079_v8 = vld [vmem:[%s10059_s9 + $0x18] sm:$0xff]  ;;  %v10168_v30 = vpack.c.bf16 %v14053_v29, %v14054_v28 }
  0x1d   : > { %274 = vst.msk [vmem:[#allocation2 + $0xd8] sm:$0x1] %vm265_vm2, %v14049_v0  ;;  %275 = vst.msk [vmem:[#allocation2 + $0xf0] sm:$0x1] %vm265_vm2, %v14049_v0  ;;  %v394_v4 = vld [vmem:[#allocation2 + $0x2] sm:$0xff]  ;;  %v10092_v11 = vld [vmem:[%s10059_s9 + $0x30] sm:$0xff] }
  0x1e   : > { %276 = vst.msk [vmem:[#allocation2 + $0x108] sm:$0x1] %vm265_vm2, %v14049_v0  ;;  %277 = vst.msk [vmem:[#allocation2 + $0x120] sm:$0x1] %vm265_vm2, %v14049_v0  ;;  %v362_v5 = vld [vmem:[#allocation2 + $0x1] sm:$0xff]  ;;  %779 = vrot.lane.b32.xlu1 %v394_v4, %s9878_s10  ;;  %v10095_v12 = vld [vmem:[%s10059_s9 + $0x38] sm:$0xff]  ;;  %9186 = vmatprep.subr.bf16.mxu0 %v10168_v30 }
  0x1f   : > { %278 = vst.msk [vmem:[#allocation2 + $0x138] sm:$0x1] %vm265_vm2, %v14049_v0  ;;  %279 = vst.msk [vmem:[#allocation2 + $0x150] sm:$0x1] %vm265_vm2, %v14049_v0  ;;  %v395_v6 = vld [vmem:[#allocation2 + $0xa] sm:$0xff]  ;;  %651 = vrot.lane.b32.xlu0 %v362_v5, %s9879_s11  ;;  %v10082_v9 = vld [vmem:[%s10059_s9 + $0x20] sm:$0xff]  ;;  %9188 = vmatpush3.bf16.msra.mxu0 %v10168_v30 }
  0x20   : > { %280 = vst.msk [vmem:[#allocation2 + $0x168] sm:$0x1] %vm265_vm2, %v14049_v0  ;;  %281 = vst.msk [vmem:[#allocation2 + $0x180] sm:$0x1] %vm265_vm2, %v14049_v0  ;;  %v363_v7 = vld [vmem:[#allocation2 + $0x9] sm:$0xff]  ;;  %v10104_v13 = vld [vmem:[%s10059_s9 + $0x40] sm:$0xff] }
  0x21   : > { %282 = vst.msk [vmem:[#allocation2 + $0x29] sm:$0x1] %vm265_vm2, %v14049_v0  ;;  %283 = vst.msk [vmem:[#allocation2 + $0x41] sm:$0x1] %vm265_vm2, %v14049_v0  ;;  %v10089_v10 = vld [vmem:[%s10059_s9 + $0x28] sm:$0xff]  ;;  %v10128_v20 = vld [vmem:[%s10059_s9 + $0x50] sm:$0xff] }
  0x22   : > { %284 = vst.msk [vmem:[#allocation2 + $0x59] sm:$0x1] %vm265_vm2, %v14049_v0  ;;  %285 = vst.msk [vmem:[#allocation2 + $0x71] sm:$0x1] %vm265_vm2, %v14049_v0  ;;  %v10109_v14 = vld [vmem:[%s10059_s9 + $0x48] sm:$0xff]  ;;  %781 = vrot.lane.b32.xlu1 %v395_v6, %s9878_s10  ;;  %v10137_v23 = vld [vmem:[%s10059_s9 + $0x58] sm:$0xff] }
  0x23   : > { %286 = vst.msk [vmem:[#allocation2 + $0x89] sm:$0x1] %vm265_vm2, %v14049_v0  ;;  %287 = vst.msk [vmem:[#allocation2 + $0xa1] sm:$0x1] %vm265_vm2, %v14049_v0  ;;  %653 = vrot.lane.b32.xlu0 %v363_v7, %s9879_s11  ;;  %v10181_v32 = vld [vmem:[%s14044_s1 + $0x18] sm:$0xff]  ;;  %v14052_v35 = vand.u32 4294901760, %v10176_v31 }
  0x24   : > { %288 = vst.msk [vmem:[#allocation2 + $0xb9] sm:$0x1] %vm265_vm2, %v14049_v0  ;;  %289 = vst.msk [vmem:[#allocation2 + $0xd1] sm:$0x1] %vm265_vm2, %v14049_v0  ;;  %v14051_v36 = vand.u32 4294901760, %v10181_v32  ;;  %s9885_s17 = smov 32  }
  0x25   : > { %290 = vst.msk [vmem:[#allocation2 + $0xe9] sm:$0x1] %vm265_vm2, %v14049_v0  ;;  %291 = vst.msk [vmem:[#allocation2 + $0x101] sm:$0x1] %vm265_vm2, %v14049_v0  ;;  %v1910_v38 = vld [vmem:[%s14044_s1 + $0x20] sm:$0xf] }
  0x26   : > { %292 = vst.msk [vmem:[#allocation2 + $0x119] sm:$0x1] %vm265_vm2, %v14049_v0  ;;  %293 = vst.msk [vmem:[#allocation2 + $0x131] sm:$0x1] %vm265_vm2, %v14049_v0  ;;  %v10191_v37 = vpack.c.bf16 %v14051_v36, %v14052_v35  ;;  %vm2015_vm4 = vcmask 1043456   ;;  %v10211_v42 = vld [vmem:[%s10059_s9 + $0x60] sm:$0xff] }
  0x27   : > { %294 = vst.msk [vmem:[#allocation2 + $0x149] sm:$0x1] %vm265_vm2, %v14049_v0  ;;  %295 = vst.msk [vmem:[#allocation2 + $0x161] sm:$0x1] %vm265_vm2, %v14049_v0  ;;  %v10201_v39 = vsel %vm2015_vm4, %v1910_v38, 0  ;;  %v10222_v44 = vld [vmem:[%s10059_s9 + $0x68] sm:$0xff] }
  0x28   : > { %296 = vst.msk [vmem:[#allocation2 + $0x179] sm:$0x1] %vm265_vm2, %v14049_v0  ;;  %297 = vst.msk [vmem:[#allocation2 + $0x191] sm:$0x1] %vm265_vm2, %v14049_v0  ;;  %9190 = vmatprep.subr.bf16.mxu0 %v10191_v37  ;;  %v10204_v40 = vand.u32 4294901760, %v10201_v39  ;;  %v10245_v50 = vld [vmem:[%s10059_s9 + $0x70] sm:$0xff] }
  0x29   : > { %3914 = vst.msk [vmem:[#allocation3] sm:$0xff] %vm1675_vm3, %v14049_v0  ;;  %3915 = vst.msk [vmem:[#allocation3 + $0x8] sm:$0xff] %vm1675_vm3, %v14049_v0  ;;  %9192 = vmatpush3.bf16.msra.mxu0 %v10191_v37  ;;  %v10256_v52 = vld [vmem:[%s10059_s9 + $0x78] sm:$0xff]  ;;  %v10279_v58 = vld [vmem:[%s10059_s9 + $0x80] sm:$0xff]  ;;  %vm1708_vm5 = vcmask 97280   ;;  %vm1741_vm6 = vcmask 130048  }
  0x2a   : > { %3919 = vst.msk [vmem:[#allocation3 + $0x198] sm:$0xff] %vm1675_vm3, %v14049_v0  ;;  %3920 = vst.msk [vmem:[#allocation3 + $0x1a0] sm:$0xff] %vm1675_vm3, %v14049_v0  ;;  %8437 = vmatprep.subr.mxu0 %v10204_v40  ;;  %v10294_v4 = vld [vmem:[%s10059_s9 + $0x88] sm:$0xff]  ;;  %vm1774_vm7 = vcmask 162816   ;;  %vm1807_vm8 = vcmask 195584   ;;  %vm1840_vm9 = vcmask 228352  }
  0x2b   : > { %14380 = vst [vmem:[#allocation7_spill] sm:$0xff] %v10062_v1  ;;  %14381 = vst [vmem:[#allocation8_spill] sm:$0xff] %v10065_v2  ;;  %vm1873_vm10 = vcmask 261120   ;;  %vm1918_vm11 = vcmask 293888   ;;  %vm3923_vm12 = vcmask 57344   ;;  %s9889_s26 = smov 56  }
  0x2c   : > { %14382 = vst [vmem:[#allocation9_spill] sm:$0xff] %v10068_v3  ;;  %298 = vst.msk [vmem:[#allocation2 + $0x19] sm:$0xff] %vm255_vm0, %v10062_v1  ;;  %s9890_s23 = smov 48   ;;  %vm5557_vm13 = vcmask 326656   ;;  %vm5590_vm14 = vcmask 392192   ;;  %vm5623_vm15 = vcmask 457728  }
  0x2d   : > { %299 = vst.msk [vmem:[#allocation2 + $0x21] sm:$0xff] %vm255_vm0, %v10065_v2  ;;  %300 = vst.msk [vmem:[#allocation2 + $0x31] sm:$0xff] %vm255_vm0, %v10068_v3  ;;  %8438 = vmatpush3.msra.mxu0 %v10204_v40  ;;  %v10350_v2 = vld [vmem:[%s10059_s9 + $0x98] sm:$0xff]  ;;  %vm5689_vm1 = vcmask 588800   ;;  %vm5739_vm2 = vcmask 621568  }
  0x2e   : > { %14383 = vst [vmem:[#allocation10_spill] sm:$0xff] %v10079_v8  ;;  %14384 = vst [vmem:[#allocation11_spill] sm:$0xff] %v10082_v9 }
  0x2f   : > { %301 = vst.msk [vmem:[#allocation2 + $0x39] sm:$0xff] %vm255_vm0, %v10079_v8  ;;  %302 = vst.msk [vmem:[#allocation2 + $0x49] sm:$0xff] %vm255_vm0, %v10082_v9 }
  0x30   : > { %14385 = vst [vmem:[#allocation12_spill] sm:$0xff] %v10089_v10  ;;  %14386 = vst [vmem:[#allocation13_spill] sm:$0xff] %v10092_v11 }
  0x31   : > { %14387 = vst [vmem:[#allocation14_spill] sm:$0xff] %v10095_v12  ;;  %303 = vst.msk [vmem:[#allocation2 + $0x51] sm:$0xff] %vm255_vm0, %v10089_v10 }
  0x32   : > { %304 = vst.msk [vmem:[#allocation2 + $0x61] sm:$0xff] %vm255_vm0, %v10092_v11  ;;  %305 = vst.msk [vmem:[#allocation2 + $0x69] sm:$0xff] %vm255_vm0, %v10095_v12 }
  0x33   : > { %14388 = vst [vmem:[#allocation15_spill] sm:$0xff] %v10104_v13  ;;  %306 = vst.msk [vmem:[#allocation2 + $0x79] sm:$0xff] %vm255_vm0, %v10104_v13  ;;  %v10117_v16 = vld [vmem:[#allocation2 + $0x18] sm:$0xff] }
  0x34   : > { %14389 = vst [vmem:[#allocation16_spill] sm:$0xff] %v10109_v14  ;;  %307 = vst.msk [vmem:[#allocation2 + $0x81] sm:$0xff] %vm255_vm0, %v10109_v14  ;;  %v10115_v15 = vld [vmem:[#allocation2 + $0x20] sm:$0xff]  ;;  %907 = vrot.lane.b32.xlu0 %v10117_v16, %s9880_s12  ;;  %v10134_v22 = vld [vmem:[#allocation2 + $0x30] sm:$0xff] }
  0x35   : > { %909 = vrot.lane.b32.xlu1 %v10115_v15, %s9880_s12  ;;  %v458_v17 = vld [vmem:[#allocation2 + $0x19] sm:$0xff]  ;;  %v459_v18 = vld [vmem:[#allocation2 + $0x21] sm:$0xff]  ;;  %14390 = vst [vmem:[#allocation17_spill] sm:$0xff] %v10128_v20  ;;  %308 = vst.msk [vmem:[#allocation2 + $0x91] sm:$0xff] %vm255_vm0, %v10128_v20 }
  0x36   : > { %v490_v19 = vld [vmem:[#allocation2 + $0x1a] sm:$0xff]  ;;  %v491_v21 = vld [vmem:[#allocation2 + $0x22] sm:$0xff]  ;;  %14391 = vst [vmem:[#allocation18_spill] sm:$0xff] %v10137_v23  ;;  %309 = vst.msk [vmem:[#allocation2 + $0x99] sm:$0xff] %vm255_vm0, %v10137_v23 }
  0x37   : > { %v10147_v24 = vld [vmem:[#allocation2 + $0x38] sm:$0xff]  ;;  %14392 = vst [vmem:[#allocation19_spill] sm:$0xff] %v10191_v37  ;;  %14393 = vst [vmem:[#allocation20_spill] sm:$0xff] %v10211_v42  ;;  %v10219_v43 = vld [vmem:[#allocation2 + $0x48] sm:$0xff] }
  0x38   : > { %1035 = vrot.lane.b32.xlu0 %v458_v17, %s9881_s13  ;;  %v555_v25 = vld [vmem:[#allocation2 + $0x31] sm:$0xff]  ;;  %v556_v33 = vld [vmem:[#allocation2 + $0x39] sm:$0xff]  ;;  %310 = vst.msk [vmem:[#allocation2 + $0xa9] sm:$0xff] %vm255_vm0, %v10211_v42  ;;  %14394 = vst [vmem:[#allocation21_spill] sm:$0xff] %v10222_v44 }
  0x39   : > { %655 = vrot.lane.b32.xlu1 %v458_v17, %s9879_s11  ;;  %v587_v34 = vld [vmem:[#allocation2 + $0x32] sm:$0xff]  ;;  %v588_v41 = vld [vmem:[#allocation2 + $0x3a] sm:$0xff]  ;;  %311 = vst.msk [vmem:[#allocation2 + $0xb1] sm:$0xff] %vm255_vm0, %v10222_v44  ;;  %v557_v46 = vld [vmem:[#allocation2 + $0x49] sm:$0xff] }
  0x3a   : > { %v10232_v45 = vld [vmem:[#allocation2 + $0x50] sm:$0xff]  ;;  %14395 = vst [vmem:[#allocation22_spill] sm:$0xff] %v10245_v50  ;;  %312 = vst.msk [vmem:[#allocation2 + $0xc1] sm:$0xff] %vm255_vm0, %v10245_v50  ;;  %v10253_v51 = vld [vmem:[#allocation2 + $0x60] sm:$0xff] }
  0x3b   : > { %v558_v47 = vld [vmem:[#allocation2 + $0x51] sm:$0xff]  ;;  %14396 = vst [vmem:[#allocation23_spill] sm:$0xff] %v10256_v52  ;;  %313 = vst.msk [vmem:[#allocation2 + $0xc9] sm:$0xff] %vm255_vm0, %v10256_v52  ;;  %v10266_v53 = vld [vmem:[#allocation2 + $0x68] sm:$0xff] }
  0x3c   : > { %1037 = vrot.lane.b32.xlu0 %v459_v18, %s9881_s13  ;;  %v589_v48 = vld [vmem:[#allocation2 + $0x4a] sm:$0xff]  ;;  %v590_v49 = vld [vmem:[#allocation2 + $0x52] sm:$0xff]  ;;  %v559_v54 = vld [vmem:[#allocation2 + $0x61] sm:$0xff]  ;;  %14397 = vst [vmem:[#allocation24_spill] sm:$0xff] %v10279_v58 }
  0x3d   : > { %1163 = vrot.lane.b32.xlu1 %v490_v19, %s9882_s14  ;;  %v560_v55 = vld [vmem:[#allocation2 + $0x69] sm:$0xff]  ;;  %314 = vst.msk [vmem:[#allocation2 + $0xd9] sm:$0xff] %vm255_vm0, %v10279_v58  ;;  %v10287_v61 = vld [vmem:[#allocation2 + $0x78] sm:$0xff]  ;;  %14398 = vst [vmem:[#allocation25_spill] sm:$0xff] %v10294_v4 }
  0x3e   : > { %v591_v56 = vld [vmem:[#allocation2 + $0x62] sm:$0xff]  ;;  %v592_v57 = vld [vmem:[#allocation2 + $0x6a] sm:$0xff]  ;;  %315 = vst.msk [vmem:[#allocation2 + $0xe1] sm:$0xff] %vm255_vm0, %v10294_v4  ;;  %v561_v17 = vld [vmem:[#allocation2 + $0x79] sm:$0xff] }
  0x3f   : > { %v10306_v7 = vld [vmem:[#allocation2 + $0x80] sm:$0xff]  ;;  %v10341_v35 = vld [vmem:[#allocation2 + $0x90] sm:$0xff]  ;;  %14400 = vst [vmem:[#allocation27_spill] sm:$0xff] %v10350_v2  ;;  %317 = vst.msk [vmem:[#allocation2 + $0xf9] sm:$0xff] %vm255_vm0, %v10350_v2 }
  0x40   : > { %657 = vrot.lane.b32.xlu0 %v459_v18, %s9879_s11  ;;  %v10434_v4 = vld [vmem:[#allocation2 + $0xa8] sm:$0xff] }
  0x41   : > { %783 = vrot.lane.b32.xlu1 %v490_v19, %s9878_s10  ;;  %v10530_v44 = vld [vmem:[#allocation2 + $0xc0] sm:$0xff] }
  0x44   : > { %1165 = vrot.lane.b32.xlu0 %v491_v21, %s9882_s14  ;;  %v10626_v13 = vld [vmem:[#allocation2 + $0xd8] sm:$0xff] }
  0x45   : > { %1291 = vrot.lane.b32.xlu1 %v10134_v22, %s9883_s15 }
  0x48   : > { %785 = vrot.lane.b32.xlu0 %v491_v21, %s9878_s10 }
  0x49   : > { %911 = vrot.lane.b32.xlu1 %v10134_v22, %s9880_s12 }
  0x4c   : > { %1293 = vrot.lane.b32.xlu0 %v10147_v24, %s9883_s15 }
  0x4d   : > { %1419 = vrot.lane.b32.xlu1 %v555_v25, %s9884_s16 }
  0x50   : > { %913 = vrot.lane.b32.xlu0 %v10147_v24, %s9880_s12 }
  0x51   : > { %1039 = vrot.lane.b32.xlu1 %v555_v25, %s9881_s13 }
  0x54   : > { %1421 = vrot.lane.b32.xlu0 %v556_v33, %s9884_s16 }
  0x55   : > { %1547 = vrot.lane.b32.xlu1 %v587_v34, %s9885_s17 }
  0x58   : > { %659 = vrot.lane.b32.xlu0 %v555_v25, %s9879_s11 }
  0x59   : > { %1041 = vrot.lane.b32.xlu1 %v556_v33, %s9881_s13 }
  0x5c   : > { %1167 = vrot.lane.b32.xlu0 %v587_v34, %s9882_s14 }
  0x5d   : > { %1549 = vrot.lane.b32.xlu1 %v588_v41, %s9885_s17 }
  0x60   : > { %661 = vrot.lane.b32.xlu0 %v556_v33, %s9879_s11  ;;  %v562_v33 = vld [vmem:[#allocation2 + $0x81] sm:$0xff] }
  0x61   : > { %787 = vrot.lane.b32.xlu1 %v587_v34, %s9878_s10  ;;  %v593_v34 = vld [vmem:[#allocation2 + $0x7a] sm:$0xff] }
  0x64   : > { %1169 = vrot.lane.b32.xlu0 %v588_v41, %s9882_s14 }
  0x65   : > { %1295 = vrot.lane.b32.xlu1 %v10219_v43, %s9883_s15 }
  0x68   : > { %789 = vrot.lane.b32.xlu0 %v588_v41, %s9878_s10 }
  0x69   : > { %915 = vrot.lane.b32.xlu1 %v10219_v43, %s9880_s12 }
  0x6c   : > { %1297 = vrot.lane.b32.xlu0 %v10232_v45, %s9883_s15 }
  0x6d   : > { %1423 = vrot.lane.b32.xlu1 %v557_v46, %s9884_s16 }
  0x70   : > { %917 = vrot.lane.b32.xlu0 %v10232_v45, %s9880_s12 }
  0x71   : > { %1043 = vrot.lane.b32.xlu1 %v557_v46, %s9881_s13 }
  0x74   : > { %1425 = vrot.lane.b32.xlu0 %v558_v47, %s9884_s16 }
  0x75   : > { %1551 = vrot.lane.b32.xlu1 %v589_v48, %s9885_s17 }
  0x78   : > { %663 = vrot.lane.b32.xlu0 %v557_v46, %s9879_s11 }
  0x79   : > { %1045 = vrot.lane.b32.xlu1 %v558_v47, %s9881_s13 }
  0x7c   : > { %1171 = vrot.lane.b32.xlu0 %v589_v48, %s9882_s14 }
  0x7d   : > { %1553 = vrot.lane.b32.xlu1 %v590_v49, %s9885_s17 }
  0x80   : > { %665 = vrot.lane.b32.xlu0 %v558_v47, %s9879_s11 }
  0x81   : > { %791 = vrot.lane.b32.xlu1 %v589_v48, %s9878_s10  ;;  %v594_v48 = vld [vmem:[#allocation2 + $0x82] sm:$0xff] }
  0x84   : > { %1173 = vrot.lane.b32.xlu0 %v590_v49, %s9882_s14 }
  0x85   : > { %1299 = vrot.lane.b32.xlu1 %v10253_v51, %s9883_s15 }
  0x88   : > { %793 = vrot.lane.b32.xlu0 %v590_v49, %s9878_s10 }
  0x89   : > { %919 = vrot.lane.b32.xlu1 %v10253_v51, %s9880_s12 }
  0x8c   : > { %1301 = vrot.lane.b32.xlu0 %v10266_v53, %s9883_s15 }
  0x8d   : > { %1427 = vrot.lane.b32.xlu1 %v559_v54, %s9884_s16 }
  0x90   : > { %921 = vrot.lane.b32.xlu0 %v10266_v53, %s9880_s12  ;;  %v780_v59 = vpop.permute.xlu1 %779 }
  0x91   : > { %1047 = vrot.lane.b32.xlu1 %v559_v54, %s9881_s13  ;;  %v652_v60 = vpop.permute.xlu0 %651 }
  0x94   : > { %1429 = vrot.lane.b32.xlu0 %v560_v55, %s9884_s16  ;;  %v10289_v62 = vpop.permute.xlu1 %781 }
  0x95   : > { %1555 = vrot.lane.b32.xlu1 %v591_v56, %s9885_s17  ;;  %v10291_v63 = vpop.permute.xlu0 %653 }
  0x98   : > { %667 = vrot.lane.b32.xlu0 %v559_v54, %s9879_s11 }
  0x99   : > { %1049 = vrot.lane.b32.xlu1 %v560_v55, %s9881_s13 }
  0x9c   : > { %1175 = vrot.lane.b32.xlu0 %v591_v56, %s9882_s14 }
  0x9d   : > { %1557 = vrot.lane.b32.xlu1 %v592_v57, %s9885_s17 }
  0xa0   : > { %669 = vrot.lane.b32.xlu0 %v560_v55, %s9879_s11  ;;  %v330_v55 = vld [vmem:[#allocation2] sm:$0xff] }
  0xa1   : > { %795 = vrot.lane.b32.xlu1 %v591_v56, %s9878_s10  ;;  %v10331_v56 = vld [vmem:[%s10059_s9 + $0x90] sm:$0xff] }
  0xa2   : > { %14399 = vst [vmem:[#allocation26_spill] sm:$0xff] %v10331_v56  ;;  %316 = vst.msk [vmem:[#allocation2 + $0xf1] sm:$0xff] %vm255_vm0, %v10331_v56  ;;  %v10421_v56 = vld [vmem:[%s10059_s9 + $0xa0] sm:$0xff] }
  0xa3   : > { %14403 = vst [vmem:[#allocation30_spill] sm:$0xff] %v10421_v56  ;;  %318 = vst.msk [vmem:[#allocation2 + $0x109] sm:$0xff] %vm255_vm0, %v10421_v56 }
  0xa4   : > { %1177 = vrot.lane.b32.xlu0 %v592_v57, %s9882_s14 }
  0xa5   : > { %1303 = vrot.lane.b32.xlu1 %v10287_v61, %s9883_s15 }
  0xa6   : > { %v908_v6 = vpop.permute.xlu0 %907 }
  0xa7   : > { %v10301_v5 = vpop.permute.xlu1 %909 }
  0xa8   : > { %797 = vrot.lane.b32.xlu0 %v592_v57, %s9878_s10  ;;  %v1643_v57 = vsel %vm255_vm0, %v330_v55, %v652_v60  ;;  %v331_v55 = vld [vmem:[#allocation2 + $0x8] sm:$0xff] }
  0xa9   : > { %923 = vrot.lane.b32.xlu1 %v10287_v61, %s9880_s12  ;;  %v1676_v36 = vsel %vm1675_vm3, %v1643_v57, %v780_v59  ;;  %v10371_v57 = vld [vmem:[#allocation2 + $0x98] sm:$0xff]  ;;  %v10722_v9 = vld [vmem:[#allocation2 + $0xf0] sm:$0xff] }
  0xaa   : > { %v1036_v18 = vpop.permute.xlu0 %1035  ;;  %v1709_v29 = vsel %vm1708_vm5, %v1676_v36, %v908_v6 }
  0xab   : > { %v10308_v19 = vpop.permute.xlu1 %655  ;;  %v1742_v1 = vsel %vm1741_vm6, %v1709_v29, %v1036_v18  ;;  %v1644_v29 = vsel %vm255_vm0, %v331_v55, %v10291_v63  ;;  %v563_v63 = vld [vmem:[#allocation2 + $0x91] sm:$0xff] }
  0xac   : > { %1305 = vrot.lane.b32.xlu0 %v10306_v7, %s9883_s15 }
  0xad   : > { %1431 = vrot.lane.b32.xlu1 %v561_v17, %s9884_s16 }
  0xae   : > { %v10313_v21 = vpop.permute.xlu0 %1037 }
  0xaf   : > { %v1164_v25 = vpop.permute.xlu1 %1163 }
  0xb0   : > { %925 = vrot.lane.b32.xlu0 %v10306_v7, %s9880_s12 }
  0xb1   : > { %1051 = vrot.lane.b32.xlu1 %v561_v17, %s9881_s13 }
  0xb2   : > { %v10318_v38 = vpop.permute.xlu0 %657 }
  0xb3   : > { %v10320_v41 = vpop.permute.xlu1 %783 }
  0xb4   : > { %1433 = vrot.lane.b32.xlu0 %v562_v33, %s9884_s16 }
  0xb5   : > { %1559 = vrot.lane.b32.xlu1 %v593_v34, %s9885_s17 }
  0xb6   : > { %v1166_v46 = vpop.permute.xlu0 %1165 }
  0xb7   : > { %v1292_v47 = vpop.permute.xlu1 %1291 }
  0xb8   : > { %671 = vrot.lane.b32.xlu0 %v561_v17, %s9879_s11 }
  0xb9   : > { %1053 = vrot.lane.b32.xlu1 %v562_v33, %s9881_s13 }
  0xba   : > { %v10326_v49 = vpop.permute.xlu0 %785 }
  0xbb   : > { %v10328_v54 = vpop.permute.xlu1 %911 }
  0xbc   : > { %1179 = vrot.lane.b32.xlu0 %v593_v34, %s9882_s14 }
  0xbd   : > { %1561 = vrot.lane.b32.xlu1 %v594_v48, %s9885_s17 }
  0xbe   : > { %v1294_v17 = vpop.permute.xlu0 %1293 }
  0xbf   : > { %v1420_v0 = vpop.permute.xlu1 %1419 }
  0xc0   : > { %673 = vrot.lane.b32.xlu0 %v562_v33, %s9879_s11  ;;  %v1775_v33 = vsel %vm1774_vm7, %v1742_v1, %v1164_v25 }
  0xc1   : > { %799 = vrot.lane.b32.xlu1 %v593_v34, %s9878_s10  ;;  %v1808_v36 = vsel %vm1807_vm8, %v1775_v33, %v1292_v47  ;;  %v1677_v34 = vsel %vm1675_vm3, %v1644_v29, %v10289_v62 }
  0xc2   : > { %v10344_v28 = vpop.permute.xlu0 %913  ;;  %v1841_v59 = vsel %vm1840_vm9, %v1808_v36, %v1420_v0  ;;  %v1710_v0 = vsel %vm1708_vm5, %v1677_v34, %v10301_v5 }
  0xc3   : > { %v10346_v60 = vpop.permute.xlu1 %1039 }
  0xc4   : > { %1181 = vrot.lane.b32.xlu0 %v594_v48, %s9882_s14 }
  0xc5   : > { %1307 = vrot.lane.b32.xlu1 %v10341_v35, %s9883_s15 }
  0xc6   : > { %v1422_v6 = vpop.permute.xlu0 %1421 }
  0xc7   : > { %v1548_v18 = vpop.permute.xlu1 %1547 }
  0xc8   : > { %v1874_v1 = vsel %vm1873_vm10, %v1841_v59, %v1548_v18  ;;  %801 = vrot.lane.b32.xlu0 %v594_v48, %s9878_s10  ;;  %v1743_v48 = vsel %vm1741_vm6, %v1710_v0, %v10313_v21  ;;  %v564_v0 = vld [vmem:[#allocation2 + $0x99] sm:$0xff] }
  0xc9   : > { %v1920_v25 = vsel %vm1918_vm11, %v1874_v1, 0  ;;  %927 = vrot.lane.b32.xlu1 %v10341_v35, %s9880_s12  ;;  %v1776_v62 = vsel %vm1774_vm7, %v1743_v48, %v1166_v46 }
  0xca   : > { %v10369_v47 = vand.u32 4294901760, %v1920_v25  ;;  %v10375_v55 = vpop.permute.xlu0 %659  ;;  %v1809_v29 = vsel %vm1807_vm8, %v1776_v62, %v1294_v17 }
  0xcb   : > { %v10377_v33 = vpop.permute.xlu1 %1041  ;;  %v1842_v59 = vsel %vm1840_vm9, %v1809_v29, %v1422_v6  ;;  %v595_v6 = vld [vmem:[#allocation2 + $0x92] sm:$0xff] }
  0xcc   : > { %v10382_v36 = vsub.f32 %v1920_v25, %v10369_v47  ;;  %1309 = vrot.lane.b32.xlu0 %v10371_v57, %s9883_s15 }
  0xcd   : > { %1435 = vrot.lane.b32.xlu1 %v563_v63, %s9884_s16 }
  0xce   : > { %14401 = vst [vmem:[#allocation28_spill] sm:$0xff] %v10382_v36  ;;  %v14057_v5 = vand.u32 4294901760, %v10382_v36  ;;  %v1168_v18 = vpop.permute.xlu0 %1167 }
  0xcf   : > { %v1550_v1 = vpop.permute.xlu1 %1549 }
  0xd0   : > { %v1875_v21 = vsel %vm1873_vm10, %v1842_v59, %v1550_v1  ;;  %v2092_v25 = vsub.f32 %v10382_v36, %v14057_v5  ;;  %929 = vrot.lane.b32.xlu0 %v10371_v57, %s9880_s12 }
  0xd1   : > { %v1923_v46 = vsel %vm1918_vm11, %v1875_v21, 0  ;;  %1055 = vrot.lane.b32.xlu1 %v563_v63, %s9881_s13 }
  0xd2   : > { %v10399_v17 = vand.u32 4294901760, %v1923_v46  ;;  %v2093_v34 = vand.u32 4294901760, %v2092_v25  ;;  %v10401_v48 = vpop.permute.xlu0 %661 }
  0xd3   : > { %v10403_v62 = vpop.permute.xlu1 %787 }
  0xd4   : > { %v10406_v29 = vsub.f32 %v1923_v46, %v10399_v17  ;;  %8439 = vmatprep.mubr.f32.mxu0 %v2093_v34  ;;  %1437 = vrot.lane.b32.xlu0 %v564_v0, %s9884_s16  ;;  %v596_v46 = vld [vmem:[#allocation2 + $0x9a] sm:$0xff] }
  0xd5   : > { %1563 = vrot.lane.b32.xlu1 %v595_v6, %s9885_s17 }
  0xd6   : > { %14402 = vst [vmem:[#allocation29_spill] sm:$0xff] %v10406_v29  ;;  %v14060_v59 = vand.u32 4294901760, %v10406_v29  ;;  %v1170_v1 = vpop.permute.xlu0 %1169 }
  0xd7   : > { %v1296_v21 = vpop.permute.xlu1 %1295 }
  0xd8   : > { %v2102_v25 = vsub.f32 %v10406_v29, %v14060_v59  ;;  %675 = vrot.lane.b32.xlu0 %v563_v63, %s9879_s11 }
  0xd9   : > { %1057 = vrot.lane.b32.xlu1 %v564_v0, %s9881_s13 }
  0xda   : > { %v2103_v5 = vand.u32 4294901760, %v2102_v25  ;;  %v10416_v2 = vpop.permute.xlu0 %789  ;;  %v1645_v25 = vsel %vm255_vm0, %v10117_v16, %v10308_v19  ;;  %v10445_v16 = vld [vmem:[%s10059_s9 + $0xa8] sm:$0xff] }
  0xdb   : > { %v10418_v34 = vpop.permute.xlu1 %915  ;;  %14404 = vst [vmem:[#allocation31_spill] sm:$0xff] %v10445_v16  ;;  %319 = vst.msk [vmem:[#allocation2 + $0x111] sm:$0xff] %vm255_vm0, %v10445_v16  ;;  %v10517_v16 = vld [vmem:[%s10059_s9 + $0xb0] sm:$0xff] }
  0xdc   : > { %8440 = vmatmul.mubr.f32.vlgmr.msra.gmra.mrb[0].mxu0 %v2103_v5  ;;  %1183 = vrot.lane.b32.xlu0 %v595_v6, %s9882_s14  ;;  %v1678_v5 = vsel %vm1675_vm3, %v1645_v25, %v10320_v41  ;;  %v565_v25 = vld [vmem:[#allocation2 + $0xa9] sm:$0xff]  ;;  %14407 = vst [vmem:[#allocation34_spill] sm:$0xff] %v10517_v16  ;;  %320 = vst.msk [vmem:[#allocation2 + $0x121] sm:$0xff] %vm255_vm0, %v10517_v16 }
  0xdd   : > { %1565 = vrot.lane.b32.xlu1 %v596_v46, %s9885_s17  ;;  %v1711_v58 = vsel %vm1708_vm5, %v1678_v5, %v10328_v54 }
  0xde   : > { %v1298_v63 = vpop.permute.xlu0 %1297  ;;  %v1744_v50 = vsel %vm1741_vm6, %v1711_v58, %v10346_v60 }
  0xdf   : > { %v1424_v59 = vpop.permute.xlu1 %1423  ;;  %v1777_v19 = vsel %vm1774_vm7, %v1744_v50, %v1168_v18  ;;  %v1646_v50 = vsel %vm255_vm0, %v10115_v15, %v10318_v38 }
  0xe0   : > { %677 = vrot.lane.b32.xlu0 %v564_v0, %s9879_s11  ;;  %v1810_v41 = vsel %vm1807_vm8, %v1777_v19, %v1296_v21  ;;  %v1679_v18 = vsel %vm1675_vm3, %v1646_v50, %v10326_v49 }
  0xe1   : > { %803 = vrot.lane.b32.xlu1 %v595_v6, %s9878_s10  ;;  %v1843_v54 = vsel %vm1840_vm9, %v1810_v41, %v1424_v59  ;;  %v10467_v59 = vld [vmem:[#allocation2 + $0xb0] sm:$0xff]  ;;  %v1712_v5 = vsel %vm1708_vm5, %v1679_v18, %v10344_v28 }
  0xe2   : > { %v10438_v52 = vpop.permute.xlu0 %917  ;;  %v1745_v38 = vsel %vm1741_vm6, %v1712_v5, %v10377_v33  ;;  %v566_v18 = vld [vmem:[#allocation2 + $0xb1] sm:$0xff] }
  0xe3   : > { %v10440_v56 = vpop.permute.xlu1 %1043  ;;  %v1778_v49 = vsel %vm1774_vm7, %v1745_v38, %v1170_v1 }
  0xe4   : > { %1185 = vrot.lane.b32.xlu0 %v596_v46, %s9882_s14  ;;  %v1811_v41 = vsel %vm1807_vm8, %v1778_v49, %v1298_v63 }
  0xe5   : > { %1311 = vrot.lane.b32.xlu1 %v10434_v4, %s9883_s15 }
  0xe6   : > { %v1426_v0 = vpop.permute.xlu0 %1425 }
  0xe7   : > { %v1552_v6 = vpop.permute.xlu1 %1551 }
  0xe8   : > { %v1876_v58 = vsel %vm1873_vm10, %v1843_v54, %v1552_v6  ;;  %805 = vrot.lane.b32.xlu0 %v596_v46, %s9878_s10  ;;  %v1844_v54 = vsel %vm1840_vm9, %v1811_v41, %v1426_v0  ;;  %v597_v0 = vld [vmem:[#allocation2 + $0xaa] sm:$0xff] }
  0xe9   : > { %v1926_v60 = vsel %vm1918_vm11, %v1876_v58, 0  ;;  %931 = vrot.lane.b32.xlu1 %v10434_v4, %s9880_s12 }
  0xea   : > { %v10465_v21 = vand.u32 4294901760, %v1926_v60  ;;  %v10471_v19 = vpop.permute.xlu0 %663 }
  0xeb   : > { %v10473_v15 = vpop.permute.xlu1 %1045 }
  0xec   : > { %v10478_v46 = vsub.f32 %v1926_v60, %v10465_v21  ;;  %1313 = vrot.lane.b32.xlu0 %v10467_v59, %s9883_s15 }
  0xed   : > { %1439 = vrot.lane.b32.xlu1 %v565_v25, %s9884_s16 }
  0xee   : > { %14405 = vst [vmem:[#allocation32_spill] sm:$0xff] %v10478_v46  ;;  %v14066_v28 = vand.u32 4294901760, %v10478_v46  ;;  %v1172_v6 = vpop.permute.xlu0 %1171 }
  0xef   : > { %v1554_v58 = vpop.permute.xlu1 %1553 }
  0xf0   : > { %v1877_v33 = vsel %vm1873_vm10, %v1844_v54, %v1554_v58  ;;  %v2112_v50 = vsub.f32 %v10478_v46, %v14066_v28  ;;  %933 = vrot.lane.b32.xlu0 %v10467_v59, %s9880_s12 }
  0xf1   : > { %v1929_v1 = vsel %vm1918_vm11, %v1877_v33, 0  ;;  %1059 = vrot.lane.b32.xlu1 %v565_v25, %s9881_s13 }
  0xf2   : > { %v10495_v63 = vand.u32 4294901760, %v1929_v1  ;;  %v2113_v60 = vand.u32 4294901760, %v2112_v50  ;;  %v10497_v5 = vpop.permute.xlu0 %665 }
  0xf3   : > { %v10499_v38 = vpop.permute.xlu1 %791 }
  0xf4   : > { %v10502_v49 = vsub.f32 %v1929_v1, %v10495_v63  ;;  %8442 = vmatprep.mubr.f32.mxu0 %v2113_v60  ;;  %1441 = vrot.lane.b32.xlu0 %v566_v18, %s9884_s16  ;;  %v598_v1 = vld [vmem:[#allocation2 + $0xb2] sm:$0xff] }
  0xf5   : > { %1567 = vrot.lane.b32.xlu1 %v597_v0, %s9885_s17 }
  0xf6   : > { %14406 = vst [vmem:[#allocation33_spill] sm:$0xff] %v10502_v49  ;;  %v14068_v41 = vand.u32 4294901760, %v10502_v49  ;;  %v1174_v54 = vpop.permute.xlu0 %1173 }
  0xf7   : > { %v1300_v58 = vpop.permute.xlu1 %1299 }
  0xf8   : > { %v2122_v33 = vsub.f32 %v10502_v49, %v14068_v41  ;;  %679 = vrot.lane.b32.xlu0 %v565_v25, %s9879_s11 }
  0xf9   : > { %1061 = vrot.lane.b32.xlu1 %v566_v18, %s9881_s13 }
  0xfa   : > { %v2123_v50 = vand.u32 4294901760, %v2122_v33  ;;  %v10512_v28 = vpop.permute.xlu0 %793  ;;  %v1647_v33 = vsel %vm255_vm0, %v10134_v22, %v10375_v55  ;;  %v10541_v22 = vld [vmem:[%s10059_s9 + $0xb8] sm:$0xff] }
  0xfb   : > { %v10514_v60 = vpop.permute.xlu1 %919  ;;  %14408 = vst [vmem:[#allocation35_spill] sm:$0xff] %v10541_v22  ;;  %321 = vst.msk [vmem:[#allocation2 + $0x129] sm:$0xff] %vm255_vm0, %v10541_v22  ;;  %v10613_v22 = vld [vmem:[%s10059_s9 + $0xc0] sm:$0xff] }
  0xfc   : > { %8443 = vmatmul.mubr.f32.gmra.mrb[2].mxu0 %v2123_v50  ;;  %1187 = vrot.lane.b32.xlu0 %v597_v0, %s9882_s14  ;;  %v1680_v50 = vsel %vm1675_vm3, %v1647_v33, %v10403_v62  ;;  %v567_v33 = vld [vmem:[#allocation2 + $0xc1] sm:$0xff]  ;;  %14411 = vst [vmem:[#allocation38_spill] sm:$0xff] %v10613_v22  ;;  %322 = vst.msk [vmem:[#allocation2 + $0x139] sm:$0xff] %vm255_vm0, %v10613_v22 }
  0xfd   : > { %1569 = vrot.lane.b32.xlu1 %v598_v1, %s9885_s17  ;;  %v1713_v42 = vsel %vm1708_vm5, %v1680_v50, %v10418_v34 }
  0xfe   : > { %v1302_v25 = vpop.permute.xlu0 %1301  ;;  %v1746_v23 = vsel %vm1741_vm6, %v1713_v42, %v10440_v56 }
  0xff   : > { %v1428_v41 = vpop.permute.xlu1 %1427  ;;  %v1779_v55 = vsel %vm1774_vm7, %v1746_v23, %v1172_v6  ;;  %v1648_v23 = vsel %vm255_vm0, %v10147_v24, %v10401_v48 }
 0x100   : > { %681 = vrot.lane.b32.xlu0 %v566_v18, %s9879_s11  ;;  %v1812_v62 = vsel %vm1807_vm8, %v1779_v55, %v1300_v58  ;;  %v1681_v6 = vsel %vm1675_vm3, %v1648_v23, %v10416_v2 }
 0x101   : > { %807 = vrot.lane.b32.xlu1 %v597_v0, %s9878_s10  ;;  %v1845_v34 = vsel %vm1840_vm9, %v1812_v62, %v1428_v41  ;;  %v10563_v41 = vld [vmem:[#allocation2 + $0xc8] sm:$0xff]  ;;  %v1714_v50 = vsel %vm1708_vm5, %v1681_v6, %v10438_v52 }
 0x102   : > { %v10534_v20 = vpop.permute.xlu0 %921  ;;  %v1747_v48 = vsel %vm1741_vm6, %v1714_v50, %v10473_v15  ;;  %v568_v6 = vld [vmem:[#allocation2 + $0xc9] sm:$0xff] }
 0x103   : > { %v10536_v16 = vpop.permute.xlu1 %1047  ;;  %v1780_v2 = vsel %vm1774_vm7, %v1747_v48, %v1174_v54 }
 0x104   : > { %1189 = vrot.lane.b32.xlu0 %v598_v1, %s9882_s14  ;;  %v1813_v62 = vsel %vm1807_vm8, %v1780_v2, %v1302_v25 }
 0x105   : > { %1315 = vrot.lane.b32.xlu1 %v10530_v44, %s9883_s15 }
 0x106   : > { %v1430_v18 = vpop.permute.xlu0 %1429 }
 0x107   : > { %v1556_v0 = vpop.permute.xlu1 %1555 }
 0x108   : > { %v1878_v42 = vsel %vm1873_vm10, %v1845_v34, %v1556_v0  ;;  %809 = vrot.lane.b32.xlu0 %v598_v1, %s9878_s10  ;;  %v1846_v34 = vsel %vm1840_vm9, %v1813_v62, %v1430_v18  ;;  %v599_v18 = vld [vmem:[#allocation2 + $0xc2] sm:$0xff] }
 0x109   : > { %v1932_v56 = vsel %vm1918_vm11, %v1878_v42, 0  ;;  %935 = vrot.lane.b32.xlu1 %v10530_v44, %s9880_s12 }
 0x10a   : > { %v10561_v58 = vand.u32 4294901760, %v1932_v56  ;;  %v10567_v55 = vpop.permute.xlu0 %667 }
 0x10b   : > { %v10569_v24 = vpop.permute.xlu1 %1049 }
 0x10c   : > { %v10574_v1 = vsub.f32 %v1932_v56, %v10561_v58  ;;  %1317 = vrot.lane.b32.xlu0 %v10563_v41, %s9883_s15 }
 0x10d   : > { %1443 = vrot.lane.b32.xlu1 %v567_v33, %s9884_s16 }
 0x10e   : > { %14409 = vst [vmem:[#allocation36_spill] sm:$0xff] %v10574_v1  ;;  %v14074_v52 = vand.u32 4294901760, %v10574_v1  ;;  %v1176_v0 = vpop.permute.xlu0 %1175 }
 0x10f   : > { %v1558_v42 = vpop.permute.xlu1 %1557 }
 0x110   : > { %v1879_v15 = vsel %vm1873_vm10, %v1846_v34, %v1558_v42  ;;  %v2132_v23 = vsub.f32 %v10574_v1, %v14074_v52  ;;  %937 = vrot.lane.b32.xlu0 %v10563_v41, %s9880_s12 }
 0x111   : > { %v1935_v54 = vsel %vm1918_vm11, %v1879_v15, 0  ;;  %1063 = vrot.lane.b32.xlu1 %v567_v33, %s9881_s13 }
 0x112   : > { %v10591_v25 = vand.u32 4294901760, %v1935_v54  ;;  %v2133_v56 = vand.u32 4294901760, %v2132_v23  ;;  %v10593_v50 = vpop.permute.xlu0 %669 }
 0x113   : > { %v10595_v48 = vpop.permute.xlu1 %795 }
 0x114   : > { %v10598_v2 = vsub.f32 %v1935_v54, %v10591_v25  ;;  %8445 = vmatprep.mubr.f32.mxu0 %v2133_v56  ;;  %1445 = vrot.lane.b32.xlu0 %v568_v6, %s9884_s16  ;;  %v600_v54 = vld [vmem:[#allocation2 + $0xca] sm:$0xff] }
 0x115   : > { %1571 = vrot.lane.b32.xlu1 %v599_v18, %s9885_s17 }
 0x116   : > { %14410 = vst [vmem:[#allocation37_spill] sm:$0xff] %v10598_v2  ;;  %v14076_v62 = vand.u32 4294901760, %v10598_v2  ;;  %v1178_v34 = vpop.permute.xlu0 %1177 }
 0x117   : > { %v1304_v42 = vpop.permute.xlu1 %1303 }
 0x118   : > { %v2142_v15 = vsub.f32 %v10598_v2, %v14076_v62  ;;  %683 = vrot.lane.b32.xlu0 %v567_v33, %s9879_s11 }
 0x119   : > { %1065 = vrot.lane.b32.xlu1 %v568_v6, %s9881_s13 }
 0x11a   : > { %v2143_v23 = vand.u32 4294901760, %v2142_v15  ;;  %v10608_v52 = vpop.permute.xlu0 %797  ;;  %v1649_v15 = vsel %vm255_vm0, %v10219_v43, %v10471_v19  ;;  %v10637_v43 = vld [vmem:[%s10059_s9 + $0xc8] sm:$0xff] }
 0x11b   : > { %v10610_v56 = vpop.permute.xlu1 %923  ;;  %14412 = vst [vmem:[#allocation39_spill] sm:$0xff] %v10637_v43  ;;  %323 = vst.msk [vmem:[#allocation2 + $0x141] sm:$0xff] %vm255_vm0, %v10637_v43  ;;  %v10709_v43 = vld [vmem:[%s10059_s9 + $0xd0] sm:$0xff] }
 0x11c   : > { %8446 = vmatmul.mubr.f32.gmra.mrb[4].mxu0 %v2143_v23  ;;  %1191 = vrot.lane.b32.xlu0 %v599_v18, %s9882_s14  ;;  %v1682_v23 = vsel %vm1675_vm3, %v1649_v15, %v10499_v38  ;;  %v569_v15 = vld [vmem:[#allocation2 + $0xd9] sm:$0xff]  ;;  %14415 = vst [vmem:[#allocation42_spill] sm:$0xff] %v10709_v43  ;;  %324 = vst.msk [vmem:[#allocation2 + $0x151] sm:$0xff] %vm255_vm0, %v10709_v43 }
 0x11d   : > { %1573 = vrot.lane.b32.xlu1 %v600_v54, %s9885_s17  ;;  %v1715_v14 = vsel %vm1708_vm5, %v1682_v23, %v10514_v60 }
 0x11e   : > { %v1306_v33 = vpop.permute.xlu0 %1305  ;;  %v1748_v12 = vsel %vm1741_vm6, %v1715_v14, %v10536_v16 }
 0x11f   : > { %v1432_v62 = vpop.permute.xlu1 %1431  ;;  %v1781_v19 = vsel %vm1774_vm7, %v1748_v12, %v1176_v0  ;;  %v1650_v12 = vsel %vm255_vm0, %v10232_v45, %v10497_v5 }
 0x120   : > { %685 = vrot.lane.b32.xlu0 %v568_v6, %s9879_s11  ;;  %v1814_v38 = vsel %vm1807_vm8, %v1781_v19, %v1304_v42  ;;  %v1683_v0 = vsel %vm1675_vm3, %v1650_v12, %v10512_v28 }
 0x121   : > { %811 = vrot.lane.b32.xlu1 %v599_v18, %s9878_s10  ;;  %v1847_v60 = vsel %vm1840_vm9, %v1814_v38, %v1432_v62  ;;  %v10659_v62 = vld [vmem:[#allocation2 + $0xe0] sm:$0xff]  ;;  %v1716_v23 = vsel %vm1708_vm5, %v1683_v0, %v10534_v20 }
 0x122   : > { %v10630_v11 = vpop.permute.xlu0 %925  ;;  %v1749_v5 = vsel %vm1741_vm6, %v1716_v23, %v10569_v24  ;;  %v570_v0 = vld [vmem:[#allocation2 + $0xe1] sm:$0xff] }
 0x123   : > { %v10632_v22 = vpop.permute.xlu1 %1051  ;;  %v1782_v28 = vsel %vm1774_vm7, %v1749_v5, %v1178_v34 }
 0x124   : > { %1193 = vrot.lane.b32.xlu0 %v600_v54, %s9882_s14  ;;  %v1815_v38 = vsel %vm1807_vm8, %v1782_v28, %v1306_v33 }
 0x125   : > { %1319 = vrot.lane.b32.xlu1 %v10626_v13, %s9883_s15 }
 0x126   : > { %v1434_v6 = vpop.permute.xlu0 %1433 }
 0x127   : > { %v1560_v18 = vpop.permute.xlu1 %1559 }
 0x128   : > { %v1880_v14 = vsel %vm1873_vm10, %v1847_v60, %v1560_v18  ;;  %813 = vrot.lane.b32.xlu0 %v600_v54, %s9878_s10  ;;  %v1848_v60 = vsel %vm1840_vm9, %v1815_v38, %v1434_v6  ;;  %v601_v6 = vld [vmem:[#allocation2 + $0xda] sm:$0xff] }
 0x129   : > { %v1938_v16 = vsel %vm1918_vm11, %v1880_v14, 0  ;;  %939 = vrot.lane.b32.xlu1 %v10626_v13, %s9880_s12 }
 0x12a   : > { %v10657_v42 = vand.u32 4294901760, %v1938_v16  ;;  %v10663_v19 = vpop.permute.xlu0 %671 }
 0x12b   : > { %v10665_v45 = vpop.permute.xlu1 %1053 }
 0x12c   : > { %v10670_v54 = vsub.f32 %v1938_v16, %v10657_v42  ;;  %1321 = vrot.lane.b32.xlu0 %v10659_v62, %s9883_s15 }
 0x12d   : > { %1447 = vrot.lane.b32.xlu1 %v569_v15, %s9884_s16 }
 0x12e   : > { %14413 = vst [vmem:[#allocation40_spill] sm:$0xff] %v10670_v54  ;;  %v14082_v20 = vand.u32 4294901760, %v10670_v54  ;;  %v1180_v18 = vpop.permute.xlu0 %1179 }
 0x12f   : > { %v1562_v14 = vpop.permute.xlu1 %1561 }
 0x130   : > { %v1881_v24 = vsel %vm1873_vm10, %v1848_v60, %v1562_v14  ;;  %v2152_v12 = vsub.f32 %v10670_v54, %v14082_v20  ;;  %941 = vrot.lane.b32.xlu0 %v10659_v62, %s9880_s12 }
 0x131   : > { %v1941_v34 = vsel %vm1918_vm11, %v1881_v24, 0  ;;  %1067 = vrot.lane.b32.xlu1 %v569_v15, %s9881_s13 }
 0x132   : > { %v10687_v33 = vand.u32 4294901760, %v1941_v34  ;;  %v2153_v16 = vand.u32 4294901760, %v2152_v12  ;;  %v10689_v23 = vpop.permute.xlu0 %673 }
 0x133   : > { %v10691_v5 = vpop.permute.xlu1 %799 }
 0x134   : > { %v10694_v28 = vsub.f32 %v1941_v34, %v10687_v33  ;;  %8448 = vmatprep.mubr.f32.mxu0 %v2153_v16  ;;  %1449 = vrot.lane.b32.xlu0 %v570_v0, %s9884_s16  ;;  %v602_v34 = vld [vmem:[#allocation2 + $0xe2] sm:$0xff] }
 0x135   : > { %1575 = vrot.lane.b32.xlu1 %v601_v6, %s9885_s17 }
 0x136   : > { %14414 = vst [vmem:[#allocation41_spill] sm:$0xff] %v10694_v28  ;;  %v14084_v38 = vand.u32 4294901760, %v10694_v28  ;;  %v1182_v60 = vpop.permute.xlu0 %1181 }
 0x137   : > { %v1308_v14 = vpop.permute.xlu1 %1307 }
 0x138   : > { %v2162_v24 = vsub.f32 %v10694_v28, %v14084_v38  ;;  %687 = vrot.lane.b32.xlu0 %v569_v15, %s9879_s11 }
 0x139   : > { %1069 = vrot.lane.b32.xlu1 %v570_v0, %s9881_s13 }
 0x13a   : > { %v2163_v12 = vand.u32 4294901760, %v2162_v24  ;;  %v10704_v20 = vpop.permute.xlu0 %801  ;;  %v1651_v24 = vsel %vm255_vm0, %v10253_v51, %v10567_v55  ;;  %v10733_v51 = vld [vmem:[%s10059_s9 + $0xd8] sm:$0xff] }
 0x13b   : > { %v10706_v16 = vpop.permute.xlu1 %927  ;;  %14416 = vst [vmem:[#allocation43_spill] sm:$0xff] %v10733_v51  ;;  %325 = vst.msk [vmem:[#allocation2 + $0x159] sm:$0xff] %vm255_vm0, %v10733_v51  ;;  %v10805_v51 = vld [vmem:[%s10059_s9 + $0xe0] sm:$0xff] }
 0x13c   : > { %8449 = vmatmul.mubr.f32.gmra.mrb[6].mxu0 %v2163_v12  ;;  %1195 = vrot.lane.b32.xlu0 %v601_v6, %s9882_s14  ;;  %v1684_v12 = vsel %vm1675_vm3, %v1651_v24, %v10595_v48  ;;  %v571_v24 = vld [vmem:[#allocation2 + $0xf1] sm:$0xff]  ;;  %14419 = vst [vmem:[#allocation46_spill] sm:$0xff] %v10805_v51  ;;  %326 = vst.msk [vmem:[#allocation2 + $0x169] sm:$0xff] %vm255_vm0, %v10805_v51 }
 0x13d   : > { %1577 = vrot.lane.b32.xlu1 %v602_v34, %s9885_s17  ;;  %v1717_v10 = vsel %vm1708_vm5, %v1684_v12, %v10610_v56 }
 0x13e   : > { %v1310_v15 = vpop.permute.xlu0 %1309  ;;  %v1750_v8 = vsel %vm1741_vm6, %v1717_v10, %v10632_v22 }
 0x13f   : > { %v1436_v38 = vpop.permute.xlu1 %1435  ;;  %v1783_v55 = vsel %vm1774_vm7, %v1750_v8, %v1180_v18  ;;  %v1652_v8 = vsel %vm255_vm0, %v10266_v53, %v10593_v50 }
 0x140   : > { %689 = vrot.lane.b32.xlu0 %v570_v0, %s9879_s11  ;;  %v1816_v48 = vsel %vm1807_vm8, %v1783_v55, %v1308_v14  ;;  %v1685_v18 = vsel %vm1675_vm3, %v1652_v8, %v10608_v52 }
 0x141   : > { %815 = vrot.lane.b32.xlu1 %v601_v6, %s9878_s10  ;;  %v1849_v56 = vsel %vm1840_vm9, %v1816_v48, %v1436_v38  ;;  %v10755_v38 = vld [vmem:[#allocation2 + $0xf8] sm:$0xff]  ;;  %v1718_v12 = vsel %vm1708_vm5, %v1685_v18, %v10630_v11 }
 0x142   : > { %v10726_v3 = vpop.permute.xlu0 %929  ;;  %v1751_v50 = vsel %vm1741_vm6, %v1718_v12, %v10665_v45  ;;  %v572_v18 = vld [vmem:[#allocation2 + $0xf9] sm:$0xff] }
 0x143   : > { %v10728_v43 = vpop.permute.xlu1 %1055  ;;  %v1784_v52 = vsel %vm1774_vm7, %v1751_v50, %v1182_v60 }
 0x144   : > { %1197 = vrot.lane.b32.xlu0 %v602_v34, %s9882_s14  ;;  %v1817_v48 = vsel %vm1807_vm8, %v1784_v52, %v1310_v15 }
 0x145   : > { %1323 = vrot.lane.b32.xlu1 %v10722_v9, %s9883_s15 }
 0x146   : > { %v1438_v0 = vpop.permute.xlu0 %1437 }
 0x147   : > { %v1564_v6 = vpop.permute.xlu1 %1563 }
 0x148   : > { %v1882_v10 = vsel %vm1873_vm10, %v1849_v56, %v1564_v6  ;;  %817 = vrot.lane.b32.xlu0 %v602_v34, %s9878_s10  ;;  %v1850_v56 = vsel %vm1840_vm9, %v1817_v48, %v1438_v0  ;;  %v603_v0 = vld [vmem:[#allocation2 + $0xf2] sm:$0xff] }
 0x149   : > { %v1944_v22 = vsel %vm1918_vm11, %v1882_v10, 0  ;;  %943 = vrot.lane.b32.xlu1 %v10722_v9, %s9880_s12 }
 0x14a   : > { %v10753_v14 = vand.u32 4294901760, %v1944_v22  ;;  %v10759_v55 = vpop.permute.xlu0 %675 }
 0x14b   : > { %v10761_v53 = vpop.permute.xlu1 %1057 }
 0x14c   : > { %v10766_v34 = vsub.f32 %v1944_v22, %v10753_v14  ;;  %1325 = vrot.lane.b32.xlu0 %v10755_v38, %s9883_s15 }
 0x14d   : > { %1451 = vrot.lane.b32.xlu1 %v571_v24, %s9884_s16 }
 0x14e   : > { %14417 = vst [vmem:[#allocation44_spill] sm:$0xff] %v10766_v34  ;;  %v14090_v11 = vand.u32 4294901760, %v10766_v34  ;;  %v1184_v6 = vpop.permute.xlu0 %1183 }
 0x14f   : > { %v1566_v10 = vpop.permute.xlu1 %1565 }
 0x150   : > { %v1883_v45 = vsel %vm1873_vm10, %v1850_v56, %v1566_v10  ;;  %v2172_v8 = vsub.f32 %v10766_v34, %v14090_v11  ;;  %945 = vrot.lane.b32.xlu0 %v10755_v38, %s9880_s12 }
 0x151   : > { %v1947_v60 = vsel %vm1918_vm11, %v1883_v45, 0  ;;  %1071 = vrot.lane.b32.xlu1 %v571_v24, %s9881_s13 }
 0x152   : > { %v10783_v15 = vand.u32 4294901760, %v1947_v60  ;;  %v2173_v22 = vand.u32 4294901760, %v2172_v8  ;;  %v10785_v12 = vpop.permute.xlu0 %677 }
 0x153   : > { %v10787_v50 = vpop.permute.xlu1 %803 }
 0x154   : > { %v10790_v52 = vsub.f32 %v1947_v60, %v10783_v15  ;;  %8451 = vmatprep.mubr.f32.mxu0 %v2173_v22  ;;  %1453 = vrot.lane.b32.xlu0 %v572_v18, %s9884_s16  ;;  %v604_v60 = vld [vmem:[#allocation2 + $0xfa] sm:$0xff] }
 0x155   : > { %1579 = vrot.lane.b32.xlu1 %v603_v0, %s9885_s17 }
 0x156   : > { %14418 = vst [vmem:[#allocation45_spill] sm:$0xff] %v10790_v52  ;;  %v14092_v48 = vand.u32 4294901760, %v10790_v52  ;;  %v1186_v56 = vpop.permute.xlu0 %1185 }
 0x157   : > { %v1312_v10 = vpop.permute.xlu1 %1311 }
 0x158   : > { %v2182_v45 = vsub.f32 %v10790_v52, %v14092_v48  ;;  %691 = vrot.lane.b32.xlu0 %v571_v24, %s9879_s11  ;;  %v10818_v52 = vld [vmem:[#allocation2 + $0x108] sm:$0xff] }
 0x159   : > { %1073 = vrot.lane.b32.xlu1 %v572_v18, %s9881_s13 }
 0x15a   : > { %v2183_v8 = vand.u32 4294901760, %v2182_v45  ;;  %v10800_v11 = vpop.permute.xlu0 %805  ;;  %v1653_v45 = vsel %vm255_vm0, %v10287_v61, %v10663_v19  ;;  %v10829_v61 = vld [vmem:[%s10059_s9 + $0xe8] sm:$0xff] }
 0x15b   : > { %v10802_v22 = vpop.permute.xlu1 %931  ;;  %14420 = vst [vmem:[#allocation47_spill] sm:$0xff] %v10829_v61  ;;  %327 = vst.msk [vmem:[#allocation2 + $0x171] sm:$0xff] %vm255_vm0, %v10829_v61  ;;  %v10901_v61 = vld [vmem:[%s10059_s9 + $0xf0] sm:$0xff] }
 0x15c   : > { %8452 = vmatmul.mubr.f32.gmra.mrb[8].mxu0 %v2183_v8  ;;  %1199 = vrot.lane.b32.xlu0 %v603_v0, %s9882_s14  ;;  %v1686_v8 = vsel %vm1675_vm3, %v1653_v45, %v10691_v5  ;;  %v573_v45 = vld [vmem:[#allocation2 + $0x109] sm:$0xff]  ;;  %14423 = vst [vmem:[#allocation50_spill] sm:$0xff] %v10901_v61  ;;  %328 = vst.msk [vmem:[#allocation2 + $0x181] sm:$0xff] %vm255_vm0, %v10901_v61 }
 0x15d   : > { %1581 = vrot.lane.b32.xlu1 %v604_v60, %s9885_s17  ;;  %v1719_v34 = vsel %vm1708_vm5, %v1686_v8, %v10706_v16 }
 0x15e   : > { %v1314_v24 = vpop.permute.xlu0 %1313  ;;  %v1752_v54 = vsel %vm1741_vm6, %v1719_v34, %v10728_v43 }
 0x15f   : > { %v1440_v48 = vpop.permute.xlu1 %1439  ;;  %v1785_v19 = vsel %vm1774_vm7, %v1752_v54, %v1184_v6  ;;  %v1654_v54 = vsel %vm255_vm0, %v10306_v7, %v10689_v23 }
 0x160   : > { %693 = vrot.lane.b32.xlu0 %v572_v18, %s9879_s11  ;;  %v1818_v5 = vsel %vm1807_vm8, %v1785_v19, %v1312_v10  ;;  %v1687_v6 = vsel %vm1675_vm3, %v1654_v54, %v10704_v20 }
 0x161   : > { %819 = vrot.lane.b32.xlu1 %v603_v0, %s9878_s10  ;;  %v1851_v16 = vsel %vm1840_vm9, %v1818_v5, %v1440_v48  ;;  %v10851_v48 = vld [vmem:[#allocation2 + $0x110] sm:$0xff]  ;;  %v1720_v8 = vsel %vm1708_vm5, %v1687_v6, %v10726_v3 }
 0x162   : > { %v10822_v28 = vpop.permute.xlu0 %933  ;;  %v1753_v23 = vsel %vm1741_vm6, %v1720_v8, %v10761_v53  ;;  %v574_v6 = vld [vmem:[#allocation2 + $0x111] sm:$0xff] }
 0x163   : > { %v10824_v51 = vpop.permute.xlu1 %1059  ;;  %v1786_v20 = vsel %vm1774_vm7, %v1753_v23, %v1186_v56 }
 0x164   : > { %1201 = vrot.lane.b32.xlu0 %v604_v60, %s9882_s14  ;;  %v1819_v5 = vsel %vm1807_vm8, %v1786_v20, %v1314_v24 }
 0x165   : > { %1327 = vrot.lane.b32.xlu1 %v10818_v52, %s9883_s15 }
 0x166   : > { %v1442_v18 = vpop.permute.xlu0 %1441 }
 0x167   : > { %v1568_v0 = vpop.permute.xlu1 %1567 }
 0x168   : > { %v1884_v43 = vsel %vm1873_vm10, %v1851_v16, %v1568_v0  ;;  %821 = vrot.lane.b32.xlu0 %v604_v60, %s9878_s10  ;;  %v1852_v16 = vsel %vm1840_vm9, %v1819_v5, %v1442_v18  ;;  %v605_v18 = vld [vmem:[#allocation2 + $0x10a] sm:$0xff] }
 0x169   : > { %v1950_v34 = vsel %vm1918_vm11, %v1884_v43, 0  ;;  %947 = vrot.lane.b32.xlu1 %v10818_v52, %s9880_s12 }
 0x16a   : > { %v10849_v10 = vand.u32 4294901760, %v1950_v34  ;;  %v10855_v19 = vpop.permute.xlu0 %679 }
 0x16b   : > { %v10857_v7 = vpop.permute.xlu1 %1061 }
 0x16c   : > { %v10862_v60 = vsub.f32 %v1950_v34, %v10849_v10  ;;  %1329 = vrot.lane.b32.xlu0 %v10851_v48, %s9883_s15 }
 0x16d   : > { %1455 = vrot.lane.b32.xlu1 %v573_v45, %s9884_s16 }
 0x16e   : > { %14421 = vst [vmem:[#allocation48_spill] sm:$0xff] %v10862_v60  ;;  %v14102_v3 = vand.u32 4294901760, %v10862_v60  ;;  %v1188_v0 = vpop.permute.xlu0 %1187 }
 0x16f   : > { %v1570_v43 = vpop.permute.xlu1 %1569 }
 0x170   : > { %v1885_v53 = vsel %vm1873_vm10, %v1852_v16, %v1570_v43  ;;  %v2192_v54 = vsub.f32 %v10862_v60, %v14102_v3  ;;  %949 = vrot.lane.b32.xlu0 %v10851_v48, %s9880_s12 }
 0x171   : > { %v1953_v56 = vsel %vm1918_vm11, %v1885_v53, 0  ;;  %1075 = vrot.lane.b32.xlu1 %v573_v45, %s9881_s13 }
 0x172   : > { %v10879_v24 = vand.u32 4294901760, %v1953_v56  ;;  %v2193_v34 = vand.u32 4294901760, %v2192_v54  ;;  %v10881_v8 = vpop.permute.xlu0 %681 }
 0x173   : > { %v10883_v23 = vpop.permute.xlu1 %807 }
 0x174   : > { %v10886_v20 = vsub.f32 %v1953_v56, %v10879_v24  ;;  %8454 = vmatprep.mubr.f32.mxu0 %v2193_v34  ;;  %1457 = vrot.lane.b32.xlu0 %v574_v6, %s9884_s16  ;;  %v606_v56 = vld [vmem:[#allocation2 + $0x112] sm:$0xff] }
 0x175   : > { %1583 = vrot.lane.b32.xlu1 %v605_v18, %s9885_s17 }
 0x176   : > { %14422 = vst [vmem:[#allocation49_spill] sm:$0xff] %v10886_v20  ;;  %v14104_v5 = vand.u32 4294901760, %v10886_v20  ;;  %v1190_v16 = vpop.permute.xlu0 %1189 }
 0x177   : > { %v1316_v43 = vpop.permute.xlu1 %1315 }
 0x178   : > { %v2202_v53 = vsub.f32 %v10886_v20, %v14104_v5  ;;  %695 = vrot.lane.b32.xlu0 %v573_v45, %s9879_s11  ;;  %v10914_v20 = vld [vmem:[#allocation2 + $0x120] sm:$0xff] }
 0x179   : > { %1077 = vrot.lane.b32.xlu1 %v574_v6, %s9881_s13 }
 0x17a   : > { %v2203_v54 = vand.u32 4294901760, %v2202_v53  ;;  %v10896_v3 = vpop.permute.xlu0 %809  ;;  %v1655_v53 = vsel %vm255_vm0, %v10341_v35, %v10759_v55  ;;  %v10925_v35 = vld [vmem:[%s10059_s9 + $0xf8] sm:$0xff]  ;;  %s9888_s9 = smov 64  }
 0x17b   : > { %v10898_v34 = vpop.permute.xlu1 %935  ;;  %14424 = vst [vmem:[#allocation51_spill] sm:$0xff] %v10925_v35  ;;  %329 = vst.msk [vmem:[#allocation2 + $0x189] sm:$0xff] %vm255_vm0, %v10925_v35 }
 0x17c   : > { %8455 = vmatmul.mubr.f32.gmra.mrb[10].mxu0 %v2203_v54  ;;  %1203 = vrot.lane.b32.xlu0 %v605_v18, %s9882_s14  ;;  %v1688_v54 = vsel %vm1675_vm3, %v1655_v53, %v10787_v50  ;;  %v575_v53 = vld [vmem:[#allocation2 + $0x121] sm:$0xff] }
 0x17d   : > { %1585 = vrot.lane.b32.xlu1 %v606_v56, %s9885_s17  ;;  %v1721_v60 = vsel %vm1708_vm5, %v1688_v54, %v10802_v22 }
 0x17e   : > { %v1318_v45 = vpop.permute.xlu0 %1317  ;;  %v1754_v1 = vsel %vm1741_vm6, %v1721_v60, %v10824_v51 }
 0x17f   : > { %v1444_v5 = vpop.permute.xlu1 %1443  ;;  %v1787_v55 = vsel %vm1774_vm7, %v1754_v1, %v1188_v0  ;;  %v1656_v1 = vsel %vm255_vm0, %v10371_v57, %v10785_v12 }
 0x180   : > { %697 = vrot.lane.b32.xlu0 %v574_v6, %s9879_s11  ;;  %v1820_v50 = vsel %vm1807_vm8, %v1787_v55, %v1316_v43  ;;  %v1689_v0 = vsel %vm1675_vm3, %v1656_v1, %v10800_v11 }
 0x181   : > { %823 = vrot.lane.b32.xlu1 %v605_v18, %s9878_s10  ;;  %v1853_v22 = vsel %vm1840_vm9, %v1820_v50, %v1444_v5  ;;  %v10947_v5 = vld [vmem:[#allocation2 + $0x128] sm:$0xff]  ;;  %v1722_v54 = vsel %vm1708_vm5, %v1689_v0, %v10822_v28 }
 0x182   : > { %v10918_v2 = vpop.permute.xlu0 %937  ;;  %v1755_v12 = vsel %vm1741_vm6, %v1722_v54, %v10857_v7  ;;  %v576_v0 = vld [vmem:[#allocation2 + $0x129] sm:$0xff] }
 0x183   : > { %v10920_v61 = vpop.permute.xlu1 %1063  ;;  %v1788_v11 = vsel %vm1774_vm7, %v1755_v12, %v1190_v16 }
 0x184   : > { %1205 = vrot.lane.b32.xlu0 %v606_v56, %s9882_s14  ;;  %v1821_v50 = vsel %vm1807_vm8, %v1788_v11, %v1318_v45 }
 0x185   : > { %1331 = vrot.lane.b32.xlu1 %v10914_v20, %s9883_s15 }
 0x186   : > { %v1446_v6 = vpop.permute.xlu0 %1445 }
 0x187   : > { %v1572_v18 = vpop.permute.xlu1 %1571 }
 0x188   : > { %v1886_v51 = vsel %vm1873_vm10, %v1853_v22, %v1572_v18  ;;  %825 = vrot.lane.b32.xlu0 %v606_v56, %s9878_s10  ;;  %v1854_v22 = vsel %vm1840_vm9, %v1821_v50, %v1446_v6  ;;  %v607_v6 = vld [vmem:[#allocation2 + $0x122] sm:$0xff] }
 0x189   : > { %v1956_v60 = vsel %vm1918_vm11, %v1886_v51, 0  ;;  %951 = vrot.lane.b32.xlu1 %v10914_v20, %s9880_s12 }
 0x18a   : > { %v10945_v43 = vand.u32 4294901760, %v1956_v60  ;;  %v10951_v55 = vpop.permute.xlu0 %683 }
 0x18b   : > { %v10953_v57 = vpop.permute.xlu1 %1065 }
 0x18c   : > { %v10958_v56 = vsub.f32 %v1956_v60, %v10945_v43  ;;  %1333 = vrot.lane.b32.xlu0 %v10947_v5, %s9883_s15 }
 0x18d   : > { %1459 = vrot.lane.b32.xlu1 %v575_v53, %s9884_s16 }
 0x18e   : > { %14425 = vst [vmem:[#allocation52_spill] sm:$0xff] %v10958_v56  ;;  %v14114_v28 = vand.u32 4294901760, %v10958_v56  ;;  %v1192_v18 = vpop.permute.xlu0 %1191 }
 0x18f   : > { %v1574_v51 = vpop.permute.xlu1 %1573 }
 0x190   : > { %v1887_v7 = vsel %vm1873_vm10, %v1854_v22, %v1574_v51  ;;  %v2212_v1 = vsub.f32 %v10958_v56, %v14114_v28  ;;  %953 = vrot.lane.b32.xlu0 %v10947_v5, %s9880_s12 }
 0x191   : > { %v1959_v16 = vsel %vm1918_vm11, %v1887_v7, 0  ;;  %1079 = vrot.lane.b32.xlu1 %v575_v53, %s9881_s13 }
 0x192   : > { %v10975_v45 = vand.u32 4294901760, %v1959_v16  ;;  %v2213_v60 = vand.u32 4294901760, %v2212_v1  ;;  %v10977_v54 = vpop.permute.xlu0 %685 }
 0x193   : > { %v10979_v12 = vpop.permute.xlu1 %811 }
 0x194   : > { %v10982_v11 = vsub.f32 %v1959_v16, %v10975_v45  ;;  %8457 = vmatprep.mubr.f32.mxu0 %v2213_v60  ;;  %1461 = vrot.lane.b32.xlu0 %v576_v0, %s9884_s16  ;;  %v608_v16 = vld [vmem:[#allocation2 + $0x12a] sm:$0xff] }
 0x195   : > { %1587 = vrot.lane.b32.xlu1 %v607_v6, %s9885_s17 }
 0x196   : > { %14426 = vst [vmem:[#allocation53_spill] sm:$0xff] %v10982_v11  ;;  %v14118_v50 = vand.u32 4294901760, %v10982_v11  ;;  %v1194_v22 = vpop.permute.xlu0 %1193 }
 0x197   : > { %v1320_v51 = vpop.permute.xlu1 %1319 }
 0x198   : > { %v2222_v7 = vsub.f32 %v10982_v11, %v14118_v50  ;;  %699 = vrot.lane.b32.xlu0 %v575_v53, %s9879_s11  ;;  %v1657_v50 = vsel %vm255_vm0, %v10434_v4, %v10855_v19 }
 0x199   : > { %1081 = vrot.lane.b32.xlu1 %v576_v0, %s9881_s13  ;;  %v1690_v53 = vsel %vm1675_vm3, %v1657_v50, %v10883_v23  ;;  %v1658_v50 = vsel %vm255_vm0, %v10467_v59, %v10881_v8 }
 0x19a   : > { %v2223_v1 = vand.u32 4294901760, %v2222_v7  ;;  %v10992_v28 = vpop.permute.xlu0 %813  ;;  %v11005_v7 = vld [vmem:[#allocation2 + $0x138] sm:$0xff] }
 0x19b   : > { %v10994_v60 = vpop.permute.xlu1 %939 }
 0x19c   : > { %8458 = vmatmul.mubr.f32.gmra.mrb[12].mxu0 %v2223_v1  ;;  %1207 = vrot.lane.b32.xlu0 %v607_v6, %s9882_s14  ;;  %v1723_v1 = vsel %vm1708_vm5, %v1690_v53, %v10898_v34 }
 0x19d   : > { %1589 = vrot.lane.b32.xlu1 %v608_v16, %s9885_s17  ;;  %v1756_v37 = vsel %vm1741_vm6, %v1723_v1, %v10920_v61 }
 0x19e   : > { %v1322_v35 = vpop.permute.xlu0 %1321  ;;  %v1789_v4 = vsel %vm1774_vm7, %v1756_v37, %v1192_v18  ;;  %v1691_v37 = vsel %vm1675_vm3, %v1658_v50, %v10896_v3 }
 0x19f   : > { %v1448_v56 = vpop.permute.xlu1 %1447  ;;  %v1822_v19 = vsel %vm1807_vm8, %v1789_v4, %v1320_v51  ;;  %v577_v51 = vld [vmem:[#allocation2 + $0x139] sm:$0xff]  ;;  %v1724_v53 = vsel %vm1708_vm5, %v1691_v37, %v10918_v2 }
 0x1a0   : > { %701 = vrot.lane.b32.xlu0 %v576_v0, %s9879_s11  ;;  %v1855_v23 = vsel %vm1840_vm9, %v1822_v19, %v1448_v56  ;;  %v11033_v56 = vld [vmem:[#allocation2 + $0x140] sm:$0xff]  ;;  %v1757_v8 = vsel %vm1741_vm6, %v1724_v53, %v10953_v57 }
 0x1a1   : > { %827 = vrot.lane.b32.xlu1 %v607_v6, %s9878_s10  ;;  %v1790_v3 = vsel %vm1774_vm7, %v1757_v8, %v1194_v22 }
 0x1a2   : > { %v11009_v11 = vpop.permute.xlu0 %941  ;;  %v1823_v4 = vsel %vm1807_vm8, %v1790_v3, %v1322_v35 }
 0x1a3   : > { %v11011_v49 = vpop.permute.xlu1 %1067 }
 0x1a4   : > { %1209 = vrot.lane.b32.xlu0 %v608_v16, %s9882_s14 }
 0x1a5   : > { %1335 = vrot.lane.b32.xlu1 %v11005_v7, %s9883_s15 }
 0x1a6   : > { %v1450_v0 = vpop.permute.xlu0 %1449 }
 0x1a7   : > { %v1576_v34 = vpop.permute.xlu1 %1575  ;;  %v1856_v19 = vsel %vm1840_vm9, %v1823_v4, %v1450_v0  ;;  %v609_v0 = vld [vmem:[#allocation2 + $0x13a] sm:$0xff] }
 0x1a8   : > { %v1888_v6 = vsel %vm1873_vm10, %v1855_v23, %v1576_v34  ;;  %829 = vrot.lane.b32.xlu0 %v608_v16, %s9878_s10 }
 0x1a9   : > { %v1962_v61 = vsel %vm1918_vm11, %v1888_v6, 0  ;;  %955 = vrot.lane.b32.xlu1 %v11005_v7, %s9880_s12 }
 0x1aa   : > { %v11031_v18 = vand.u32 4294901760, %v1962_v61  ;;  %v11037_v1 = vpop.permute.xlu0 %687 }
 0x1ab   : > { %v11039_v59 = vpop.permute.xlu1 %1069 }
 0x1ac   : > { %v11044_v16 = vsub.f32 %v1962_v61, %v11031_v18  ;;  %1337 = vrot.lane.b32.xlu0 %v11033_v56, %s9883_s15  ;;  %v578_v61 = vld [vmem:[#allocation2 + $0x141] sm:$0xff] }
 0x1ad   : > { %1463 = vrot.lane.b32.xlu1 %v577_v51, %s9884_s16 }
 0x1ae   : > { %14427 = vst [vmem:[#allocation54_spill] sm:$0xff] %v11044_v16  ;;  %v14125_v2 = vand.u32 4294901760, %v11044_v16  ;;  %v1196_v23 = vpop.permute.xlu0 %1195 }
 0x1af   : > { %v1578_v34 = vpop.permute.xlu1 %1577 }
 0x1b0   : > { %v1889_v57 = vsel %vm1873_vm10, %v1856_v19, %v1578_v34  ;;  %v2232_v6 = vsub.f32 %v11044_v16, %v14125_v2  ;;  %957 = vrot.lane.b32.xlu0 %v11033_v56, %s9880_s12 }
 0x1b1   : > { %v1965_v22 = vsel %vm1918_vm11, %v1889_v57, 0  ;;  %1083 = vrot.lane.b32.xlu1 %v577_v51, %s9881_s13 }
 0x1b2   : > { %v11061_v35 = vand.u32 4294901760, %v1965_v22  ;;  %v2233_v50 = vand.u32 4294901760, %v2232_v6  ;;  %v11063_v37 = vpop.permute.xlu0 %689  ;;  %v610_v6 = vld [vmem:[#allocation2 + $0x142] sm:$0xff] }
 0x1b3   : > { %v11065_v53 = vpop.permute.xlu1 %815 }
 0x1b4   : > { %14428 = vst [vmem:[#allocation55_spill] sm:$0xff] %v11061_v35  ;;  %v11068_v8 = vsub.f32 %v1965_v22, %v11061_v35  ;;  %8460 = vmatprep.mubr.f32.mxu0 %v2233_v50  ;;  %1465 = vrot.lane.b32.xlu0 %v578_v61, %s9884_s16 }
 0x1b5   : > { %1591 = vrot.lane.b32.xlu1 %v609_v0, %s9885_s17 }
 0x1b6   : > { %14429 = vst [vmem:[#allocation56_spill] sm:$0xff] %v11068_v8  ;;  %v14128_v3 = vand.u32 4294901760, %v11068_v8  ;;  %v1198_v4 = vpop.permute.xlu0 %1197 }
 0x1b7   : > { %v1324_v19 = vpop.permute.xlu1 %1323 }
 0x1b8   : > { %v2242_v34 = vsub.f32 %v11068_v8, %v14128_v3  ;;  %703 = vrot.lane.b32.xlu0 %v577_v51, %s9879_s11  ;;  %v1659_v3 = vsel %vm255_vm0, %v10530_v44, %v10951_v55 }
 0x1b9   : > { %1085 = vrot.lane.b32.xlu1 %v578_v61, %s9881_s13  ;;  %v1692_v51 = vsel %vm1675_vm3, %v1659_v3, %v10979_v12  ;;  %v1660_v3 = vsel %vm255_vm0, %v10563_v41, %v10977_v54 }
 0x1ba   : > { %v2243_v57 = vand.u32 4294901760, %v2242_v34  ;;  %v11078_v22 = vpop.permute.xlu0 %817  ;;  %v11091_v34 = vld [vmem:[#allocation2 + $0x150] sm:$0xff] }
 0x1bb   : > { %v11080_v50 = vpop.permute.xlu1 %943 }
 0x1bc   : > { %8461 = vmatmul.mubr.f32.gmra.mrb[14].mxu0 %v2243_v57  ;;  %1211 = vrot.lane.b32.xlu0 %v609_v0, %s9882_s14  ;;  %v1725_v57 = vsel %vm1708_vm5, %v1692_v51, %v10994_v60 }
 0x1bd   : > { %1593 = vrot.lane.b32.xlu1 %v610_v6, %s9885_s17  ;;  %v1758_v29 = vsel %vm1741_vm6, %v1725_v57, %v11011_v49 }
 0x1be   : > { %v1326_v2 = vpop.permute.xlu0 %1325  ;;  %v1791_v44 = vsel %vm1774_vm7, %v1758_v29, %v1196_v23  ;;  %v1693_v29 = vsel %vm1675_vm3, %v1660_v3, %v10992_v28 }
 0x1bf   : > { %v1452_v16 = vpop.permute.xlu1 %1451  ;;  %v1824_v55 = vsel %vm1807_vm8, %v1791_v44, %v1324_v19  ;;  %v579_v19 = vld [vmem:[#allocation2 + $0x151] sm:$0xff]  ;;  %v1726_v51 = vsel %vm1708_vm5, %v1693_v29, %v11009_v11 }
 0x1c0   : > { %705 = vrot.lane.b32.xlu0 %v578_v61, %s9879_s11  ;;  %v1857_v12 = vsel %vm1840_vm9, %v1824_v55, %v1452_v16  ;;  %v11119_v16 = vld [vmem:[#allocation2 + $0x158] sm:$0xff]  ;;  %v1759_v54 = vsel %vm1741_vm6, %v1726_v51, %v11039_v59 }
 0x1c1   : > { %831 = vrot.lane.b32.xlu1 %v609_v0, %s9878_s10  ;;  %v1792_v28 = vsel %vm1774_vm7, %v1759_v54, %v1198_v4 }
 0x1c2   : > { %v11095_v8 = vpop.permute.xlu0 %945  ;;  %v1825_v44 = vsel %vm1807_vm8, %v1792_v28, %v1326_v2 }
 0x1c3   : > { %v11097_v46 = vpop.permute.xlu1 %1071 }
 0x1c4   : > { %1213 = vrot.lane.b32.xlu0 %v610_v6, %s9882_s14 }
 0x1c5   : > { %1339 = vrot.lane.b32.xlu1 %v11091_v34, %s9883_s15 }
 0x1c6   : > { %v1454_v61 = vpop.permute.xlu0 %1453 }
 0x1c7   : > { %v1580_v60 = vpop.permute.xlu1 %1579  ;;  %v1858_v55 = vsel %vm1840_vm9, %v1825_v44, %v1454_v61  ;;  %v611_v61 = vld [vmem:[#allocation2 + $0x152] sm:$0xff] }
 0x1c8   : > { %v1890_v0 = vsel %vm1873_vm10, %v1857_v12, %v1580_v60  ;;  %833 = vrot.lane.b32.xlu0 %v610_v6, %s9878_s10 }
 0x1c9   : > { %v1968_v49 = vsel %vm1918_vm11, %v1890_v0, 0  ;;  %959 = vrot.lane.b32.xlu1 %v11091_v34, %s9880_s12 }
 0x1ca   : > { %v11117_v23 = vand.u32 4294901760, %v1968_v49  ;;  %v11123_v57 = vpop.permute.xlu0 %691 }
 0x1cb   : > { %v11125_v41 = vpop.permute.xlu1 %1073 }
 0x1cc   : > { %14430 = vst [vmem:[#allocation57_spill] sm:$0xff] %v11117_v23  ;;  %v11130_v6 = vsub.f32 %v1968_v49, %v11117_v23  ;;  %1341 = vrot.lane.b32.xlu0 %v11119_v16, %s9883_s15  ;;  %v580_v49 = vld [vmem:[#allocation2 + $0x159] sm:$0xff] }
 0x1cd   : > { %1467 = vrot.lane.b32.xlu1 %v579_v19, %s9884_s16 }
 0x1ce   : > { %14431 = vst [vmem:[#allocation58_spill] sm:$0xff] %v11130_v6  ;;  %v14135_v11 = vand.u32 4294901760, %v11130_v6  ;;  %v1200_v12 = vpop.permute.xlu0 %1199 }
 0x1cf   : > { %v1582_v60 = vpop.permute.xlu1 %1581 }
 0x1d0   : > { %v1891_v59 = vsel %vm1873_vm10, %v1858_v55, %v1582_v60  ;;  %v2252_v0 = vsub.f32 %v11130_v6, %v14135_v11  ;;  %961 = vrot.lane.b32.xlu0 %v11119_v16, %s9880_s12 }
 0x1d1   : > { %v1971_v4 = vsel %vm1918_vm11, %v1891_v59, 0  ;;  %1087 = vrot.lane.b32.xlu1 %v579_v19, %s9881_s13 }
 0x1d2   : > { %v11147_v2 = vand.u32 4294901760, %v1971_v4  ;;  %v2253_v3 = vand.u32 4294901760, %v2252_v0  ;;  %v11149_v29 = vpop.permute.xlu0 %693  ;;  %v612_v0 = vld [vmem:[#allocation2 + $0x15a] sm:$0xff] }
 0x1d3   : > { %v11151_v51 = vpop.permute.xlu1 %819 }
 0x1d4   : > { %14432 = vst [vmem:[#allocation59_spill] sm:$0xff] %v11147_v2  ;;  %v11154_v54 = vsub.f32 %v1971_v4, %v11147_v2  ;;  %8463 = vmatprep.mubr.f32.mxu0 %v2253_v3  ;;  %1469 = vrot.lane.b32.xlu0 %v580_v49, %s9884_s16 }
 0x1d5   : > { %1595 = vrot.lane.b32.xlu1 %v611_v61, %s9885_s17 }
 0x1d6   : > { %14433 = vst [vmem:[#allocation60_spill] sm:$0xff] %v11154_v54  ;;  %v14138_v28 = vand.u32 4294901760, %v11154_v54  ;;  %v1202_v44 = vpop.permute.xlu0 %1201 }
 0x1d7   : > { %v1328_v55 = vpop.permute.xlu1 %1327 }
 0x1d8   : > { %v2262_v60 = vsub.f32 %v11154_v54, %v14138_v28  ;;  %707 = vrot.lane.b32.xlu0 %v579_v19, %s9879_s11  ;;  %v1661_v28 = vsel %vm255_vm0, %v10626_v13, %v11037_v1 }
 0x1d9   : > { %1089 = vrot.lane.b32.xlu1 %v580_v49, %s9881_s13  ;;  %v1694_v19 = vsel %vm1675_vm3, %v1661_v28, %v11065_v53  ;;  %v1662_v28 = vsel %vm255_vm0, %v10659_v62, %v11063_v37 }
 0x1da   : > { %v2263_v59 = vand.u32 4294901760, %v2262_v60  ;;  %v11164_v4 = vpop.permute.xlu0 %821  ;;  %v11177_v60 = vld [vmem:[#allocation2 + $0x168] sm:$0xff] }
 0x1db   : > { %v11166_v3 = vpop.permute.xlu1 %947 }
 0x1dc   : > { %8464 = vmatmul.mubr.f32.gmra.mrb[16].mxu0 %v2263_v59  ;;  %1215 = vrot.lane.b32.xlu0 %v611_v61, %s9882_s14  ;;  %v1727_v59 = vsel %vm1708_vm5, %v1694_v19, %v11080_v50 }
 0x1dd   : > { %1597 = vrot.lane.b32.xlu1 %v612_v0, %s9885_s17  ;;  %v1760_v2 = vsel %vm1741_vm6, %v1727_v59, %v11097_v46 }
 0x1de   : > { %v1330_v11 = vpop.permute.xlu0 %1329  ;;  %v1793_v13 = vsel %vm1774_vm7, %v1760_v2, %v1200_v12  ;;  %v1695_v12 = vsel %vm1675_vm3, %v1662_v28, %v11078_v22  ;;  %v9800_v22 = vld [vmem:[%s14044_s1] sm:$0xff] }
 0x1df   : > { %v1456_v6 = vpop.permute.xlu1 %1455  ;;  %v1826_v1 = vsel %vm1807_vm8, %v1793_v13, %v1328_v55  ;;  %v581_v55 = vld [vmem:[#allocation2 + $0x169] sm:$0xff]  ;;  %v1728_v19 = vsel %vm1708_vm5, %v1695_v12, %v11095_v8  ;;  %v14436_v13 = vand.u32 4294901760, %v10155_v26 }
 0x1e0   : > { %709 = vrot.lane.b32.xlu0 %v580_v49, %s9879_s11  ;;  %v1859_v53 = vsel %vm1840_vm9, %v1826_v1, %v1456_v6  ;;  %v11205_v6 = vld [vmem:[#allocation2 + $0x170] sm:$0xff]  ;;  %v1761_v37 = vsel %vm1741_vm6, %v1728_v19, %v11125_v41  ;;  %v9801_v41 = vld [vmem:[%s14044_s1 + $0x8] sm:$0xff] }
 0x1e1   : > { %835 = vrot.lane.b32.xlu1 %v611_v61, %s9878_s10  ;;  %v11223_v1 = vsub.f32 %v9800_v22, %v14436_v13  ;;  %v1794_v8 = vsel %vm1774_vm7, %v1761_v37, %v1202_v44 }
 0x1e2   : > { %v11181_v54 = vpop.permute.xlu0 %949 }
 0x1e3   : > { %v11183_v36 = vpop.permute.xlu1 %1075  ;;  %v14147_v28 = vand.u32 4294901760, %v11223_v1 }
 0x1e4   : > { %1217 = vrot.lane.b32.xlu0 %v612_v0, %s9882_s14 }
 0x1e5   : > { %1343 = vrot.lane.b32.xlu1 %v11177_v60, %s9883_s15 }
 0x1e6   : > { %v1458_v49 = vpop.permute.xlu0 %1457 }
 0x1e7   : > { %v1584_v50 = vpop.permute.xlu1 %1583 }
 0x1e8   : > { %v1892_v61 = vsel %vm1873_vm10, %v1859_v53, %v1584_v50  ;;  %837 = vrot.lane.b32.xlu0 %v612_v0, %s9878_s10  ;;  %v14437_v53 = vand.u32 4294901760, %v10160_v27 }
 0x1e9   : > { %v1974_v46 = vsel %vm1918_vm11, %v1892_v61, 0  ;;  %963 = vrot.lane.b32.xlu1 %v11177_v60, %s9880_s12  ;;  %v1827_v61 = vsel %vm1807_vm8, %v1794_v8, %v1330_v11  ;;  %v2413_v11 = vsub.f32 %v11223_v1, %v14147_v28 }
 0x1ea   : > { %v11203_v2 = vand.u32 4294901760, %v1974_v46  ;;  %v11209_v59 = vpop.permute.xlu0 %695  ;;  %v11234_v50 = vsub.f32 %v9801_v41, %v14437_v53  ;;  %v1860_v44 = vsel %vm1840_vm9, %v1827_v61, %v1458_v49  ;;  %v582_v41 = vld [vmem:[#allocation2 + $0x171] sm:$0xff] }
 0x1eb   : > { %v11211_v62 = vpop.permute.xlu1 %1077  ;;  %v613_v53 = vld [vmem:[#allocation2 + $0x16a] sm:$0xff]  ;;  %v2414_v61 = vand.u32 4294901760, %v2413_v11 }
 0x1ec   : > { %14434 = vst [vmem:[#allocation61_spill] sm:$0xff] %v11203_v2  ;;  %v11216_v0 = vsub.f32 %v1974_v46, %v11203_v2  ;;  %1345 = vrot.lane.b32.xlu0 %v11205_v6, %s9883_s15  ;;  %v14146_v19 = vand.u32 4294901760, %v11234_v50  ;;  %v1663_v2 = vsel %vm255_vm0, %v10722_v9, %v11123_v57 }
 0x1ed   : > { %1471 = vrot.lane.b32.xlu1 %v581_v55, %s9884_s16 }
 0x1ee   : > { %14435 = vst [vmem:[#allocation62_spill] sm:$0xff] %v11216_v0  ;;  %v14145_v26 = vand.u32 4294901760, %v11216_v0  ;;  %v1204_v46 = vpop.permute.xlu0 %1203  ;;  %v2420_v49 = vsub.f32 %v11234_v50, %v14146_v19 }
 0x1ef   : > { %v1586_v12 = vpop.permute.xlu1 %1585 }
 0x1f0   : > { %v1893_v37 = vsel %vm1873_vm10, %v1860_v44, %v1586_v12  ;;  %v2272_v27 = vsub.f32 %v11216_v0, %v14145_v26  ;;  %965 = vrot.lane.b32.xlu0 %v11205_v6, %s9880_s12 }
 0x1f1   : > { %v1977_v22 = vsel %vm1918_vm11, %v1893_v37, 0  ;;  %1091 = vrot.lane.b32.xlu1 %v581_v55, %s9881_s13  ;;  %v2421_v37 = vand.u32 4294901760, %v2420_v49  ;;  %v614_v49 = vld [vmem:[#allocation2 + $0x172] sm:$0xff] }
 0x1f2   : > { %v11255_v13 = vand.u32 4294901760, %v1977_v22  ;;  %v2273_v8 = vand.u32 4294901760, %v2272_v27  ;;  %v11257_v44 = vpop.permute.xlu0 %697 }
 0x1f3   : > { %v11259_v12 = vpop.permute.xlu1 %823  ;;  %v9193_v19 = vpack.c.bf16 %v2421_v37, %v2414_v61 }
 0x1f4   : > { %14438 = vst [vmem:[#allocation63_spill] sm:$0xff] %v11255_v13  ;;  %v11262_v26 = vsub.f32 %v1977_v22, %v11255_v13  ;;  %8466 = vmatprep.mubr.f32.mxu0 %v2273_v8  ;;  %1473 = vrot.lane.b32.xlu0 %v582_v41, %s9884_s16 }
 0x1f5   : > { %1599 = vrot.lane.b32.xlu1 %v613_v53, %s9885_s17  ;;  %9194 = vmatprep.subr.bf16.mxu0 %v9193_v19 }
 0x1f6   : > { %14439 = vst [vmem:[#allocation64_spill] sm:$0xff] %v11262_v26  ;;  %v14152_v28 = vand.u32 4294901760, %v11262_v26  ;;  %v1206_v27 = vpop.permute.xlu0 %1205  ;;  %9196 = vmatpush3.bf16.msra.mxu0 %v9193_v19  ;;  %v9802_v19 = vld [vmem:[%s14044_s1 + $0x10] sm:$0xff] }
 0x1f7   : > { %v1332_v0 = vpop.permute.xlu1 %1331 }
 0x1f8   : > { %v2282_v11 = vsub.f32 %v11262_v26, %v14152_v28  ;;  %711 = vrot.lane.b32.xlu0 %v581_v55, %s9879_s11  ;;  %v14440_v55 = vand.u32 4294901760, %v10176_v31  ;;  %v1696_v31 = vsel %vm1675_vm3, %v1663_v2, %v11151_v51 }
 0x1f9   : > { %1093 = vrot.lane.b32.xlu1 %v582_v41, %s9881_s13 }
 0x1fa   : > { %v2283_v22 = vand.u32 4294901760, %v2282_v11  ;;  %v11272_v8 = vpop.permute.xlu0 %825  ;;  %v11283_v28 = vsub.f32 %v9802_v19, %v14440_v55  ;;  %v9803_v11 = vld [vmem:[%s14044_s1 + $0x18] sm:$0xff]  ;;  %v551_v19 = vld [vmem:[#allocation2 + $0x180] sm:$0xff] }
 0x1fb   : > { %v11274_v13 = vpop.permute.xlu1 %951 }
 0x1fc   : > { %8467 = vmatmul.mubr.f32.gmra.mrb[18].mxu0 %v2283_v22  ;;  %1219 = vrot.lane.b32.xlu0 %v613_v53, %s9882_s14  ;;  %14441 = vst [vmem:[#allocation65_spill] sm:$0xff] %v11283_v28  ;;  %v14442_v22 = vand.u32 4294901760, %v10181_v32  ;;  %v14159_v55 = vand.u32 4294901760, %v11283_v28  ;;  %v1729_v32 = vsel %vm1708_vm5, %v1696_v31, %v11166_v3 }
 0x1fd   : > { %1601 = vrot.lane.b32.xlu1 %v614_v49, %s9885_s17  ;;  %v1762_v9 = vsel %vm1741_vm6, %v1729_v32, %v11183_v36 }
 0x1fe   : > { %v1334_v61 = vpop.permute.xlu0 %1333  ;;  %v11290_v26 = vsub.f32 %v9803_v11, %v14442_v22  ;;  %v2427_v57 = vsub.f32 %v11283_v28, %v14159_v55  ;;  %v1795_v2 = vsel %vm1774_vm7, %v1762_v9, %v1204_v46 }
 0x1ff   : > { %v1460_v37 = vpop.permute.xlu1 %1459  ;;  %v1828_v3 = vsel %vm1807_vm8, %v1795_v2, %v1332_v0 }
 0x200   : > { %14443 = vst [vmem:[#allocation66_spill] sm:$0xff] %v11290_v26  ;;  %713 = vrot.lane.b32.xlu0 %v582_v41, %s9879_s11  ;;  %v14162_v23 = vand.u32 4294901760, %v11290_v26  ;;  %v2428_v41 = vand.u32 4294901760, %v2427_v57  ;;  %v1861_v36 = vsel %vm1840_vm9, %v1828_v3, %v1460_v37  ;;  %v552_v37 = vld [vmem:[#allocation2 + $0x188] sm:$0xff]  ;;  %s9886_s11 = smov 72  }
 0x201   : > { %839 = vrot.lane.b32.xlu1 %v613_v53, %s9878_s10  ;;  %v583_v57 = vld [vmem:[#allocation2 + $0x181] sm:$0xff] }
 0x202   : > { %v11303_v11 = vpop.permute.xlu0 %953  ;;  %v2434_v51 = vsub.f32 %v11290_v26, %v14162_v23  ;;  %v1664_v23 = vsel %vm255_vm0, %v10755_v38, %v11149_v29 }
 0x203   : > { %v11305_v22 = vpop.permute.xlu1 %1079  ;;  %v1697_v0 = vsel %vm1675_vm3, %v1664_v23, %v11164_v4 }
 0x204   : > { %1221 = vrot.lane.b32.xlu0 %v614_v49, %s9882_s14  ;;  %v2435_v53 = vand.u32 4294901760, %v2434_v51  ;;  %v1730_v51 = vsel %vm1708_vm5, %v1697_v0, %v11181_v54 }
 0x205   : > { %1347 = vrot.lane.b32.xlu1 %v551_v19, %s9883_s15  ;;  %v1763_v29 = vsel %vm1741_vm6, %v1730_v51, %v11211_v62 }
 0x206   : > { %v1462_v31 = vpop.permute.xlu0 %1461  ;;  %v9197_v35 = vpack.c.bf16 %v2435_v53, %v2428_v41  ;;  %v1796_v23 = vsel %vm1774_vm7, %v1763_v29, %v1206_v27  ;;  %v584_v53 = vld [vmem:[#allocation2 + $0x189] sm:$0xff]  ;;  %v11372_v29 = vsub.f32 %v10201_v39, %v10204_v40  ;;  %v553_v39 = vld [vmem:[#allocation2 + $0x198] sm:$0xff] }
 0x207   : > { %v1588_v32 = vpop.permute.xlu1 %1587  ;;  %v1829_v4 = vsel %vm1807_vm8, %v1796_v23, %v1334_v61 }
 0x208   : > { %v1894_v55 = vsel %vm1873_vm10, %v1861_v36, %v1588_v32  ;;  %841 = vrot.lane.b32.xlu0 %v614_v49, %s9878_s10  ;;  %9198 = vmatprep.subr.bf16.mxu0 %v9197_v35  ;;  %v615_v36 = vld [vmem:[#allocation2 + $0x182] sm:$0xff] }
 0x209   : > { %v1980_v46 = vsel %vm1918_vm11, %v1894_v55, 0  ;;  %967 = vrot.lane.b32.xlu1 %v551_v19, %s9880_s12  ;;  %9200 = vmatpush3.bf16.msra.mxu0 %v9197_v35  ;;  %v1862_v19 = vsel %vm1840_vm9, %v1829_v4, %v1462_v31  ;;  %v616_v4 = vld [vmem:[#allocation2 + $0x18a] sm:$0xff] }
 0x20a   : > { %v11329_v9 = vand.u32 4294901760, %v1980_v46  ;;  %v11333_v2 = vpop.permute.xlu0 %699 }
 0x20b   : > { %v11335_v38 = vpop.permute.xlu1 %1081 }
 0x20c   : > { %14444 = vst [vmem:[#allocation67_spill] sm:$0xff] %v11329_v9  ;;  %v11340_v49 = vsub.f32 %v1980_v46, %v11329_v9  ;;  %1349 = vrot.lane.b32.xlu0 %v552_v37, %s9883_s15 }
 0x20d   : > { %1475 = vrot.lane.b32.xlu1 %v583_v57, %s9884_s16 }
 0x20e   : > { %14445 = vst [vmem:[#allocation68_spill] sm:$0xff] %v11340_v49  ;;  %v14164_v54 = vand.u32 4294901760, %v11340_v49  ;;  %v1208_v55 = vpop.permute.xlu0 %1207 }
 0x20f   : > { %v1590_v35 = vpop.permute.xlu1 %1589 }
 0x210   : > { %v1895_v3 = vsel %vm1873_vm10, %v1862_v19, %v1590_v35  ;;  %v2292_v62 = vsub.f32 %v11340_v49, %v14164_v54  ;;  %969 = vrot.lane.b32.xlu0 %v552_v37, %s9880_s12  ;;  %v11377_v19 = vand.u32 4294901760, %v11372_v29  ;;  %v586_v54 = vld [vmem:[#allocation2 + $0x1a1] sm:$0xff]  ;;  %s9891_s12 = smov [#allocation4]  }
 0x211   : > { %v1983_v27 = vsel %vm1918_vm11, %v1895_v3, 0  ;;  %1095 = vrot.lane.b32.xlu1 %v583_v57, %s9881_s13 }
 0x212   : > { %v11355_v41 = vand.u32 4294901760, %v1983_v27  ;;  %v2293_v61 = vand.u32 4294901760, %v2292_v62  ;;  %v11357_v31 = vpop.permute.xlu0 %701  ;;  %14448 = vst [vmem:[#allocation71_spill] sm:$0xff] %v11377_v19  ;;  %v2441_v62 = vsub.f32 %v11372_v29, %v11377_v19 }
 0x213   : > { %v11359_v32 = vpop.permute.xlu1 %827 }
 0x214   : > { %14446 = vst [vmem:[#allocation69_spill] sm:$0xff] %v11355_v41  ;;  %v11362_v46 = vsub.f32 %v1983_v27, %v11355_v41  ;;  %8469 = vmatprep.mubr.f32.mxu0 %v2293_v61  ;;  %1477 = vrot.lane.b32.xlu0 %v584_v53, %s9884_s16  ;;  %v554_v27 = vld [vmem:[#allocation2 + $0x1a0] sm:$0xff]  ;;  %v2442_v61 = vand.u32 4294901760, %v2441_v62 }
 0x215   : > { %1603 = vrot.lane.b32.xlu1 %v615_v36, %s9885_s17 }
 0x216   : > { %14447 = vst [vmem:[#allocation70_spill] sm:$0xff] %v11362_v46  ;;  %v14163_v0 = vand.u32 4294901760, %v11362_v46  ;;  %v1210_v37 = vpop.permute.xlu0 %1209  ;;  %8495 = vmatprep.subr.mxu0 %v2442_v61 }
 0x217   : > { %v1336_v57 = vpop.permute.xlu1 %1335  ;;  %8496 = vmatpush3.msra.mxu0 %v2442_v61 }
 0x218   : > { %v2302_v51 = vsub.f32 %v11362_v46, %v14163_v0  ;;  %1097 = vrot.lane.b32.xlu0 %v584_v53, %s9881_s13  ;;  %v585_v0 = vld [vmem:[#allocation2 + $0x199] sm:$0xff] }
 0x219   : > { %1223 = vrot.lane.b32.xlu1 %v615_v36, %s9882_s14 }
 0x21a   : > { %v2303_v23 = vand.u32 4294901760, %v2302_v51  ;;  %v11379_v35 = vpop.permute.xlu0 %829  ;;  %v1665_v51 = vsel %vm255_vm0, %v10818_v52, %v11209_v59 }
 0x21b   : > { %v11381_v3 = vpop.permute.xlu1 %955 }
 0x21c   : > { %8470 = vmatmul.mubr.f32.gmra.mrb[20].mxu0 %v2303_v23  ;;  %1605 = vrot.lane.b32.xlu0 %v616_v4, %s9885_s17  ;;  %v1698_v23 = vsel %vm1675_vm3, %v1665_v51, %v11259_v12  ;;  %v617_v12 = vld [vmem:[#allocation2 + $0x19a] sm:$0xff] }
 0x21d   : > { %1225 = vrot.lane.b32.xlu1 %v616_v4, %s9882_s14  ;;  %v1731_v4 = vsel %vm1708_vm5, %v1698_v23, %v11274_v13 }
 0x21e   : > { %v1338_v53 = vpop.permute.xlu0 %1337  ;;  %v1764_v46 = vsel %vm1741_vm6, %v1731_v4, %v11305_v22  ;;  %v1666_v22 = vsel %vm255_vm0, %v10851_v48, %v11257_v44 }
 0x21f   : > { %v1464_v36 = vpop.permute.xlu1 %1463  ;;  %v1797_v52 = vsel %vm1774_vm7, %v1764_v46, %v1208_v55 }
 0x220   : > { %1351 = vrot.lane.b32.xlu0 %v553_v39, %s9883_s15  ;;  %v1830_v59 = vsel %vm1807_vm8, %v1797_v52, %v1336_v57  ;;  %v618_v39 = vld [vmem:[#allocation2 + $0x1a2] sm:$0xff] }
 0x221   : > { %1353 = vrot.lane.b32.xlu1 %v554_v27, %s9883_s15  ;;  %v1863_v27 = vsel %vm1840_vm9, %v1830_v59, %v1464_v36 }
 0x222   : > { %v11396_v62 = vpop.permute.xlu0 %957 }
 0x223   : > { %v1084_v19 = vpop.permute.xlu1 %1083 }
 0x224   : > { %1479 = vrot.lane.b32.xlu0 %v585_v0, %s9884_s16  ;;  %v11418_v0 = vpack.c.bf16 %v11234_v50, %v11223_v1 }
 0x225   : > { %1481 = vrot.lane.b32.xlu1 %v586_v54, %s9884_s16  ;;  %v1699_v54 = vsel %vm1675_vm3, %v1666_v22, %v11272_v8  ;;  %s9887_s16 = smov 40  }
 0x226   : > { %v1466_v61 = vpop.permute.xlu0 %1465  ;;  %v1732_v57 = vsel %vm1708_vm5, %v1699_v54, %v11303_v11  ;;  %9202 = vmatprep.subr.bf16.mxu0 %v11418_v0 }
 0x227   : > { %v1592_v13 = vpop.permute.xlu1 %1591  ;;  %v1765_v44 = vsel %vm1741_vm6, %v1732_v57, %v11335_v38 }
 0x228   : > { %v1896_v51 = vsel %vm1873_vm10, %v1863_v27, %v1592_v13  ;;  %1607 = vrot.lane.b32.xlu0 %v617_v12, %s9885_s17  ;;  %v1798_v8 = vsel %vm1774_vm7, %v1765_v44, %v1210_v37 }
 0x229   : > { %v1986_v55 = vsel %vm1918_vm11, %v1896_v51, 0  ;;  %1609 = vrot.lane.b32.xlu1 %v618_v39, %s9885_s17  ;;  %v1831_v4 = vsel %vm1807_vm8, %v1798_v8, %v1338_v53 }
 0x22a   : > { %v11414_v46 = vand.u32 4294901760, %v1986_v55  ;;  %v11422_v36 = vpop.permute.xlu0 %703  ;;  %v1864_v59 = vsel %vm1840_vm9, %v1831_v4, %v1466_v61 }
 0x22b   : > { %v1086_v48 = vpop.permute.xlu1 %1085 }
 0x22c   : > { %14449 = vst [vmem:[#allocation72_spill] sm:$0xff] %v11414_v46  ;;  %v11427_v23 = vsub.f32 %v1986_v55, %v11414_v46 }
 0x22e   : > { %14450 = vst [vmem:[#allocation73_spill] sm:$0xff] %v11427_v23  ;;  %v14170_v52 = vand.u32 4294901760, %v11427_v23  ;;  %v1212_v11 = vpop.permute.xlu0 %1211 }
 0x22f   : > { %v1594_v12 = vpop.permute.xlu1 %1593 }
 0x230   : > { %v1897_v39 = vsel %vm1873_vm10, %v1864_v59, %v1594_v12  ;;  %v2312_v38 = vsub.f32 %v11427_v23, %v14170_v52 }
 0x231   : > { %v1989_v27 = vsel %vm1918_vm11, %v1897_v39, 0  ;;  %v1667_v39 = vsel %vm255_vm0, %v10914_v20, %v11333_v2 }
 0x232   : > { %v11439_v13 = vand.u32 4294901760, %v1989_v27  ;;  %v2313_v51 = vand.u32 4294901760, %v2312_v38  ;;  %v11441_v37 = vpop.permute.xlu0 %705  ;;  %v1700_v38 = vsel %vm1675_vm3, %v1667_v39, %v11359_v32  ;;  %v1668_v39 = vsel %vm255_vm0, %v10947_v5, %v11357_v31 }
 0x233   : > { %v832_v53 = vpop.permute.xlu1 %831 }
 0x234   : > { %14451 = vst [vmem:[#allocation74_spill] sm:$0xff] %v11439_v13  ;;  %v11444_v22 = vsub.f32 %v1989_v27, %v11439_v13  ;;  %8472 = vmatprep.mubr.f32.mxu0 %v2313_v51  ;;  %v11459_v27 = vpack.c.bf16 %v11290_v26, %v11283_v28  ;;  %v1733_v51 = vsel %vm1708_vm5, %v1700_v38, %v11381_v3 }
 0x235   : > { %v1701_v38 = vsel %vm1675_vm3, %v1668_v39, %v11379_v35 }
 0x236   : > { %14452 = vst [vmem:[#allocation75_spill] sm:$0xff] %v11444_v22  ;;  %v14169_v61 = vand.u32 4294901760, %v11444_v22  ;;  %v1214_v55 = vpop.permute.xlu0 %1213 }
 0x237   : > { %v1340_v54 = vpop.permute.xlu1 %1339 }
 0x238   : > { %v2322_v57 = vsub.f32 %v11444_v22, %v14169_v61 }
 0x23a   : > { %v2323_v44 = vand.u32 4294901760, %v2322_v57  ;;  %v11450_v8 = vpop.permute.xlu0 %833 }
 0x23b   : > { %v960_v4 = vpop.permute.xlu1 %959 }
 0x23c   : > { %8473 = vmatmul.mubr.f32.gmra.mrb[22].mxu0 %v2323_v44  ;;  %v1766_v44 = vsel %vm1741_vm6, %v1733_v51, %v1084_v19 }
 0x23d   : > { %v1799_v52 = vsel %vm1774_vm7, %v1766_v44, %v1212_v11 }
 0x23e   : > { %v1342_v59 = vpop.permute.xlu0 %1341  ;;  %v1832_v22 = vsel %vm1807_vm8, %v1799_v52, %v1340_v54  ;;  %v1734_v52 = vsel %vm1708_vm5, %v1701_v38, %v11396_v62 }
 0x23f   : > { %v1468_v12 = vpop.permute.xlu1 %1467  ;;  %v1767_v54 = vsel %vm1741_vm6, %v1734_v52, %v1086_v48 }
 0x240   : > { %v1865_v20 = vsel %vm1840_vm9, %v1832_v22, %v1468_v12  ;;  %v1800_v5 = vsel %vm1774_vm7, %v1767_v54, %v1214_v55 }
 0x241   : > { %v1833_v31 = vsel %vm1807_vm8, %v1800_v5, %v1342_v59 }
 0x242   : > { %v962_v57 = vpop.permute.xlu0 %961 }
 0x243   : > { %v1088_v61 = vpop.permute.xlu1 %1087 }
 0x246   : > { %v1470_v2 = vpop.permute.xlu0 %1469 }
 0x247   : > { %v1596_v23 = vpop.permute.xlu1 %1595  ;;  %v1866_v35 = vsel %vm1840_vm9, %v1833_v31, %v1470_v2 }
 0x248   : > { %v1898_v32 = vsel %vm1873_vm10, %v1865_v20, %v1596_v23 }
 0x249   : > { %v1992_v3 = vsel %vm1918_vm11, %v1898_v32, 0 }
 0x24a   : > { %v11474_v19 = vand.u32 4294901760, %v1992_v3  ;;  %v11478_v11 = vpop.permute.xlu0 %707 }
 0x24b   : > { %v1090_v22 = vpop.permute.xlu1 %1089 }
 0x24c   : > { %14453 = vst [vmem:[#allocation76_spill] sm:$0xff] %v11474_v19  ;;  %v11482_v23 = vsub.f32 %v1992_v3, %v11474_v19 }
 0x24e   : > { %14454 = vst [vmem:[#allocation77_spill] sm:$0xff] %v11482_v23  ;;  %v14175_v12 = vand.u32 4294901760, %v11482_v23  ;;  %v1216_v51 = vpop.permute.xlu0 %1215 }
 0x24f   : > { %v1598_v44 = vpop.permute.xlu1 %1597 }
 0x250   : > { %v1899_v62 = vsel %vm1873_vm10, %v1866_v35, %v1598_v44  ;;  %v2332_v20 = vsub.f32 %v11482_v23, %v14175_v12 }
 0x251   : > { %v1995_v48 = vsel %vm1918_vm11, %v1899_v62, 0 }
 0x252   : > { %v11493_v32 = vand.u32 4294901760, %v1995_v48  ;;  %v2333_v39 = vand.u32 4294901760, %v2332_v20  ;;  %v11495_v55 = vpop.permute.xlu0 %709  ;;  %v1669_v20 = vsel %vm255_vm0, %v11005_v7, %v11422_v36  ;;  %v1670_v7 = vsel %vm255_vm0, %v11033_v56, %v11441_v37 }
 0x253   : > { %v836_v59 = vpop.permute.xlu1 %835 }
 0x254   : > { %14455 = vst [vmem:[#allocation78_spill] sm:$0xff] %v11493_v32  ;;  %v11498_v3 = vsub.f32 %v1995_v48, %v11493_v32  ;;  %8475 = vmatprep.mubr.f32.mxu0 %v2333_v39  ;;  %v1702_v48 = vsel %vm1675_vm3, %v1669_v20, %v832_v53  ;;  %v1703_v53 = vsel %vm1675_vm3, %v1670_v7, %v11450_v8 }
 0x255   : > { %v1735_v39 = vsel %vm1708_vm5, %v1702_v48, %v960_v4 }
 0x256   : > { %14456 = vst [vmem:[#allocation79_spill] sm:$0xff] %v11498_v3  ;;  %v14178_v2 = vand.u32 4294901760, %v11498_v3  ;;  %v1218_v38 = vpop.permute.xlu0 %1217  ;;  %v1768_v28 = vsel %vm1741_vm6, %v1735_v39, %v1088_v61 }
 0x257   : > { %v1344_v52 = vpop.permute.xlu1 %1343 }
 0x258   : > { %v2342_v54 = vsub.f32 %v11498_v3, %v14178_v2 }
 0x25a   : > { %v2343_v5 = vand.u32 4294901760, %v2342_v54  ;;  %v11504_v31 = vpop.permute.xlu0 %837  ;;  %v1801_v54 = vsel %vm1774_vm7, %v1768_v28, %v1216_v51  ;;  %v1736_v28 = vsel %vm1708_vm5, %v1703_v53, %v962_v57 }
 0x25b   : > { %v964_v35 = vpop.permute.xlu1 %963  ;;  %v1834_v2 = vsel %vm1807_vm8, %v1801_v54, %v1344_v52 }
 0x25c   : > { %8476 = vmatmul.mubr.f32.gmra.mrb[24].mxu0 %v2343_v5 }
 0x25e   : > { %v1346_v44 = vpop.permute.xlu0 %1345 }
 0x25f   : > { %v1472_v62 = vpop.permute.xlu1 %1471 }
 0x260   : > { %v1867_v5 = vsel %vm1840_vm9, %v1834_v2, %v1472_v62  ;;  %v1769_v2 = vsel %vm1741_vm6, %v1736_v28, %v1090_v22 }
 0x261   : > { %v1802_v52 = vsel %vm1774_vm7, %v1769_v2, %v1218_v38 }
 0x262   : > { %v966_v12 = vpop.permute.xlu0 %965  ;;  %v1835_v56 = vsel %vm1807_vm8, %v1802_v52, %v1346_v44 }
 0x263   : > { %v1092_v26 = vpop.permute.xlu1 %1091 }
 0x266   : > { %v1474_v3 = vpop.permute.xlu0 %1473 }
 0x267   : > { %v1600_v23 = vpop.permute.xlu1 %1599  ;;  %v1868_v37 = vsel %vm1840_vm9, %v1835_v56, %v1474_v3 }
 0x268   : > { %v1900_v49 = vsel %vm1873_vm10, %v1867_v5, %v1600_v23 }
 0x269   : > { %v1998_v36 = vsel %vm1918_vm11, %v1900_v49, 0 }
 0x26a   : > { %v11522_v61 = vand.u32 4294901760, %v1998_v36  ;;  %v11525_v4 = vpop.permute.xlu0 %711 }
 0x26b   : > { %v1094_v51 = vpop.permute.xlu1 %1093 }
 0x26c   : > { %14457 = vst [vmem:[#allocation80_spill] sm:$0xff] %v11522_v61  ;;  %v11529_v23 = vsub.f32 %v1998_v36, %v11522_v61 }
 0x26e   : > { %14458 = vst [vmem:[#allocation81_spill] sm:$0xff] %v11529_v23  ;;  %v14186_v49 = vand.u32 4294901760, %v11529_v23  ;;  %v1220_v8 = vpop.permute.xlu0 %1219 }
 0x26f   : > { %v1602_v62 = vpop.permute.xlu1 %1601 }
 0x270   : > { %v1901_v57 = vsel %vm1873_vm10, %v1868_v37, %v1602_v62  ;;  %v2352_v20 = vsub.f32 %v11529_v23, %v14186_v49  ;;  %v1671_v37 = vsel %vm255_vm0, %v11091_v34, %v11478_v11  ;;  %v1672_v34 = vsel %vm255_vm0, %v11119_v16, %v11495_v55 }
 0x271   : > { %v2001_v22 = vsel %vm1918_vm11, %v1901_v57, 0  ;;  %v1704_v62 = vsel %vm1675_vm3, %v1671_v37, %v836_v59  ;;  %v1705_v59 = vsel %vm1675_vm3, %v1672_v34, %v11504_v31 }
 0x272   : > { %v11540_v48 = vand.u32 4294901760, %v2001_v22  ;;  %v2353_v39 = vand.u32 4294901760, %v2352_v20  ;;  %v714_v38 = vpop.permute.xlu0 %713  ;;  %v1737_v57 = vsel %vm1708_vm5, %v1704_v62, %v964_v35  ;;  %v1738_v35 = vsel %vm1708_vm5, %v1705_v59, %v966_v12 }
 0x273   : > { %v840_v54 = vpop.permute.xlu1 %839 }
 0x274   : > { %14459 = vst [vmem:[#allocation82_spill] sm:$0xff] %v11540_v48  ;;  %v11543_v44 = vsub.f32 %v2001_v22, %v11540_v48  ;;  %8478 = vmatprep.mubr.f32.mxu0 %v2353_v39  ;;  %v1770_v39 = vsel %vm1741_vm6, %v1737_v57, %v1092_v26 }
 0x276   : > { %14460 = vst [vmem:[#allocation83_spill] sm:$0xff] %v11543_v44  ;;  %v14185_v3 = vand.u32 4294901760, %v11543_v44  ;;  %v1222_v5 = vpop.permute.xlu0 %1221 }
 0x277   : > { %v1348_v7 = vpop.permute.xlu1 %1347 }
 0x278   : > { %v2362_v36 = vsub.f32 %v11543_v44, %v14185_v3  ;;  %v1803_v3 = vsel %vm1774_vm7, %v1770_v39, %v1220_v8 }
 0x27a   : > { %v2363_v53 = vand.u32 4294901760, %v2362_v36  ;;  %v842_v28 = vpop.permute.xlu0 %841  ;;  %v1836_v36 = vsel %vm1807_vm8, %v1803_v3, %v1348_v7  ;;  %v1771_v7 = vsel %vm1741_vm6, %v1738_v35, %v1094_v51 }
 0x27b   : > { %v968_v2 = vpop.permute.xlu1 %967 }
 0x27c   : > { %8479 = vmatmul.mubr.f32.gmra.mrb[26].mxu0 %v2363_v53 }
 0x27e   : > { %v1350_v52 = vpop.permute.xlu0 %1349 }
 0x27f   : > { %v1476_v56 = vpop.permute.xlu1 %1475 }
 0x280   : > { %v1869_v53 = vsel %vm1840_vm9, %v1836_v36, %v1476_v56 }
 0x282   : > { %v970_v20 = vpop.permute.xlu0 %969 }
 0x283   : > { %v1096_v22 = vpop.permute.xlu1 %1095 }
 0x286   : > { %v1478_v49 = vpop.permute.xlu0 %1477 }
 0x287   : > { %v1604_v44 = vpop.permute.xlu1 %1603 }
 0x288   : > { %v1902_v23 = vsel %vm1873_vm10, %v1869_v53, %v1604_v44  ;;  %v1804_v44 = vsel %vm1774_vm7, %v1771_v7, %v1222_v5  ;;  %v1674_v53 = vsel %vm255_vm0, %v11205_v6, %v714_v38 }
 0x289   : > { %v2004_v11 = vsel %vm1918_vm11, %v1902_v23, 0  ;;  %v1837_v16 = vsel %vm1807_vm8, %v1804_v44, %v1350_v52 }
 0x28a   : > { %v11565_v26 = vand.u32 4294901760, %v2004_v11  ;;  %v1098_v8 = vpop.permute.xlu0 %1097  ;;  %v1870_v23 = vsel %vm1840_vm9, %v1837_v16, %v1478_v49  ;;  %v1673_v49 = vsel %vm255_vm0, %v11177_v60, %v11525_v4  ;;  %vm5656_vm0 = vcmask 523264  }
 0x28b   : > { %v1224_v3 = vpop.permute.xlu1 %1223  ;;  %v1706_v34 = vsel %vm1675_vm3, %v1673_v49, %v840_v54 }
 0x28c   : > { %14461 = vst [vmem:[#allocation84_spill] sm:$0xff] %v11565_v26  ;;  %v11570_v56 = vsub.f32 %v2004_v11, %v11565_v26  ;;  %v1707_v11 = vsel %vm1675_vm3, %v1674_v53, %v842_v28  ;;  %v1739_v35 = vsel %vm1708_vm5, %v1706_v34, %v968_v2 }
 0x28d   : > { %v1740_v7 = vsel %vm1708_vm5, %v1707_v11, %v970_v20 }
 0x28e   : > { %v14194_v55 = vand.u32 4294901760, %v11570_v56  ;;  %v1606_v31 = vpop.permute.xlu0 %1605 }
 0x28f   : > { %v1226_v37 = vpop.permute.xlu1 %1225  ;;  %v1903_v62 = vsel %vm1873_vm10, %v1870_v23, %v1606_v31  ;;  %v1772_v23 = vsel %vm1741_vm6, %v1739_v35, %v1096_v22  ;;  %v1773_v31 = vsel %vm1741_vm6, %v1740_v7, %v1098_v8 }
 0x290   : > { %v2372_v12 = vsub.f32 %v11570_v56, %v14194_v55  ;;  %v2007_v51 = vsel %vm1918_vm11, %v1903_v62, 0  ;;  %v1805_v6 = vsel %vm1774_vm7, %v1772_v23, %v1224_v3  ;;  %v1806_v4 = vsel %vm1774_vm7, %v1773_v31, %v1226_v37  ;;  %v14470_v23 = vld [vmem:[#allocation28_spill] sm:$0xff]  ;;  %v14471_v31 = vld [vmem:[#allocation29_spill] sm:$0xff]  ;;  %v14496_v55 = vld [vmem:[#allocation75_spill] sm:$0xff] }
 0x291   : > { %v11581_v57 = vand.u32 4294901760, %v2007_v51 }
 0x292   : > { %v2373_v39 = vand.u32 4294901760, %v2372_v12  ;;  %v1352_v5 = vpop.permute.xlu0 %1351 }
 0x293   : > { %14462 = vst [vmem:[#allocation85_spill] sm:$0xff] %v11581_v57  ;;  %v1354_v36 = vpop.permute.xlu1 %1353  ;;  %v11584_v52 = vsub.f32 %v2007_v51, %v11581_v57  ;;  %v1838_v38 = vsel %vm1807_vm8, %v1805_v6, %v1352_v5  ;;  %v14473_v6 = vld [vmem:[#allocation19_spill] sm:$0xff] }
 0x294   : > { %8481 = vmatprep.mubr.f32.mxu0 %v2373_v39  ;;  %v1839_v54 = vsel %vm1807_vm8, %v1806_v4, %v1354_v36  ;;  %v14474_v4 = vld [vmem:[#allocation33_spill] sm:$0xff] }
 0x295   : > { %v14193_v59 = vand.u32 4294901760, %v11584_v52 }
 0x296   : > { %v1480_v44 = vpop.permute.xlu0 %1479 }
 0x297   : > { %v1482_v16 = vpop.permute.xlu1 %1481  ;;  %v2382_v60 = vsub.f32 %v11584_v52, %v14193_v59  ;;  %v1871_v2 = vsel %vm1840_vm9, %v1838_v38, %v1480_v44  ;;  %v14468_v44 = vld [vmem:[#allocation61_spill] sm:$0xff]  ;;  %v14475_v38 = vld [vmem:[#allocation36_spill] sm:$0xff] }
 0x298   : > { %v1872_v20 = vsel %vm1840_vm9, %v1839_v54, %v1482_v16  ;;  %v14469_v16 = vld [vmem:[#allocation63_spill] sm:$0xff]  ;;  %v14476_v54 = vand.u32 4294901760, %v11223_v1  ;;  %v14485_v1 = vld [vmem:[#allocation52_spill] sm:$0xff]  ;;  %v14495_v59 = vld [vmem:[#allocation73_spill] sm:$0xff] }
 0x299   : > { %v2383_v28 = vand.u32 4294901760, %v2382_v60  ;;  %v14472_v60 = vld [vmem:[#allocation32_spill] sm:$0xff] }
 0x29a   : > { %v1608_v22 = vpop.permute.xlu0 %1607 }
 0x29b   : > { %v1610_v62 = vpop.permute.xlu1 %1609  ;;  %v1904_v8 = vsel %vm1873_vm10, %v1871_v2, %v1608_v22  ;;  %8482 = vmatmul.mubr.f32.gmra.mrb[28].mxu0 %v2383_v28  ;;  %v14477_v28 = vand.u32 4294901760, %v11234_v50  ;;  %v14479_v22 = vld [vmem:[#allocation40_spill] sm:$0xff]  ;;  %v14486_v50 = vld [vmem:[#allocation53_spill] sm:$0xff] }
 0x29c   : > { %v1905_v12 = vsel %vm1873_vm10, %v1872_v20, %v1610_v62  ;;  %v2010_v3 = vsel %vm1918_vm11, %v1904_v8, 0  ;;  %v14478_v20 = vld [vmem:[#allocation37_spill] sm:$0xff]  ;;  %v14481_v8 = vld [vmem:[#allocation44_spill] sm:$0xff] }
 0x29d   : > { %v2013_v37 = vsel %vm1918_vm11, %v1905_v12, 0  ;;  %v11611_v51 = vand.u32 4294901760, %v2010_v3  ;;  %v9217_v2 = vpack.c.bf16 %v14477_v28, %v14476_v54  ;;  %v14480_v62 = vld [vmem:[#allocation41_spill] sm:$0xff]  ;;  %v14491_v54 = vld [vmem:[#allocation62_spill] sm:$0xff]  ;;  %v14492_v28 = vld [vmem:[#allocation64_spill] sm:$0xff] }
 0x29e   : > { %v11613_v39 = vand.u32 4294901760, %v2013_v37  ;;  %v14482_v12 = vld [vmem:[#allocation45_spill] sm:$0xff] }
 0x29f   : > { %14463 = vst [vmem:[#allocation86_spill] sm:$0xff] %v11611_v51  ;;  %v11616_v5 = vsub.f32 %v2010_v3, %v11611_v51  ;;  %v14483_v3 = vld [vmem:[#allocation48_spill] sm:$0xff] }
 0x2a0   : > { %14464 = vst [vmem:[#allocation87_spill] sm:$0xff] %v11613_v39  ;;  %v11619_v36 = vsub.f32 %v2013_v37, %v11613_v39  ;;  %v14484_v37 = vld [vmem:[#allocation49_spill] sm:$0xff] }
 0x2a1   : > { %v14192_v49 = vand.u32 4294901760, %v11616_v5 }
 0x2a2   : > { %v14191_v53 = vand.u32 4294901760, %v11619_v36 }
 0x2a3   : > { %v2392_v34 = vsub.f32 %v11616_v5, %v14192_v49  ;;  %v14494_v49 = vld [vmem:[#allocation70_spill] sm:$0xff] }
 0x2a4   : > { %v2402_v11 = vsub.f32 %v11619_v36, %v14191_v53  ;;  %v14493_v53 = vld [vmem:[#allocation68_spill] sm:$0xff] }
 0x2a5   : > { %v2393_v35 = vand.u32 4294901760, %v2392_v34  ;;  %v14487_v34 = vld [vmem:[#allocation54_spill] sm:$0xff] }
 0x2a6   : > { %v2403_v7 = vand.u32 4294901760, %v2402_v11  ;;  %v14488_v11 = vld [vmem:[#allocation56_spill] sm:$0xff] }
 0x2a7   : > { %8484 = vmatprep.mubr.f32.mxu0 %v2393_v35  ;;  %v14489_v35 = vld [vmem:[#allocation58_spill] sm:$0xff] }
 0x2a8   : > { %8485 = vmatmul.mubr.f32.gmra.mrb[30].mxu0 %v2403_v7  ;;  %v14490_v7 = vld [vmem:[#allocation60_spill] sm:$0xff] }
 0x2a9   : > { %8497 = vmatprep.mubr.f32.mxu0 %v10369_v47 }
 0x2ac   : > { %8498 = vmatmul.mubr.f32.vlgmr.msra.gmra.mrb[0].mxu0 %v10399_v17 }
 0x2ad   : > { %9204 = vmatpush3.bf16.msra.mxu0 %v11418_v0  ;;  %8500 = vmatprep.mubr.f32.mxu0 %v10465_v21  ;;  %v14465_v0 = vld [vmem:[#allocation55_spill] sm:$0xff] }
 0x2ae   : > { %9206 = vmatprep.subr.bf16.mxu0 %v11459_v27 }
 0x2b0   : > { %8501 = vmatmul.mubr.f32.gmra.mrb[2].mxu0 %v10495_v63 }
 0x2b1   : > { %8503 = vmatprep.mubr.f32.mxu0 %v10561_v58  ;;  %9208 = vmatpush3.bf16.msra.mxu0 %v11459_v27  ;;  %v14467_v27 = vld [vmem:[#allocation59_spill] sm:$0xff] }
 0x2b2   : > { %8553 = vmatprep.subr.mxu0 %v11372_v29 }
 0x2b4   : > { %8504 = vmatmul.mubr.f32.gmra.mrb[4].mxu0 %v10591_v25 }
 0x2b5   : > { %8506 = vmatprep.mubr.f32.mxu0 %v10657_v42  ;;  %8554 = vmatpush3.msra.mxu0 %v11372_v29  ;;  %v14466_v29 = vld [vmem:[#allocation57_spill] sm:$0xff] }
 0x2b6   : > { %9210 = vmatprep.subr.bf16.mxu0 %v10168_v30 }
 0x2b8   : > { %8507 = vmatmul.mubr.f32.gmra.mrb[6].mxu0 %v10687_v33 }
 0x2b9   : > { %8509 = vmatprep.mubr.f32.mxu0 %v10753_v14 }
 0x2bc   : > { %8510 = vmatmul.mubr.f32.gmra.mrb[8].mxu0 %v10783_v15 }
 0x2bd   : > { %8512 = vmatprep.mubr.f32.mxu0 %v10849_v10 }
 0x2c0   : > { %8513 = vmatmul.mubr.f32.gmra.mrb[10].mxu0 %v10879_v24 }
 0x2c1   : > { %8515 = vmatprep.mubr.f32.mxu0 %v10945_v43 }
 0x2c4   : > { %8516 = vmatmul.mubr.f32.gmra.mrb[12].mxu0 %v10975_v45 }
 0x2c5   : > { %8518 = vmatprep.mubr.f32.mxu0 %v11031_v18 }
 0x2c8   : > { %8519 = vmatmul.mubr.f32.gmra.mrb[14].mxu0 %v14465_v0 }
 0x2c9   : > { %8521 = vmatprep.mubr.f32.mxu0 %v14466_v29 }
 0x2cc   : > { %8522 = vmatmul.mubr.f32.gmra.mrb[16].mxu0 %v14467_v27 }
 0x2cd   : > { %8524 = vmatprep.mubr.f32.mxu0 %v14468_v44  ;;  %v14509_v44 = vand.u32 4294901760, %v14475_v38 }
 0x2d0   : > { %8525 = vmatmul.mubr.f32.gmra.mrb[18].mxu0 %v14469_v16  ;;  %v14508_v16 = vand.u32 4294901760, %v14474_v4 }
 0x2d1   : > { %8527 = vmatprep.mubr.f32.mxu0 %v11329_v9  ;;  %v14507_v9 = vand.u32 4294901760, %v14472_v60 }
 0x2d4   : > { %8528 = vmatmul.mubr.f32.gmra.mrb[20].mxu0 %v11355_v41  ;;  %v14506_v41 = vand.u32 4294901760, %v14471_v31 }
 0x2d5   : > { %8530 = vmatprep.mubr.f32.mxu0 %v11414_v46 }
 0x2d8   : > { %8531 = vmatmul.mubr.f32.gmra.mrb[22].mxu0 %v11439_v13 }
 0x2d9   : > { %8533 = vmatprep.mubr.f32.mxu0 %v11474_v19  ;;  %v14504_v19 = vld [vmem:[#allocation66_spill] sm:$0xff] }
 0x2da   : > { %v14505_v13 = vand.u32 4294901760, %v14504_v19  ;;  %v14511_v19 = vand.u32 4294901760, %v14478_v20 }
 0x2dc   : > { %8534 = vmatmul.mubr.f32.gmra.mrb[24].mxu0 %v11493_v32 }
 0x2dd   : > { %8536 = vmatprep.mubr.f32.mxu0 %v11522_v61  ;;  %v14502_v61 = vld [vmem:[#allocation65_spill] sm:$0xff] }
 0x2de   : > { %v14503_v32 = vand.u32 4294901760, %v14502_v61  ;;  %v14517_v61 = vand.u32 4294901760, %v14484_v37 }
 0x2e0   : > { %8537 = vmatmul.mubr.f32.gmra.mrb[26].mxu0 %v11540_v48  ;;  %v14501_v48 = vand.u32 4294901760, %v14470_v23  ;;  %v9221_v46 = vpack.c.bf16 %v14505_v13, %v14503_v32  ;;  %v14512_v13 = vand.u32 4294901760, %v14479_v22  ;;  %v14516_v32 = vand.u32 4294901760, %v14483_v3 }
 0x2e1   : > { %8539 = vmatprep.mubr.f32.mxu0 %v11565_v26  ;;  %v14500_v26 = vld [vmem:[#allocation83_spill] sm:$0xff] }
 0x2e4   : > { %8540 = vmatmul.mubr.f32.gmra.mrb[28].mxu0 %v11581_v57  ;;  %v14499_v57 = vld [vmem:[#allocation81_spill] sm:$0xff] }
 0x2e5   : > { %8542 = vmatprep.mubr.f32.mxu0 %v11611_v51  ;;  %v14498_v51 = vld [vmem:[#allocation79_spill] sm:$0xff] }
 0x2e8   : > { %8543 = vmatmul.mubr.f32.gmra.mrb[30].mxu0 %v11613_v39  ;;  %v14497_v39 = vld [vmem:[#allocation77_spill] sm:$0xff] }
 0x2e9   : > { %8555 = vmatprep.mubr.f32.mxu0 %v14470_v23  ;;  %v14520_v23 = vand.u32 4294901760, %v14487_v34 }
 0x2ec   : > { %8556 = vmatmul.mubr.f32.vlgmr.msra.gmra.mrb[0].mxu0 %v14471_v31  ;;  %v14521_v31 = vand.u32 4294901760, %v14488_v11 }
 0x2ed   : > { %9212 = vmatpush3.bf16.msra.mxu0 %v10168_v30  ;;  %8558 = vmatprep.mubr.f32.mxu0 %v14472_v60  ;;  %v14522_v60 = vand.u32 4294901760, %v14489_v35 }
 0x2ee   : > { %9214 = vmatprep.subr.bf16.mxu0 %v14473_v6 }
 0x2f0   : > { %8559 = vmatmul.mubr.f32.gmra.mrb[2].mxu0 %v14474_v4  ;;  %v14523_v4 = vand.u32 4294901760, %v14490_v7 }
 0x2f1   : > { %8561 = vmatprep.mubr.f32.mxu0 %v14475_v38  ;;  %9216 = vmatpush3.bf16.msra.mxu0 %v14473_v6  ;;  %v14524_v38 = vand.u32 4294901760, %v14491_v54 }
 0x2f2   : > { %8611 = vmatprep.subr.mxu0 %v10204_v40 }
 0x2f4   : > { %8562 = vmatmul.mubr.f32.gmra.mrb[4].mxu0 %v14478_v20  ;;  %v14526_v20 = vand.u32 4294901760, %v14493_v53 }
 0x2f5   : > { %8564 = vmatprep.mubr.f32.mxu0 %v14479_v22  ;;  %8612 = vmatpush3.msra.mxu0 %v10204_v40  ;;  %v14527_v22 = vand.u32 4294901760, %v14494_v49 }
 0x2f6   : > { %9218 = vmatprep.subr.bf16.mxu0 %v9217_v2 }
 0x2f8   : > { %8565 = vmatmul.mubr.f32.gmra.mrb[6].mxu0 %v14480_v62 }
 0x2f9   : > { %8567 = vmatprep.mubr.f32.mxu0 %v14481_v8 }
 0x2fc   : > { %8568 = vmatmul.mubr.f32.gmra.mrb[8].mxu0 %v14482_v12 }
 0x2fd   : > { %8570 = vmatprep.mubr.f32.mxu0 %v14483_v3  ;;  %v14531_v3 = vand.u32 4294901760, %v14498_v51 }
 0x300   : > { %8571 = vmatmul.mubr.f32.gmra.mrb[10].mxu0 %v14484_v37  ;;  %v14532_v37 = vand.u32 4294901760, %v14499_v57 }
 0x301   : > { %8573 = vmatprep.mubr.f32.mxu0 %v14485_v1 }
 0x304   : > { %8574 = vmatmul.mubr.f32.gmra.mrb[12].mxu0 %v14486_v50 }
 0x305   : > { %8576 = vmatprep.mubr.f32.mxu0 %v14487_v34  ;;  %v14550_v34 = vld [vmem:[#allocation67_spill] sm:$0xff] }
 0x308   : > { %8577 = vmatmul.mubr.f32.gmra.mrb[14].mxu0 %v14488_v11  ;;  %v14551_v11 = vld [vmem:[#allocation69_spill] sm:$0xff] }
 0x309   : > { %8579 = vmatprep.mubr.f32.mxu0 %v14489_v35  ;;  %v14552_v35 = vld [vmem:[#allocation72_spill] sm:$0xff] }
 0x30c   : > { %8580 = vmatmul.mubr.f32.gmra.mrb[16].mxu0 %v14490_v7  ;;  %v14553_v7 = vld [vmem:[#allocation74_spill] sm:$0xff] }
 0x30d   : > { %8582 = vmatprep.mubr.f32.mxu0 %v14491_v54  ;;  %v14554_v54 = vld [vmem:[#allocation76_spill] sm:$0xff] }
 0x310   : > { %8583 = vmatmul.mubr.f32.gmra.mrb[18].mxu0 %v14492_v28 }
 0x311   : > { %8585 = vmatprep.mubr.f32.mxu0 %v14493_v53  ;;  %v14533_v53 = vand.u32 4294901760, %v14500_v26 }
 0x314   : > { %8586 = vmatmul.mubr.f32.gmra.mrb[20].mxu0 %v14494_v49  ;;  %v14534_v49 = vand.u32 4294901760, %v11570_v56 }
 0x315   : > { %8588 = vmatprep.mubr.f32.mxu0 %v14495_v59 }
 0x318   : > { %8589 = vmatmul.mubr.f32.gmra.mrb[22].mxu0 %v14496_v55 }
 0x319   : > { %8591 = vmatprep.mubr.f32.mxu0 %v14497_v39 }
 0x31c   : > { %8592 = vmatmul.mubr.f32.gmra.mrb[24].mxu0 %v14498_v51  ;;  %v14543_v51 = vld [vmem:[#allocation13_spill] sm:$0xff] }
 0x31d   : > { %8594 = vmatprep.mubr.f32.mxu0 %v14499_v57  ;;  %v14538_v57 = vld [vmem:[#allocation10_spill] sm:$0xff] }
 0x31e   : > { %5339 = vrot.lane.b32.xlu1 %v14538_v57, %s9886_s11 }
 0x320   : > { %8595 = vmatmul.mubr.f32.gmra.mrb[26].mxu0 %v14500_v26  ;;  %v14539_v26 = vld [vmem:[#allocation9_spill] sm:$0xff] }
 0x321   : > { %8597 = vmatprep.mubr.f32.mxu0 %v11570_v56  ;;  %5337 = vrot.lane.b32.xlu0 %v14539_v26, %s9886_s11  ;;  %v14540_v56 = vld [vmem:[#allocation12_spill] sm:$0xff] }
 0x322   : > { %5343 = vrot.lane.b32.xlu1 %v14540_v56, %s9886_s11 }
 0x324   : > { %8598 = vmatmul.mubr.f32.gmra.mrb[28].mxu0 %v11584_v52 }
 0x325   : > { %8600 = vmatprep.mubr.f32.mxu0 %v11616_v5 }
 0x328   : > { %8601 = vmatmul.mubr.f32.gmra.mrb[30].mxu0 %v11619_v36 }
 0x329   : > { %8613 = vmatprep.mubr.f32.mxu0 %v14501_v48  ;;  %v14510_v48 = vld [vmem:[#allocation71_spill] sm:$0xff] }
 0x32c   : > { %8614 = vmatmul.mubr.f32.vlgmr.msra.gmra.mrb[0].mxu0 %v14506_v41  ;;  %v14514_v41 = vand.u32 4294901760, %v14481_v8  ;;  %v14529_v8 = vand.u32 4294901760, %v14496_v55  ;;  %v14536_v55 = vand.u32 4294901760, %v11616_v5  ;;  %v14544_v5 = vld [vmem:[#allocation16_spill] sm:$0xff] }
 0x32d   : > { %9220 = vmatpush3.bf16.msra.mxu0 %v9217_v2  ;;  %8616 = vmatprep.mubr.f32.mxu0 %v14507_v9  ;;  %v14513_v9 = vand.u32 4294901760, %v14480_v62  ;;  %v14525_v2 = vand.u32 4294901760, %v14492_v28  ;;  %v14528_v62 = vand.u32 4294901760, %v14495_v59  ;;  %v14535_v59 = vand.u32 4294901760, %v11584_v52  ;;  %v14541_v52 = vld [vmem:[#allocation11_spill] sm:$0xff]  ;;  %v14555_v28 = vld [vmem:[#allocation78_spill] sm:$0xff] }
 0x32e   : > { %9222 = vmatprep.subr.bf16.mxu0 %v9221_v46  ;;  %5341 = vrot.lane.b32.xlu0 %v14541_v52, %s9886_s11 }
 0x330   : > { %8617 = vmatmul.mubr.f32.gmra.mrb[2].mxu0 %v14508_v16  ;;  %v14519_v16 = vand.u32 4294901760, %v14486_v50  ;;  %v14549_v50 = vld [vmem:[#allocation63_spill] sm:$0xff] }
 0x331   : > { %8619 = vmatprep.mubr.f32.mxu0 %v14509_v44  ;;  %9224 = vmatpush3.bf16.msra.mxu0 %v9221_v46  ;;  %v14515_v46 = vand.u32 4294901760, %v14482_v12  ;;  %v14518_v44 = vand.u32 4294901760, %v14485_v1  ;;  %v14530_v12 = vand.u32 4294901760, %v14497_v39  ;;  %v14537_v39 = vand.u32 4294901760, %v11619_v36  ;;  %v14545_v36 = vld [vmem:[#allocation15_spill] sm:$0xff]  ;;  %v14547_v1 = vld [vmem:[#allocation17_spill] sm:$0xff] }
 0x332   : > { %8669 = vmatprep.subr.mxu0 %v14510_v48  ;;  %5345 = vrot.lane.b32.xlu0 %v14543_v51, %s9886_s11 }
 0x334   : > { %8620 = vmatmul.mubr.f32.gmra.mrb[4].mxu0 %v14511_v19  ;;  %v14557_v19 = vld [vmem:[#allocation82_spill] sm:$0xff] }
 0x335   : > { %8622 = vmatprep.mubr.f32.mxu0 %v14512_v13  ;;  %8670 = vmatpush3.msra.mxu0 %v14510_v48  ;;  %v14556_v48 = vld [vmem:[#allocation80_spill] sm:$0xff] }
 0x336   : > { %9226 = vmatprep.subr.bf16.mxu0 %v10168_v30  ;;  %5349 = vrot.lane.b32.xlu0 %v14545_v36, %s9886_s11  ;;  %v14558_v13 = vld [vmem:[#allocation84_spill] sm:$0xff] }
 0x338   : > { %8623 = vmatmul.mubr.f32.gmra.mrb[6].mxu0 %v14513_v9  ;;  %v14559_v9 = vld [vmem:[#allocation85_spill] sm:$0xff] }
 0x339   : > { %8625 = vmatprep.mubr.f32.mxu0 %v14514_v41  ;;  %v14560_v41 = vld [vmem:[#allocation86_spill] sm:$0xff] }
 0x33a   : > { %5353 = vrot.lane.b32.xlu0 %v14547_v1, %s9886_s11 }
 0x33c   : > { %8626 = vmatmul.mubr.f32.gmra.mrb[8].mxu0 %v14515_v46  ;;  %v14561_v46 = vld [vmem:[#allocation87_spill] sm:$0xff] }
 0x33d   : > { %8628 = vmatprep.mubr.f32.mxu0 %v14516_v32 }
 0x340   : > { %8629 = vmatmul.mubr.f32.gmra.mrb[10].mxu0 %v14517_v61 }
 0x341   : > { %8631 = vmatprep.mubr.f32.mxu0 %v14518_v44 }
 0x344   : > { %8632 = vmatmul.mubr.f32.gmra.mrb[12].mxu0 %v14519_v16 }
 0x345   : > { %8634 = vmatprep.mubr.f32.mxu0 %v14520_v23 }
 0x348   : > { %8635 = vmatmul.mubr.f32.gmra.mrb[14].mxu0 %v14521_v31 }
 0x349   : > { %8637 = vmatprep.mubr.f32.mxu0 %v14522_v60 }
 0x34c   : > { %8638 = vmatmul.mubr.f32.gmra.mrb[16].mxu0 %v14523_v4 }
 0x34d   : > { %8640 = vmatprep.mubr.f32.mxu0 %v14524_v38 }
 0x350   : > { %8641 = vmatmul.mubr.f32.gmra.mrb[18].mxu0 %v14525_v2 }
 0x351   : > { %8643 = vmatprep.mubr.f32.mxu0 %v14526_v20 }
 0x354   : > { %8644 = vmatmul.mubr.f32.gmra.mrb[20].mxu0 %v14527_v22 }
 0x355   : > { %8646 = vmatprep.mubr.f32.mxu0 %v14528_v62 }
 0x358   : > { %8647 = vmatmul.mubr.f32.gmra.mrb[22].mxu0 %v14529_v8 }
 0x359   : > { %8649 = vmatprep.mubr.f32.mxu0 %v14530_v12 }
 0x35c   : > { %8650 = vmatmul.mubr.f32.gmra.mrb[24].mxu0 %v14531_v3 }
 0x35d   : > { %8652 = vmatprep.mubr.f32.mxu0 %v14532_v37 }
 0x360   : > { %8653 = vmatmul.mubr.f32.gmra.mrb[26].mxu0 %v14533_v53 }
 0x361   : > { %8655 = vmatprep.mubr.f32.mxu0 %v14534_v49 }
 0x364   : > { %8656 = vmatmul.mubr.f32.gmra.mrb[28].mxu0 %v14535_v59 }
 0x365   : > { %8658 = vmatprep.mubr.f32.mxu0 %v14536_v55 }
 0x368   : > { %8659 = vmatmul.mubr.f32.gmra.mrb[30].mxu0 %v14537_v39 }
 0x369   : > { %8671 = vmatprep.mubr.f32.mxu0 %v10369_v47 }
 0x36c   : > { %8672 = vmatmul.mubr.f32.vlgmr.msra.gmra.mrb[0].mxu0 %v10399_v17 }
 0x36d   : > { %9228 = vmatpush3.bf16.msra.mxu0 %v10168_v30  ;;  %8674 = vmatprep.mubr.f32.mxu0 %v10465_v21  ;;  %v14542_v30 = vld [vmem:[#allocation14_spill] sm:$0xff] }
 0x36e   : > { %9230 = vmatprep.subr.bf16.mxu0 %v14473_v6  ;;  %5347 = vrot.lane.b32.xlu1 %v14542_v30, %s9886_s11 }
 0x370   : > { %8675 = vmatmul.mubr.f32.gmra.mrb[2].mxu0 %v10495_v63 }
 0x371   : > { %8677 = vmatprep.mubr.f32.mxu0 %v10561_v58  ;;  %9232 = vmatpush3.bf16.msra.mxu0 %v14473_v6  ;;  %v14546_v6 = vld [vmem:[#allocation18_spill] sm:$0xff] }
 0x372   : > { %8727 = vmatprep.subr.mxu0 %v10204_v40  ;;  %5351 = vrot.lane.b32.xlu1 %v14544_v5, %s9886_s11 }
 0x374   : > { %8678 = vmatmul.mubr.f32.gmra.mrb[4].mxu0 %v10591_v25 }
 0x375   : > { %8680 = vmatprep.mubr.f32.mxu0 %v10657_v42  ;;  %8728 = vmatpush3.msra.mxu0 %v10204_v40  ;;  %v14548_v40 = vld [vmem:[#allocation61_spill] sm:$0xff] }
 0x376   : > { %5355 = vrot.lane.b32.xlu1 %v14546_v6, %s9886_s11 }
 0x378   : > { %8681 = vmatmul.mubr.f32.gmra.mrb[6].mxu0 %v10687_v33 }
 0x379   : > { %8683 = vmatprep.mubr.f32.mxu0 %v10753_v14 }
 0x37c   : > { %8684 = vmatmul.mubr.f32.gmra.mrb[8].mxu0 %v10783_v15 }
 0x37d   : > { %8686 = vmatprep.mubr.f32.mxu0 %v10849_v10 }
 0x380   : > { %8687 = vmatmul.mubr.f32.gmra.mrb[10].mxu0 %v10879_v24 }
 0x381   : > { %8689 = vmatprep.mubr.f32.mxu0 %v10945_v43 }
 0x384   : > { %8690 = vmatmul.mubr.f32.gmra.mrb[12].mxu0 %v10975_v45 }
 0x385   : > { %8692 = vmatprep.mubr.f32.mxu0 %v11031_v18 }
 0x388   : > { %8693 = vmatmul.mubr.f32.gmra.mrb[14].mxu0 %v14465_v0 }
 0x389   : > { %8695 = vmatprep.mubr.f32.mxu0 %v14466_v29 }
 0x38c   : > { %8696 = vmatmul.mubr.f32.gmra.mrb[16].mxu0 %v14467_v27 }
 0x38d   : > { %8698 = vmatprep.mubr.f32.mxu0 %v14548_v40 }
 0x390   : > { %8699 = vmatmul.mubr.f32.gmra.mrb[18].mxu0 %v14549_v50 }
 0x391   : > { %8701 = vmatprep.mubr.f32.mxu0 %v14550_v34 }
 0x394   : > { %8702 = vmatmul.mubr.f32.gmra.mrb[20].mxu0 %v14551_v11 }
 0x395   : > { %8704 = vmatprep.mubr.f32.mxu0 %v14552_v35 }
 0x398   : > { %8705 = vmatmul.mubr.f32.gmra.mrb[22].mxu0 %v14553_v7 }
 0x399   : > { %8707 = vmatprep.mubr.f32.mxu0 %v14554_v54 }
 0x39c   : > { %8708 = vmatmul.mubr.f32.gmra.mrb[24].mxu0 %v14555_v28 }
 0x39d   : > { %8710 = vmatprep.mubr.f32.mxu0 %v14556_v48 }
 0x3a0   : > { %8711 = vmatmul.mubr.f32.gmra.mrb[26].mxu0 %v14557_v19 }
 0x3a1   : > { %8713 = vmatprep.mubr.f32.mxu0 %v14558_v13 }
 0x3a4   : > { %8714 = vmatmul.mubr.f32.gmra.mrb[28].mxu0 %v14559_v9 }
 0x3a5   : > { %8716 = vmatprep.mubr.f32.mxu0 %v14560_v41 }
 0x3a8   : > { %8717 = vmatmul.mubr.f32.gmra.mrb[30].mxu0 %v14561_v46 }
 0x3a9   : > { %8729 = vmatprep.mubr.f32.mxu0 %v10369_v47  ;;  %v14562_v47 = vmov 0.0  }
 0x3aa   : > { %3940 = vst.msk [vmem:[#allocation3 + $0x29] sm:$0x1] %vm3923_vm12, %v14562_v47  ;;  %3924 = vst.msk [vmem:[#allocation3 + $0x18] sm:$0x1] %vm3923_vm12, %v14562_v47 }
 0x3ab   : > { %3925 = vst.msk [vmem:[#allocation3 + $0x30] sm:$0x1] %vm3923_vm12, %v14562_v47  ;;  %3926 = vst.msk [vmem:[#allocation3 + $0x48] sm:$0x1] %vm3923_vm12, %v14562_v47 }
 0x3ac   : > { %8730 = vmatmul.mubr.f32.vlgmr.msra.gmra.mrb[0].mxu0 %v10399_v17  ;;  %3927 = vst.msk [vmem:[#allocation3 + $0x60] sm:$0x1] %vm3923_vm12, %v14562_v47  ;;  %3928 = vst.msk [vmem:[#allocation3 + $0x78] sm:$0x1] %vm3923_vm12, %v14562_v47  ;;  %v11935_v17 = vld [vmem:[%s14045_s2] ss:$0 sm:$0xff] }
 0x3ad   : > { %8732 = vmatprep.mubr.f32.mxu0 %v10465_v21  ;;  %3929 = vst.msk [vmem:[#allocation3 + $0x90] sm:$0x1] %vm3923_vm12, %v14562_v47  ;;  %3930 = vst.msk [vmem:[#allocation3 + $0xa8] sm:$0x1] %vm3923_vm12, %v14562_v47 }
 0x3ae   : > { %3931 = vst.msk [vmem:[#allocation3 + $0xc0] sm:$0x1] %vm3923_vm12, %v14562_v47  ;;  %3932 = vst.msk [vmem:[#allocation3 + $0xd8] sm:$0x1] %vm3923_vm12, %v14562_v47 }
 0x3af   : > { %3933 = vst.msk [vmem:[#allocation3 + $0xf0] sm:$0x1] %vm3923_vm12, %v14562_v47  ;;  %3934 = vst.msk [vmem:[#allocation3 + $0x108] sm:$0x1] %vm3923_vm12, %v14562_v47 }
 0x3b0   : > { %8733 = vmatmul.mubr.f32.gmra.mrb[2].mxu0 %v10495_v63  ;;  %3935 = vst.msk [vmem:[#allocation3 + $0x120] sm:$0x1] %vm3923_vm12, %v14562_v47  ;;  %3936 = vst.msk [vmem:[#allocation3 + $0x138] sm:$0x1] %vm3923_vm12, %v14562_v47 }
 0x3b1   : > { %8735 = vmatprep.mubr.f32.mxu0 %v10561_v58  ;;  %3937 = vst.msk [vmem:[#allocation3 + $0x150] sm:$0x1] %vm3923_vm12, %v14562_v47  ;;  %3938 = vst.msk [vmem:[#allocation3 + $0x168] sm:$0x1] %vm3923_vm12, %v14562_v47 }
 0x3b2   : > { %3939 = vst.msk [vmem:[#allocation3 + $0x180] sm:$0x1] %vm3923_vm12, %v14562_v47  ;;  %3941 = vst.msk [vmem:[#allocation3 + $0x41] sm:$0x1] %vm3923_vm12, %v14562_v47 }
 0x3b3   : > { %3942 = vst.msk [vmem:[#allocation3 + $0x59] sm:$0x1] %vm3923_vm12, %v14562_v47  ;;  %3943 = vst.msk [vmem:[#allocation3 + $0x71] sm:$0x1] %vm3923_vm12, %v14562_v47 }
 0x3b4   : > { %8736 = vmatmul.mubr.f32.gmra.mrb[4].mxu0 %v10591_v25  ;;  %3944 = vst.msk [vmem:[#allocation3 + $0x89] sm:$0x1] %vm3923_vm12, %v14562_v47  ;;  %3945 = vst.msk [vmem:[#allocation3 + $0xa1] sm:$0x1] %vm3923_vm12, %v14562_v47 }
 0x3b5   : > { %8738 = vmatprep.mubr.f32.mxu0 %v10657_v42  ;;  %3946 = vst.msk [vmem:[#allocation3 + $0xb9] sm:$0x1] %vm3923_vm12, %v14562_v47  ;;  %3947 = vst.msk [vmem:[#allocation3 + $0xd1] sm:$0x1] %vm3923_vm12, %v14562_v47 }
 0x3b6   : > { %3948 = vst.msk [vmem:[#allocation3 + $0xe9] sm:$0x1] %vm3923_vm12, %v14562_v47  ;;  %3949 = vst.msk [vmem:[#allocation3 + $0x101] sm:$0x1] %vm3923_vm12, %v14562_v47 }
 0x3b7   : > { %3950 = vst.msk [vmem:[#allocation3 + $0x119] sm:$0x1] %vm3923_vm12, %v14562_v47  ;;  %3951 = vst.msk [vmem:[#allocation3 + $0x131] sm:$0x1] %vm3923_vm12, %v14562_v47 }
 0x3b8   : > { %8739 = vmatmul.mubr.f32.gmra.mrb[6].mxu0 %v10687_v33  ;;  %3952 = vst.msk [vmem:[#allocation3 + $0x149] sm:$0x1] %vm3923_vm12, %v14562_v47  ;;  %3953 = vst.msk [vmem:[#allocation3 + $0x161] sm:$0x1] %vm3923_vm12, %v14562_v47 }
 0x3b9   : > { %8741 = vmatprep.mubr.f32.mxu0 %v10753_v14  ;;  %3954 = vst.msk [vmem:[#allocation3 + $0x179] sm:$0x1] %vm3923_vm12, %v14562_v47  ;;  %3955 = vst.msk [vmem:[#allocation3 + $0x191] sm:$0x1] %vm3923_vm12, %v14562_v47 }
 0x3bc   : > { %8742 = vmatmul.mubr.f32.gmra.mrb[8].mxu0 %v10783_v15 }
 0x3bd   : > { %8744 = vmatprep.mubr.f32.mxu0 %v10849_v10 }
 0x3c0   : > { %8745 = vmatmul.mubr.f32.gmra.mrb[10].mxu0 %v10879_v24 }
 0x3c1   : > { %8747 = vmatprep.mubr.f32.mxu0 %v10945_v43 }
 0x3c4   : > { %8748 = vmatmul.mubr.f32.gmra.mrb[12].mxu0 %v10975_v45 }
 0x3c5   : > { %8750 = vmatprep.mubr.f32.mxu0 %v11031_v18 }
 0x3c8   : > { %8751 = vmatmul.mubr.f32.gmra.mrb[14].mxu0 %v14465_v0 }
 0x3c9   : > { %8753 = vmatprep.mubr.f32.mxu0 %v14466_v29 }
 0x3cc   : > { %8754 = vmatmul.mubr.f32.gmra.mrb[16].mxu0 %v14467_v27 }
 0x3cd   : > { %8756 = vmatprep.mubr.f32.mxu0 %v14548_v40 }
 0x3d0   : > { %8757 = vmatmul.mubr.f32.gmra.mrb[18].mxu0 %v14549_v50 }
 0x3d1   : > { %8759 = vmatprep.mubr.f32.mxu0 %v14550_v34 }
 0x3d4   : > { %8760 = vmatmul.mubr.f32.gmra.mrb[20].mxu0 %v14551_v11 }
 0x3d5   : > { %8762 = vmatprep.mubr.f32.mxu0 %v14552_v35 }
 0x3d8   : > { %8763 = vmatmul.mubr.f32.gmra.mrb[22].mxu0 %v14553_v7 }
 0x3d9   : > { %8765 = vmatprep.mubr.f32.mxu0 %v14554_v54 }
 0x3dc   : > { %8766 = vmatmul.mubr.f32.gmra.mrb[24].mxu0 %v14555_v28 }
 0x3dd   : > { %8768 = vmatprep.mubr.f32.mxu0 %v14556_v48 }
 0x3e0   : > { %8769 = vmatmul.mubr.f32.gmra.mrb[26].mxu0 %v14557_v19 }
 0x3e1   : > { %8771 = vmatprep.mubr.f32.mxu0 %v14558_v13 }
 0x3e4   : > { %8772 = vmatmul.mubr.f32.gmra.mrb[28].mxu0 %v14559_v9 }
 0x3e5   : > { %8774 = vmatprep.mubr.f32.mxu0 %v14560_v41 }
 0x3e8   : > { %8775 = vmatmul.mubr.f32.gmra.mrb[30].mxu0 %v14561_v46 }
 0x47f   : > { %v8731_v21 = vpop.f32.mrb[0].mxu0 }
 0x480   : > { %v9363_v63 = vadd.f32 %v8731_v21, %v11935_v17  ;;  %v3660_v58 = vpop.f32.mrb[1].mxu0 }
 0x481   : > { %v9364_v25 = vadd.f32 %v11935_v17, %v3660_v58 }
 0x482   : > { %v3851_v42 = vmul.f32 0.01, %v9363_v63 }
 0x483   : > { %v3850_v33 = vmul.f32 0.01, %v9364_v25  ;;  %v8734_v14 = vpop.f32.mrb[2].mxu0 }
 0x484   : > { %v3883_v15 = vmax.f32 %v9363_v63, %v3851_v42  ;;  %v9365_v10 = vadd.f32 %v8734_v14, %v11935_v17  ;;  %v3672_v24 = vpop.f32.mrb[3].mxu0 }
 0x485   : > { %v3882_v43 = vmax.f32 %v9364_v25, %v3850_v33  ;;  %v9366_v45 = vadd.f32 %v11935_v17, %v3672_v24 }
 0x486   : > { %3957 = vst.msk [vmem:[#allocation3 + $0x21] sm:$0xff] %vm1675_vm3, %v3883_v15  ;;  %v3853_v18 = vmul.f32 0.01, %v9365_v10 }
 0x487   : > { %3956 = vst.msk [vmem:[#allocation3 + $0x19] sm:$0xff] %vm1675_vm3, %v3882_v43  ;;  %v3852_v0 = vmul.f32 0.01, %v9366_v45  ;;  %v8737_v29 = vpop.f32.mrb[4].mxu0 }
 0x488   : > { %v3885_v27 = vmax.f32 %v9365_v10, %v3853_v18  ;;  %v9367_v32 = vadd.f32 %v8737_v29, %v11935_v17  ;;  %v3684_v61 = vpop.f32.mrb[5].mxu0 }
 0x489   : > { %v3884_v44 = vmax.f32 %v9366_v45, %v3852_v0  ;;  %v9368_v16 = vadd.f32 %v11935_v17, %v3684_v61 }
 0x48a   : > { %3959 = vst.msk [vmem:[#allocation3 + $0x39] sm:$0xff] %vm1675_vm3, %v3885_v27  ;;  %v3855_v23 = vmul.f32 0.01, %v9367_v32 }
 0x48b   : > { %3958 = vst.msk [vmem:[#allocation3 + $0x31] sm:$0xff] %vm1675_vm3, %v3884_v44  ;;  %v3854_v31 = vmul.f32 0.01, %v9368_v16  ;;  %v8740_v60 = vpop.f32.mrb[6].mxu0 }
 0x48c   : > { %v3887_v4 = vmax.f32 %v9367_v32, %v3855_v23  ;;  %v9369_v38 = vadd.f32 %v8740_v60, %v11935_v17  ;;  %v3696_v2 = vpop.f32.mrb[7].mxu0 }
 0x48d   : > { %v3886_v20 = vmax.f32 %v9368_v16, %v3854_v31  ;;  %v9370_v22 = vadd.f32 %v11935_v17, %v3696_v2  ;;  %v4023_v62 = vld [vmem:[#allocation3 + $0x21] sm:$0xff] }
 0x48e   : > { %3961 = vst.msk [vmem:[#allocation3 + $0x51] sm:$0xff] %vm1675_vm3, %v3887_v4  ;;  %v3857_v8 = vmul.f32 0.01, %v9369_v38  ;;  %4315 = vrot.lane.b32.xlu1 %v4023_v62, %s9878_s10  ;;  %v4022_v12 = vld [vmem:[#allocation3 + $0x19] sm:$0xff]  ;;  %v4055_v57 = vld [vmem:[#allocation3 + $0x22] sm:$0xff] }
 0x48f   : > { %3960 = vst.msk [vmem:[#allocation3 + $0x49] sm:$0xff] %vm1675_vm3, %v3886_v20  ;;  %v3856_v3 = vmul.f32 0.01, %v9370_v22  ;;  %v8743_v37 = vpop.f32.mrb[8].mxu0  ;;  %4313 = vrot.lane.b32.xlu0 %v4022_v12, %s9878_s10  ;;  %v4054_v56 = vld [vmem:[#allocation3 + $0x1a] sm:$0xff] }
 0x490   : > { %v3889_v53 = vmax.f32 %v9369_v38, %v3857_v8  ;;  %v9371_v49 = vadd.f32 %v8743_v37, %v11935_v17  ;;  %v3708_v59 = vpop.f32.mrb[9].mxu0 }
 0x491   : > { %v3888_v55 = vmax.f32 %v9370_v22, %v3856_v3  ;;  %v9372_v39 = vadd.f32 %v11935_v17, %v3708_v59  ;;  %v4119_v34 = vld [vmem:[#allocation3 + $0x39] sm:$0xff] }
 0x492   : > { %3963 = vst.msk [vmem:[#allocation3 + $0x69] sm:$0xff] %vm1675_vm3, %v3889_v53  ;;  %v3859_v26 = vmul.f32 0.01, %v9371_v49  ;;  %4443 = vrot.lane.b32.xlu1 %v4055_v57, %s9881_s13  ;;  %v11961_v40 = vld [vmem:[#allocation3 + $0x38] sm:$0xff]  ;;  %v11990_v2 = vld [vmem:[#allocation3 + $0x30] sm:$0xff] }
 0x493   : > { %3962 = vst.msk [vmem:[#allocation3 + $0x61] sm:$0xff] %vm1675_vm3, %v3888_v55  ;;  %v3858_v52 = vmul.f32 0.01, %v9372_v39  ;;  %v8746_v30 = vpop.f32.mrb[10].mxu0  ;;  %4441 = vrot.lane.b32.xlu0 %v4054_v56, %s9881_s13  ;;  %v4024_v13 = vld [vmem:[#allocation3 + $0x31] sm:$0xff]  ;;  %v4151_v15 = vld [vmem:[#allocation3 + $0x3a] sm:$0xff] }
 0x494   : > { %v3891_v51 = vmax.f32 %v9371_v49, %v3859_v26  ;;  %v9373_v5 = vadd.f32 %v8746_v30, %v11935_v17  ;;  %v3720_v36 = vpop.f32.mrb[11].mxu0  ;;  %v4150_v33 = vld [vmem:[#allocation3 + $0x32] sm:$0xff] }
 0x495   : > { %v3890_v6 = vmax.f32 %v9372_v39, %v3858_v52  ;;  %v9374_v1 = vadd.f32 %v11935_v17, %v3720_v36  ;;  %v4121_v4 = vld [vmem:[#allocation3 + $0x51] sm:$0xff] }
 0x496   : > { %3965 = vst.msk [vmem:[#allocation3 + $0x81] sm:$0xff] %vm1675_vm3, %v3891_v51  ;;  %v3861_v50 = vmul.f32 0.01, %v9373_v5  ;;  %4571 = vrot.lane.b32.xlu1 %v11961_v40, %s9883_s15  ;;  %v4248_v53 = vld [vmem:[#allocation3 + $0x52] sm:$0xff] }
 0x497   : > { %3964 = vst.msk [vmem:[#allocation3 + $0x79] sm:$0xff] %vm1675_vm3, %v3890_v6  ;;  %v3860_v11 = vmul.f32 0.01, %v9374_v1  ;;  %v8749_v35 = vpop.f32.mrb[12].mxu0  ;;  %4699 = vrot.lane.b32.xlu0 %v4119_v34, %s9885_s17  ;;  %v12010_v36 = vld [vmem:[%s14046_s3] sm:$0xff]  ;;  %v12015_v6 = vld [vmem:[%s14046_s3 + $0x8] sm:$0xff] }
 0x498   : > { %v3893_v7 = vmax.f32 %v9373_v5, %v3861_v50  ;;  %v9375_v54 = vadd.f32 %v8749_v35, %v11935_v17  ;;  %v3732_v28 = vpop.f32.mrb[13].mxu0  ;;  %v14227_v35 = vand.u32 4294901760, %v12015_v6 }
 0x499   : > { %v3892_v48 = vmax.f32 %v9374_v1, %v3860_v11  ;;  %v9376_v19 = vadd.f32 %v11935_v17, %v3732_v28  ;;  %v14228_v11 = vand.u32 4294901760, %v12010_v36 }
 0x49a   : > { %3967 = vst.msk [vmem:[#allocation3 + $0x99] sm:$0xff] %vm1675_vm3, %v3893_v7  ;;  %v3863_v9 = vmul.f32 0.01, %v9375_v54  ;;  %4317 = vrot.lane.b32.xlu1 %v4024_v13, %s9878_s10 }
 0x49b   : > { %3966 = vst.msk [vmem:[#allocation3 + $0x91] sm:$0xff] %vm1675_vm3, %v3892_v48  ;;  %v3862_v41 = vmul.f32 0.01, %v9376_v19  ;;  %v8752_v46 = vpop.f32.mrb[14].mxu0  ;;  %4319 = vrot.lane.b32.xlu0 %v4119_v34, %s9878_s10  ;;  %v12027_v48 = vpack.c.bf16 %v14227_v35, %v14228_v11 }
 0x49c   : > { %v3895_v21 = vmax.f32 %v9375_v54, %v3863_v9  ;;  %v9377_v63 = vadd.f32 %v8752_v46, %v11935_v17  ;;  %v3744_v58 = vpop.f32.mrb[15].mxu0  ;;  %v12034_v9 = vld [vmem:[%s14046_s3 + $0x10] sm:$0xff]  ;;  %v5731_v46 = vld [vmem:[%s14046_s3 + $0x48] sm:$0xf] }
 0x49d   : > { %v3894_v25 = vmax.f32 %v9376_v19, %v3862_v41  ;;  %v9378_v42 = vadd.f32 %v11935_v17, %v3744_v58  ;;  %14563 = vst [vmem:[#allocation55_spill] sm:$0xff] %v12027_v48  ;;  %v12039_v41 = vld [vmem:[%s14046_s3 + $0x18] sm:$0xff]  ;;  %9353 = vmatprep.subr.bf16.mxu1 %v12027_v48  ;;  %9234 = vmatprep.subr.bf16.mxu0 %v12027_v48 }
 0x49e   : > { %3969 = vst.msk [vmem:[#allocation3 + $0xb1] sm:$0xff] %vm1675_vm3, %v3895_v21  ;;  %v3865_v14 = vmul.f32 0.01, %v9377_v63  ;;  %4825 = vrot.lane.b32.xlu1 %v4150_v33, %s9887_s16  ;;  %9358 = vmatpush3.bf16.msra.mxu1 %v12027_v48 }
 0x49f   : > { %3968 = vst.msk [vmem:[#allocation3 + $0xa9] sm:$0xff] %vm1675_vm3, %v3894_v25  ;;  %v3864_v10 = vmul.f32 0.01, %v9378_v42  ;;  %v8755_v24 = vpop.f32.mrb[16].mxu0  ;;  %4827 = vrot.lane.b32.xlu0 %v4151_v15, %s9887_s16  ;;  %v14226_v25 = vand.u32 4294901760, %v12034_v9  ;;  %9236 = vmatpush3.bf16.msra.mxu0 %v12027_v48 }
 0x4a0   : > { %v3897_v43 = vmax.f32 %v9377_v63, %v3865_v14  ;;  %v9379_v45 = vadd.f32 %v8755_v24, %v11935_v17  ;;  %v3756_v18 = vpop.f32.mrb[17].mxu0 }
 0x4a1   : > { %v3896_v0 = vmax.f32 %v9378_v42, %v3864_v10  ;;  %v9380_v29 = vadd.f32 %v11935_v17, %v3756_v18  ;;  %v14225_v42 = vand.u32 4294901760, %v12039_v41  ;;  %v12057_v10 = vld [vmem:[%s14046_s3 + $0x40] sm:$0xff]  ;;  %v12071_v18 = vsel %vm2015_vm4, %v5731_v46, 0  ;;  %v12177_v46 = vpop.permute.xlu1 %5339 }
 0x4a2   : > { %3971 = vst.msk [vmem:[#allocation3 + $0xc9] sm:$0xff] %vm1675_vm3, %v3897_v43  ;;  %v3867_v27 = vmul.f32 0.01, %v9379_v45  ;;  %4445 = vrot.lane.b32.xlu1 %v4150_v33, %s9881_s13  ;;  %v12062_v43 = vld [vmem:[#allocation3 + $0x50] sm:$0xff]  ;;  %vm3916_vm4 = vcmask 58368  }
 0x4a3   : > { %3970 = vst.msk [vmem:[#allocation3 + $0xc1] sm:$0xff] %vm1675_vm3, %v3896_v0  ;;  %v3866_v32 = vmul.f32 0.01, %v9380_v29  ;;  %v8758_v61 = vpop.f32.mrb[18].mxu0  ;;  %4447 = vrot.lane.b32.xlu0 %v4151_v15, %s9881_s13  ;;  %v12050_v15 = vld [vmem:[#allocation3 + $0x48] sm:$0xff] }
 0x4a4   : > { %v3899_v44 = vmax.f32 %v9379_v45, %v3867_v27  ;;  %v9381_v16 = vadd.f32 %v8758_v61, %v11935_v17  ;;  %v3768_v23 = vpop.f32.mrb[19].mxu0  ;;  %v12068_v45 = vpack.c.bf16 %v14225_v42, %v14226_v25  ;;  %v12079_v27 = vld [vmem:[%s14046_s3 + $0x20] sm:$0xff]  ;;  %3921 = vst.msk [vmem:[#allocation3 + $0x1a8] sm:$0x3] %vm3916_vm4, %v14562_v47  ;;  %3917 = vst.msk [vmem:[#allocation3 + $0x10] sm:$0x3] %vm3916_vm4, %v14562_v47 }
 0x4a5   : > { %v3898_v31 = vmax.f32 %v9380_v29, %v3866_v32  ;;  %v9382_v60 = vadd.f32 %v11935_v17, %v3768_v23  ;;  %v12084_v32 = vld [vmem:[%s14046_s3 + $0x28] sm:$0xff]  ;;  %v14224_v23 = vand.u32 4294901760, %v12079_v27 }
 0x4a6   : > { %3973 = vst.msk [vmem:[#allocation3 + $0xe1] sm:$0xff] %vm1675_vm3, %v3899_v44  ;;  %v3869_v38 = vmul.f32 0.01, %v9381_v16  ;;  %4703 = vrot.lane.b32.xlu1 %v4121_v4, %s9885_s17  ;;  %14564 = vst [vmem:[#allocation57_spill] sm:$0xff] %v12068_v45  ;;  %9354 = vmatprep.subr.bf16.mxu1 %v12068_v45  ;;  %v12295_v11 = vld [vmem:[#allocation3 + $0xa8] sm:$0xff] }
 0x4a7   : > { %3972 = vst.msk [vmem:[#allocation3 + $0xd9] sm:$0xff] %vm1675_vm3, %v3898_v31  ;;  %v3868_v20 = vmul.f32 0.01, %v9382_v60  ;;  %v8761_v22 = vpop.f32.mrb[20].mxu0  ;;  %4569 = vrot.lane.b32.xlu0 %v11990_v2, %s9883_s15  ;;  %v14223_v31 = vand.u32 4294901760, %v12084_v32  ;;  %9238 = vmatprep.subr.bf16.mxu0 %v12068_v45 }
 0x4a8   : > { %v3901_v62 = vmax.f32 %v9381_v16, %v3869_v38  ;;  %v9383_v8 = vadd.f32 %v8761_v22, %v11935_v17  ;;  %v3780_v12 = vpop.f32.mrb[21].mxu0  ;;  %9359 = vmatpush3.bf16.msra.mxu1 %v12068_v45  ;;  %9240 = vmatpush3.bf16.msra.mxu0 %v12068_v45  ;;  %v14220_v38 = vand.u32 4294901760, %v12057_v10 }
 0x4a9   : > { %v3900_v3 = vmax.f32 %v9382_v60, %v3868_v20  ;;  %v9384_v37 = vadd.f32 %v11935_v17, %v3780_v12  ;;  %v14219_v20 = vand.u32 4294901760, %v12071_v18 }
 0x4aa   : > { %3975 = vst.msk [vmem:[#allocation3 + $0xf9] sm:$0xff] %vm1675_vm3, %v3901_v62  ;;  %v3871_v49 = vmul.f32 0.01, %v9383_v8  ;;  %5211 = vrot.lane.b32.xlu1 %v4248_v53, %s9888_s9  ;;  %v12103_v62 = vpack.c.bf16 %v14223_v31, %v14224_v23 }
 0x4ab   : > { %3974 = vst.msk [vmem:[#allocation3 + $0xf1] sm:$0xff] %vm1675_vm3, %v3900_v3  ;;  %v3870_v59 = vmul.f32 0.01, %v9384_v37  ;;  %v8764_v55 = vpop.f32.mrb[22].mxu0  ;;  %4697 = vrot.lane.b32.xlu0 %v4024_v13, %s9885_s17  ;;  %v12111_v3 = vld [vmem:[%s14046_s3 + $0x30] sm:$0xff] }
 0x4ac   : > { %v3903_v39 = vmax.f32 %v9383_v8, %v3871_v49  ;;  %v9385_v57 = vadd.f32 %v8764_v55, %v11935_v17  ;;  %v3792_v26 = vpop.f32.mrb[23].mxu0  ;;  %14565 = vst [vmem:[#allocation59_spill] sm:$0xff] %v12103_v62  ;;  %9355 = vmatprep.subr.bf16.mxu1 %v12103_v62  ;;  %v14222_v55 = vand.u32 4294901760, %v12111_v3  ;;  %9242 = vmatprep.subr.bf16.mxu0 %v12103_v62 }
 0x4ad   : > { %v3902_v56 = vmax.f32 %v9384_v37, %v3870_v59  ;;  %v9386_v52 = vadd.f32 %v11935_v17, %v3792_v26  ;;  %v12116_v37 = vld [vmem:[%s14046_s3 + $0x38] sm:$0xff]  ;;  %9360 = vmatpush3.bf16.msra.mxu1 %v12103_v62  ;;  %9244 = vmatpush3.bf16.msra.mxu0 %v12103_v62 }
 0x4ae   : > { %3977 = vst.msk [vmem:[#allocation3 + $0x111] sm:$0xff] %vm1675_vm3, %v3903_v39  ;;  %v3873_v30 = vmul.f32 0.01, %v9385_v57  ;;  %4323 = vrot.lane.b32.xlu1 %v4121_v4, %s9878_s10  ;;  %v14221_v39 = vand.u32 4294901760, %v12116_v37 }
 0x4af   : > { %3976 = vst.msk [vmem:[#allocation3 + $0x109] sm:$0xff] %vm1675_vm3, %v3902_v56  ;;  %v3872_v51 = vmul.f32 0.01, %v9386_v52  ;;  %v8767_v5 = vpop.f32.mrb[24].mxu0  ;;  %5083 = vrot.lane.b32.xlu0 %v4121_v4, %s9889_s26  ;;  %v4215_v56 = vld [vmem:[#allocation3 + $0x49] sm:$0xff] }
 0x4b0   : > { %v3905_v1 = vmax.f32 %v9385_v57, %v3873_v30  ;;  %v9387_v50 = vadd.f32 %v8767_v5, %v11935_v17  ;;  %v3804_v34 = vpop.f32.mrb[25].mxu0 }
 0x4b1   : > { %v3904_v7 = vmax.f32 %v9386_v52, %v3872_v51  ;;  %v9388_v54 = vadd.f32 %v11935_v17, %v3804_v34  ;;  %v12130_v52 = vpack.c.bf16 %v14219_v20, %v14220_v38  ;;  %v4123_v34 = vld [vmem:[#allocation3 + $0x69] sm:$0xff]  ;;  %v3991_v38 = vld [vmem:[#allocation3 + $0x20] sm:$0xff] }
 0x4b2   : > { %3979 = vst.msk [vmem:[#allocation3 + $0x129] sm:$0xff] %vm1675_vm3, %v3905_v1  ;;  %v3875_v28 = vmul.f32 0.01, %v9387_v50  ;;  %4831 = vrot.lane.b32.xlu1 %v4248_v53, %s9887_s16 }
 0x4b3   : > { %3978 = vst.msk [vmem:[#allocation3 + $0x121] sm:$0xff] %vm1675_vm3, %v3904_v7  ;;  %v3874_v19 = vmul.f32 0.01, %v9388_v54  ;;  %v8770_v13 = vpop.f32.mrb[26].mxu0  ;;  %4451 = vrot.lane.b32.xlu0 %v4248_v53, %s9881_s13  ;;  %14566 = vst [vmem:[#allocation28_spill] sm:$0xff] %v12130_v52  ;;  %v4250_v7 = vld [vmem:[#allocation3 + $0x6a] sm:$0xff] }
 0x4b4   : > { %v3907_v21 = vmax.f32 %v9387_v50, %v3875_v28  ;;  %v9389_v63 = vadd.f32 %v8770_v13, %v11935_v17  ;;  %v3816_v58 = vpop.f32.mrb[27].mxu0  ;;  %v4152_v50 = vld [vmem:[#allocation3 + $0x4a] sm:$0xff]  ;;  %v4154_v13 = vld [vmem:[#allocation3 + $0x62] sm:$0xff] }
 0x4b5   : > { %v3906_v33 = vmax.f32 %v9388_v54, %v3874_v19  ;;  %v9390_v14 = vadd.f32 %v11935_v17, %v3816_v58  ;;  %v12161_v54 = vld [vmem:[#allocation3 + $0x60] sm:$0xff]  ;;  %v12166_v28 = vld [vmem:[#allocation3 + $0x68] sm:$0xff] }
 0x4b6   : > { %3981 = vst.msk [vmem:[#allocation3 + $0x141] sm:$0xff] %vm1675_vm3, %v3907_v21  ;;  %v3877_v24 = vmul.f32 0.01, %v9389_v63  ;;  %4953 = vrot.lane.b32.xlu1 %v12050_v15, %s9890_s23  ;;  %v4217_v19 = vld [vmem:[#allocation3 + $0x61] sm:$0xff]  ;;  %v12180_v21 = vpop.permute.xlu0 %5337 }
 0x4b7   : > { %3980 = vst.msk [vmem:[#allocation3 + $0x139] sm:$0xff] %vm1675_vm3, %v3906_v33  ;;  %v3876_v0 = vmul.f32 0.01, %v9390_v14  ;;  %v8773_v29 = vpop.f32.mrb[28].mxu0  ;;  %4955 = vrot.lane.b32.xlu0 %v12062_v43, %s9890_s23  ;;  %v4125_v58 = vld [vmem:[#allocation3 + $0x81] sm:$0xff] }
 0x4b8   : > { %v3909_v61 = vmax.f32 %v9389_v63, %v3877_v24  ;;  %v9391_v44 = vadd.f32 %v8773_v29, %v11935_v17  ;;  %v3828_v16 = vpop.f32.mrb[29].mxu0  ;;  %v12184_v63 = vpop.permute.xlu1 %5343  ;;  %v12197_v29 = vld [vmem:[#allocation3 + $0x78] sm:$0xff] }
 0x4b9   : > { %v3908_v60 = vmax.f32 %v9390_v14, %v3876_v0  ;;  %v9392_v4 = vadd.f32 %v11935_v17, %v3828_v16  ;;  %v4252_v14 = vld [vmem:[#allocation3 + $0x82] sm:$0xff] }
 0x4ba   : > { %3983 = vst.msk [vmem:[#allocation3 + $0x159] sm:$0xff] %vm1675_vm3, %v3909_v61  ;;  %v3879_v22 = vmul.f32 0.01, %v9391_v44  ;;  %4573 = vrot.lane.b32.xlu1 %v12050_v15, %s9883_s15  ;;  %v12186_v33 = vpop.permute.xlu0 %5341  ;;  %v12206_v16 = vld [vmem:[#allocation3 + $0x80] sm:$0xff] }
 0x4bb   : > { %3982 = vst.msk [vmem:[#allocation3 + $0x151] sm:$0xff] %vm1675_vm3, %v3908_v60  ;;  %v3878_v8 = vmul.f32 0.01, %v9392_v4  ;;  %v8776_v12 = vpop.f32.mrb[30].mxu0  ;;  %4575 = vrot.lane.b32.xlu0 %v12062_v43, %s9883_s15 }
 0x4bc   : > { %v3911_v53 = vmax.f32 %v9391_v44, %v3879_v22  ;;  %v9393_v49 = vadd.f32 %v8776_v12, %v11935_v17  ;;  %v3840_v59 = vpop.f32.mrb[31].mxu0  ;;  %v12191_v24 = vpop.permute.xlu1 %5347  ;;  %v4219_v22 = vld [vmem:[#allocation3 + $0x79] sm:$0xff] }
 0x4bd   : > { %v3910_v57 = vmax.f32 %v9392_v4, %v3878_v8  ;;  %v9394_v26 = vadd.f32 %v11935_v17, %v3840_v59  ;;  %v12138_v17 = vpack.c.bf16 %v14221_v39, %v14222_v55  ;;  %v4158_v39 = vld [vmem:[#allocation3 + $0x92] sm:$0xff] }
 0x4be   : > { %3985 = vst.msk [vmem:[#allocation3 + $0x171] sm:$0xff] %vm1675_vm3, %v3911_v53  ;;  %v3881_v30 = vmul.f32 0.01, %v9393_v49  ;;  %5081 = vrot.lane.b32.xlu1 %v4215_v56, %s9889_s26  ;;  %v12194_v0 = vpop.permute.xlu0 %5345  ;;  %v4156_v53 = vld [vmem:[#allocation3 + $0x7a] sm:$0xff] }
 0x4bf   : > { %14567 = vst [vmem:[#allocation29_spill] sm:$0xff] %v12138_v17  ;;  %3984 = vst.msk [vmem:[#allocation3 + $0x169] sm:$0xff] %vm1675_vm3, %v3910_v57  ;;  %v3880_v51 = vmul.f32 0.01, %v9394_v26  ;;  %4321 = vrot.lane.b32.xlu0 %v4215_v56, %s9878_s10  ;;  %9356 = vmatprep.subr.bf16.mxu1 %v12138_v17 }
 0x4c0   : > { %v3913_v5 = vmax.f32 %v9393_v49, %v3881_v30  ;;  %9246 = vmatprep.subr.bf16.mxu0 %v12138_v17  ;;  %9361 = vmatpush3.bf16.msra.mxu1 %v12138_v17  ;;  %v12201_v61 = vpop.permute.xlu1 %5351 }
 0x4c1   : > { %v3912_v1 = vmax.f32 %v9394_v26, %v3880_v51  ;;  %9248 = vmatpush3.bf16.msra.mxu0 %v12138_v17  ;;  %9357 = vmatprep.subr.bf16.mxu1 %v12130_v52 }
 0x4c2   : > { %3987 = vst.msk [vmem:[#allocation3 + $0x189] sm:$0xff] %vm1675_vm3, %v3913_v5  ;;  %4701 = vrot.lane.b32.xlu1 %v4215_v56, %s9885_s17  ;;  %9250 = vmatprep.subr.bf16.mxu0 %v12130_v52  ;;  %v12203_v44 = vpop.permute.xlu0 %5349  ;;  %v4127_v56 = vld [vmem:[#allocation3 + $0x99] sm:$0xff] }
 0x4c3   : > { %3986 = vst.msk [vmem:[#allocation3 + $0x181] sm:$0xff] %vm1675_vm3, %v3912_v1  ;;  %4829 = vrot.lane.b32.xlu0 %v4152_v50, %s9887_s16  ;;  %v4254_v5 = vld [vmem:[#allocation3 + $0x9a] sm:$0xff] }
 0x4c4   : > { %9362 = vmatpush3.bf16.msra.mxu1 %v12130_v52  ;;  %v12212_v60 = vpop.permute.xlu1 %5355 }
 0x4c5   : > { %9252 = vmatpush3.bf16.msra.mxu0 %v12130_v52 }
 0x4c6   : > { %5209 = vrot.lane.b32.xlu1 %v4152_v50, %s9888_s9  ;;  %v12216_v4 = vpop.permute.xlu0 %5353 }
 0x4c7   : > { %4449 = vrot.lane.b32.xlu0 %v4152_v50, %s9881_s13 }
 0x4ca   : > { %4707 = vrot.lane.b32.xlu1 %v4123_v34, %s9885_s17 }
 0x4cb   : > { %5087 = vrot.lane.b32.xlu0 %v4123_v34, %s9889_s26 }
 0x4ce   : > { %5215 = vrot.lane.b32.xlu1 %v4250_v7, %s9888_s9 }
 0x4cf   : > { %4455 = vrot.lane.b32.xlu0 %v4250_v7, %s9881_s13 }
 0x4d2   : > { %4327 = vrot.lane.b32.xlu1 %v4123_v34, %s9878_s10  ;;  %v12239_v34 = vld [vmem:[#allocation3 + $0x90] sm:$0xff] }
 0x4d3   : > { %4957 = vrot.lane.b32.xlu0 %v12161_v54, %s9890_s23 }
 0x4d6   : > { %4835 = vrot.lane.b32.xlu1 %v4250_v7, %s9887_s16 }
 0x4d7   : > { %4959 = vrot.lane.b32.xlu0 %v12166_v28, %s9890_s23 }
 0x4da   : > { %4577 = vrot.lane.b32.xlu1 %v12161_v54, %s9883_s15 }
 0x4db   : > { %4579 = vrot.lane.b32.xlu0 %v12166_v28, %s9883_s15 }
 0x4de   : > { %5085 = vrot.lane.b32.xlu1 %v4217_v19, %s9889_s26 }
 0x4df   : > { %4325 = vrot.lane.b32.xlu0 %v4217_v19, %s9878_s10 }
 0x4e2   : > { %4705 = vrot.lane.b32.xlu1 %v4217_v19, %s9885_s17 }
 0x4e3   : > { %4833 = vrot.lane.b32.xlu0 %v4154_v13, %s9887_s16 }
 0x4e6   : > { %5213 = vrot.lane.b32.xlu1 %v4154_v13, %s9888_s9 }
 0x4e7   : > { %4453 = vrot.lane.b32.xlu0 %v4154_v13, %s9881_s13  ;;  %v12248_v13 = vld [vmem:[#allocation3 + $0x98] sm:$0xff] }
 0x4ea   : > { %4711 = vrot.lane.b32.xlu1 %v4125_v58, %s9885_s17 }
 0x4eb   : > { %5091 = vrot.lane.b32.xlu0 %v4125_v58, %s9889_s26 }
 0x4ee   : > { %5219 = vrot.lane.b32.xlu1 %v4252_v14, %s9888_s9 }
 0x4ef   : > { %4459 = vrot.lane.b32.xlu0 %v4252_v14, %s9881_s13 }
 0x4f2   : > { %4331 = vrot.lane.b32.xlu1 %v4125_v58, %s9878_s10 }
 0x4f3   : > { %4961 = vrot.lane.b32.xlu0 %v12197_v29, %s9890_s23 }
 0x4f6   : > { %4839 = vrot.lane.b32.xlu1 %v4252_v14, %s9887_s16 }
 0x4f7   : > { %4963 = vrot.lane.b32.xlu0 %v12206_v16, %s9890_s23 }
 0x4fa   : > { %4581 = vrot.lane.b32.xlu1 %v12197_v29, %s9883_s15 }
 0x4fb   : > { %4583 = vrot.lane.b32.xlu0 %v12206_v16, %s9883_s15 }
 0x4fe   : > { %5089 = vrot.lane.b32.xlu1 %v4219_v22, %s9889_s26 }
 0x4ff   : > { %4329 = vrot.lane.b32.xlu0 %v4219_v22, %s9878_s10 }
 0x500   : > { %v4316_v8 = vpop.permute.xlu1 %4315 }
 0x501   : > { %v12220_v12 = vpop.permute.xlu0 %4313  ;;  %v5432_v55 = vsel %vm1675_vm3, %v3991_v38, %v4316_v8  ;;  %v4129_v8 = vld [vmem:[#allocation3 + $0xb1] sm:$0xff] }
 0x502   : > { %4709 = vrot.lane.b32.xlu1 %v4219_v22, %s9885_s17 }
 0x503   : > { %4837 = vrot.lane.b32.xlu0 %v4156_v53, %s9887_s16 }
 0x504   : > { %v4444_v49 = vpop.permute.xlu1 %4443 }
 0x505   : > { %v12224_v59 = vpop.permute.xlu0 %4441  ;;  %v5464_v31 = vsel %vm1741_vm6, %v5432_v55, %v4444_v49 }
 0x506   : > { %5217 = vrot.lane.b32.xlu1 %v4156_v53, %s9888_s9 }
 0x507   : > { %4457 = vrot.lane.b32.xlu0 %v4156_v53, %s9881_s13 }
 0x508   : > { %v4572_v57 = vpop.permute.xlu1 %4571 }
 0x509   : > { %v4700_v26 = vpop.permute.xlu0 %4699  ;;  %v5496_v42 = vsel %vm1807_vm8, %v5464_v31, %v4572_v57 }
 0x50a   : > { %4715 = vrot.lane.b32.xlu1 %v4127_v56, %s9885_s17 }
 0x50b   : > { %5095 = vrot.lane.b32.xlu0 %v4127_v56, %s9889_s26 }
 0x50c   : > { %v12230_v30 = vpop.permute.xlu1 %4317 }
 0x50d   : > { %v12232_v51 = vpop.permute.xlu0 %4319 }
 0x50e   : > { %5223 = vrot.lane.b32.xlu1 %v4254_v5, %s9888_s9 }
 0x50f   : > { %4463 = vrot.lane.b32.xlu0 %v4254_v5, %s9881_s13 }
 0x510   : > { %v12236_v1 = vpop.permute.xlu1 %4825 }
 0x511   : > { %v4828_v50 = vpop.permute.xlu0 %4827 }
 0x512   : > { %4335 = vrot.lane.b32.xlu1 %v4127_v56, %s9878_s10  ;;  %v4221_v56 = vld [vmem:[#allocation3 + $0x91] sm:$0xff] }
 0x513   : > { %4965 = vrot.lane.b32.xlu0 %v12239_v34, %s9890_s23 }
 0x514   : > { %v12243_v7 = vpop.permute.xlu1 %4445 }
 0x515   : > { %v12245_v19 = vpop.permute.xlu0 %4447 }
 0x516   : > { %4843 = vrot.lane.b32.xlu1 %v4254_v5, %s9887_s16 }
 0x517   : > { %4967 = vrot.lane.b32.xlu0 %v12248_v13, %s9890_s23 }
 0x518   : > { %v12252_v58 = vpop.permute.xlu1 %4703 }
 0x519   : > { %v4570_v14 = vpop.permute.xlu0 %4569 }
 0x51a   : > { %4585 = vrot.lane.b32.xlu1 %v12239_v34, %s9883_s15 }
 0x51b   : > { %4587 = vrot.lane.b32.xlu0 %v12248_v13, %s9883_s15 }
 0x51c   : > { %v5212_v22 = vpop.permute.xlu1 %5211 }
 0x51d   : > { %v4698_v53 = vpop.permute.xlu0 %4697 }
 0x51e   : > { %5093 = vrot.lane.b32.xlu1 %v4221_v56, %s9889_s26 }
 0x51f   : > { %4333 = vrot.lane.b32.xlu0 %v4221_v56, %s9878_s10 }
 0x520   : > { %v12260_v5 = vpop.permute.xlu1 %4323 }
 0x521   : > { %v5084_v20 = vpop.permute.xlu0 %5083 }
 0x522   : > { %4713 = vrot.lane.b32.xlu1 %v4221_v56, %s9885_s17  ;;  %v5528_v56 = vsel %vm1873_vm10, %v5496_v42, %v4700_v26  ;;  %v4256_v26 = vld [vmem:[#allocation3 + $0xb2] sm:$0xff] }
 0x523   : > { %4841 = vrot.lane.b32.xlu0 %v4158_v39, %s9887_s16  ;;  %v5561_v38 = vsel %vm5557_vm13, %v5528_v56, %v4828_v50  ;;  %v3990_v50 = vld [vmem:[#allocation3 + $0x18] sm:$0xff] }
 0x524   : > { %v12266_v23 = vpop.permute.xlu1 %4831 }
 0x525   : > { %v12269_v25 = vpop.permute.xlu0 %4451 }
 0x526   : > { %5221 = vrot.lane.b32.xlu1 %v4158_v39, %s9888_s9 }
 0x527   : > { %4461 = vrot.lane.b32.xlu0 %v4158_v39, %s9881_s13 }
 0x528   : > { %v4954_v35 = vpop.permute.xlu1 %4953 }
 0x529   : > { %v4956_v55 = vpop.permute.xlu0 %4955 }
 0x52a   : > { %v5594_v49 = vsel %vm5590_vm14, %v5561_v38, %v4956_v55  ;;  %4719 = vrot.lane.b32.xlu1 %v4129_v8, %s9885_s17 }
 0x52b   : > { %v5627_v31 = vsel %vm5623_vm15, %v5594_v49, %v5084_v20  ;;  %5099 = vrot.lane.b32.xlu0 %v4129_v8, %s9889_s26  ;;  %v5431_v20 = vsel %vm1675_vm3, %v3990_v50, %v12220_v12  ;;  %v12309_v50 = vld [vmem:[#allocation3 + $0xb0] sm:$0xff] }
 0x52c   : > { %v5660_v39 = vsel %vm5656_vm0, %v5627_v31, %v5212_v22  ;;  %v12280_v57 = vpop.permute.xlu1 %4573  ;;  %v5463_v22 = vsel %vm1741_vm6, %v5431_v20, %v12224_v59 }
 0x52d   : > { %v4576_v42 = vpop.permute.xlu0 %4575  ;;  %v5693_v56 = vsel %vm5689_vm1, %v5660_v39, %v12177_v46  ;;  %v5495_v49 = vsel %vm1807_vm8, %v5463_v22, %v4570_v14 }
 0x52e   : > { %5227 = vrot.lane.b32.xlu1 %v4256_v26, %s9888_s9  ;;  %v5750_v31 = vsel %vm5739_vm2, %v5693_v56, 0  ;;  %v5527_v46 = vsel %vm1873_vm10, %v5495_v49, %v4698_v53 }
 0x52f   : > { %4467 = vrot.lane.b32.xlu0 %v4256_v26, %s9881_s13  ;;  %v12302_v39 = vand.u32 4294901760, %v5750_v31  ;;  %v5560_v14 = vsel %vm5557_vm13, %v5527_v46, %v12236_v1 }
 0x530   : > { %v5082_v38 = vpop.permute.xlu1 %5081 }
 0x531   : > { %v12290_v55 = vpop.permute.xlu0 %4321  ;;  %v12319_v49 = vsub.f32 %v5750_v31, %v12302_v39 }
 0x532   : > { %4339 = vrot.lane.b32.xlu1 %v4129_v8, %s9878_s10  ;;  %v5593_v8 = vsel %vm5590_vm14, %v5560_v14, %v4954_v35  ;;  %v4223_v14 = vld [vmem:[#allocation3 + $0xa9] sm:$0xff] }
 0x533   : > { %4969 = vrot.lane.b32.xlu0 %v12295_v11, %s9890_s23  ;;  %v5626_v53 = vsel %vm5623_vm15, %v5593_v8, %v5082_v38  ;;  %14568 = vst [vmem:[#allocation32_spill] sm:$0xff] %v12319_v49  ;;  %v14239_v31 = vand.u32 4294901760, %v12319_v49 }
 0x534   : > { %v12300_v12 = vpop.permute.xlu1 %4701 }
 0x535   : > { %v12304_v59 = vpop.permute.xlu0 %4829 }
 0x536   : > { %4847 = vrot.lane.b32.xlu1 %v4256_v26, %s9887_s16 }
 0x537   : > { %4971 = vrot.lane.b32.xlu0 %v12309_v50, %s9890_s23 }
 0x538   : > { %v5210_v56 = vpop.permute.xlu1 %5209 }
 0x539   : > { %v5659_v20 = vsel %vm5656_vm0, %v5626_v53, %v5210_v56  ;;  %v12316_v22 = vpop.permute.xlu0 %4449  ;;  %v5434_v56 = vsel %vm1675_vm3, %v11961_v40, %v12232_v51 }
 0x53a   : > { %v5692_v1 = vsel %vm5689_vm1, %v5659_v20, %v12180_v21  ;;  %4589 = vrot.lane.b32.xlu1 %v12295_v11, %s9883_s15  ;;  %v5466_v52 = vsel %vm1741_vm6, %v5434_v56, %v12245_v19 }
 0x53b   : > { %v5747_v35 = vsel %vm5739_vm2, %v5692_v1, 0  ;;  %4591 = vrot.lane.b32.xlu0 %v12309_v50, %s9883_s15  ;;  %v5947_v1 = vsub.f32 %v12319_v49, %v14239_v31  ;;  %v5498_v62 = vsel %vm1807_vm8, %v5466_v52, %v4576_v42 }
 0x53c   : > { %v12328_v26 = vand.u32 4294901760, %v5747_v35  ;;  %v12330_v38 = vpop.permute.xlu1 %4707  ;;  %v5530_v31 = vsel %vm1873_vm10, %v5498_v62, %v12252_v58 }
 0x53d   : > { %v5088_v46 = vpop.permute.xlu0 %5087  ;;  %v5948_v48 = vand.u32 4294901760, %v5947_v1  ;;  %v5563_v52 = vsel %vm5557_vm13, %v5530_v31, %v12266_v23  ;;  %v4225_v1 = vld [vmem:[#allocation3 + $0xc1] sm:$0xff] }
 0x53e   : > { %5097 = vrot.lane.b32.xlu1 %v4223_v14, %s9889_s26  ;;  %v12335_v21 = vsub.f32 %v5747_v35, %v12328_v26  ;;  %v4160_v35 = vld [vmem:[#allocation3 + $0xaa] sm:$0xff] }
 0x53f   : > { %4337 = vrot.lane.b32.xlu0 %v4223_v14, %s9878_s10  ;;  %v12377_v23 = vld [vmem:[#allocation3 + $0xc8] sm:$0xff] }
 0x540   : > { %14569 = vst [vmem:[#allocation19_spill] sm:$0xff] %v12335_v21  ;;  %v5216_v8 = vpop.permute.xlu1 %5215  ;;  %v14240_v53 = vand.u32 4294901760, %v12335_v21 }
 0x541   : > { %v12342_v20 = vpop.permute.xlu0 %4455 }
 0x542   : > { %4717 = vrot.lane.b32.xlu1 %v4223_v14, %s9885_s17  ;;  %v5937_v17 = vsub.f32 %v12335_v21, %v14240_v53  ;;  %v12365_v14 = vld [vmem:[#allocation3 + $0xc0] sm:$0xff]  ;;  %v14574_v21 = vld [vmem:[#allocation20_spill] sm:$0xff] }
 0x543   : > { %4845 = vrot.lane.b32.xlu0 %v4160_v35, %s9887_s16 }
 0x544   : > { %v12355_v40 = vpop.permute.xlu1 %4327  ;;  %v5938_v51 = vand.u32 4294901760, %v5937_v17 }
 0x545   : > { %v4958_v45 = vpop.permute.xlu0 %4957 }
 0x546   : > { %5225 = vrot.lane.b32.xlu1 %v4160_v35, %s9888_s9  ;;  %8800 = vmatprep.mubr.f32.mxu1 %v5938_v51 }
 0x547   : > { %4465 = vrot.lane.b32.xlu0 %v4160_v35, %s9881_s13  ;;  %8801 = vmatmul.mubr.f32.vlgmr.msra.gmra.mrb[0].mxu1 %v5948_v48 }
 0x548   : > { %v12361_v19 = vpop.permute.xlu1 %4835 }
 0x549   : > { %v4960_v42 = vpop.permute.xlu0 %4959 }
 0x54a   : > { %v5596_v17 = vsel %vm5590_vm14, %v5563_v52, %v4960_v42  ;;  %4593 = vrot.lane.b32.xlu1 %v12365_v14, %s9883_s15 }
 0x54b   : > { %v5629_v62 = vsel %vm5623_vm15, %v5596_v17, %v5088_v46  ;;  %4973 = vrot.lane.b32.xlu0 %v12365_v14, %s9890_s23  ;;  %v5433_v46 = vsel %vm1675_vm3, %v11990_v2, %v12230_v30  ;;  %v4257_v17 = vld [vmem:[#allocation3 + $0xc2] sm:$0xff] }
 0x54c   : > { %v5662_v48 = vsel %vm5656_vm0, %v5629_v62, %v5216_v8  ;;  %v12374_v58 = vpop.permute.xlu1 %4577  ;;  %v5465_v8 = vsel %vm1741_vm6, %v5433_v46, %v12243_v7  ;;  %v4226_v62 = vld [vmem:[#allocation3 + $0xc9] sm:$0xff] }
 0x54d   : > { %v4580_v56 = vpop.permute.xlu0 %4579  ;;  %v5695_v31 = vsel %vm5689_vm1, %v5662_v48, %v12184_v63  ;;  %v5497_v52 = vsel %vm1807_vm8, %v5465_v8, %v12280_v57 }
 0x54e   : > { %5101 = vrot.lane.b32.xlu1 %v4225_v1, %s9889_s26  ;;  %v5756_v42 = vsel %vm5739_vm2, %v5695_v31, 0  ;;  %v5529_v63 = vsel %vm1873_vm10, %v5497_v52, %v12300_v12 }
 0x54f   : > { %4975 = vrot.lane.b32.xlu0 %v12377_v23, %s9890_s23  ;;  %v12400_v30 = vand.u32 4294901760, %v5756_v42  ;;  %v5562_v57 = vsel %vm5557_vm13, %v5529_v63, %v12304_v59 }
 0x550   : > { %v5086_v35 = vpop.permute.xlu1 %5085  ;;  %v5595_v48 = vsel %vm5590_vm14, %v5562_v57, %v4958_v45 }
 0x551   : > { %v12388_v51 = vpop.permute.xlu0 %4325  ;;  %14570 = vst [vmem:[#allocation33_spill] sm:$0xff] %v12400_v30  ;;  %v5628_v12 = vsel %vm5623_vm15, %v5595_v48, %v5086_v35  ;;  %v12414_v52 = vsub.f32 %v5756_v42, %v12400_v30  ;;  %v4258_v48 = vld [vmem:[#allocation3 + $0xca] sm:$0xff] }
 0x552   : > { %4721 = vrot.lane.b32.xlu1 %v4225_v1, %s9885_s17 }
 0x553   : > { %4595 = vrot.lane.b32.xlu0 %v12377_v23, %s9883_s15  ;;  %14571 = vst [vmem:[#allocation36_spill] sm:$0xff] %v12414_v52 }
 0x554   : > { %v12398_v2 = vpop.permute.xlu1 %4705 }
 0x555   : > { %v12402_v7 = vpop.permute.xlu0 %4833 }
 0x556   : > { %5229 = vrot.lane.b32.xlu1 %v4257_v17, %s9888_s9 }
 0x557   : > { %5103 = vrot.lane.b32.xlu0 %v4226_v62, %s9889_s26 }
 0x558   : > { %v5214_v31 = vpop.permute.xlu1 %5213 }
 0x559   : > { %v5661_v46 = vsel %vm5656_vm0, %v5628_v12, %v5214_v31  ;;  %v12411_v8 = vpop.permute.xlu0 %4453  ;;  %v14249_v12 = vand.u32 4294901760, %v12414_v52 }
 0x55a   : > { %v5694_v59 = vsel %vm5689_vm1, %v5661_v46, %v12186_v33  ;;  %4723 = vrot.lane.b32.xlu1 %v4226_v62, %s9885_s17 }
 0x55b   : > { %v5753_v63 = vsel %vm5739_vm2, %v5694_v59, 0  ;;  %4341 = vrot.lane.b32.xlu0 %v4225_v1, %s9878_s10  ;;  %v5436_v1 = vsel %vm1675_vm3, %v12062_v43, %v12260_v5  ;;  %v5967_v59 = vsub.f32 %v12414_v52, %v14249_v12 }
 0x55c   : > { %v12421_v45 = vand.u32 4294901760, %v5753_v63  ;;  %v12423_v35 = vpop.permute.xlu1 %4711 }
 0x55d   : > { %v5092_v57 = vpop.permute.xlu0 %5091 }
 0x55e   : > { %14572 = vst [vmem:[#allocation37_spill] sm:$0xff] %v12421_v45  ;;  %v12427_v42 = vsub.f32 %v5753_v63, %v12421_v45  ;;  %5231 = vrot.lane.b32.xlu1 %v4258_v48, %s9888_s9  ;;  %v5468_v63 = vsel %vm1741_vm6, %v5436_v1, %v12269_v25  ;;  %v5968_v45 = vand.u32 4294901760, %v5967_v59  ;;  %v12462_v1 = vld [vmem:[#allocation3 + $0xd8] sm:$0xff] }
 0x55f   : > { %4849 = vrot.lane.b32.xlu0 %v4257_v17, %s9887_s16  ;;  %v5500_v49 = vsel %vm1807_vm8, %v5468_v63, %v4580_v56  ;;  %v4227_v63 = vld [vmem:[#allocation3 + $0xd9] sm:$0xff] }
 0x560   : > { %14573 = vst [vmem:[#allocation40_spill] sm:$0xff] %v12427_v42  ;;  %v5220_v33 = vpop.permute.xlu1 %5219  ;;  %v14250_v31 = vand.u32 4294901760, %v12427_v42  ;;  %v5532_v12 = vsel %vm1873_vm10, %v5500_v49, %v12330_v38 }
 0x561   : > { %v12435_v46 = vpop.permute.xlu0 %4459  ;;  %v5565_v56 = vsel %vm5557_vm13, %v5532_v12, %v12361_v19 }
 0x562   : > { %4343 = vrot.lane.b32.xlu1 %v4226_v62, %s9878_s10  ;;  %v5957_v53 = vsub.f32 %v12427_v42, %v14250_v31 }
 0x563   : > { %5357 = vrot.lane.b32.xlu0 %v14574_v21, %s9886_s11 }
 0x564   : > { %v12449_v43 = vpop.permute.xlu1 %4331  ;;  %v5958_v5 = vand.u32 4294901760, %v5957_v53  ;;  %v14575_v53 = vld [vmem:[#allocation21_spill] sm:$0xff] }
 0x565   : > { %v4962_v30 = vpop.permute.xlu0 %4961 }
 0x566   : > { %4851 = vrot.lane.b32.xlu1 %v4258_v48, %s9887_s16  ;;  %8803 = vmatprep.mubr.f32.mxu1 %v5958_v5 }
 0x567   : > { %4469 = vrot.lane.b32.xlu0 %v4257_v17, %s9881_s13  ;;  %8804 = vmatmul.mubr.f32.gmra.mrb[2].mxu1 %v5968_v45 }
 0x568   : > { %v12455_v25 = vpop.permute.xlu1 %4839 }
 0x569   : > { %v4964_v21 = vpop.permute.xlu0 %4963 }
 0x56a   : > { %v5598_v62 = vsel %vm5590_vm14, %v5565_v56, %v4964_v21  ;;  %5359 = vrot.lane.b32.xlu1 %v14575_v53, %s9886_s11 }
 0x56b   : > { %v5631_v49 = vsel %vm5623_vm15, %v5598_v62, %v5092_v57  ;;  %4977 = vrot.lane.b32.xlu0 %v12462_v1, %s9890_s23  ;;  %v5435_v57 = vsel %vm1675_vm3, %v12050_v15, %v12290_v55 }
 0x56c   : > { %v5664_v38 = vsel %vm5656_vm0, %v5631_v49, %v5220_v33  ;;  %v12468_v17 = vpop.permute.xlu1 %4581  ;;  %v5467_v59 = vsel %vm1741_vm6, %v5435_v57, %v12316_v22 }
 0x56d   : > { %v4584_v45 = vpop.permute.xlu0 %4583  ;;  %v5697_v19 = vsel %vm5689_vm1, %v5664_v38, %v12191_v24  ;;  %v5499_v5 = vsel %vm1807_vm8, %v5467_v59, %v12374_v58  ;;  %v12486_v24 = vld [vmem:[#allocation3 + $0xe0] sm:$0xff] }
 0x56e   : > { %4597 = vrot.lane.b32.xlu1 %v12462_v1, %s9883_s15  ;;  %v5762_v56 = vsel %vm5739_vm2, %v5697_v19, 0  ;;  %v4259_v38 = vld [vmem:[#allocation3 + $0xda] sm:$0xff] }
 0x56f   : > { %4471 = vrot.lane.b32.xlu0 %v4258_v48, %s9881_s13  ;;  %v5531_v48 = vsel %vm1873_vm10, %v5499_v5, %v12398_v2  ;;  %v12494_v55 = vand.u32 4294901760, %v5762_v56 }
 0x570   : > { %v5090_v12 = vpop.permute.xlu1 %5089  ;;  %v5564_v58 = vsel %vm5557_vm13, %v5531_v48, %v12402_v7 }
 0x571   : > { %v12480_v33 = vpop.permute.xlu0 %4329  ;;  %v5597_v21 = vsel %vm5590_vm14, %v5564_v58, %v4962_v30  ;;  %v12509_v19 = vsub.f32 %v5762_v56, %v12494_v55  ;;  %v4228_v30 = vld [vmem:[#allocation3 + $0xe1] sm:$0xff] }
 0x572   : > { %5105 = vrot.lane.b32.xlu1 %v4227_v63, %s9889_s26  ;;  %v5630_v2 = vsel %vm5623_vm15, %v5597_v21, %v5090_v12 }
 0x573   : > { %4979 = vrot.lane.b32.xlu0 %v12486_v24, %s9890_s23  ;;  %14576 = vst [vmem:[#allocation41_spill] sm:$0xff] %v12509_v19  ;;  %v14253_v48 = vand.u32 4294901760, %v12509_v19 }
 0x574   : > { %v12492_v15 = vpop.permute.xlu1 %4709 }
 0x575   : > { %v12496_v22 = vpop.permute.xlu0 %4837 }
 0x576   : > { %4725 = vrot.lane.b32.xlu1 %v4227_v63, %s9885_s17 }
 0x577   : > { %4599 = vrot.lane.b32.xlu0 %v12486_v24, %s9883_s15 }
 0x578   : > { %v5218_v62 = vpop.permute.xlu1 %5217 }
 0x579   : > { %v5663_v53 = vsel %vm5656_vm0, %v5630_v2, %v5218_v62  ;;  %v12506_v49 = vpop.permute.xlu0 %4457  ;;  %v4260_v62 = vld [vmem:[#allocation3 + $0xe2] sm:$0xff] }
 0x57a   : > { %v5696_v7 = vsel %vm5689_vm1, %v5663_v53, %v12194_v0  ;;  %5233 = vrot.lane.b32.xlu1 %v4259_v38, %s9888_s9  ;;  %v5438_v0 = vsel %vm1675_vm3, %v12166_v28, %v12355_v40  ;;  %v5987_v53 = vsub.f32 %v12509_v19, %v14253_v48 }
 0x57b   : > { %v5759_v57 = vsel %vm5739_vm2, %v5696_v7, 0  ;;  %5107 = vrot.lane.b32.xlu0 %v4228_v30, %s9889_s26  ;;  %v5470_v7 = vsel %vm1741_vm6, %v5438_v0, %v12342_v20  ;;  %v14578_v20 = vld [vmem:[#allocation22_spill] sm:$0xff] }
 0x57c   : > { %v12516_v12 = vand.u32 4294901760, %v5759_v57  ;;  %v12518_v59 = vpop.permute.xlu1 %4715  ;;  %v5502_v40 = vsel %vm1807_vm8, %v5470_v7, %v4584_v45  ;;  %v5988_v52 = vand.u32 4294901760, %v5987_v53 }
 0x57d   : > { %v5096_v5 = vpop.permute.xlu0 %5095  ;;  %v5534_v48 = vsel %vm1873_vm10, %v5502_v40, %v12423_v35 }
 0x57e   : > { %v12522_v56 = vsub.f32 %v5759_v57, %v12516_v12  ;;  %4727 = vrot.lane.b32.xlu1 %v4228_v30, %s9885_s17  ;;  %v5567_v45 = vsel %vm5557_vm13, %v5534_v48, %v12455_v25 }
 0x57f   : > { %4345 = vrot.lane.b32.xlu0 %v4227_v63, %s9878_s10 }
 0x580   : > { %14577 = vst [vmem:[#allocation44_spill] sm:$0xff] %v12522_v56  ;;  %v5224_v58 = vpop.permute.xlu1 %5223  ;;  %v14254_v21 = vand.u32 4294901760, %v12522_v56 }
 0x581   : > { %v12530_v2 = vpop.permute.xlu0 %4463 }
 0x582   : > { %5235 = vrot.lane.b32.xlu1 %v4260_v62, %s9888_s9  ;;  %v5977_v28 = vsub.f32 %v12522_v56, %v14254_v21  ;;  %v4262_v56 = vld [vmem:[#allocation3 + $0xfa] sm:$0xff] }
 0x583   : > { %4853 = vrot.lane.b32.xlu0 %v4259_v38, %s9887_s16 }
 0x584   : > { %v12543_v63 = vpop.permute.xlu1 %4335  ;;  %v5978_v57 = vand.u32 4294901760, %v5977_v28 }
 0x585   : > { %v4966_v31 = vpop.permute.xlu0 %4965 }
 0x586   : > { %4347 = vrot.lane.b32.xlu1 %v4228_v30, %s9878_s10  ;;  %8806 = vmatprep.mubr.f32.mxu1 %v5978_v57  ;;  %v12563_v57 = vld [vmem:[#allocation3 + $0xf0] sm:$0xff] }
 0x587   : > { %5361 = vrot.lane.b32.xlu0 %v14578_v20, %s9886_s11  ;;  %8807 = vmatmul.mubr.f32.gmra.mrb[4].mxu1 %v5988_v52  ;;  %v14579_v52 = vld [vmem:[#allocation23_spill] sm:$0xff] }
 0x588   : > { %v12550_v0 = vpop.permute.xlu1 %4843 }
 0x589   : > { %v4968_v7 = vpop.permute.xlu0 %4967 }
 0x58a   : > { %v5600_v28 = vsel %vm5590_vm14, %v5567_v45, %v4968_v7  ;;  %4855 = vrot.lane.b32.xlu1 %v4260_v62, %s9887_s16  ;;  %v4229_v7 = vld [vmem:[#allocation3 + $0xf1] sm:$0xff] }
 0x58b   : > { %v5633_v53 = vsel %vm5623_vm15, %v5600_v28, %v5096_v5  ;;  %4473 = vrot.lane.b32.xlu0 %v4259_v38, %s9881_s13  ;;  %v5437_v38 = vsel %vm1675_vm3, %v12161_v54, %v12388_v51  ;;  %v12593_v28 = vld [vmem:[#allocation3 + $0xf8] sm:$0xff] }
 0x58c   : > { %v5666_v35 = vsel %vm5656_vm0, %v5633_v53, %v5224_v58  ;;  %v12559_v30 = vpop.permute.xlu1 %4585  ;;  %v5469_v48 = vsel %vm1741_vm6, %v5437_v38, %v12411_v8 }
 0x58d   : > { %v4588_v40 = vpop.permute.xlu0 %4587  ;;  %v5699_v25 = vsel %vm5689_vm1, %v5666_v35, %v12201_v61  ;;  %v5501_v20 = vsel %vm1807_vm8, %v5469_v48, %v12468_v17 }
 0x58e   : > { %5363 = vrot.lane.b32.xlu1 %v14579_v52, %s9886_s11  ;;  %v5768_v45 = vsel %vm5739_vm2, %v5699_v25, 0  ;;  %v5533_v61 = vsel %vm1873_vm10, %v5501_v20, %v12492_v15  ;;  %v4261_v20 = vld [vmem:[#allocation3 + $0xf2] sm:$0xff] }
 0x58f   : > { %4981 = vrot.lane.b32.xlu0 %v12563_v57, %s9890_s23  ;;  %v12586_v51 = vand.u32 4294901760, %v5768_v45  ;;  %v5566_v17 = vsel %vm5557_vm13, %v5533_v61, %v12496_v22 }
 0x590   : > { %v5094_v5 = vpop.permute.xlu1 %5093  ;;  %v5599_v53 = vsel %vm5590_vm14, %v5566_v17, %v4966_v31  ;;  %v5440_v17 = vsel %vm1675_vm3, %v12206_v16, %v12449_v43 }
 0x591   : > { %v12574_v58 = vpop.permute.xlu0 %4333  ;;  %v5632_v15 = vsel %vm5623_vm15, %v5599_v53, %v5094_v5  ;;  %v12603_v25 = vsub.f32 %v5768_v45, %v12586_v51 }
 0x592   : > { %4601 = vrot.lane.b32.xlu1 %v12563_v57, %s9883_s15 }
 0x593   : > { %4475 = vrot.lane.b32.xlu0 %v4260_v62, %s9881_s13  ;;  %14580 = vst [vmem:[#allocation45_spill] sm:$0xff] %v12603_v25  ;;  %v14261_v61 = vand.u32 4294901760, %v12603_v25 }
 0x594   : > { %v12584_v54 = vpop.permute.xlu1 %4713 }
 0x595   : > { %v12588_v8 = vpop.permute.xlu0 %4841 }
 0x596   : > { %5109 = vrot.lane.b32.xlu1 %v4229_v7, %s9889_s26 }
 0x597   : > { %4983 = vrot.lane.b32.xlu0 %v12593_v28, %s9890_s23 }
 0x598   : > { %v5222_v62 = vpop.permute.xlu1 %5221 }
 0x599   : > { %v5665_v35 = vsel %vm5656_vm0, %v5632_v15, %v5222_v62  ;;  %v12600_v52 = vpop.permute.xlu0 %4461 }
 0x59a   : > { %v5698_v22 = vsel %vm5689_vm1, %v5665_v35, %v12203_v44  ;;  %4729 = vrot.lane.b32.xlu1 %v4229_v7, %s9885_s17  ;;  %v4230_v44 = vld [vmem:[#allocation3 + $0xf9] sm:$0xff]  ;;  %v6007_v35 = vsub.f32 %v12603_v25, %v14261_v61 }
 0x59b   : > { %v5765_v31 = vsel %vm5739_vm2, %v5698_v22, 0  ;;  %4603 = vrot.lane.b32.xlu0 %v12593_v28, %s9883_s15  ;;  %v5472_v22 = vsel %vm1741_vm6, %v5440_v17, %v12435_v46  ;;  %v4264_v25 = vld [vmem:[#allocation3 + $0x112] sm:$0xff] }
 0x59c   : > { %v12611_v38 = vand.u32 4294901760, %v5765_v31  ;;  %v12613_v5 = vpop.permute.xlu1 %4719  ;;  %v5504_v43 = vsel %vm1807_vm8, %v5472_v22, %v4588_v40  ;;  %v6008_v42 = vand.u32 4294901760, %v6007_v35 }
 0x59d   : > { %v5100_v48 = vpop.permute.xlu0 %5099  ;;  %v5536_v61 = vsel %vm1873_vm10, %v5504_v43, %v12518_v59  ;;  %v14582_v59 = vld [vmem:[#allocation24_spill] sm:$0xff] }
 0x59e   : > { %v12617_v45 = vsub.f32 %v5765_v31, %v12611_v38  ;;  %5237 = vrot.lane.b32.xlu1 %v4261_v20, %s9888_s9  ;;  %v5569_v40 = vsel %vm5557_vm13, %v5536_v61, %v12550_v0 }
 0x59f   : > { %5111 = vrot.lane.b32.xlu0 %v4230_v44, %s9889_s26 }
 0x5a0   : > { %14581 = vst [vmem:[#allocation48_spill] sm:$0xff] %v12617_v45  ;;  %v5228_v53 = vpop.permute.xlu1 %5227  ;;  %v14262_v15 = vand.u32 4294901760, %v12617_v45 }
 0x5a1   : > { %v12625_v62 = vpop.permute.xlu0 %4467 }
 0x5a2   : > { %4731 = vrot.lane.b32.xlu1 %v4230_v44, %s9885_s17  ;;  %v5997_v16 = vsub.f32 %v12617_v45, %v14262_v15 }
 0x5a3   : > { %4349 = vrot.lane.b32.xlu0 %v4229_v7, %s9878_s10 }
 0x5a4   : > { %v12638_v31 = vpop.permute.xlu1 %4339  ;;  %v5998_v21 = vand.u32 4294901760, %v5997_v16 }
 0x5a5   : > { %v4970_v19 = vpop.permute.xlu0 %4969 }
 0x5a6   : > { %5239 = vrot.lane.b32.xlu1 %v4262_v56, %s9888_s9  ;;  %8809 = vmatprep.mubr.f32.mxu1 %v5998_v21 }
 0x5a7   : > { %4857 = vrot.lane.b32.xlu0 %v4261_v20, %s9887_s16  ;;  %8810 = vmatmul.mubr.f32.gmra.mrb[6].mxu1 %v6008_v42 }
 0x5a8   : > { %v12644_v46 = vpop.permute.xlu1 %4847 }
 0x5a9   : > { %v4972_v7 = vpop.permute.xlu0 %4971 }
 0x5aa   : > { %v5602_v17 = vsel %vm5590_vm14, %v5569_v40, %v4972_v7  ;;  %4351 = vrot.lane.b32.xlu1 %v4230_v44, %s9878_s10  ;;  %v14583_v40 = vld [vmem:[#allocation25_spill] sm:$0xff] }
 0x5ab   : > { %v5635_v35 = vsel %vm5623_vm15, %v5602_v17, %v5100_v48  ;;  %5365 = vrot.lane.b32.xlu0 %v14582_v59, %s9886_s11  ;;  %v5439_v48 = vsel %vm1675_vm3, %v12197_v29, %v12480_v33 }
 0x5ac   : > { %v5668_v21 = vsel %vm5656_vm0, %v5635_v35, %v5228_v53  ;;  %v12654_v22 = vpop.permute.xlu1 %4589  ;;  %v5471_v44 = vsel %vm1741_vm6, %v5439_v48, %v12506_v49  ;;  %v12698_v48 = vld [vmem:[#allocation3 + $0x110] sm:$0xff] }
 0x5ad   : > { %v12656_v42 = vpop.permute.xlu0 %4591  ;;  %v5701_v0 = vsel %vm5689_vm1, %v5668_v21, %v12212_v60  ;;  %v5503_v16 = vsel %vm1807_vm8, %v5471_v44, %v12559_v30  ;;  %v12674_v60 = vld [vmem:[#allocation3 + $0x108] sm:$0xff] }
 0x5ae   : > { %4859 = vrot.lane.b32.xlu1 %v4262_v56, %s9887_s16  ;;  %v5774_v43 = vsel %vm5739_vm2, %v5701_v0, 0  ;;  %v4231_v21 = vld [vmem:[#allocation3 + $0x109] sm:$0xff] }
 0x5af   : > { %4477 = vrot.lane.b32.xlu0 %v4261_v20, %s9881_s13  ;;  %v5535_v20 = vsel %vm1873_vm10, %v5503_v16, %v12584_v54  ;;  %v12680_v33 = vand.u32 4294901760, %v5774_v43 }
 0x5b0   : > { %v5098_v61 = vpop.permute.xlu1 %5097  ;;  %v5568_v30 = vsel %vm5557_vm13, %v5535_v20, %v12588_v8 }
 0x5b1   : > { %v12667_v53 = vpop.permute.xlu0 %4337  ;;  %14584 = vst [vmem:[#allocation49_spill] sm:$0xff] %v12680_v33  ;;  %v5601_v7 = vsel %vm5590_vm14, %v5568_v30, %v4970_v19  ;;  %v12693_v0 = vsub.f32 %v5774_v43, %v12680_v33  ;;  %v4263_v30 = vld [vmem:[#allocation3 + $0x10a] sm:$0xff] }
 0x5b2   : > { %5367 = vrot.lane.b32.xlu1 %v14583_v40, %s9886_s11  ;;  %v5634_v17 = vsel %vm5623_vm15, %v5601_v7, %v5098_v61 }
 0x5b3   : > { %4985 = vrot.lane.b32.xlu0 %v12674_v60, %s9890_s23  ;;  %14585 = vst [vmem:[#allocation52_spill] sm:$0xff] %v12693_v0  ;;  %v14263_v16 = vand.u32 4294901760, %v12693_v0 }
 0x5b4   : > { %v4718_v29 = vpop.permute.xlu1 %4717 }
 0x5b5   : > { %v4846_v49 = vpop.permute.xlu0 %4845  ;;  %v6027_v7 = vsub.f32 %v12693_v0, %v14263_v16 }
 0x5b6   : > { %4605 = vrot.lane.b32.xlu1 %v12674_v60, %s9883_s15 }
 0x5b7   : > { %4479 = vrot.lane.b32.xlu0 %v4262_v56, %s9881_s13  ;;  %v6028_v15 = vand.u32 4294901760, %v6027_v7 }
 0x5b8   : > { %v5226_v54 = vpop.permute.xlu1 %5225 }
 0x5b9   : > { %v5667_v35 = vsel %vm5656_vm0, %v5634_v17, %v5226_v54  ;;  %v12690_v59 = vpop.permute.xlu0 %4465  ;;  %v4232_v17 = vld [vmem:[#allocation3 + $0x111] sm:$0xff] }
 0x5ba   : > { %v5700_v8 = vsel %vm5689_vm1, %v5667_v35, %v12216_v4  ;;  %5113 = vrot.lane.b32.xlu1 %v4231_v21, %s9889_s26 }
 0x5bb   : > { %v5771_v19 = vsel %vm5739_vm2, %v5700_v8, 0  ;;  %4987 = vrot.lane.b32.xlu0 %v12698_v48, %s9890_s23 }
 0x5bc   : > { %v12703_v56 = vand.u32 4294901760, %v5771_v19  ;;  %v12705_v61 = vpop.permute.xlu1 %4593 }
 0x5bd   : > { %v4974_v44 = vpop.permute.xlu0 %4973 }
 0x5be   : > { %v12709_v43 = vsub.f32 %v5771_v19, %v12703_v56  ;;  %4733 = vrot.lane.b32.xlu1 %v4231_v21, %s9885_s17 }
 0x5bf   : > { %4607 = vrot.lane.b32.xlu0 %v12698_v48, %s9883_s15 }
 0x5c0   : > { %14586 = vst [vmem:[#allocation53_spill] sm:$0xff] %v12709_v43  ;;  %v5102_v4 = vpop.permute.xlu1 %5101  ;;  %v14268_v40 = vand.u32 4294901760, %v12709_v43 }
 0x5c1   : > { %v4976_v20 = vpop.permute.xlu0 %4975 }
 0x5c2   : > { %5241 = vrot.lane.b32.xlu1 %v4263_v30, %s9888_s9  ;;  %v6017_v54 = vsub.f32 %v12709_v43, %v14268_v40 }
 0x5c3   : > { %5115 = vrot.lane.b32.xlu0 %v4232_v17, %s9889_s26 }
 0x5c4   : > { %v12723_v35 = vpop.permute.xlu1 %4721  ;;  %v6018_v8 = vand.u32 4294901760, %v6017_v54  ;;  %v5441_v54 = vsel %vm1675_vm3, %v12239_v34, %v12574_v58  ;;  %v14587_v34 = vld [vmem:[#allocation26_spill] sm:$0xff] }
 0x5c5   : > { %v12725_v19 = vpop.permute.xlu0 %4595  ;;  %v5473_v7 = vsel %vm1741_vm6, %v5441_v54, %v12600_v52 }
 0x5c6   : > { %4735 = vrot.lane.b32.xlu1 %v4232_v17, %s9885_s17  ;;  %8812 = vmatprep.mubr.f32.mxu1 %v6018_v8 }
 0x5c7   : > { %4353 = vrot.lane.b32.xlu0 %v4231_v21, %s9878_s10  ;;  %8813 = vmatmul.mubr.f32.gmra.mrb[8].mxu1 %v6028_v15  ;;  %v5505_v15 = vsel %vm1807_vm8, %v5473_v7, %v12654_v22  ;;  %v5442_v21 = vsel %vm1675_vm3, %v12248_v13, %v12543_v63 }
 0x5c8   : > { %v5230_v16 = vpop.permute.xlu1 %5229  ;;  %v5537_v43 = vsel %vm1873_vm10, %v5505_v15, %v4718_v29  ;;  %v5474_v52 = vsel %vm1741_vm6, %v5442_v21, %v12530_v2 }
 0x5c9   : > { %v5104_v0 = vpop.permute.xlu0 %5103  ;;  %v5570_v54 = vsel %vm5557_vm13, %v5537_v43, %v4846_v49  ;;  %v5506_v22 = vsel %vm1807_vm8, %v5474_v52, %v12656_v42  ;;  %v14588_v43 = vld [vmem:[#allocation27_spill] sm:$0xff]  ;;  %v12768_v42 = vld [vmem:[#allocation3 + $0x120] sm:$0xff] }
 0x5ca   : > { %5243 = vrot.lane.b32.xlu1 %v4264_v25, %s9888_s9  ;;  %v5603_v13 = vsel %vm5590_vm14, %v5570_v54, %v4974_v44  ;;  %v5538_v2 = vsel %vm1873_vm10, %v5506_v22, %v12613_v5 }
 0x5cb   : > { %4861 = vrot.lane.b32.xlu0 %v4263_v30, %s9887_s16  ;;  %v5636_v63 = vsel %vm5623_vm15, %v5603_v13, %v5102_v4 }
 0x5cc   : > { %v12734_v40 = vpop.permute.xlu1 %4723 }
 0x5cd   : > { %v12738_v8 = vpop.permute.xlu0 %4341 }
 0x5ce   : > { %4355 = vrot.lane.b32.xlu1 %v4232_v17, %s9878_s10  ;;  %v5669_v17 = vsel %vm5656_vm0, %v5636_v63, %v5230_v16  ;;  %v5571_v16 = vsel %vm5557_vm13, %v5538_v2, %v12644_v46  ;;  %v4233_v63 = vld [vmem:[#allocation3 + $0x121] sm:$0xff] }
 0x5cf   : > { %5369 = vrot.lane.b32.xlu0 %v14587_v34, %s9886_s11  ;;  %v5604_v15 = vsel %vm5590_vm14, %v5571_v16, %v4976_v20 }
 0x5d0   : > { %v5232_v58 = vpop.permute.xlu1 %5231  ;;  %v5637_v34 = vsel %vm5623_vm15, %v5604_v15, %v5104_v0  ;;  %v4265_v15 = vld [vmem:[#allocation3 + $0x122] sm:$0xff] }
 0x5d1   : > { %v12749_v45 = vpop.permute.xlu0 %4849  ;;  %v5670_v52 = vsel %vm5656_vm0, %v5637_v34, %v5232_v58 }
 0x5d2   : > { %4863 = vrot.lane.b32.xlu1 %v4264_v25, %s9887_s16 }
 0x5d3   : > { %4481 = vrot.lane.b32.xlu0 %v4263_v30, %s9881_s13 }
 0x5d4   : > { %v12760_v29 = vpop.permute.xlu1 %4343 }
 0x5d5   : > { %v5358_v7 = vpop.permute.xlu0 %5357 }
 0x5d6   : > { %v5702_v49 = vsel %vm5689_vm1, %v5669_v17, %v5358_v7  ;;  %5371 = vrot.lane.b32.xlu1 %v14588_v43, %s9886_s11  ;;  %v12794_v17 = vld [vmem:[#allocation3 + $0x128] sm:$0xff] }
 0x5d7   : > { %v5777_v44 = vsel %vm5739_vm2, %v5702_v49, 0  ;;  %4989 = vrot.lane.b32.xlu0 %v12768_v42, %s9890_s23 }
 0x5d8   : > { %v12773_v4 = vand.u32 4294901760, %v5777_v44  ;;  %v12775_v30 = vpop.permute.xlu1 %4851 }
 0x5d9   : > { %v12779_v5 = vpop.permute.xlu0 %4469 }
 0x5da   : > { %14589 = vst [vmem:[#allocation54_spill] sm:$0xff] %v12773_v4  ;;  %v12783_v21 = vsub.f32 %v5777_v44, %v12773_v4  ;;  %4609 = vrot.lane.b32.xlu1 %v12768_v42, %s9883_s15 }
 0x5db   : > { %4483 = vrot.lane.b32.xlu0 %v4264_v25, %s9881_s13 }
 0x5dc   : > { %14590 = vst [vmem:[#allocation56_spill] sm:$0xff] %v12783_v21  ;;  %v5360_v54 = vpop.permute.xlu1 %5359  ;;  %v14273_v22 = vand.u32 4294901760, %v12783_v21 }
 0x5dd   : > { %v5703_v46 = vsel %vm5689_vm1, %v5670_v52, %v5360_v54  ;;  %v4978_v13 = vpop.permute.xlu0 %4977  ;;  %v4234_v52 = vld [vmem:[#allocation3 + $0x129] sm:$0xff] }
 0x5de   : > { %v5780_v20 = vsel %vm5739_vm2, %v5703_v46, 0  ;;  %5117 = vrot.lane.b32.xlu1 %v4233_v63, %s9889_s26  ;;  %v6037_v0 = vsub.f32 %v12783_v21, %v14273_v22  ;;  %v4266_v22 = vld [vmem:[#allocation3 + $0x12a] sm:$0xff] }
 0x5df   : > { %v12799_v25 = vand.u32 4294901760, %v5780_v20  ;;  %4991 = vrot.lane.b32.xlu0 %v12794_v17, %s9890_s23 }
 0x5e0   : > { %v12803_v58 = vpop.permute.xlu1 %4597  ;;  %v6038_v7 = vand.u32 4294901760, %v6037_v0 }
 0x5e1   : > { %14591 = vst [vmem:[#allocation58_spill] sm:$0xff] %v12799_v25  ;;  %v12806_v2 = vsub.f32 %v5780_v20, %v12799_v25  ;;  %v12808_v49 = vpop.permute.xlu0 %4471 }
 0x5e2   : > { %4737 = vrot.lane.b32.xlu1 %v4233_v63, %s9885_s17  ;;  %8815 = vmatprep.mubr.f32.mxu1 %v6038_v7 }
 0x5e3   : > { %14592 = vst [vmem:[#allocation60_spill] sm:$0xff] %v12806_v2  ;;  %4611 = vrot.lane.b32.xlu0 %v12794_v17, %s9883_s15  ;;  %v14274_v43 = vand.u32 4294901760, %v12806_v2 }
 0x5e4   : > { %v5106_v44 = vpop.permute.xlu1 %5105 }
 0x5e5   : > { %v4980_v16 = vpop.permute.xlu0 %4979  ;;  %v6047_v34 = vsub.f32 %v12806_v2, %v14274_v43 }
 0x5e6   : > { %5245 = vrot.lane.b32.xlu1 %v4265_v15, %s9888_s9 }
 0x5e7   : > { %5119 = vrot.lane.b32.xlu0 %v4234_v52, %s9889_s26  ;;  %v6048_v54 = vand.u32 4294901760, %v6047_v34  ;;  %v5443_v34 = vsel %vm1675_vm3, %v12295_v11, %v12667_v53  ;;  %v5444_v53 = vsel %vm1675_vm3, %v12309_v50, %v12638_v31  ;;  %v12862_v50 = vld [vmem:[#allocation3 + $0x138] sm:$0xff] }
 0x5e8   : > { %v12819_v46 = vpop.permute.xlu1 %4725 }
 0x5e9   : > { %v12821_v20 = vpop.permute.xlu0 %4599  ;;  %8816 = vmatmul.mubr.f32.gmra.mrb[10].mxu1 %v6048_v54  ;;  %v14593_v54 = vld [vmem:[#allocation30_spill] sm:$0xff] }
 0x5ea   : > { %4739 = vrot.lane.b32.xlu1 %v4234_v52, %s9885_s17 }
 0x5eb   : > { %4357 = vrot.lane.b32.xlu0 %v4233_v63, %s9878_s10  ;;  %v5475_v63 = vsel %vm1741_vm6, %v5443_v34, %v12690_v59  ;;  %v14594_v34 = vld [vmem:[#allocation31_spill] sm:$0xff] }
 0x5ec   : > { %v5234_v0 = vpop.permute.xlu1 %5233  ;;  %v5507_v21 = vsel %vm1807_vm8, %v5475_v63, %v12705_v61 }
 0x5ed   : > { %v5108_v7 = vpop.permute.xlu0 %5107  ;;  %v5539_v4 = vsel %vm1873_vm10, %v5507_v21, %v12723_v35 }
 0x5ee   : > { %5247 = vrot.lane.b32.xlu1 %v4266_v22, %s9888_s9  ;;  %v5572_v11 = vsel %vm5557_vm13, %v5539_v4, %v12749_v45  ;;  %v5476_v45 = vsel %vm1741_vm6, %v5444_v53, %v12625_v62 }
 0x5ef   : > { %4865 = vrot.lane.b32.xlu0 %v4265_v15, %s9887_s16  ;;  %v5605_v59 = vsel %vm5590_vm14, %v5572_v11, %v4978_v13  ;;  %v5508_v31 = vsel %vm1807_vm8, %v5476_v45, %v12725_v19 }
 0x5f0   : > { %v12827_v43 = vpop.permute.xlu1 %4727  ;;  %v5638_v61 = vsel %vm5623_vm15, %v5605_v59, %v5106_v44  ;;  %v5540_v44 = vsel %vm1873_vm10, %v5508_v31, %v12734_v40 }
 0x5f1   : > { %v12829_v2 = vpop.permute.xlu0 %4345  ;;  %v5671_v35 = vsel %vm5656_vm0, %v5638_v61, %v5234_v0  ;;  %v5573_v0 = vsel %vm5557_vm13, %v5540_v44, %v12775_v30 }
 0x5f2   : > { %4359 = vrot.lane.b32.xlu1 %v4234_v52, %s9878_s10 }
 0x5f3   : > { %5373 = vrot.lane.b32.xlu0 %v14593_v54, %s9886_s11  ;;  %v5606_v54 = vsel %vm5590_vm14, %v5573_v0, %v4980_v16  ;;  %v4267_v0 = vld [vmem:[#allocation3 + $0x13a] sm:$0xff] }
 0x5f4   : > { %v5236_v25 = vpop.permute.xlu1 %5235  ;;  %v5639_v11 = vsel %vm5623_vm15, %v5606_v54, %v5108_v7  ;;  %v4236_v54 = vld [vmem:[#allocation3 + $0x141] sm:$0xff] }
 0x5f5   : > { %v12843_v33 = vpop.permute.xlu0 %4853  ;;  %v5672_v40 = vsel %vm5656_vm0, %v5639_v11, %v5236_v25 }
 0x5f6   : > { %4867 = vrot.lane.b32.xlu1 %v4266_v22, %s9887_s16 }
 0x5f7   : > { %4485 = vrot.lane.b32.xlu0 %v4265_v15, %s9881_s13 }
 0x5f8   : > { %v12854_v52 = vpop.permute.xlu1 %4347 }
 0x5f9   : > { %v5362_v21 = vpop.permute.xlu0 %5361 }
 0x5fa   : > { %v5704_v4 = vsel %vm5689_vm1, %v5671_v35, %v5362_v21  ;;  %5375 = vrot.lane.b32.xlu1 %v14594_v34, %s9886_s11  ;;  %v4235_v35 = vld [vmem:[#allocation3 + $0x139] sm:$0xff] }
 0x5fb   : > { %v5783_v13 = vsel %vm5739_vm2, %v5704_v4, 0  ;;  %4993 = vrot.lane.b32.xlu0 %v12862_v50, %s9890_s23  ;;  %v12892_v21 = vld [vmem:[#allocation3 + $0x140] sm:$0xff] }
 0x5fc   : > { %v12871_v15 = vand.u32 4294901760, %v5783_v13  ;;  %v12873_v62 = vpop.permute.xlu1 %4855 }
 0x5fd   : > { %v12877_v63 = vpop.permute.xlu0 %4473 }
 0x5fe   : > { %14595 = vst [vmem:[#allocation62_spill] sm:$0xff] %v12871_v15  ;;  %v12881_v19 = vsub.f32 %v5783_v13, %v12871_v15  ;;  %4613 = vrot.lane.b32.xlu1 %v12862_v50, %s9883_s15 }
 0x5ff   : > { %4487 = vrot.lane.b32.xlu0 %v4266_v22, %s9881_s13 }
 0x600   : > { %14596 = vst [vmem:[#allocation64_spill] sm:$0xff] %v12881_v19  ;;  %v5364_v53 = vpop.permute.xlu1 %5363  ;;  %v14286_v59 = vand.u32 4294901760, %v12881_v19 }
 0x601   : > { %v5705_v30 = vsel %vm5689_vm1, %v5672_v40, %v5364_v53  ;;  %v4982_v61 = vpop.permute.xlu0 %4981 }
 0x602   : > { %v5786_v16 = vsel %vm5739_vm2, %v5705_v30, 0  ;;  %5121 = vrot.lane.b32.xlu1 %v4235_v35, %s9889_s26  ;;  %v6057_v7 = vsub.f32 %v12881_v19, %v14286_v59 }
 0x603   : > { %v12897_v22 = vand.u32 4294901760, %v5786_v16  ;;  %4995 = vrot.lane.b32.xlu0 %v12892_v21, %s9890_s23 }
 0x604   : > { %v12903_v25 = vpop.permute.xlu1 %4601  ;;  %v6058_v45 = vand.u32 4294901760, %v6057_v7  ;;  %v4268_v7 = vld [vmem:[#allocation3 + $0x142] sm:$0xff] }
 0x605   : > { %14597 = vst [vmem:[#allocation68_spill] sm:$0xff] %v12897_v22  ;;  %v12906_v4 = vsub.f32 %v5786_v16, %v12897_v22  ;;  %v12908_v34 = vpop.permute.xlu0 %4475 }
 0x606   : > { %4741 = vrot.lane.b32.xlu1 %v4235_v35, %s9885_s17  ;;  %8818 = vmatprep.mubr.f32.mxu1 %v6058_v45 }
 0x607   : > { %14598 = vst [vmem:[#allocation70_spill] sm:$0xff] %v12906_v4  ;;  %4615 = vrot.lane.b32.xlu0 %v12892_v21, %s9883_s15  ;;  %v14285_v31 = vand.u32 4294901760, %v12906_v4 }
 0x608   : > { %v5110_v13 = vpop.permute.xlu1 %5109 }
 0x609   : > { %v4984_v44 = vpop.permute.xlu0 %4983  ;;  %v6067_v47 = vsub.f32 %v12906_v4, %v14285_v31 }
 0x60a   : > { %5249 = vrot.lane.b32.xlu1 %v4267_v0, %s9888_s9 }
 0x60b   : > { %5123 = vrot.lane.b32.xlu0 %v4236_v54, %s9889_s26  ;;  %v6068_v11 = vand.u32 4294901760, %v6067_v47  ;;  %v5445_v47 = vsel %vm1675_vm3, %v12365_v14, %v12738_v8 }
 0x60c   : > { %v12919_v40 = vpop.permute.xlu1 %4729 }
 0x60d   : > { %v12921_v53 = vpop.permute.xlu0 %4603  ;;  %8819 = vmatmul.mubr.f32.gmra.mrb[12].mxu1 %v6068_v11  ;;  %v14599_v11 = vld [vmem:[#allocation34_spill] sm:$0xff] }
 0x60e   : > { %4743 = vrot.lane.b32.xlu1 %v4236_v54, %s9885_s17 }
 0x60f   : > { %4361 = vrot.lane.b32.xlu0 %v4235_v35, %s9878_s10  ;;  %v5477_v35 = vsel %vm1741_vm6, %v5445_v47, %v12779_v5 }
 0x610   : > { %v5238_v30 = vpop.permute.xlu1 %5237  ;;  %v5509_v59 = vsel %vm1807_vm8, %v5477_v35, %v12803_v58  ;;  %v5446_v58 = vsel %vm1675_vm3, %v12377_v23, %v12760_v29 }
 0x611   : > { %v5112_v16 = vpop.permute.xlu0 %5111  ;;  %v5541_v19 = vsel %vm1873_vm10, %v5509_v59, %v12819_v46 }
 0x612   : > { %5251 = vrot.lane.b32.xlu1 %v4268_v7, %s9888_s9  ;;  %v5574_v14 = vsel %vm5557_vm13, %v5541_v19, %v12843_v33  ;;  %v5478_v33 = vsel %vm1741_vm6, %v5446_v58, %v12808_v49 }
 0x613   : > { %4869 = vrot.lane.b32.xlu0 %v4267_v0, %s9887_s16  ;;  %v5607_v8 = vsel %vm5590_vm14, %v5574_v14, %v4982_v61  ;;  %v14600_v61 = vld [vmem:[#allocation35_spill] sm:$0xff] }
 0x614   : > { %v12927_v45 = vpop.permute.xlu1 %4731  ;;  %v5640_v5 = vsel %vm5623_vm15, %v5607_v8, %v5110_v13  ;;  %v5510_v13 = vsel %vm1807_vm8, %v5478_v33, %v12821_v20 }
 0x615   : > { %v12929_v31 = vpop.permute.xlu0 %4349  ;;  %v5673_v46 = vsel %vm5656_vm0, %v5640_v5, %v5238_v30  ;;  %v5542_v23 = vsel %vm1873_vm10, %v5510_v13, %v12827_v43 }
 0x616   : > { %4363 = vrot.lane.b32.xlu1 %v4236_v54, %s9878_s10  ;;  %v5575_v30 = vsel %vm5557_vm13, %v5542_v23, %v12873_v62 }
 0x617   : > { %5377 = vrot.lane.b32.xlu0 %v14599_v11, %s9886_s11  ;;  %v5608_v11 = vsel %vm5590_vm14, %v5575_v30, %v4984_v44  ;;  %v4269_v30 = vld [vmem:[#allocation3 + $0x152] sm:$0xff] }
 0x618   : > { %v5240_v4 = vpop.permute.xlu1 %5239  ;;  %v5641_v14 = vsel %vm5623_vm15, %v5608_v11, %v5112_v16 }
 0x619   : > { %v12943_v22 = vpop.permute.xlu0 %4857  ;;  %v5674_v43 = vsel %vm5656_vm0, %v5641_v14, %v5240_v4  ;;  %v4238_v14 = vld [vmem:[#allocation3 + $0x159] sm:$0xff] }
 0x61a   : > { %4871 = vrot.lane.b32.xlu1 %v4268_v7, %s9887_s16 }
 0x61b   : > { %4489 = vrot.lane.b32.xlu0 %v4267_v0, %s9881_s13  ;;  %v12962_v0 = vld [vmem:[#allocation3 + $0x150] sm:$0xff] }
 0x61c   : > { %v12951_v54 = vpop.permute.xlu1 %4351 }
 0x61d   : > { %v5366_v59 = vpop.permute.xlu0 %5365 }
 0x61e   : > { %v5706_v19 = vsel %vm5689_vm1, %v5673_v46, %v5366_v59  ;;  %5379 = vrot.lane.b32.xlu1 %v14600_v61, %s9886_s11  ;;  %v4237_v46 = vld [vmem:[#allocation3 + $0x151] sm:$0xff] }
 0x61f   : > { %v5789_v47 = vsel %vm5739_vm2, %v5706_v19, 0  ;;  %4997 = vrot.lane.b32.xlu0 %v12962_v0, %s9890_s23  ;;  %v12992_v59 = vld [vmem:[#allocation3 + $0x158] sm:$0xff] }
 0x620   : > { %v12971_v29 = vand.u32 4294901760, %v5789_v47  ;;  %v12973_v49 = vpop.permute.xlu1 %4859 }
 0x621   : > { %v12977_v35 = vpop.permute.xlu0 %4477 }
 0x622   : > { %14601 = vst [vmem:[#allocation73_spill] sm:$0xff] %v12971_v29  ;;  %v12981_v20 = vsub.f32 %v5789_v47, %v12971_v29  ;;  %4617 = vrot.lane.b32.xlu1 %v12962_v0, %s9883_s15 }
 0x623   : > { %4491 = vrot.lane.b32.xlu0 %v4268_v7, %s9881_s13 }
 0x624   : > { %14602 = vst [vmem:[#allocation75_spill] sm:$0xff] %v12981_v20  ;;  %v5368_v8 = vpop.permute.xlu1 %5367  ;;  %v14294_v5 = vand.u32 4294901760, %v12981_v20 }
 0x625   : > { %v5707_v62 = vsel %vm5689_vm1, %v5674_v43, %v5368_v8  ;;  %v4986_v58 = vpop.permute.xlu0 %4985 }
 0x626   : > { %v5792_v44 = vsel %vm5739_vm2, %v5707_v62, 0  ;;  %5125 = vrot.lane.b32.xlu1 %v4237_v46, %s9889_s26  ;;  %v6077_v16 = vsub.f32 %v12981_v20, %v14294_v5 }
 0x627   : > { %v12997_v7 = vand.u32 4294901760, %v5792_v44  ;;  %4999 = vrot.lane.b32.xlu0 %v12992_v59, %s9890_s23 }
 0x628   : > { %v13001_v4 = vpop.permute.xlu1 %4605  ;;  %v6078_v33 = vand.u32 4294901760, %v6077_v16 }
 0x629   : > { %14603 = vst [vmem:[#allocation77_spill] sm:$0xff] %v12997_v7  ;;  %v13004_v19 = vsub.f32 %v5792_v44, %v12997_v7  ;;  %v13006_v61 = vpop.permute.xlu0 %4479 }
 0x62a   : > { %4745 = vrot.lane.b32.xlu1 %v4237_v46, %s9885_s17  ;;  %8821 = vmatprep.mubr.f32.mxu1 %v6078_v33  ;;  %v4270_v33 = vld [vmem:[#allocation3 + $0x15a] sm:$0xff] }
 0x62b   : > { %14604 = vst [vmem:[#allocation79_spill] sm:$0xff] %v13004_v19  ;;  %4619 = vrot.lane.b32.xlu0 %v12992_v59, %s9883_s15  ;;  %v14293_v13 = vand.u32 4294901760, %v13004_v19 }
 0x62c   : > { %v5114_v47 = vpop.permute.xlu1 %5113 }
 0x62d   : > { %v4988_v23 = vpop.permute.xlu0 %4987  ;;  %v6087_v11 = vsub.f32 %v13004_v19, %v14293_v13 }
 0x62e   : > { %5253 = vrot.lane.b32.xlu1 %v4269_v30, %s9888_s9 }
 0x62f   : > { %5127 = vrot.lane.b32.xlu0 %v4238_v14, %s9889_s26  ;;  %v6088_v43 = vand.u32 4294901760, %v6087_v11  ;;  %v5447_v11 = vsel %vm1675_vm3, %v12462_v1, %v12829_v2 }
 0x630   : > { %v13017_v8 = vpop.permute.xlu1 %4733 }
 0x631   : > { %v13019_v62 = vpop.permute.xlu0 %4607  ;;  %8822 = vmatmul.mubr.f32.gmra.mrb[14].mxu1 %v6088_v43  ;;  %v14605_v43 = vld [vmem:[#allocation38_spill] sm:$0xff] }
 0x632   : > { %4747 = vrot.lane.b32.xlu1 %v4238_v14, %s9885_s17 }
 0x633   : > { %4365 = vrot.lane.b32.xlu0 %v4237_v46, %s9878_s10  ;;  %v5479_v46 = vsel %vm1741_vm6, %v5447_v11, %v12877_v63 }
 0x634   : > { %v5242_v44 = vpop.permute.xlu1 %5241  ;;  %v5511_v19 = vsel %vm1807_vm8, %v5479_v46, %v12903_v25  ;;  %v5448_v25 = vsel %vm1675_vm3, %v12486_v24, %v12854_v52 }
 0x635   : > { %v5116_v16 = vpop.permute.xlu0 %5115  ;;  %v5543_v7 = vsel %vm1873_vm10, %v5511_v19, %v12919_v40 }
 0x636   : > { %5255 = vrot.lane.b32.xlu1 %v4270_v33, %s9888_s9  ;;  %v5576_v1 = vsel %vm5557_vm13, %v5543_v7, %v12943_v22  ;;  %v5480_v22 = vsel %vm1741_vm6, %v5448_v25, %v12908_v34 }
 0x637   : > { %4873 = vrot.lane.b32.xlu0 %v4269_v30, %s9887_s16  ;;  %v5609_v2 = vsel %vm5590_vm14, %v5576_v1, %v4986_v58  ;;  %v14606_v58 = vld [vmem:[#allocation39_spill] sm:$0xff] }
 0x638   : > { %v13025_v13 = vpop.permute.xlu1 %4735  ;;  %v5642_v63 = vsel %vm5623_vm15, %v5609_v2, %v5114_v47  ;;  %v5512_v47 = vsel %vm1807_vm8, %v5480_v22, %v12921_v53 }
 0x639   : > { %v13027_v5 = vpop.permute.xlu0 %4353  ;;  %v5675_v40 = vsel %vm5656_vm0, %v5642_v63, %v5242_v44  ;;  %v5544_v24 = vsel %vm1873_vm10, %v5512_v47, %v12927_v45 }
 0x63a   : > { %4367 = vrot.lane.b32.xlu1 %v4238_v14, %s9878_s10  ;;  %v5577_v44 = vsel %vm5557_vm13, %v5544_v24, %v12973_v49 }
 0x63b   : > { %5381 = vrot.lane.b32.xlu0 %v14605_v43, %s9886_s11  ;;  %v5610_v43 = vsel %vm5590_vm14, %v5577_v44, %v4988_v23  ;;  %v4271_v44 = vld [vmem:[#allocation3 + $0x16a] sm:$0xff] }
 0x63c   : > { %v5244_v20 = vpop.permute.xlu1 %5243  ;;  %v5643_v1 = vsel %vm5623_vm15, %v5610_v43, %v5116_v16 }
 0x63d   : > { %v13041_v29 = vpop.permute.xlu0 %4861  ;;  %v5676_v45 = vsel %vm5656_vm0, %v5643_v1, %v5244_v20  ;;  %v4240_v1 = vld [vmem:[#allocation3 + $0x171] sm:$0xff] }
 0x63e   : > { %4875 = vrot.lane.b32.xlu1 %v4270_v33, %s9887_s16 }
 0x63f   : > { %4493 = vrot.lane.b32.xlu0 %v4269_v30, %s9881_s13  ;;  %v13060_v30 = vld [vmem:[#allocation3 + $0x168] sm:$0xff] }
 0x640   : > { %v13049_v14 = vpop.permute.xlu1 %4355 }
 0x641   : > { %v5370_v19 = vpop.permute.xlu0 %5369 }
 0x642   : > { %v5708_v7 = vsel %vm5689_vm1, %v5675_v40, %v5370_v19  ;;  %5383 = vrot.lane.b32.xlu1 %v14606_v58, %s9886_s11  ;;  %v4239_v40 = vld [vmem:[#allocation3 + $0x169] sm:$0xff] }
 0x643   : > { %v5795_v11 = vsel %vm5739_vm2, %v5708_v7, 0  ;;  %5001 = vrot.lane.b32.xlu0 %v13060_v30, %s9890_s23  ;;  %v13090_v19 = vld [vmem:[#allocation3 + $0x170] sm:$0xff] }
 0x644   : > { %v13069_v52 = vand.u32 4294901760, %v5795_v11  ;;  %v13071_v34 = vpop.permute.xlu1 %4863 }
 0x645   : > { %v13075_v46 = vpop.permute.xlu0 %4481 }
 0x646   : > { %14607 = vst [vmem:[#allocation81_spill] sm:$0xff] %v13069_v52  ;;  %v13079_v53 = vsub.f32 %v5795_v11, %v13069_v52  ;;  %4621 = vrot.lane.b32.xlu1 %v13060_v30, %s9883_s15 }
 0x647   : > { %4495 = vrot.lane.b32.xlu0 %v4270_v33, %s9881_s13 }
 0x648   : > { %14608 = vst [vmem:[#allocation83_spill] sm:$0xff] %v13079_v53  ;;  %v5372_v2 = vpop.permute.xlu1 %5371  ;;  %v14304_v63 = vand.u32 4294901760, %v13079_v53 }
 0x649   : > { %v5709_v49 = vsel %vm5689_vm1, %v5676_v45, %v5372_v2  ;;  %v4990_v25 = vpop.permute.xlu0 %4989 }
 0x64a   : > { %v5798_v23 = vsel %vm5739_vm2, %v5709_v49, 0  ;;  %5129 = vrot.lane.b32.xlu1 %v4239_v40, %s9889_s26  ;;  %v6097_v16 = vsub.f32 %v13079_v53, %v14304_v63 }
 0x64b   : > { %v13095_v33 = vand.u32 4294901760, %v5798_v23  ;;  %5003 = vrot.lane.b32.xlu0 %v13090_v19, %s9890_s23 }
 0x64c   : > { %v13099_v20 = vpop.permute.xlu1 %4609  ;;  %v6098_v22 = vand.u32 4294901760, %v6097_v16 }
 0x64d   : > { %14609 = vst [vmem:[#allocation65_spill] sm:$0xff] %v13095_v33  ;;  %v13102_v7 = vsub.f32 %v5798_v23, %v13095_v33  ;;  %v13104_v58 = vpop.permute.xlu0 %4483 }
 0x64e   : > { %4749 = vrot.lane.b32.xlu1 %v4239_v40, %s9885_s17  ;;  %8824 = vmatprep.mubr.f32.mxu1 %v6098_v22  ;;  %v4272_v22 = vld [vmem:[#allocation3 + $0x172] sm:$0xff] }
 0x64f   : > { %14610 = vst [vmem:[#allocation66_spill] sm:$0xff] %v13102_v7  ;;  %4623 = vrot.lane.b32.xlu0 %v13090_v19, %s9883_s15  ;;  %v14303_v47 = vand.u32 4294901760, %v13102_v7 }
 0x650   : > { %v5118_v11 = vpop.permute.xlu1 %5117 }
 0x651   : > { %v4992_v24 = vpop.permute.xlu0 %4991  ;;  %v6107_v43 = vsub.f32 %v13102_v7, %v14303_v47 }
 0x652   : > { %5257 = vrot.lane.b32.xlu1 %v4271_v44, %s9888_s9 }
 0x653   : > { %5131 = vrot.lane.b32.xlu0 %v4240_v1, %s9889_s26  ;;  %v6108_v45 = vand.u32 4294901760, %v6107_v43  ;;  %v5449_v43 = vsel %vm1675_vm3, %v12563_v57, %v12929_v31 }
 0x654   : > { %v13115_v2 = vpop.permute.xlu1 %4737 }
 0x655   : > { %v13117_v49 = vpop.permute.xlu0 %4611  ;;  %8825 = vmatmul.mubr.f32.gmra.mrb[16].mxu1 %v6108_v45  ;;  %v14611_v45 = vld [vmem:[#allocation42_spill] sm:$0xff] }
 0x656   : > { %4751 = vrot.lane.b32.xlu1 %v4240_v1, %s9885_s17 }
 0x657   : > { %4369 = vrot.lane.b32.xlu0 %v4239_v40, %s9878_s10  ;;  %v5481_v40 = vsel %vm1741_vm6, %v5449_v43, %v12977_v35 }
 0x658   : > { %v5246_v23 = vpop.permute.xlu1 %5245  ;;  %v5513_v7 = vsel %vm1807_vm8, %v5481_v40, %v13001_v4  ;;  %v5450_v4 = vsel %vm1675_vm3, %v12593_v28, %v12951_v54 }
 0x659   : > { %v5120_v16 = vpop.permute.xlu0 %5119  ;;  %v5545_v33 = vsel %vm1873_vm10, %v5513_v7, %v13017_v8 }
 0x65a   : > { %5259 = vrot.lane.b32.xlu1 %v4272_v22, %s9888_s9  ;;  %v5578_v57 = vsel %vm5557_vm13, %v5545_v33, %v13041_v29  ;;  %v5482_v29 = vsel %vm1741_vm6, %v5450_v4, %v13006_v61 }
 0x65b   : > { %4877 = vrot.lane.b32.xlu0 %v4271_v44, %s9887_s16  ;;  %v5611_v31 = vsel %vm5590_vm14, %v5578_v57, %v4990_v25  ;;  %v14612_v25 = vld [vmem:[#allocation43_spill] sm:$0xff] }
 0x65c   : > { %v13123_v47 = vpop.permute.xlu1 %4739  ;;  %v5644_v35 = vsel %vm5623_vm15, %v5611_v31, %v5118_v11  ;;  %v5514_v11 = vsel %vm1807_vm8, %v5482_v29, %v13019_v62 }
 0x65d   : > { %v13125_v63 = vpop.permute.xlu0 %4357  ;;  %v5677_v8 = vsel %vm5656_vm0, %v5644_v35, %v5246_v23  ;;  %v5546_v28 = vsel %vm1873_vm10, %v5514_v11, %v13025_v13 }
 0x65e   : > { %4371 = vrot.lane.b32.xlu1 %v4240_v1, %s9878_s10  ;;  %v5579_v61 = vsel %vm5557_vm13, %v5546_v28, %v13071_v34  ;;  %v4273_v28 = vld [vmem:[#allocation3 + $0x182] sm:$0xff] }
 0x65f   : > { %5385 = vrot.lane.b32.xlu0 %v14611_v45, %s9886_s11  ;;  %v5612_v45 = vsel %vm5590_vm14, %v5579_v61, %v4992_v24 }
 0x660   : > { %v5248_v53 = vpop.permute.xlu1 %5247  ;;  %v5645_v57 = vsel %vm5623_vm15, %v5612_v45, %v5120_v16  ;;  %v9804_v45 = vld [vmem:[%s14046_s3] sm:$0xff] }
 0x661   : > { %v13139_v52 = vpop.permute.xlu0 %4865  ;;  %v5678_v13 = vsel %vm5656_vm0, %v5645_v57, %v5248_v53  ;;  %v14617_v57 = vand.u32 4294901760, %v12010_v36 }
 0x662   : > { %4879 = vrot.lane.b32.xlu1 %v4272_v22, %s9887_s16 }
 0x663   : > { %4497 = vrot.lane.b32.xlu0 %v4271_v44, %s9881_s13  ;;  %v4209_v44 = vld [vmem:[#allocation3 + $0x180] sm:$0xff] }
 0x664   : > { %v13147_v1 = vpop.permute.xlu1 %4359 }
 0x665   : > { %v5374_v7 = vpop.permute.xlu0 %5373 }
 0x666   : > { %v5710_v33 = vsel %vm5689_vm1, %v5677_v8, %v5374_v7  ;;  %5387 = vrot.lane.b32.xlu1 %v14612_v25, %s9886_s11  ;;  %v4241_v8 = vld [vmem:[#allocation3 + $0x181] sm:$0xff] }
 0x667   : > { %v5801_v43 = vsel %vm5739_vm2, %v5710_v33, 0  ;;  %5005 = vrot.lane.b32.xlu0 %v4209_v44, %s9890_s23  ;;  %v4210_v7 = vld [vmem:[#allocation3 + $0x188] sm:$0xff] }
 0x668   : > { %v13164_v54 = vand.u32 4294901760, %v5801_v43  ;;  %v13166_v23 = vpop.permute.xlu1 %4867 }
 0x669   : > { %v13170_v40 = vpop.permute.xlu0 %4485 }
 0x66a   : > { %14613 = vst [vmem:[#allocation71_spill] sm:$0xff] %v13164_v54  ;;  %v13174_v62 = vsub.f32 %v5801_v43, %v13164_v54  ;;  %4625 = vrot.lane.b32.xlu1 %v4209_v44, %s9883_s15 }
 0x66b   : > { %4499 = vrot.lane.b32.xlu0 %v4272_v22, %s9881_s13 }
 0x66c   : > { %14614 = vst [vmem:[#allocation10_spill] sm:$0xff] %v13174_v62  ;;  %v5376_v31 = vpop.permute.xlu1 %5375  ;;  %v14314_v35 = vand.u32 4294901760, %v13174_v62 }
 0x66d   : > { %v5711_v34 = vsel %vm5689_vm1, %v5678_v13, %v5376_v31  ;;  %v13182_v4 = vpop.permute.xlu0 %4993  ;;  %v13212_v13 = vsub.f32 %v9804_v45, %v14617_v57  ;;  %v9805_v31 = vld [vmem:[%s14046_s3 + $0x8] sm:$0xff] }
 0x66e   : > { %v5804_v24 = vsel %vm5739_vm2, %v5711_v34, 0  ;;  %5133 = vrot.lane.b32.xlu1 %v4241_v8, %s9889_s26  ;;  %v6117_v16 = vsub.f32 %v13174_v62, %v14314_v35  ;;  %v14618_v34 = vand.u32 4294901760, %v12015_v6 }
 0x66f   : > { %v13189_v22 = vand.u32 4294901760, %v5804_v24  ;;  %5007 = vrot.lane.b32.xlu0 %v4210_v7, %s9890_s23 }
 0x670   : > { %v13192_v53 = vpop.permute.xlu1 %4613  ;;  %v6118_v29 = vand.u32 4294901760, %v6117_v16  ;;  %v14317_v16 = vand.u32 4294901760, %v13212_v13 }
 0x671   : > { %14615 = vst [vmem:[#allocation9_spill] sm:$0xff] %v13189_v22  ;;  %v13195_v33 = vsub.f32 %v5804_v24, %v13189_v22  ;;  %v13197_v25 = vpop.permute.xlu0 %4487  ;;  %v4242_v24 = vld [vmem:[#allocation3 + $0x189] sm:$0xff] }
 0x672   : > { %4753 = vrot.lane.b32.xlu1 %v4241_v8, %s9885_s17  ;;  %8827 = vmatprep.mubr.f32.mxu1 %v6118_v29  ;;  %v13219_v8 = vsub.f32 %v9805_v31, %v14618_v34  ;;  %v6238_v6 = vsub.f32 %v13212_v13, %v14317_v16  ;;  %v9806_v16 = vld [vmem:[%s14046_s3 + $0x10] sm:$0xff] }
 0x673   : > { %14616 = vst [vmem:[#allocation12_spill] sm:$0xff] %v13195_v33  ;;  %4627 = vrot.lane.b32.xlu0 %v4210_v7, %s9883_s15  ;;  %v14313_v44 = vand.u32 4294901760, %v13195_v33 }
 0x674   : > { %v5122_v11 = vpop.permute.xlu1 %5121  ;;  %v14318_v36 = vand.u32 4294901760, %v13219_v8 }
 0x675   : > { %v13202_v43 = vpop.permute.xlu0 %4995  ;;  %v6127_v61 = vsub.f32 %v13195_v33, %v14313_v44  ;;  %v4274_v33 = vld [vmem:[#allocation3 + $0x18a] sm:$0xff] }
 0x676   : > { %5261 = vrot.lane.b32.xlu1 %v4273_v28, %s9888_s9  ;;  %v6245_v57 = vsub.f32 %v13219_v8, %v14318_v36  ;;  %v14620_v36 = vand.u32 4294901760, %v12034_v9 }
 0x677   : > { %5135 = vrot.lane.b32.xlu0 %v4242_v24, %s9889_s26  ;;  %v6128_v7 = vand.u32 4294901760, %v6127_v61  ;;  %v6239_v61 = vand.u32 4294901760, %v6238_v6 }
 0x678   : > { %v13225_v29 = vpop.permute.xlu1 %4741  ;;  %v6246_v31 = vand.u32 4294901760, %v6245_v57  ;;  %v13246_v62 = vsub.f32 %v9806_v16, %v14620_v36  ;;  %v4211_v57 = vld [vmem:[#allocation3 + $0x198] sm:$0xff]  ;;  %v5451_v36 = vsel %vm1675_vm3, %v12674_v60, %v13027_v5 }
 0x679   : > { %v13227_v45 = vpop.permute.xlu0 %4615  ;;  %8828 = vmatmul.mubr.f32.gmra.mrb[18].mxu1 %v6128_v7  ;;  %v14619_v7 = vld [vmem:[#allocation46_spill] sm:$0xff] }
 0x67a   : > { %4881 = vrot.lane.b32.xlu1 %v4273_v28, %s9887_s16  ;;  %v9253_v35 = vpack.c.bf16 %v6246_v31, %v6239_v61  ;;  %14621 = vst [vmem:[#allocation11_spill] sm:$0xff] %v13246_v62  ;;  %v9807_v28 = vld [vmem:[%s14046_s3 + $0x18] sm:$0xff]  ;;  %v14323_v31 = vand.u32 4294901760, %v13246_v62 }
 0x67b   : > { %4755 = vrot.lane.b32.xlu0 %v4242_v24, %s9885_s17  ;;  %v14622_v24 = vand.u32 4294901760, %v12039_v41 }
 0x67c   : > { %v5250_v34 = vpop.permute.xlu1 %5249  ;;  %9254 = vmatprep.subr.bf16.mxu1 %v9253_v35  ;;  %v6252_v41 = vsub.f32 %v13246_v62, %v14323_v31 }
 0x67d   : > { %v13237_v44 = vpop.permute.xlu0 %5123  ;;  %v13253_v6 = vsub.f32 %v9807_v28, %v14622_v24  ;;  %9256 = vmatpush3.bf16.msra.mxu1 %v9253_v35  ;;  %v4212_v28 = vld [vmem:[#allocation3 + $0x1a0] sm:$0xff] }
 0x67e   : > { %5389 = vrot.lane.b32.xlu1 %v14619_v7, %s9886_s11  ;;  %v5483_v7 = vsel %vm1741_vm6, %v5451_v36, %v13075_v46  ;;  %v6253_v5 = vand.u32 4294901760, %v6252_v41  ;;  %v14624_v36 = vld [vmem:[#allocation47_spill] sm:$0xff] }
 0x67f   : > { %14623 = vst [vmem:[#allocation14_spill] sm:$0xff] %v13253_v6  ;;  %5263 = vrot.lane.b32.xlu0 %v4274_v33, %s9888_s9  ;;  %v14324_v9 = vand.u32 4294901760, %v13253_v6  ;;  %v5515_v24 = vsel %vm1807_vm8, %v5483_v7, %v13099_v20  ;;  %v4244_v20 = vld [vmem:[#allocation3 + $0x1a1] sm:$0xff] }
 0x680   : > { %v13256_v61 = vpop.permute.xlu1 %4743  ;;  %v5547_v22 = vsel %vm1873_vm10, %v5515_v24, %v13115_v2  ;;  %v4243_v2 = vld [vmem:[#allocation3 + $0x199] sm:$0xff] }
 0x681   : > { %v13260_v16 = vpop.permute.xlu0 %4361  ;;  %v6259_v35 = vsub.f32 %v13253_v6, %v14324_v9  ;;  %v5580_v9 = vsel %vm5557_vm13, %v5547_v22, %v13139_v52  ;;  %v5452_v52 = vsel %vm1675_vm3, %v12698_v48, %v13049_v14  ;;  %v9809_v48 = vld [vmem:[%s14046_s3 + $0x28] sm:$0xff]  ;;  %v14627_v14 = vand.u32 4294901760, %v12084_v32 }
 0x682   : > { %5009 = vrot.lane.b32.xlu1 %v4211_v57, %s9890_s23 }
 0x683   : > { %4883 = vrot.lane.b32.xlu0 %v4274_v33, %s9887_s16  ;;  %v6260_v57 = vand.u32 4294901760, %v6259_v35  ;;  %v5613_v33 = vsel %vm5590_vm14, %v5580_v9, %v13182_v4  ;;  %v5484_v4 = vsel %vm1741_vm6, %v5452_v52, %v13104_v58 }
 0x684   : > { %v5252_v60 = vpop.permute.xlu1 %5251  ;;  %v5646_v41 = vsel %vm5623_vm15, %v5613_v33, %v5122_v11  ;;  %v9808_v11 = vld [vmem:[%s14046_s3 + $0x20] sm:$0xff]  ;;  %v5516_v58 = vsel %vm1807_vm8, %v5484_v4, %v13117_v49 }
 0x685   : > { %v13279_v31 = vpop.permute.xlu0 %4869  ;;  %v9257_v46 = vpack.c.bf16 %v6260_v57, %v6253_v5  ;;  %v5679_v22 = vsel %vm5656_vm0, %v5646_v41, %v5250_v34  ;;  %v13311_v34 = vsub.f32 %v9809_v48, %v14627_v14  ;;  %v4276_v57 = vld [vmem:[#allocation3 + $0x1a2] sm:$0xff] }
 0x686   : > { %5011 = vrot.lane.b32.xlu1 %v4212_v28, %s9890_s23  ;;  %v14625_v28 = vand.u32 4294901760, %v12079_v27  ;;  %v5548_v27 = vsel %vm1873_vm10, %v5516_v58, %v13123_v47  ;;  %v14631_v58 = vld [vmem:[#allocation51_spill] sm:$0xff] }
 0x687   : > { %5391 = vrot.lane.b32.xlu0 %v14624_v36, %s9886_s11  ;;  %9258 = vmatprep.subr.bf16.mxu1 %v9257_v46  ;;  %14628 = vst [vmem:[#allocation16_spill] sm:$0xff] %v13311_v34  ;;  %v4275_v36 = vld [vmem:[#allocation3 + $0x19a] sm:$0xff]  ;;  %v5581_v49 = vsel %vm5557_vm13, %v5548_v27, %v13166_v23  ;;  %v4021_v27 = vld [vmem:[#allocation3 + $0x9] sm:$0xff] }
 0x688   : > { %v13289_v35 = vpop.permute.xlu1 %4363  ;;  %9260 = vmatpush3.bf16.msra.mxu1 %v9257_v46  ;;  %v13304_v24 = vsub.f32 %v9808_v11, %v14625_v28 }
 0x689   : > { %v5378_v7 = vpop.permute.xlu0 %5377 }
 0x68a   : > { %v5712_v9 = vsel %vm5689_vm1, %v5679_v22, %v5378_v7  ;;  %5139 = vrot.lane.b32.xlu1 %v4244_v20, %s9889_s26  ;;  %14626 = vst [vmem:[#allocation13_spill] sm:$0xff] %v13304_v24  ;;  %v14330_v32 = vand.u32 4294901760, %v13304_v24  ;;  %v14327_v20 = vand.u32 4294901760, %v13311_v34 }
 0x68b   : > { %v5807_v5 = vsel %vm5739_vm2, %v5712_v9, 0  ;;  %5137 = vrot.lane.b32.xlu0 %v4243_v2, %s9889_s26  ;;  %v5614_v2 = vsel %vm5590_vm14, %v5581_v49, %v13202_v43 }
 0x68c   : > { %v13319_v46 = vand.u32 4294901760, %v5807_v5  ;;  %v13321_v33 = vpop.permute.xlu1 %4871  ;;  %v6266_v47 = vsub.f32 %v13304_v24, %v14330_v32  ;;  %v6273_v22 = vsub.f32 %v13311_v34, %v14327_v20  ;;  %v5647_v23 = vsel %vm5623_vm15, %v5614_v2, %v13237_v44  ;;  %v4020_v2 = vld [vmem:[#allocation3 + $0x1] sm:$0xff] }
 0x68d   : > { %v13327_v41 = vpop.permute.xlu0 %4489  ;;  %v5680_v43 = vsel %vm5656_vm0, %v5647_v23, %v5252_v60  ;;  %v9810_v23 = vld [vmem:[%s14046_s3 + $0x30] sm:$0xff] }
 0x68e   : > { %14629 = vst [vmem:[#allocation15_spill] sm:$0xff] %v13319_v46  ;;  %v13332_v52 = vsub.f32 %v5807_v5, %v13319_v46  ;;  %5267 = vrot.lane.b32.xlu1 %v4276_v57, %s9888_s9  ;;  %v6267_v9 = vand.u32 4294901760, %v6266_v47  ;;  %v6274_v11 = vand.u32 4294901760, %v6273_v22  ;;  %v14633_v57 = vld [vmem:[#allocation50_spill] sm:$0xff] }
 0x68f   : > { %5265 = vrot.lane.b32.xlu0 %v4275_v36, %s9888_s9  ;;  %v4117_v32 = vld [vmem:[#allocation3 + $0x21] sm:$0xff] }
 0x690   : > { %14630 = vst [vmem:[#allocation18_spill] sm:$0xff] %v13332_v52  ;;  %v5380_v7 = vpop.permute.xlu1 %5379  ;;  %v14325_v4 = vand.u32 4294901760, %v13332_v52  ;;  %v9261_v5 = vpack.c.bf16 %v6274_v11, %v6267_v9  ;;  %v9811_v9 = vld [vmem:[%s14046_s3 + $0x38] sm:$0xff]  ;;  %v14636_v11 = vand.u32 4294901760, %v12116_v37 }
 0x691   : > { %v5713_v28 = vsel %vm5689_vm1, %v5680_v43, %v5380_v7  ;;  %v13347_v48 = vpop.permute.xlu0 %4997  ;;  %v14635_v43 = vand.u32 4294901760, %v12111_v3 }
 0x692   : > { %v5810_v14 = vsel %vm5739_vm2, %v5713_v28, 0  ;;  %5395 = vrot.lane.b32.xlu1 %v14631_v58, %s9886_s11  ;;  %v6137_v44 = vsub.f32 %v13332_v52, %v14325_v4  ;;  %9262 = vmatprep.subr.bf16.mxu1 %v9261_v5  ;;  %v13379_v28 = vsub.f32 %v9811_v9, %v14636_v11 }
 0x693   : > { %v13355_v60 = vand.u32 4294901760, %v5810_v14  ;;  %5393 = vrot.lane.b32.xlu0 %v14633_v57, %s9886_s11  ;;  %9264 = vmatpush3.bf16.msra.mxu1 %v9261_v5  ;;  %v13372_v7 = vsub.f32 %v9810_v23, %v14635_v43  ;;  %v4052_v5 = vld [vmem:[#allocation3 + $0x2] sm:$0xff] }
 0x694   : > { %v13359_v36 = vpop.permute.xlu1 %4617  ;;  %v6138_v49 = vand.u32 4294901760, %v6137_v44  ;;  %14637 = vst [vmem:[#allocation63_spill] sm:$0xff] %v13379_v28  ;;  %v14329_v3 = vand.u32 4294901760, %v13379_v28 }
 0x695   : > { %14632 = vst [vmem:[#allocation17_spill] sm:$0xff] %v13355_v60  ;;  %v13362_v47 = vsub.f32 %v5810_v14, %v13355_v60  ;;  %v13364_v22 = vpop.permute.xlu0 %4491  ;;  %v4053_v14 = vld [vmem:[#allocation3 + $0xa] sm:$0xff]  ;;  %v14328_v57 = vand.u32 4294901760, %v13372_v7 }
 0x696   : > { %4311 = vrot.lane.b32.xlu1 %v4021_v27, %s9878_s10  ;;  %8830 = vmatprep.mubr.f32.mxu1 %v6138_v49 }
 0x697   : > { %14634 = vst [vmem:[#allocation61_spill] sm:$0xff] %v13362_v47  ;;  %4309 = vrot.lane.b32.xlu0 %v4020_v2, %s9878_s10  ;;  %v14326_v58 = vand.u32 4294901760, %v13362_v47  ;;  %v6280_v37 = vsub.f32 %v13372_v7, %v14328_v57  ;;  %v6287_v2 = vsub.f32 %v13379_v28, %v14329_v3 }
 0x698   : > { %v5126_v44 = vpop.permute.xlu1 %5125 }
 0x699   : > { %v13385_v27 = vpop.permute.xlu0 %4999  ;;  %v6147_v49 = vsub.f32 %v13362_v47, %v14326_v58  ;;  %v6281_v9 = vand.u32 4294901760, %v6280_v37  ;;  %v6288_v11 = vand.u32 4294901760, %v6287_v2  ;;  %v4085_v58 = vld [vmem:[#allocation3 + $0x20] sm:$0xff]  ;;  %v14638_v37 = vand.u32 4294901760, %v12057_v10 }
 0x69a   : > { %4439 = vrot.lane.b32.xlu1 %v4053_v14, %s9881_s13  ;;  %v4084_v14 = vld [vmem:[#allocation3 + $0x18] sm:$0xff]  ;;  %v5453_v10 = vsel %vm1675_vm3, %v12768_v42, %v13125_v63 }
 0x69b   : > { %4437 = vrot.lane.b32.xlu0 %v4052_v5, %s9881_s13  ;;  %v6148_v23 = vand.u32 4294901760, %v6147_v49  ;;  %v9265_v20 = vpack.c.bf16 %v6288_v11, %v6281_v9  ;;  %v4116_v5 = vld [vmem:[#allocation3 + $0x19] sm:$0xff]  ;;  %v9812_v49 = vld [vmem:[%s14046_s3 + $0x40] sm:$0xff] }
 0x69c   : > { %v13398_v43 = vpop.permute.xlu1 %4745  ;;  %v13410_v2 = vsub.f32 %v9812_v49, %v14638_v37  ;;  %v4148_v49 = vld [vmem:[#allocation3 + $0x1a] sm:$0xff]  ;;  %v5485_v37 = vsel %vm1741_vm6, %v5453_v10, %v13170_v40  ;;  %v4181_v40 = vld [vmem:[#allocation3 + $0x30] sm:$0xff] }
 0x69d   : > { %v13400_v4 = vpop.permute.xlu0 %4619  ;;  %8831 = vmatmul.mubr.f32.gmra.mrb[20].mxu1 %v6148_v23  ;;  %9266 = vmatprep.subr.bf16.mxu1 %v9265_v20 }
 0x69e   : > { %4567 = vrot.lane.b32.xlu1 %v4085_v58, %s9883_s15  ;;  %9268 = vmatpush3.bf16.msra.mxu1 %v9265_v20  ;;  %14639 = vst [vmem:[#allocation67_spill] sm:$0xff] %v13410_v2  ;;  %v14640_v58 = vand.u32 4294901760, %v12071_v18 }
 0x69f   : > { %4565 = vrot.lane.b32.xlu0 %v4084_v14, %s9883_s15  ;;  %v4149_v14 = vld [vmem:[#allocation3 + $0x22] sm:$0xff] }
 0x6a0   : > { %v5254_v57 = vpop.permute.xlu1 %5253  ;;  %v13415_v23 = vsub.f32 %v12071_v18, %v14640_v58  ;;  %v5517_v58 = vsel %vm1807_vm8, %v5485_v37, %v13192_v53 }
 0x6a1   : > { %v5128_v3 = vpop.permute.xlu0 %5127  ;;  %v5549_v47 = vsel %vm1873_vm10, %v5517_v58, %v13225_v29  ;;  %v5454_v29 = vsel %vm1675_vm3, %v12794_v17, %v13147_v1 }
 0x6a2   : > { %4695 = vrot.lane.b32.xlu1 %v4117_v32, %s9885_s17  ;;  %14641 = vst [vmem:[#allocation69_spill] sm:$0xff] %v13415_v23  ;;  %v14335_v32 = vand.u32 4294901760, %v13410_v2  ;;  %v14336_v20 = vand.u32 4294901760, %v13415_v23 }
 0x6a3   : > { %4693 = vrot.lane.b32.xlu0 %v4116_v5, %s9885_s17 }
 0x6a4   : > { %v13418_v9 = vpop.permute.xlu1 %4747  ;;  %v6294_v18 = vsub.f32 %v13410_v2, %v14335_v32  ;;  %v6301_v5 = vsub.f32 %v13415_v23, %v14336_v20  ;;  %v4182_v32 = vld [vmem:[#allocation3 + $0x38] sm:$0xff]  ;;  %v5582_v20 = vsel %vm5557_vm13, %v5549_v47, %v13279_v31 }
 0x6a5   : > { %v13422_v11 = vpop.permute.xlu0 %4365 }
 0x6a6   : > { %4823 = vrot.lane.b32.xlu1 %v4149_v14, %s9887_s16  ;;  %v6295_v63 = vand.u32 4294901760, %v6294_v18  ;;  %v6302_v14 = vand.u32 4294901760, %v6301_v5  ;;  %v5486_v5 = vsel %vm1741_vm6, %v5454_v29, %v13197_v25 }
 0x6a7   : > { %4821 = vrot.lane.b32.xlu0 %v4148_v49, %s9887_s16  ;;  %v5615_v49 = vsel %vm5590_vm14, %v5582_v20, %v13347_v48  ;;  %v5518_v20 = vsel %vm1807_vm8, %v5486_v5, %v13227_v45 }
 0x6a8   : > { %v5256_v42 = vpop.permute.xlu1 %5255  ;;  %v9269_v10 = vpack.c.bf16 %v6302_v14, %v6295_v63  ;;  %v5648_v53 = vsel %vm5623_vm15, %v5615_v49, %v5126_v44  ;;  %v4213_v44 = vld [vmem:[#allocation3 + $0x31] sm:$0xff]  ;;  %v5550_v17 = vsel %vm1873_vm10, %v5518_v20, %v13256_v61  ;;  %v4246_v63 = vld [vmem:[#allocation3 + $0x3a] sm:$0xff] }
 0x6a9   : > { %v13441_v52 = vpop.permute.xlu0 %4873  ;;  %v5681_v31 = vsel %vm5656_vm0, %v5648_v53, %v5254_v57  ;;  %v5583_v25 = vsel %vm5557_vm13, %v5550_v17, %v13321_v33  ;;  %v13510_v17 = vpack.c.bf16 %v13253_v6, %v13246_v62 }
 0x6aa   : > { %4951 = vrot.lane.b32.xlu1 %v4182_v32, %s9890_s23  ;;  %9270 = vmatprep.subr.bf16.mxu1 %v9269_v10  ;;  %v4214_v32 = vld [vmem:[#allocation3 + $0x39] sm:$0xff]  ;;  %v5616_v45 = vsel %vm5590_vm14, %v5583_v25, %v13385_v27 }
 0x6ab   : > { %4949 = vrot.lane.b32.xlu0 %v4181_v40, %s9890_s23  ;;  %9272 = vmatpush3.bf16.msra.mxu1 %v9269_v10  ;;  %v4245_v40 = vld [vmem:[#allocation3 + $0x32] sm:$0xff]  ;;  %v5649_v61 = vsel %vm5623_vm15, %v5616_v45, %v5128_v3  ;;  %v13484_v10 = vpack.c.bf16 %v13219_v8, %v13212_v13  ;;  %s7954_s23 = sshll.u32 %s9943_s22, 8  ;;  %s9817_s22 = sshll.u32 %s9891_s12, 4  ;;  %s9818_s22 = int_to_ptr.vmem [resolvable:$false] %s9817_s22 }
 0x6ac   : > { %v13450_v18 = vpop.permute.xlu1 %4367  ;;  %v5682_v33 = vsel %vm5656_vm0, %v5649_v61, %v5256_v42  ;;  %v14643_v3 = vld [vmem:[#allocation8_spill] sm:$0xff]  ;;  %v14645_v42 = vld [vmem:[#allocation7_spill] sm:$0xff]  ;;  %s14003_s7 = scalar_lea.hbm %s14048_s5, %s7954_s23  ;;  %s9819_s14 = scalar_lea.vmem %s9818_s22, 512 }
 0x6ad   : > { %v5382_v47 = vpop.permute.xlu0 %5381  ;;  %9274 = vmatprep.subr.bf16.mxu1 %v13484_v10 }
 0x6ae   : > { %v5714_v48 = vsel %vm5689_vm1, %v5681_v31, %v5382_v47  ;;  %5079 = vrot.lane.b32.xlu1 %v4214_v32, %s9889_s26 }
 0x6af   : > { %v5813_v37 = vsel %vm5739_vm2, %v5714_v48, 0  ;;  %5077 = vrot.lane.b32.xlu0 %v4213_v44, %s9889_s26 }
 0x6b0   : > { %v13466_v1 = vand.u32 4294901760, %v5813_v37  ;;  %v13468_v57 = vpop.permute.xlu1 %4875 }
 0x6b1   : > { %v13472_v58 = vpop.permute.xlu0 %4493 }
 0x6b2   : > { %14642 = vst [vmem:[#allocation72_spill] sm:$0xff] %v13466_v1  ;;  %v13477_v14 = vsub.f32 %v5813_v37, %v13466_v1  ;;  %5207 = vrot.lane.b32.xlu1 %v4246_v63, %s9888_s9 }
 0x6b3   : > { %5205 = vrot.lane.b32.xlu0 %v4245_v40, %s9888_s9 }
 0x6b4   : > { %v5384_v49 = vpop.permute.xlu1 %5383  ;;  %v14338_v53 = vand.u32 4294901760, %v13477_v14 }
 0x6b5   : > { %v5715_v27 = vsel %vm5689_vm1, %v5682_v33, %v5384_v49  ;;  %v5002_v29 = vpop.permute.xlu0 %5001 }
 0x6b6   : > { %v5816_v31 = vsel %vm5739_vm2, %v5715_v27, 0  ;;  %5335 = vrot.lane.b32.xlu1 %v14643_v3, %s9886_s11  ;;  %v6157_v47 = vsub.f32 %v13477_v14, %v14338_v53  ;;  %v13521_v3 = vpack.c.bf16 %v13311_v34, %v13304_v24 }
 0x6b7   : > { %v13496_v32 = vand.u32 4294901760, %v5816_v31  ;;  %5333 = vrot.lane.b32.xlu0 %v14645_v42, %s9886_s11  ;;  %v5455_v42 = vsel %vm1675_vm3, %v12862_v50, %v13260_v16  ;;  %v5456_v50 = vsel %vm1675_vm3, %v12892_v21, %v13289_v35  ;;  %v13556_v21 = vpack.c.bf16 %v13379_v28, %v13372_v7  ;;  %s215_s11 = sand.u32 1, %s9867_s19  }
 0x6b8   : > { %v13500_v5 = vpop.permute.xlu1 %4621  ;;  %v6158_v48 = vand.u32 4294901760, %v6157_v47  ;;  %s7943_s16 = sshll.u32 %s215_s11, 4  ;;  %s7866_s8 = scalar_lea.sflag [#allocation5], %s215_s11 }
 0x6b9   : > { %14644 = vst [vmem:[#allocation74_spill] sm:$0xff] %v13496_v32  ;;  %v13503_v44 = vsub.f32 %v5816_v31, %v13496_v32  ;;  %v13505_v20 = vpop.permute.xlu0 %4495  ;;  %s217_s9 = scalar_lea.vmem [#allocation4], %s7943_s16 }
 0x6ba   : > { %8833 = vmatprep.mubr.f32.mxu1 %v6158_v48  ;;  %v5487_v48 = vsel %vm1741_vm6, %v5455_v42, %v13327_v41  ;;  %s7880_s26 = sshll.u32 %s217_s9, 4  ;;  %s13998_s26 = int_to_ptr.vmem [resolvable:$true] %s7880_s26 }
 0x6bb   : > { %v14337_v37 = vand.u32 4294901760, %v13503_v44  ;;  %s9813_s25 = scalar_lea.vmem %s13998_s26, 256  ;;  %p9820_p0 = scmp.lt.s32.totalorder %s13998_s26, %s9818_s22 }
 0x6bc   : > { %v5130_v25 = vpop.permute.xlu1 %5129  ;;  %p9814_p11 = scmp.ne.s32.totalorder %s13998_s26, %s9813_s25  ;;  %p9821_p1 = scmp.lt.s32.totalorder %s9819_s14, %s9813_s25 }
 0x6bd   : > { %v5004_v63 = vpop.permute.xlu0 %5003  ;;  %v6167_v45 = vsub.f32 %v13503_v44, %v14337_v37 }
 0x6be   : > { %p9815_p12 = pnand %p9814_p11, %p9960_p5  ;;  %p9822_p2 = por %p9821_p1, %p9820_p0 }
 0x6bf   : > { %v6168_v40 = vand.u32 4294901760, %v6167_v45  ;;  %v5519_v45 = vsel %vm1807_vm8, %v5487_v48, %v13359_v36  ;;  %v5488_v36 = vsel %vm1741_vm6, %v5456_v50, %v13364_v22 }
 0x6c0   : > { %v4750_v61 = vpop.permute.xlu1 %4749  ;;  %v5551_v37 = vsel %vm1873_vm10, %v5519_v45, %v13398_v43  ;;  %p9816_p13 = pneg %p9815_p12 }
 0x6c1   : > { %v13515_v33 = vpop.permute.xlu0 %4623  ;;  %8834 = vmatmul.mubr.f32.gmra.mrb[22].mxu1 %v6168_v40  ;;  %v5584_v34 = vsel %vm5557_vm13, %v5551_v37, %v13441_v52  ;;  %v5520_v52 = vsel %vm1807_vm8, %v5488_v36, %v13400_v4 }
 0x6c2   : > { %v5617_v24 = vsel %vm5590_vm14, %v5584_v34, %v5002_v29  ;;  %p9823_p3 = pnand %p9822_p2, %p9816_p13 }
 0x6c3   : > { %v5650_v6 = vsel %vm5623_vm15, %v5617_v24, %v5130_v25  ;;  %v5552_v24 = vsel %vm1873_vm10, %v5520_v52, %v13418_v9  ;;  %v13582_v52 = vpack.c.bf16 %v13415_v23, %v13410_v2 }
 0x6c4   : > { %v5258_v49 = vpop.permute.xlu1 %5257 }
 0x6c5   : > { %v5132_v27 = vpop.permute.xlu0 %5131  ;;  %v5683_v16 = vsel %vm5656_vm0, %v5650_v6, %v5258_v49  ;;  %v5585_v6 = vsel %vm5557_vm13, %v5552_v24, %v13468_v57 }
 0x6c6   : > { %v5618_v22 = vsel %vm5590_vm14, %v5585_v6, %v5004_v63 }
 0x6c7   : > { %v5651_v25 = vsel %vm5623_vm15, %v5618_v22, %v5132_v27 }
 0x6c8   : > { %v13517_v31 = vpop.permute.xlu1 %4751 }
 0x6c9   : > { %v13523_v47 = vpop.permute.xlu0 %4369 }
 0x6cc   : > { %v5260_v40 = vpop.permute.xlu1 %5259 }
 0x6cd   : > { %v4878_v53 = vpop.permute.xlu0 %4877  ;;  %v5684_v9 = vsel %vm5656_vm0, %v5651_v25, %v5260_v40 }
 0x6d0   : > { %v13538_v62 = vpop.permute.xlu1 %4371 }
 0x6d1   : > { %v5386_v41 = vpop.permute.xlu0 %5385 }
 0x6d2   : > { %v5716_v43 = vsel %vm5689_vm1, %v5683_v16, %v5386_v41 }
 0x6d3   : > { %v5819_v34 = vsel %vm5739_vm2, %v5716_v43, 0 }
 0x6d4   : > { %v13552_v29 = vand.u32 4294901760, %v5819_v34  ;;  %v4880_v37 = vpop.permute.xlu1 %4879 }
 0x6d5   : > { %v13560_v35 = vpop.permute.xlu0 %4497 }
 0x6d6   : > { %14646 = vst [vmem:[#allocation76_spill] sm:$0xff] %v13552_v29  ;;  %v13564_v4 = vsub.f32 %v5819_v34, %v13552_v29 }
 0x6d8   : > { %v5388_v49 = vpop.permute.xlu1 %5387  ;;  %v14343_v42 = vand.u32 4294901760, %v13564_v4 }
 0x6d9   : > { %v5717_v48 = vsel %vm5689_vm1, %v5684_v9, %v5388_v49  ;;  %v5006_v45 = vpop.permute.xlu0 %5005  ;;  %v5457_v49 = vsel %vm1675_vm3, %v12962_v0, %v13422_v11 }
 0x6da   : > { %v5822_v50 = vsel %vm5739_vm2, %v5717_v48, 0  ;;  %v6177_v57 = vsub.f32 %v13564_v4, %v14343_v42 }
 0x6db   : > { %v13574_v63 = vand.u32 4294901760, %v5822_v50 }
 0x6dc   : > { %v4626_v16 = vpop.permute.xlu1 %4625  ;;  %v6178_v41 = vand.u32 4294901760, %v6177_v57 }
 0x6dd   : > { %14647 = vst [vmem:[#allocation78_spill] sm:$0xff] %v13574_v63  ;;  %v13577_v27 = vsub.f32 %v5822_v50, %v13574_v63  ;;  %v4500_v40 = vpop.permute.xlu0 %4499  ;;  %v5489_v50 = vsel %vm1741_vm6, %v5457_v49, %v13472_v58  ;;  %v5458_v58 = vsel %vm1675_vm3, %v12992_v59, %v13450_v18 }
 0x6de   : > { %8836 = vmatprep.mubr.f32.mxu1 %v6178_v41  ;;  %v5521_v57 = vsel %vm1807_vm8, %v5489_v50, %v13500_v5 }
 0x6df   : > { %v14344_v36 = vand.u32 4294901760, %v13577_v27  ;;  %v5553_v41 = vsel %vm1873_vm10, %v5521_v57, %v4750_v61 }
 0x6e0   : > { %v5134_v43 = vpop.permute.xlu1 %5133 }
 0x6e1   : > { %v5008_v34 = vpop.permute.xlu0 %5007  ;;  %v6187_v24 = vsub.f32 %v13577_v27, %v14344_v36 }
 0x6e3   : > { %v6188_v6 = vand.u32 4294901760, %v6187_v24  ;;  %v5586_v24 = vsel %vm5557_vm13, %v5553_v41, %v4878_v53  ;;  %v5490_v53 = vsel %vm1741_vm6, %v5458_v58, %v13505_v20 }
 0x6e4   : > { %v4754_v22 = vpop.permute.xlu1 %4753 }
 0x6e5   : > { %v4628_v25 = vpop.permute.xlu0 %4627  ;;  %8837 = vmatmul.mubr.f32.gmra.mrb[24].mxu1 %v6188_v6  ;;  %v5619_v6 = vsel %vm5590_vm14, %v5586_v24, %v5006_v45  ;;  %v5522_v45 = vsel %vm1807_vm8, %v5490_v53, %v13515_v33 }
 0x6e6   : > { %v5652_v23 = vsel %vm5623_vm15, %v5619_v6, %v5134_v43 }
 0x6e8   : > { %v5262_v9 = vpop.permute.xlu1 %5261 }
 0x6e9   : > { %v5136_v48 = vpop.permute.xlu0 %5135  ;;  %v5685_v2 = vsel %vm5656_vm0, %v5652_v23, %v5262_v9  ;;  %v5554_v23 = vsel %vm1873_vm10, %v5522_v45, %v13517_v31 }
 0x6ea   : > { %v5587_v59 = vsel %vm5557_vm13, %v5554_v23, %v4880_v37 }
 0x6eb   : > { %v5620_v18 = vsel %vm5590_vm14, %v5587_v59, %v5008_v34 }
 0x6ec   : > { %v4882_v42 = vpop.permute.xlu1 %4881  ;;  %v5653_v20 = vsel %vm5623_vm15, %v5620_v18, %v5136_v48  ;;  %v5460_v48 = vsel %vm1675_vm3, %v13090_v19, %v13538_v62 }
 0x6ed   : > { %v4756_v36 = vpop.permute.xlu0 %4755 }
 0x6f0   : > { %v5390_v0 = vpop.permute.xlu1 %5389 }
 0x6f1   : > { %v5718_v11 = vsel %vm5689_vm1, %v5685_v2, %v5390_v0  ;;  %v5264_v28 = vpop.permute.xlu0 %5263 }
 0x6f2   : > { %v5825_v5 = vsel %vm5739_vm2, %v5718_v11, 0  ;;  %v5686_v57 = vsel %vm5656_vm0, %v5653_v20, %v5264_v28  ;;  %v5459_v28 = vsel %vm1675_vm3, %v13060_v30, %v13523_v47  ;;  %v5492_v11 = vsel %vm1741_vm6, %v5460_v48, %v4500_v40 }
 0x6f3   : > { %v13606_v61 = vand.u32 4294901760, %v5825_v5  ;;  %v5524_v53 = vsel %vm1807_vm8, %v5492_v11, %v4628_v25 }
 0x6f4   : > { %v5010_v43 = vpop.permute.xlu1 %5009  ;;  %v5556_v19 = vsel %vm1873_vm10, %v5524_v53, %v4756_v36 }
 0x6f5   : > { %14648 = vst [vmem:[#allocation80_spill] sm:$0xff] %v13606_v61  ;;  %v13613_v2 = vsub.f32 %v5825_v5, %v13606_v61  ;;  %v4884_v9 = vpop.permute.xlu0 %4883  ;;  %v5491_v5 = vsel %vm1741_vm6, %v5459_v28, %v13560_v35 }
 0x6f6   : > { %v5523_v45 = vsel %vm1807_vm8, %v5491_v5, %v4626_v16  ;;  %v5589_v30 = vsel %vm5557_vm13, %v5556_v19, %v4884_v9 }
 0x6f7   : > { %v14351_v49 = vand.u32 4294901760, %v13613_v2  ;;  %v5555_v59 = vsel %vm1873_vm10, %v5523_v45, %v4754_v22 }
 0x6f8   : > { %v5012_v50 = vpop.permute.xlu1 %5011  ;;  %v5588_v40 = vsel %vm5557_vm13, %v5555_v59, %v4882_v42 }
 0x6f9   : > { %v5392_v33 = vpop.permute.xlu0 %5391  ;;  %v6197_v31 = vsub.f32 %v13613_v2, %v14351_v49  ;;  %v5622_v18 = vsel %vm5590_vm14, %v5589_v30, %v5012_v50  ;;  %v5621_v16 = vsel %vm5590_vm14, %v5588_v40, %v5010_v43  ;;  %v14678_v49 = vld [vmem:[#allocation53_spill] sm:$0xff] }
 0x6fa   : > { %v5719_v41 = vsel %vm5689_vm1, %v5686_v57, %v5392_v33 }
 0x6fb   : > { %v5828_v24 = vsel %vm5739_vm2, %v5719_v41, 0  ;;  %v6198_v6 = vand.u32 4294901760, %v6197_v31 }
 0x6fc   : > { %v13625_v37 = vand.u32 4294901760, %v5828_v24  ;;  %v5140_v34 = vpop.permute.xlu1 %5139 }
 0x6fd   : > { %v5138_v0 = vpop.permute.xlu0 %5137  ;;  %8839 = vmatprep.mubr.f32.mxu1 %v6198_v6  ;;  %v5655_v36 = vsel %vm5623_vm15, %v5622_v18, %v5140_v34 }
 0x6fe   : > { %14649 = vst [vmem:[#allocation82_spill] sm:$0xff] %v13625_v37  ;;  %v13635_v58 = vsub.f32 %v5828_v24, %v13625_v37  ;;  %v5654_v25 = vsel %vm5623_vm15, %v5621_v16, %v5138_v0 }
 0x700   : > { %v5268_v62 = vpop.permute.xlu1 %5267  ;;  %v14350_v23 = vand.u32 4294901760, %v13635_v58 }
 0x701   : > { %v5266_v47 = vpop.permute.xlu0 %5265  ;;  %v5688_v20 = vsel %vm5656_vm0, %v5655_v36, %v5268_v62  ;;  %v3989_v36 = vld [vmem:[#allocation3 + $0x8] sm:$0xff] }
 0x702   : > { %v6207_v35 = vsub.f32 %v13635_v58, %v14350_v23  ;;  %v5687_v9 = vsel %vm5656_vm0, %v5654_v25, %v5266_v47  ;;  %v14677_v23 = vld [vmem:[#allocation45_spill] sm:$0xff] }
 0x704   : > { %v5396_v22 = vpop.permute.xlu1 %5395  ;;  %v6208_v57 = vand.u32 4294901760, %v6207_v35 }
 0x705   : > { %v5721_v42 = vsel %vm5689_vm1, %v5688_v20, %v5396_v22  ;;  %v5394_v33 = vpop.permute.xlu0 %5393 }
 0x706   : > { %v5834_v50 = vsel %vm5739_vm2, %v5721_v42, 0  ;;  %v5720_v31 = vsel %vm5689_vm1, %v5687_v9, %v5394_v33  ;;  %8840 = vmatmul.mubr.f32.gmra.mrb[26].mxu1 %v6208_v57  ;;  %v3988_v57 = vld [vmem:[#allocation3] sm:$0xff] }
 0x707   : > { %v13658_v41 = vand.u32 4294901760, %v5834_v50  ;;  %v5831_v43 = vsel %vm5739_vm2, %v5720_v31, 0 }
 0x708   : > { %v13661_v24 = vand.u32 4294901760, %v5831_v43  ;;  %v4312_v6 = vpop.permute.xlu1 %4311 }
 0x709   : > { %14650 = vst [vmem:[#allocation84_spill] sm:$0xff] %v13658_v41  ;;  %v13664_v34 = vsub.f32 %v5834_v50, %v13658_v41  ;;  %v4310_v48 = vpop.permute.xlu0 %4309  ;;  %v5430_v22 = vsel %vm1675_vm3, %v3989_v36, %v4312_v6 }
 0x70a   : > { %14651 = vst [vmem:[#allocation85_spill] sm:$0xff] %v13661_v24  ;;  %v13667_v0 = vsub.f32 %v5831_v43, %v13661_v24  ;;  %v5429_v33 = vsel %vm1675_vm3, %v3988_v57, %v4310_v48 }
 0x70b   : > { %v14348_v28 = vand.u32 4294901760, %v13664_v34 }
 0x70c   : > { %v4440_v11 = vpop.permute.xlu1 %4439  ;;  %v14349_v5 = vand.u32 4294901760, %v13667_v0 }
 0x70d   : > { %v4438_v53 = vpop.permute.xlu0 %4437  ;;  %v6227_v45 = vsub.f32 %v13664_v34, %v14348_v28  ;;  %v5462_v50 = vsel %vm1741_vm6, %v5430_v22, %v4440_v11 }
 0x70e   : > { %v6217_v19 = vsub.f32 %v13667_v0, %v14349_v5  ;;  %v5461_v31 = vsel %vm1741_vm6, %v5429_v33, %v4438_v53 }
 0x70f   : > { %v6228_v47 = vand.u32 4294901760, %v6227_v45 }
 0x710   : > { %v4568_v62 = vpop.permute.xlu1 %4567  ;;  %v6218_v59 = vand.u32 4294901760, %v6217_v19 }
 0x711   : > { %v4566_v30 = vpop.permute.xlu0 %4565  ;;  %v5494_v43 = vsel %vm1807_vm8, %v5462_v50, %v4568_v62 }
 0x712   : > { %8842 = vmatprep.mubr.f32.mxu1 %v6218_v59  ;;  %v5493_v45 = vsel %vm1807_vm8, %v5461_v31, %v4566_v30 }
 0x713   : > { %8843 = vmatmul.mubr.f32.gmra.mrb[28].mxu1 %v6228_v47 }
 0x714   : > { %v4696_v40 = vpop.permute.xlu1 %4695 }
 0x715   : > { %v4694_v18 = vpop.permute.xlu0 %4693  ;;  %v5526_v19 = vsel %vm1873_vm10, %v5494_v43, %v4696_v40 }
 0x716   : > { %v5525_v47 = vsel %vm1873_vm10, %v5493_v45, %v4694_v18  ;;  %v14652_v45 = vld [vmem:[#allocation37_spill] sm:$0xff] }
 0x718   : > { %v4824_v35 = vpop.permute.xlu1 %4823 }
 0x719   : > { %v4822_v16 = vpop.permute.xlu0 %4821  ;;  %v5559_v6 = vsel %vm5557_vm13, %v5526_v19, %v4824_v35 }
 0x71a   : > { %v5558_v28 = vsel %vm5557_vm13, %v5525_v47, %v4822_v16  ;;  %v14655_v47 = vld [vmem:[#allocation49_spill] sm:$0xff] }
 0x71c   : > { %v4952_v25 = vpop.permute.xlu1 %4951 }
 0x71d   : > { %v4950_v20 = vpop.permute.xlu0 %4949  ;;  %v5592_v48 = vsel %vm5590_vm14, %v5559_v6, %v4952_v25  ;;  %v14657_v6 = vld [vmem:[#allocation58_spill] sm:$0xff] }
 0x71e   : > { %v5591_v11 = vsel %vm5590_vm14, %v5558_v28, %v4950_v20 }
 0x720   : > { %v5080_v9 = vpop.permute.xlu1 %5079 }
 0x721   : > { %v5078_v42 = vpop.permute.xlu0 %5077  ;;  %v5625_v53 = vsel %vm5623_vm15, %v5592_v48, %v5080_v9  ;;  %v14660_v48 = vld [vmem:[#allocation77_spill] sm:$0xff] }
 0x722   : > { %v5624_v62 = vsel %vm5623_vm15, %v5591_v11, %v5078_v42  ;;  %v14661_v11 = vld [vmem:[#allocation81_spill] sm:$0xff] }
 0x724   : > { %v5208_v59 = vpop.permute.xlu1 %5207 }
 0x725   : > { %v5206_v36 = vpop.permute.xlu0 %5205  ;;  %v5658_v30 = vsel %vm5656_vm0, %v5625_v53, %v5208_v59  ;;  %v14653_v59 = vld [vmem:[#allocation33_spill] sm:$0xff] }
 0x726   : > { %v5657_v40 = vsel %vm5656_vm0, %v5624_v62, %v5206_v36  ;;  %v14658_v36 = vld [vmem:[#allocation68_spill] sm:$0xff]  ;;  %v14662_v53 = vld [vmem:[#allocation65_spill] sm:$0xff]  ;;  %v14664_v62 = vld [vmem:[#allocation19_spill] sm:$0xff] }
 0x728   : > { %v5336_v22 = vpop.permute.xlu1 %5335 }
 0x729   : > { %v5691_v18 = vsel %vm5689_vm1, %v5658_v30, %v5336_v22  ;;  %v5334_v57 = vpop.permute.xlu0 %5333  ;;  %v14665_v30 = vld [vmem:[#allocation57_spill] sm:$0xff]  ;;  %v14666_v22 = vld [vmem:[#allocation32_spill] sm:$0xff] }
 0x72a   : > { %v5744_v35 = vsel %vm5739_vm2, %v5691_v18, 0  ;;  %v5690_v16 = vsel %vm5689_vm1, %v5657_v40, %v5334_v57  ;;  %v14667_v40 = vld [vmem:[#allocation40_spill] sm:$0xff]  ;;  %v14668_v18 = vld [vmem:[#allocation59_spill] sm:$0xff] }
 0x72b   : > { %v13696_v33 = vand.u32 4294901760, %v5744_v35  ;;  %v5741_v28 = vsel %vm5739_vm2, %v5690_v16, 0  ;;  %v14669_v57 = vld [vmem:[#allocation36_spill] sm:$0xff]  ;;  %v14671_v16 = vld [vmem:[#allocation29_spill] sm:$0xff] }
 0x72c   : > { %v13699_v25 = vand.u32 4294901760, %v5741_v28 }
 0x72d   : > { %v13702_v20 = vsub.f32 %v5744_v35, %v13696_v33  ;;  %v14670_v35 = vld [vmem:[#allocation44_spill] sm:$0xff] }
 0x72e   : > { %v13705_v9 = vsub.f32 %v5741_v28, %v13699_v25  ;;  %8865 = vmatprep.mubr.f32.mxu1 %v13699_v25  ;;  %v14672_v28 = vld [vmem:[#allocation41_spill] sm:$0xff] }
 0x72f   : > { %v14352_v42 = vand.u32 4294901760, %v13702_v20  ;;  %8866 = vmatmul.mubr.f32.vlgmr.msra.gmra.mrb[30].mxu1 %v13696_v33 }
 0x730   : > { %9276 = vmatpush3.bf16.msra.mxu1 %v13484_v10  ;;  %8868 = vmatprep.mubr.f32.mxu1 %v12328_v26  ;;  %v14353_v50 = vand.u32 4294901760, %v13705_v9 }
 0x731   : > { %v5927_v31 = vsub.f32 %v13702_v20, %v14352_v42  ;;  %9278 = vmatprep.subr.bf16.mxu1 %v13510_v17  ;;  %v14679_v42 = vld [vmem:[#allocation52_spill] sm:$0xff] }
 0x732   : > { %v5917_v43 = vsub.f32 %v13705_v9, %v14353_v50  ;;  %v14680_v50 = vld [vmem:[#allocation56_spill] sm:$0xff] }
 0x733   : > { %8869 = vmatmul.mubr.f32.gmra.mrb[0].mxu1 %v12302_v39  ;;  %v5928_v10 = vand.u32 4294901760, %v5927_v31  ;;  %v14673_v31 = vld [vmem:[#allocation48_spill] sm:$0xff] }
 0x734   : > { %8871 = vmatprep.mubr.f32.mxu1 %v14652_v45  ;;  %v5918_v19 = vand.u32 4294901760, %v5917_v43  ;;  %9280 = vmatpush3.bf16.msra.mxu1 %v13510_v17  ;;  %v14654_v17 = vld [vmem:[#allocation55_spill] sm:$0xff]  ;;  %v14674_v43 = vld [vmem:[#allocation28_spill] sm:$0xff] }
 0x735   : > { %9282 = vmatprep.subr.bf16.mxu1 %v13521_v3 }
 0x736   : > { %8797 = vmatprep.mubr.f32.mxu0 %v5918_v19  ;;  %v14675_v19 = vand.u32 4294901760, %v13212_v13  ;;  %v14684_v13 = vld [vmem:[#allocation75_spill] sm:$0xff] }
 0x737   : > { %8798 = vmatmul.mubr.f32.vlgmr.msra.gmra.mrb[32].mxu0 %v5928_v10  ;;  %8872 = vmatmul.mubr.f32.gmra.mrb[2].mxu1 %v14653_v59  ;;  %v14676_v10 = vand.u32 4294901760, %v13219_v8  ;;  %v14685_v8 = vld [vmem:[#allocation79_spill] sm:$0xff] }
 0x738   : > { %8874 = vmatprep.mubr.f32.mxu1 %v12516_v12  ;;  %9284 = vmatpush3.bf16.msra.mxu1 %v13521_v3  ;;  %v14656_v3 = vld [vmem:[#allocation54_spill] sm:$0xff] }
 0x739   : > { %9286 = vmatprep.subr.bf16.mxu1 %v13556_v21  ;;  %v9313_v5 = vpack.c.bf16 %v14676_v10, %v14675_v19  ;;  %v14686_v19 = vld [vmem:[#allocation83_spill] sm:$0xff]  ;;  %v14687_v10 = vld [vmem:[#allocation66_spill] sm:$0xff] }
 0x73b   : > { %8875 = vmatmul.mubr.f32.gmra.mrb[4].mxu1 %v12494_v55 }
 0x73c   : > { %8877 = vmatprep.mubr.f32.mxu1 %v12611_v38  ;;  %9288 = vmatpush3.bf16.msra.mxu1 %v13556_v21  ;;  %v14659_v21 = vld [vmem:[#allocation73_spill] sm:$0xff] }
 0x73d   : > { %9290 = vmatprep.subr.bf16.mxu1 %v13582_v52 }
 0x73f   : > { %8878 = vmatmul.mubr.f32.gmra.mrb[6].mxu1 %v12586_v51 }
 0x740   : > { %8880 = vmatprep.mubr.f32.mxu1 %v12703_v56  ;;  %9292 = vmatpush3.bf16.msra.mxu1 %v13582_v52  ;;  %v14663_v52 = vld [vmem:[#allocation9_spill] sm:$0xff] }
 0x741   : > { %9294 = vmatprep.subr.bf16.mxu1 %v14654_v17 }
 0x743   : > { %8881 = vmatmul.mubr.f32.gmra.mrb[8].mxu1 %v14655_v47 }
 0x744   : > { %8883 = vmatprep.mubr.f32.mxu1 %v14656_v3 }
 0x747   : > { %8884 = vmatmul.mubr.f32.gmra.mrb[10].mxu1 %v14657_v6 }
 0x748   : > { %8886 = vmatprep.mubr.f32.mxu1 %v12871_v15  ;;  %v14701_v15 = vld [vmem:[#allocation16_spill] sm:$0xff] }
 0x749   : > { %v14702_v6 = vand.u32 4294901760, %v14701_v15  ;;  %v14710_v15 = vld [vmem:[#allocation67_spill] sm:$0xff] }
 0x74b   : > { %8887 = vmatmul.mubr.f32.gmra.mrb[12].mxu1 %v14658_v36 }
 0x74c   : > { %8889 = vmatprep.mubr.f32.mxu1 %v14659_v21  ;;  %v14699_v21 = vld [vmem:[#allocation13_spill] sm:$0xff] }
 0x74d   : > { %v14700_v36 = vand.u32 4294901760, %v14699_v21  ;;  %v14709_v21 = vand.u32 4294901760, %v14670_v35 }
 0x74f   : > { %8890 = vmatmul.mubr.f32.gmra.mrb[14].mxu1 %v14660_v48  ;;  %v14698_v48 = vand.u32 4294901760, %v14664_v62  ;;  %v9321_v3 = vpack.c.bf16 %v14702_v6, %v14700_v36  ;;  %v14711_v6 = vand.u32 4294901760, %v14710_v15  ;;  %v14712_v36 = vld [vmem:[#allocation69_spill] sm:$0xff] }
 0x750   : > { %8892 = vmatprep.mubr.f32.mxu1 %v14661_v11  ;;  %v14697_v11 = vand.u32 4294901760, %v13702_v20 }
 0x753   : > { %8893 = vmatmul.mubr.f32.gmra.mrb[16].mxu1 %v14662_v53 }
 0x754   : > { %8895 = vmatprep.mubr.f32.mxu1 %v13164_v54 }
 0x757   : > { %8896 = vmatmul.mubr.f32.gmra.mrb[18].mxu1 %v14663_v52  ;;  %v14695_v52 = vld [vmem:[#allocation14_spill] sm:$0xff] }
 0x758   : > { %8898 = vmatprep.mubr.f32.mxu1 %v13319_v46  ;;  %v14696_v54 = vand.u32 4294901760, %v14695_v52  ;;  %v14716_v52 = vand.u32 4294901760, %v14677_v23 }
 0x75b   : > { %8899 = vmatmul.mubr.f32.gmra.mrb[20].mxu1 %v13355_v60  ;;  %v14693_v60 = vld [vmem:[#allocation11_spill] sm:$0xff] }
 0x75c   : > { %8901 = vmatprep.mubr.f32.mxu1 %v13466_v1  ;;  %v14692_v1 = vand.u32 4294901760, %v13705_v9  ;;  %v14694_v46 = vand.u32 4294901760, %v14693_v60  ;;  %v14704_v60 = vand.u32 4294901760, %v14667_v40 }
 0x75e   : > { %v9317_v53 = vpack.c.bf16 %v14696_v54, %v14694_v46  ;;  %v14705_v54 = vand.u32 4294901760, %v13372_v7  ;;  %v14706_v46 = vld [vmem:[#allocation63_spill] sm:$0xff]  ;;  %v14715_v7 = vand.u32 4294901760, %v14673_v31 }
 0x75f   : > { %8902 = vmatmul.mubr.f32.gmra.mrb[22].mxu1 %v13496_v32  ;;  %v14691_v32 = vld [vmem:[#allocation61_spill] sm:$0xff] }
 0x760   : > { %8904 = vmatprep.mubr.f32.mxu1 %v13552_v29  ;;  %v14690_v29 = vld [vmem:[#allocation18_spill] sm:$0xff] }
 0x763   : > { %8905 = vmatmul.mubr.f32.gmra.mrb[24].mxu1 %v13574_v63  ;;  %v14689_v63 = vld [vmem:[#allocation12_spill] sm:$0xff] }
 0x764   : > { %8907 = vmatprep.mubr.f32.mxu1 %v13606_v61  ;;  %v14688_v61 = vld [vmem:[#allocation10_spill] sm:$0xff] }
 0x767   : > { %8908 = vmatmul.mubr.f32.gmra.mrb[26].mxu1 %v13625_v37  ;;  %v14683_v37 = vld [vmem:[#allocation70_spill] sm:$0xff] }
 0x768   : > { %8910 = vmatprep.mubr.f32.mxu1 %v13661_v24  ;;  %v14682_v24 = vld [vmem:[#allocation64_spill] sm:$0xff] }
 0x76b   : > { %8911 = vmatmul.mubr.f32.gmra.mrb[28].mxu1 %v13658_v41  ;;  %v14681_v41 = vld [vmem:[#allocation60_spill] sm:$0xff] }
 0x76c   : > { %8933 = vmatprep.mubr.f32.mxu1 %v13705_v9  ;;  %v14708_v9 = vand.u32 4294901760, %v14669_v57 }
 0x76f   : > { %8934 = vmatmul.mubr.f32.vlgmr.msra.gmra.mrb[30].mxu1 %v13702_v20 }
 0x770   : > { %9296 = vmatpush3.bf16.msra.mxu1 %v14654_v17  ;;  %8936 = vmatprep.mubr.f32.mxu1 %v14664_v62  ;;  %v14717_v62 = vand.u32 4294901760, %v14678_v49 }
 0x771   : > { %9298 = vmatprep.subr.bf16.mxu1 %v14665_v30 }
 0x773   : > { %8937 = vmatmul.mubr.f32.gmra.mrb[0].mxu1 %v14666_v22 }
 0x774   : > { %8939 = vmatprep.mubr.f32.mxu1 %v14667_v40  ;;  %9300 = vmatpush3.bf16.msra.mxu1 %v14665_v30  ;;  %v14720_v40 = vand.u32 4294901760, %v14681_v41 }
 0x775   : > { %9302 = vmatprep.subr.bf16.mxu1 %v14668_v18 }
 0x777   : > { %8940 = vmatmul.mubr.f32.gmra.mrb[2].mxu1 %v14669_v57  ;;  %v14721_v57 = vand.u32 4294901760, %v14682_v24 }
 0x778   : > { %8942 = vmatprep.mubr.f32.mxu1 %v14670_v35  ;;  %9304 = vmatpush3.bf16.msra.mxu1 %v14668_v18  ;;  %v14724_v35 = vand.u32 4294901760, %v14685_v8 }
 0x779   : > { %9306 = vmatprep.subr.bf16.mxu1 %v14671_v16 }
 0x77b   : > { %8943 = vmatmul.mubr.f32.gmra.mrb[4].mxu1 %v14672_v28 }
 0x77c   : > { %8945 = vmatprep.mubr.f32.mxu1 %v14673_v31  ;;  %9308 = vmatpush3.bf16.msra.mxu1 %v14671_v16  ;;  %v14731_v31 = vand.u32 4294901760, %v13477_v14 }
 0x77d   : > { %9310 = vmatprep.subr.bf16.mxu1 %v14674_v43 }
 0x77f   : > { %8946 = vmatmul.mubr.f32.gmra.mrb[6].mxu1 %v14677_v23  ;;  %v14722_v23 = vand.u32 4294901760, %v14683_v37 }
 0x780   : > { %8948 = vmatprep.mubr.f32.mxu1 %v14678_v49  ;;  %9312 = vmatpush3.bf16.msra.mxu1 %v14674_v43  ;;  %v14723_v49 = vand.u32 4294901760, %v14684_v13 }
 0x781   : > { %9314 = vmatprep.subr.bf16.mxu1 %v9313_v5 }
 0x783   : > { %8949 = vmatmul.mubr.f32.gmra.mrb[8].mxu1 %v14679_v42 }
 0x784   : > { %8951 = vmatprep.mubr.f32.mxu1 %v14680_v50 }
 0x787   : > { %8952 = vmatmul.mubr.f32.gmra.mrb[10].mxu1 %v14681_v41  ;;  %v14727_v41 = vand.u32 4294901760, %v14688_v61 }
 0x788   : > { %8954 = vmatprep.mubr.f32.mxu1 %v14682_v24  ;;  %v14728_v24 = vand.u32 4294901760, %v14689_v63 }
 0x78b   : > { %8955 = vmatmul.mubr.f32.gmra.mrb[12].mxu1 %v14683_v37  ;;  %v14729_v37 = vand.u32 4294901760, %v14690_v29 }
 0x78c   : > { %8957 = vmatprep.mubr.f32.mxu1 %v14684_v13  ;;  %v14732_v13 = vand.u32 4294901760, %v13503_v44 }
 0x78f   : > { %8958 = vmatmul.mubr.f32.gmra.mrb[14].mxu1 %v14685_v8  ;;  %v14733_v8 = vand.u32 4294901760, %v13564_v4 }
 0x790   : > { %8960 = vmatprep.mubr.f32.mxu1 %v14686_v19 }
 0x793   : > { %8961 = vmatmul.mubr.f32.gmra.mrb[16].mxu1 %v14687_v10 }
 0x794   : > { %8963 = vmatprep.mubr.f32.mxu1 %v14688_v61  ;;  %v14734_v61 = vand.u32 4294901760, %v13577_v27 }
 0x797   : > { %8964 = vmatmul.mubr.f32.gmra.mrb[18].mxu1 %v14689_v63  ;;  %v14735_v63 = vand.u32 4294901760, %v13613_v2 }
 0x798   : > { %8966 = vmatprep.mubr.f32.mxu1 %v14690_v29  ;;  %v14736_v29 = vand.u32 4294901760, %v13635_v58 }
 0x79b   : > { %8967 = vmatmul.mubr.f32.gmra.mrb[20].mxu1 %v14691_v32 }
 0x79c   : > { %8969 = vmatprep.mubr.f32.mxu1 %v13477_v14  ;;  %v14738_v14 = vand.u32 4294901760, %v13664_v34 }
 0x79f   : > { %8970 = vmatmul.mubr.f32.gmra.mrb[22].mxu1 %v13503_v44  ;;  %v14739_v44 = vld [vmem:[#allocation54_spill] sm:$0xff] }
 0x7a0   : > { %8972 = vmatprep.mubr.f32.mxu1 %v13564_v4  ;;  %v14740_v4 = vld [vmem:[#allocation58_spill] sm:$0xff] }
 0x7a3   : > { %8973 = vmatmul.mubr.f32.gmra.mrb[24].mxu1 %v13577_v27  ;;  %v14741_v27 = vld [vmem:[#allocation62_spill] sm:$0xff] }
 0x7a4   : > { %8975 = vmatprep.mubr.f32.mxu1 %v13613_v2 }
 0x7a7   : > { %8976 = vmatmul.mubr.f32.gmra.mrb[26].mxu1 %v13635_v58 }
 0x7a8   : > { %8978 = vmatprep.mubr.f32.mxu1 %v13667_v0 }
 0x7ab   : > { %8979 = vmatmul.mubr.f32.gmra.mrb[28].mxu1 %v13664_v34  ;;  %v14742_v34 = vld [vmem:[#allocation68_spill] sm:$0xff] }
 0x7ac   : > { %9001 = vmatprep.mubr.f32.mxu1 %v14692_v1  ;;  %v14703_v1 = vand.u32 4294901760, %v14666_v22  ;;  %v14719_v22 = vand.u32 4294901760, %v14680_v50  ;;  %v14726_v50 = vand.u32 4294901760, %v14687_v10  ;;  %v14750_v10 = vld [vmem:[#allocation17_spill] sm:$0xff] }
 0x7af   : > { %9002 = vmatmul.mubr.f32.vlgmr.msra.gmra.mrb[30].mxu1 %v14697_v11 }
 0x7b0   : > { %9316 = vmatpush3.bf16.msra.mxu1 %v9313_v5  ;;  %9004 = vmatprep.mubr.f32.mxu1 %v14698_v48  ;;  %v14707_v5 = vand.u32 4294901760, %v14706_v46  ;;  %v14713_v48 = vand.u32 4294901760, %v14712_v36  ;;  %v14754_v46 = vld [vmem:[#allocation78_spill] sm:$0xff] }
 0x7b1   : > { %9318 = vmatprep.subr.bf16.mxu1 %v9317_v53 }
 0x7b2   : > { %v9325_v20 = vpack.c.bf16 %v14707_v5, %v14705_v54  ;;  %v9329_v11 = vpack.c.bf16 %v14713_v48, %v14711_v6  ;;  %v14753_v54 = vld [vmem:[#allocation76_spill] sm:$0xff] }
 0x7b3   : > { %9005 = vmatmul.mubr.f32.gmra.mrb[0].mxu1 %v14703_v1  ;;  %v14751_v1 = vld [vmem:[#allocation72_spill] sm:$0xff] }
 0x7b4   : > { %9007 = vmatprep.mubr.f32.mxu1 %v14704_v60  ;;  %9320 = vmatpush3.bf16.msra.mxu1 %v9317_v53  ;;  %v14714_v53 = vand.u32 4294901760, %v14672_v28  ;;  %v14730_v28 = vand.u32 4294901760, %v14691_v32  ;;  %v14737_v32 = vand.u32 4294901760, %v13667_v0  ;;  %v14743_v0 = vld [vmem:[#allocation73_spill] sm:$0xff]  ;;  %v14752_v60 = vld [vmem:[#allocation74_spill] sm:$0xff]  ;;  %v14755_v5 = vld [vmem:[#allocation80_spill] sm:$0xff] }
 0x7b5   : > { %9322 = vmatprep.subr.bf16.mxu1 %v9321_v3 }
 0x7b7   : > { %9008 = vmatmul.mubr.f32.gmra.mrb[2].mxu1 %v14708_v9  ;;  %v14757_v9 = vld [vmem:[#allocation85_spill] sm:$0xff] }
 0x7b8   : > { %9010 = vmatprep.mubr.f32.mxu1 %v14709_v21  ;;  %9324 = vmatpush3.bf16.msra.mxu1 %v9321_v3  ;;  %v14718_v3 = vand.u32 4294901760, %v14679_v42  ;;  %v14725_v42 = vand.u32 4294901760, %v14686_v19  ;;  %v14749_v19 = vld [vmem:[#allocation15_spill] sm:$0xff]  ;;  %v14758_v21 = vld [vmem:[#allocation84_spill] sm:$0xff] }
 0x7b9   : > { %9326 = vmatprep.subr.bf16.mxu1 %v9325_v20 }
 0x7bb   : > { %9011 = vmatmul.mubr.f32.gmra.mrb[4].mxu1 %v14714_v53 }
 0x7bc   : > { %9013 = vmatprep.mubr.f32.mxu1 %v14715_v7  ;;  %9328 = vmatpush3.bf16.msra.mxu1 %v9325_v20  ;;  %v14756_v20 = vld [vmem:[#allocation82_spill] sm:$0xff] }
 0x7bd   : > { %9330 = vmatprep.subr.bf16.mxu1 %v9329_v11 }
 0x7bf   : > { %9014 = vmatmul.mubr.f32.gmra.mrb[6].mxu1 %v14716_v52 }
 0x7c0   : > { %9016 = vmatprep.mubr.f32.mxu1 %v14717_v62  ;;  %9332 = vmatpush3.bf16.msra.mxu1 %v9329_v11 }
 0x7c1   : > { %9334 = vmatprep.subr.bf16.mxu1 %v14654_v17 }
 0x7c3   : > { %9017 = vmatmul.mubr.f32.gmra.mrb[8].mxu1 %v14718_v3 }
 0x7c4   : > { %9019 = vmatprep.mubr.f32.mxu1 %v14719_v22 }
 0x7c7   : > { %9020 = vmatmul.mubr.f32.gmra.mrb[10].mxu1 %v14720_v40 }
 0x7c8   : > { %9022 = vmatprep.mubr.f32.mxu1 %v14721_v57 }
 0x7cb   : > { %9023 = vmatmul.mubr.f32.gmra.mrb[12].mxu1 %v14722_v23 }
 0x7cc   : > { %9025 = vmatprep.mubr.f32.mxu1 %v14723_v49 }
 0x7cf   : > { %9026 = vmatmul.mubr.f32.gmra.mrb[14].mxu1 %v14724_v35 }
 0x7d0   : > { %9028 = vmatprep.mubr.f32.mxu1 %v14725_v42 }
 0x7d3   : > { %9029 = vmatmul.mubr.f32.gmra.mrb[16].mxu1 %v14726_v50 }
 0x7d4   : > { %9031 = vmatprep.mubr.f32.mxu1 %v14727_v41 }
 0x7d7   : > { %9032 = vmatmul.mubr.f32.gmra.mrb[18].mxu1 %v14728_v24 }
 0x7d8   : > { %9034 = vmatprep.mubr.f32.mxu1 %v14729_v37 }
 0x7db   : > { %9035 = vmatmul.mubr.f32.gmra.mrb[20].mxu1 %v14730_v28 }
 0x7dc   : > { %9037 = vmatprep.mubr.f32.mxu1 %v14731_v31 }
 0x7df   : > { %9038 = vmatmul.mubr.f32.gmra.mrb[22].mxu1 %v14732_v13 }
 0x7e0   : > { %9040 = vmatprep.mubr.f32.mxu1 %v14733_v8 }
 0x7e3   : > { %9041 = vmatmul.mubr.f32.gmra.mrb[24].mxu1 %v14734_v61 }
 0x7e4   : > { %9043 = vmatprep.mubr.f32.mxu1 %v14735_v63 }
 0x7e7   : > { %9044 = vmatmul.mubr.f32.gmra.mrb[26].mxu1 %v14736_v29 }
 0x7e8   : > { %9046 = vmatprep.mubr.f32.mxu1 %v14737_v32 }
 0x7eb   : > { %9047 = vmatmul.mubr.f32.gmra.mrb[28].mxu1 %v14738_v14 }
 0x7ec   : > { %9069 = vmatprep.mubr.f32.mxu1 %v13699_v25 }
 0x7ef   : > { %9070 = vmatmul.mubr.f32.vlgmr.msra.gmra.mrb[30].mxu1 %v13696_v33 }
 0x7f0   : > { %9336 = vmatpush3.bf16.msra.mxu1 %v14654_v17  ;;  %9072 = vmatprep.mubr.f32.mxu1 %v12328_v26  ;;  %v14744_v17 = vld [vmem:[#allocation77_spill] sm:$0xff] }
 0x7f1   : > { %9338 = vmatprep.subr.bf16.mxu1 %v14665_v30 }
 0x7f3   : > { %9073 = vmatmul.mubr.f32.gmra.mrb[0].mxu1 %v12302_v39 }
 0x7f4   : > { %9075 = vmatprep.mubr.f32.mxu1 %v14652_v45  ;;  %9340 = vmatpush3.bf16.msra.mxu1 %v14665_v30  ;;  %v14745_v30 = vld [vmem:[#allocation81_spill] sm:$0xff] }
 0x7f5   : > { %9342 = vmatprep.subr.bf16.mxu1 %v14668_v18 }
 0x7f7   : > { %9076 = vmatmul.mubr.f32.gmra.mrb[2].mxu1 %v14653_v59 }
 0x7f8   : > { %9078 = vmatprep.mubr.f32.mxu1 %v12516_v12  ;;  %9344 = vmatpush3.bf16.msra.mxu1 %v14668_v18  ;;  %v14746_v18 = vld [vmem:[#allocation65_spill] sm:$0xff] }
 0x7f9   : > { %9346 = vmatprep.subr.bf16.mxu1 %v14671_v16 }
 0x7fb   : > { %9079 = vmatmul.mubr.f32.gmra.mrb[4].mxu1 %v12494_v55 }
 0x7fc   : > { %9081 = vmatprep.mubr.f32.mxu1 %v12611_v38  ;;  %9348 = vmatpush3.bf16.msra.mxu1 %v14671_v16  ;;  %v14747_v16 = vld [vmem:[#allocation71_spill] sm:$0xff] }
 0x7fd   : > { %9350 = vmatprep.subr.bf16.mxu1 %v14674_v43 }
 0x7ff   : > { %9082 = vmatmul.mubr.f32.gmra.mrb[6].mxu1 %v12586_v51 }
 0x800   : > { %9084 = vmatprep.mubr.f32.mxu1 %v12703_v56  ;;  %9352 = vmatpush3.bf16.msra.mxu1 %v14674_v43  ;;  %v14748_v43 = vld [vmem:[#allocation9_spill] sm:$0xff] }
 0x803   : > { %9085 = vmatmul.mubr.f32.gmra.mrb[8].mxu1 %v14655_v47 }
 0x804   : > { %9087 = vmatprep.mubr.f32.mxu1 %v14739_v44 }
 0x807   : > { %9088 = vmatmul.mubr.f32.gmra.mrb[10].mxu1 %v14740_v4 }
 0x808   : > { %9090 = vmatprep.mubr.f32.mxu1 %v14741_v27 }
 0x80a   : > { %v8799_v2 = vpop.f32.mrb[32].mxu0 }
 0x80b   : > { %v5920_v58 = vpop.f32.mrb[33].mxu0  ;;  %9091 = vmatmul.mubr.f32.gmra.mrb[12].mxu1 %v14742_v34 }
 0x80c   : > { %9093 = vmatprep.mubr.f32.mxu1 %v14743_v0 }
 0x80f   : > { %9094 = vmatmul.mubr.f32.gmra.mrb[14].mxu1 %v14744_v17 }
 0x810   : > { %9096 = vmatprep.mubr.f32.mxu1 %v14745_v30 }
 0x813   : > { %9097 = vmatmul.mubr.f32.gmra.mrb[16].mxu1 %v14746_v18 }
 0x814   : > { %9099 = vmatprep.mubr.f32.mxu1 %v14747_v16 }
 0x817   : > { %9100 = vmatmul.mubr.f32.gmra.mrb[18].mxu1 %v14748_v43 }
 0x818   : > { %9102 = vmatprep.mubr.f32.mxu1 %v14749_v19 }
 0x81b   : > { %9103 = vmatmul.mubr.f32.gmra.mrb[20].mxu1 %v14750_v10 }
 0x81c   : > { %9105 = vmatprep.mubr.f32.mxu1 %v14751_v1 }
 0x81f   : > { %9106 = vmatmul.mubr.f32.gmra.mrb[22].mxu1 %v14752_v60 }
 0x820   : > { %9108 = vmatprep.mubr.f32.mxu1 %v14753_v54 }
 0x823   : > { %9109 = vmatmul.mubr.f32.gmra.mrb[24].mxu1 %v14754_v46 }
 0x824   : > { %9111 = vmatprep.mubr.f32.mxu1 %v14755_v5 }
 0x827   : > { %9112 = vmatmul.mubr.f32.gmra.mrb[26].mxu1 %v14756_v20 }
 0x828   : > { %9114 = vmatprep.mubr.f32.mxu1 %v14757_v9 }
 0x82b   : > { %9115 = vmatmul.mubr.f32.gmra.mrb[28].mxu1 %v14758_v21 }
 0x82c   : > { %9137 = vmatprep.mubr.f32.mxu1 %v13699_v25 }
 0x82f   : > { %9138 = vmatmul.mubr.f32.vlgmr.msra.gmra.mrb[30].mxu1 %v13696_v33 }
 0x830   : > { %9140 = vmatprep.mubr.f32.mxu1 %v12328_v26 }
 0x833   : > { %9141 = vmatmul.mubr.f32.gmra.mrb[0].mxu1 %v12302_v39  ;;  %v13959_v39 = vld [vmem:[%s14047_s4] ss:$0 sm:$0xff] }
 0x834   : > { %9143 = vmatprep.mubr.f32.mxu1 %v14652_v45  ;;  %v5931_v26 = vadd.f32 %v8799_v2, %v13959_v39 }
 0x837   : > { %9144 = vmatmul.mubr.f32.gmra.mrb[2].mxu1 %v14653_v59 }
 0x838   : > { %9146 = vmatprep.mubr.f32.mxu1 %v12516_v12 }
 0x83b   : > { %9147 = vmatmul.mubr.f32.gmra.mrb[4].mxu1 %v12494_v55  ;;  %v5921_v55 = vadd.f32 %v13959_v39, %v5920_v58 }
 0x83c   : > { %9149 = vmatprep.mubr.f32.mxu1 %v12611_v38 }
 0x83f   : > { %9150 = vmatmul.mubr.f32.gmra.mrb[6].mxu1 %v12586_v51 }
 0x840   : > { %9152 = vmatprep.mubr.f32.mxu1 %v12703_v56 }
 0x843   : > { %9153 = vmatmul.mubr.f32.gmra.mrb[8].mxu1 %v14655_v47 }
 0x844   : > { %9155 = vmatprep.mubr.f32.mxu1 %v14739_v44 }
 0x847   : > { %9156 = vmatmul.mubr.f32.gmra.mrb[10].mxu1 %v14740_v4 }
 0x848   : > { %9158 = vmatprep.mubr.f32.mxu1 %v14741_v27 }
 0x84b   : > { %9159 = vmatmul.mubr.f32.gmra.mrb[12].mxu1 %v14742_v34 }
 0x84c   : > { %9161 = vmatprep.mubr.f32.mxu1 %v14743_v0 }
 0x84f   : > { %9162 = vmatmul.mubr.f32.gmra.mrb[14].mxu1 %v14744_v17 }
 0x850   : > { %9164 = vmatprep.mubr.f32.mxu1 %v14745_v30 }
 0x853   : > { %9165 = vmatmul.mubr.f32.gmra.mrb[16].mxu1 %v14746_v18 }
 0x854   : > { %9167 = vmatprep.mubr.f32.mxu1 %v14747_v16 }
 0x857   : > { %9168 = vmatmul.mubr.f32.gmra.mrb[18].mxu1 %v14748_v43 }
 0x858   : > { %9170 = vmatprep.mubr.f32.mxu1 %v14749_v19 }
 0x85b   : > { %9171 = vmatmul.mubr.f32.gmra.mrb[20].mxu1 %v14750_v10 }
 0x85c   : > { %9173 = vmatprep.mubr.f32.mxu1 %v14751_v1 }
 0x85f   : > { %9174 = vmatmul.mubr.f32.gmra.mrb[22].mxu1 %v14752_v60 }
 0x860   : > { %9176 = vmatprep.mubr.f32.mxu1 %v14753_v54 }
 0x863   : > { %9177 = vmatmul.mubr.f32.gmra.mrb[24].mxu1 %v14754_v46 }
 0x864   : > { %9179 = vmatprep.mubr.f32.mxu1 %v14755_v5 }
 0x867   : > { %9180 = vmatmul.mubr.f32.gmra.mrb[26].mxu1 %v14756_v20 }
 0x868   : > { %9182 = vmatprep.mubr.f32.mxu1 %v14757_v9 }
 0x86b   : > { %9183 = vmatmul.mubr.f32.gmra.mrb[28].mxu1 %v14758_v21 }
 0x902   : > { %v9139_v12 = vpop.f32.mrb[30].mxu1 }
 0x903   : > { %v9396_v51 = vadd.f32 %v9139_v12, %v5931_v26  ;;  %v7545_v38 = vpop.f32.mrb[31].mxu1 }
 0x904   : > { %v9398_v56 = vadd.f32 %v7545_v38, %v5921_v55 }
 0x905   : > { %v7736_v59 = vmul.f32 0.01, %v9396_v51 }
 0x906   : > { %v7735_v33 = vmul.f32 0.01, %v9398_v56  ;;  %v9142_v25 = vpop.f32.mrb[0].mxu1 }
 0x907   : > { %v7557_v45 = vpop.f32.mrb[1].mxu1  ;;  %v7768_v48 = vmax.f32 %v9396_v51, %v7736_v59  ;;  %v9399_v11 = vadd.f32 %v9142_v25, %v13959_v39 }
 0x908   : > { %v7767_v47 = vmax.f32 %v9398_v56, %v7735_v33  ;;  %v9400_v15 = vadd.f32 %v13959_v39, %v7557_v45 }
 0x909   : > { %v7738_v62 = vmul.f32 0.01, %v9399_v11 }
 0x90a   : > { %v9145_v6 = vpop.f32.mrb[2].mxu1  ;;  %7799 = vxpose.xlu0.b32.start [1/16] (narrow) %v7767_v47, 8  ;;  %v7737_v53 = vmul.f32 0.01, %v9400_v15 }
 0x90b   : > { %v7569_v36 = vpop.f32.mrb[3].mxu1  ;;  %v7770_v23 = vmax.f32 %v9399_v11, %v7738_v62  ;;  %v9401_v49 = vadd.f32 %v9145_v6, %v13959_v39 }
 0x90c   : > { %v7769_v3 = vmax.f32 %v9400_v15, %v7737_v53  ;;  %v9402_v22 = vadd.f32 %v13959_v39, %v7569_v36 }
 0x90d   : > { %v7740_v41 = vmul.f32 0.01, %v9401_v49 }
 0x90e   : > { %v9148_v7 = vpop.f32.mrb[4].mxu1  ;;  %7800 = vxpose.xlu0.b32.cont [2/16] (narrow) %v7768_v48, 8  ;;  %v7739_v35 = vmul.f32 0.01, %v9402_v22 }
 0x90f   : > { %v7581_v52 = vpop.f32.mrb[5].mxu1  ;;  %v7772_v13 = vmax.f32 %v9401_v49, %v7740_v41  ;;  %v9403_v8 = vadd.f32 %v9148_v7, %v13959_v39 }
 0x910   : > { %v7771_v24 = vmax.f32 %v9402_v22, %v7739_v35  ;;  %v9404_v37 = vadd.f32 %v13959_v39, %v7581_v52 }
 0x911   : > { %v7742_v14 = vmul.f32 0.01, %v9403_v8 }
 0x912   : > { %v9151_v40 = vpop.f32.mrb[6].mxu1  ;;  %7801 = vxpose.xlu0.b32.cont [3/16] (narrow) %v7769_v3, 8  ;;  %v7741_v61 = vmul.f32 0.01, %v9404_v37 }
 0x913   : > { %v7593_v57 = vpop.f32.mrb[7].mxu1  ;;  %v9405_v27 = vadd.f32 %v9151_v40, %v13959_v39  ;;  %v7774_v34 = vmax.f32 %v9403_v8, %v7742_v14 }
 0x914   : > { %v9406_v29 = vadd.f32 %v13959_v39, %v7593_v57  ;;  %v7773_v44 = vmax.f32 %v9404_v37, %v7741_v61 }
 0x915   : > { %v7744_v16 = vmul.f32 0.01, %v9405_v27 }
 0x916   : > { %v9154_v42 = vpop.f32.mrb[8].mxu1  ;;  %7802 = vxpose.xlu0.b32.cont [4/16] (narrow) %v7770_v23, 8  ;;  %v7743_v2 = vmul.f32 0.01, %v9406_v29 }
 0x917   : > { %v7605_v50 = vpop.f32.mrb[9].mxu1  ;;  %v7776_v5 = vmax.f32 %v9405_v27, %v7744_v16  ;;  %v9407_v20 = vadd.f32 %v9154_v42, %v13959_v39 }
 0x918   : > { %v7775_v43 = vmax.f32 %v9406_v29, %v7743_v2  ;;  %v9408_v10 = vadd.f32 %v13959_v39, %v7605_v50 }
 0x919   : > { %v7746_v38 = vmul.f32 0.01, %v9407_v20 }
 0x91a   : > { %v9157_v28 = vpop.f32.mrb[10].mxu1  ;;  %7803 = vxpose.xlu0.b32.cont [5/16] (narrow) %v7771_v24, 8  ;;  %v7745_v21 = vmul.f32 0.01, %v9408_v10 }
 0x91b   : > { %v7617_v31 = vpop.f32.mrb[11].mxu1  ;;  %v9409_v6 = vadd.f32 %v9157_v28, %v13959_v39  ;;  %v7778_v11 = vmax.f32 %v9407_v20, %v7746_v38 }
 0x91c   : > { %v9410_v56 = vadd.f32 %v13959_v39, %v7617_v31  ;;  %v7777_v25 = vmax.f32 %v9408_v10, %v7745_v21 }
 0x91d   : > { %v7748_v3 = vmul.f32 0.01, %v9409_v6 }
 0x91e   : > { %v13969_v63 = vpop.f32.mrb[12].mxu1  ;;  %7804 = vxpose.xlu0.b32.cont [6/16] (narrow) %v7772_v13, 8  ;;  %v7747_v36 = vmul.f32 0.01, %v9410_v56 }
 0x91f   : > { %v7629_v32 = vpop.f32.mrb[13].mxu1  ;;  %v7780_v50 = vmax.f32 %v9409_v6, %v7748_v3  ;;  %v9411_v41 = vadd.f32 %v13969_v63, %v13959_v39 }
 0x920   : > { %v7779_v22 = vmax.f32 %v9410_v56, %v7747_v36  ;;  %v9412_v57 = vadd.f32 %v13959_v39, %v7629_v32 }
 0x921   : > { %v7750_v61 = vmul.f32 0.01, %v9411_v41 }
 0x922   : > { %v9163_v4 = vpop.f32.mrb[14].mxu1  ;;  %7805 = vxpose.xlu0.b32.cont [7/16] (narrow) %v7773_v44, 8  ;;  %v7749_v37 = vmul.f32 0.01, %v9412_v57 }
 0x923   : > { %v7641_v58 = vpop.f32.mrb[15].mxu1  ;;  %v9413_v0 = vadd.f32 %v9163_v4, %v13959_v39  ;;  %v7782_v27 = vmax.f32 %v9411_v41, %v7750_v61 }
 0x924   : > { %v9414_v17 = vadd.f32 %v13959_v39, %v7641_v58  ;;  %v7781_v32 = vmax.f32 %v9412_v57, %v7749_v37 }
 0x925   : > { %v7752_v1 = vmul.f32 0.01, %v9413_v0 }
 0x926   : > { %v7751_v30 = vmul.f32 0.01, %v9414_v17  ;;  %v9166_v18 = vpop.f32.mrb[16].mxu1  ;;  %7806 = vxpose.xlu0.b32.cont [8/16] (narrow) %v7774_v34, 8 }
 0x927   : > { %v7653_v19 = vpop.f32.mrb[17].mxu1  ;;  %v7784_v26 = vmax.f32 %v9413_v0, %v7752_v1  ;;  %v9415_v55 = vadd.f32 %v9166_v18, %v13959_v39 }
 0x928   : > { %v7783_v60 = vmax.f32 %v9414_v17, %v7751_v30  ;;  %v9416_v54 = vadd.f32 %v13959_v39, %v7653_v19 }
 0x929   : > { %v7754_v45 = vmul.f32 0.01, %v9415_v55 }
 0x92a   : > { %v9169_v46 = vpop.f32.mrb[18].mxu1  ;;  %7831 = vxpose.xlu1.b32.start [1/16] (narrow) %v7783_v60, 8  ;;  %7807 = vxpose.xlu0.b32.cont [9/16] (narrow) %v7775_v43, 8  ;;  %v7753_v12 = vmul.f32 0.01, %v9416_v54 }
 0x92b   : > { %v7665_v9 = vpop.f32.mrb[19].mxu1  ;;  %v7786_v53 = vmax.f32 %v9415_v55, %v7754_v45  ;;  %v9417_v7 = vadd.f32 %v9169_v46, %v13959_v39 }
 0x92c   : > { %v7785_v59 = vmax.f32 %v9416_v54, %v7753_v12  ;;  %v9418_v47 = vadd.f32 %v13959_v39, %v7665_v9 }
 0x92d   : > { %v7756_v23 = vmul.f32 0.01, %v9417_v7 }
 0x92e   : > { %v9172_v51 = vpop.f32.mrb[20].mxu1  ;;  %7832 = vxpose.xlu1.b32.cont [2/16] (narrow) %v7784_v26, 8  ;;  %7808 = vxpose.xlu0.b32.cont [10/16] (narrow) %v7776_v5, 8  ;;  %v7755_v52 = vmul.f32 0.01, %v9418_v47 }
 0x92f   : > { %v7677_v33 = vpop.f32.mrb[21].mxu1  ;;  %v7788_v28 = vmax.f32 %v9417_v7, %v7756_v23  ;;  %v9419_v31 = vadd.f32 %v9172_v51, %v13959_v39 }
 0x930   : > { %v7787_v49 = vmax.f32 %v9418_v47, %v7755_v52  ;;  %v9420_v35 = vadd.f32 %v13959_v39, %v7677_v33 }
 0x931   : > { %v7758_v14 = vmul.f32 0.01, %v9419_v31 }
 0x932   : > { %v9175_v15 = vpop.f32.mrb[22].mxu1  ;;  %7833 = vxpose.xlu1.b32.cont [3/16] (narrow) %v7785_v59, 8  ;;  %7809 = vxpose.xlu0.b32.cont [11/16] (narrow) %v7777_v25, 8  ;;  %v7757_v13 = vmul.f32 0.01, %v9420_v35 }
 0x933   : > { %v7689_v48 = vpop.f32.mrb[23].mxu1  ;;  %v7790_v63 = vmax.f32 %v9419_v31, %v7758_v14  ;;  %v9421_v2 = vadd.f32 %v9175_v15, %v13959_v39 }
 0x934   : > { %v7789_v44 = vmax.f32 %v9420_v35, %v7757_v13  ;;  %v9422_v4 = vadd.f32 %v13959_v39, %v7689_v48 }
 0x935   : > { %v7760_v34 = vmul.f32 0.01, %v9421_v2 }
 0x936   : > { %v9178_v62 = vpop.f32.mrb[24].mxu1  ;;  %7834 = vxpose.xlu1.b32.cont [4/16] (narrow) %v7786_v53, 8  ;;  %7810 = vxpose.xlu0.b32.cont [12/16] (narrow) %v7778_v11, 8  ;;  %v7759_v58 = vmul.f32 0.01, %v9422_v4 }
 0x937   : > { %v7701_v40 = vpop.f32.mrb[25].mxu1  ;;  %v7792_v30 = vmax.f32 %v9421_v2, %v7760_v34  ;;  %v9423_v18 = vadd.f32 %v9178_v62, %v13959_v39 }
 0x938   : > { %v7791_v0 = vmax.f32 %v9422_v4, %v7759_v58  ;;  %v9424_v17 = vadd.f32 %v13959_v39, %v7701_v40 }
 0x939   : > { %v7762_v43 = vmul.f32 0.01, %v9423_v18 }
 0x93a   : > { %v9181_v42 = vpop.f32.mrb[26].mxu1  ;;  %7835 = vxpose.xlu1.b32.cont [5/16] (narrow) %v7787_v49, 8  ;;  %7811 = vxpose.xlu0.b32.cont [13/16] (narrow) %v7779_v22, 8  ;;  %v7761_v16 = vmul.f32 0.01, %v9424_v17 }
 0x93b   : > { %v7713_v24 = vpop.f32.mrb[27].mxu1  ;;  %v7794_v1 = vmax.f32 %v9423_v18, %v7762_v43  ;;  %v9425_v60 = vadd.f32 %v9181_v42, %v13959_v39 }
 0x93c   : > { %v7793_v19 = vmax.f32 %v9424_v17, %v7761_v16  ;;  %v9426_v10 = vadd.f32 %v13959_v39, %v7713_v24 }
 0x93d   : > { %v7764_v46 = vmul.f32 0.01, %v9425_v60 }
 0x93e   : > { %v9184_v8 = vpop.f32.mrb[28].mxu1  ;;  %7836 = vxpose.xlu1.b32.cont [6/16] (narrow) %v7788_v28, 8  ;;  %7812 = vxpose.xlu0.b32.cont [14/16] (narrow) %v7780_v50, 8  ;;  %v7763_v54 = vmul.f32 0.01, %v9426_v10 }
 0x93f   : > { %v7725_v29 = vpop.f32.mrb[29].mxu1  ;;  %v7796_v9 = vmax.f32 %v9425_v60, %v7764_v46  ;;  %v9427_v21 = vadd.f32 %v9184_v8, %v13959_v39 }
 0x940   : > { %v7795_v5 = vmax.f32 %v9426_v10, %v7763_v54  ;;  %v9428_v20 = vadd.f32 %v13959_v39, %v7725_v29 }
 0x941   : > { %v7766_v55 = vmul.f32 0.01, %v9427_v21 }
 0x942   : > { %7837 = vxpose.xlu1.b32.cont [7/16] (narrow) %v7789_v44, 8  ;;  %7813 = vxpose.xlu0.b32.cont [15/16] (narrow) %v7781_v32, 8  ;;  %v7765_v26 = vmul.f32 0.01, %v9428_v20 }
 0x943   : > { %v7798_v51 = vmax.f32 %v9427_v21, %v7766_v55 }
 0x944   : > { %v7797_v12 = vmax.f32 %v9428_v20, %v7765_v26 }
 0x946   : > { %7838 = vxpose.xlu1.b32.cont [8/16] (narrow) %v7790_v63, 8  ;;  %7814 = vxpose.xlu0.b32.end [16/16] (narrow) %v7782_v27, 8 }
 0x94a   : > { %7839 = vxpose.xlu1.b32.cont [9/16] (narrow) %v7791_v0, 8 }
 0x94e   : > { %7840 = vxpose.xlu1.b32.cont [10/16] (narrow) %v7792_v30, 8 }
 0x952   : > { %7841 = vxpose.xlu1.b32.cont [11/16] (narrow) %v7793_v19, 8 }
 0x956   : > { %7842 = vxpose.xlu1.b32.cont [12/16] (narrow) %v7794_v1, 8 }
 0x95a   : > { %7843 = vxpose.xlu1.b32.cont [13/16] (narrow) %v7795_v5, 8 }
 0x95e   : > { %7844 = vxpose.xlu1.b32.cont [14/16] (narrow) %v7796_v9, 8 }
 0x962   : > { %7845 = vxpose.xlu1.b32.cont [15/16] (narrow) %v7797_v12, 8 }
 0x966   : > { %7846 = vxpose.xlu1.b32.end [16/16] (narrow) %v7798_v51, 8 }
 0x98a   : > { %v7815_v38 = vpop.trf.xlu0 }
 0x98b   : > { %7863 = vst [vmem:[%s217_s9] sm:$0xff] %v7815_v38 }
 0x9aa   : > { %v7847_v39 = vpop.trf.xlu1 }
 0x9ab   : > { %7864 = vst [vmem:[%s217_s9 + $0x8] sm:$0xff] %v7847_v39 }
 0x9ac   : > { %9826 = shalt.err (!%p9823_p3)
}
 0x9ad   : > { %s9827_s10 = scalar_lea.hbm %s14003_s7, 256  ;;  %s9831_s17 = scalar_lea.hbm %s14048_s5, 512 }
 0x9ae   : > { %p9828_p4 = scmp.ne.s32.totalorder %s14003_s7, %s9827_s10  ;;  %p9832_p9 = scmp.lt.u32.totalorder %s14003_s7, %s14048_s5 }
 0x9af   : > { %p9833_p10 = scmp.lt.u32.totalorder %s9831_s17, %s9827_s10  ;;  %p9835_p12 = scmp.lt.u32.totalorder %s9827_s10, %s14003_s7 }
 0x9b0   : > { %p9829_p7 = pnand %p9828_p4, %p9960_p5 }
 0x9b1   : > { %p9834_p11 = por %p9833_p10, %p9832_p9 }
 0x9b2   : > { %p9830_p8 = pneg %p9829_p7 }
 0x9b3   : > { %p9836_p13 = por %p9835_p12, %p9834_p11 }
 0x9b5   : > { %p9837_p0 = pnand %p9836_p13, %p9830_p8 }
 0x9b7   : > { %9840 = shalt.err (!%p9837_p0)
}
 0x9b8   : > { %9747 = dma.vmem_to_hbm [thread:$0]  (%p9960_p5), %s13998_s26, 256, %s14003_s7, %s7866_s8  }
 0x9b9 PF: > { %p9753_p1 = scmp.ge.s32.totalorder %s9875_s21, 2  ;;  %s7892_s9 = sand.u32 1, %s9863_s18  }
 0x9ba   : > { %s7893_s23 = scalar_lea.sflag [#allocation5], %s7892_s9 }
 0x9bb   : > { %p9750_p2 = pnand %p9753_p1, %p9964_p6 }
 0x9bd   : > { %9858 = dma.done.wait (!%p9750_p2), %s7893_s23, 256  }
 0x9be   : > { %9860 = vsyncadd (!%p9750_p2), %s7893_s23, 4294967040  ;;  %p15_p3 = scmp.ge.s32.totalorder %s9947_s24, 4   ;;  %s14759_s18 = smov %s9867_s19 }
 0x9bf   : > { %s14760_s19 = smov %s9871_s20  ;;  %s14761_s20 = smov %s9958_s27 }
 0x9c0   : > { %s14762_s21 = smov %s9947_s24  ;;  %17 = sbr.rel (!%p15_p3) target bundleno = 3 (0x3), region = 81 }
 0x9c7   :  { %7898 = vsyncpa [#allocation5], 1 }
 0x9c8   :  { %7900 = vsyncpa [#allocation5 + $0x1], 1 }

</bundles_post_ra>
